<compile_context>
chip_gen: v7x
topology: tpu7x:2x2x1
jax: 0.10.0
libtpu: 0.0.40
codegen_flags: <defaults>
</compile_context>

<pallas_src>
import functools

import jax
import jax.numpy as jnp
from jax import lax
from jax.experimental import pallas as pl
from jax.experimental.pallas import tpu as pltpu


def _ode_transition_kernel(x_ref, dt_ref,
                           w1_ref, b1_ref, w2_ref, b2_ref,
                           w3_ref, b3_ref, w4_ref, b4_ref,
                           out_ref, *, max_time: int, n_euler_steps: int,
                           n_sub: int):
    tb, D = x_ref.shape
    H = w1_ref.shape[1]
    chunk = tb // n_sub

    w1 = w1_ref[...]
    w2 = w2_ref[...]
    w3 = w3_ref[...]
    w4 = w4_ref[...]

    # Hoisted broadcasts: biases and dt expanded once, reused by every
    # (unrolled) Euler step of every timestep.
    b1 = jnp.broadcast_to(b1_ref[...].astype(jnp.float32), (chunk, H))
    b2 = jnp.broadcast_to(b2_ref[...].astype(jnp.float32), (chunk, H))
    b3 = jnp.broadcast_to(b3_ref[...].astype(jnp.float32), (chunk, H))
    b4 = jnp.broadcast_to(b4_ref[...].astype(jnp.float32), (chunk, D))

    x = x_ref[...].astype(jnp.float32)                       # (tb, D)
    dt_full = jnp.broadcast_to(dt_ref[...].astype(jnp.float32), (tb, D))

    # Split the tile into n_sub independent sub-chains (static slices).
    xs = tuple(x[c * chunk:(c + 1) * chunk, :] for c in range(n_sub))
    dts = tuple(dt_full[c * chunk:(c + 1) * chunk, :] for c in range(n_sub))

    def euler_step(_, xs):
        # Layer-by-layer across the independent sub-chains: gives the LLO
        # scheduler overlap of chain B's MXU push with chain A's pop / VPU work.
        hs = tuple(jnp.maximum(
            jnp.dot(xc, w1, preferred_element_type=jnp.float32) + b1, 0.0)
            for xc in xs)
        hs = tuple(jnp.maximum(
            jnp.dot(hc, w2, preferred_element_type=jnp.float32) + b2, 0.0)
            for hc in hs)
        hs = tuple(jnp.maximum(
            jnp.dot(hc, w3, preferred_element_type=jnp.float32) + b3, 0.0)
            for hc in hs)
        ds = tuple(jnp.dot(hc, w4, preferred_element_type=jnp.float32) + b4
                   for hc in hs)
        return tuple(xc + dc * dtc for xc, dc, dtc in zip(xs, ds, dts))

    def advance_and_store(t, xs):
        # Unrolled inner Euler loop: cross-iteration scheduling visibility,
        # no per-iteration loop overhead.
        xs = lax.fori_loop(0, n_euler_steps, euler_step, xs, unroll=True)
        val = xs[0] if n_sub == 1 else jnp.concatenate(xs, axis=0)
        out_ref[t + 1, :, :] = val.astype(out_ref.dtype)
        return xs

    # all_latents[0] = initial latents (contiguous leading-axis slab store).
    out_ref[0, :, :] = x.astype(out_ref.dtype)

    if max_time <= 8:
        # Small horizon: static unroll over time (t is a Python int).
        for t in range(max_time):
            xs = advance_and_store(t, xs)
    else:
        # Large horizon: bounded code size / vreg live ranges; the store uses a
        # dynamic first-axis index (supported ref[i] pattern).
        lax.fori_loop(0, max_time, advance_and_store, xs)


def _pick_batch_block(B: int, T1: int, D: int,
                      vmem_budget_bytes: int = 24 << 20) -> int:
    """Largest batch tile whose double-buffered full-time output block fits a
    conservative VMEM budget (safe on v7x's 32 MiB default scoped VMEM); split
    in two for B >= 32 so v7x's two TensorCores both get work."""
    cands = [b for b in range(8, B + 1, 8) if B % b == 0]
    if B not in cands:
        cands.append(B)
    fit = [b for b in cands if 2 * T1 * b * D * 4 <= vmem_budget_bytes]
    tb = max(fit) if fit else min(cands)
    if tb == B and B >= 32 and (B // 2) in cands:
        tb = B // 2
    return tb


def ode_transition_time_indep(latents, dt, params, *, max_time: int,
                              n_euler_steps: int, batch_block: int = None,
                              time_major: bool = False):
    """Pallas forward. Returns (B, max_time+1, D) f32 (or (max_time+1, B, D) if
    time_major=True, which skips the wrapper transpose)."""
    B, D = latents.shape
    T1 = max_time + 1

    tb = _pick_batch_block(B, T1, D) if batch_block is None else min(batch_block, B)
    assert B % tb == 0, "batch must be divisible by the batch block"
    n_blocks = B // tb
    if n_blocks > 1:
        assert tb % 8 == 0, "batch tile must be a multiple of 8 (f32 sublane)"

    # Two interleaved sub-chains when each keeps sublane-aligned (>= 8) rows.
    n_sub = 2 if (tb >= 16 and tb % 16 == 0) else 1

    kernel = functools.partial(_ode_transition_kernel,
                               max_time=max_time,
                               n_euler_steps=n_euler_steps,
                               n_sub=n_sub)

    # Weights/biases: full arrays, constant block index -> VMEM-resident.
    param_specs = [pl.BlockSpec(p.shape, lambda i, nd=p.ndim: (0,) * nd)
                   for p in params]

    out_tbd = pl.pallas_call(
        kernel,
        out_shape=jax.ShapeDtypeStruct((T1, B, D), jnp.float32),
        grid=(n_blocks,),
        in_specs=[pl.BlockSpec((tb, D), lambda i: (i, 0)),     # latents
                  pl.BlockSpec((tb, 1), lambda i: (i, 0)),     # dt
                  *param_specs],
        out_specs=pl.BlockSpec((T1, tb, D), lambda i: (0, i, 0)),
        compiler_params=pltpu.CompilerParams(
            dimension_semantics=("parallel",)),
    )(latents, dt, *params)

    if time_major:
        return out_tbd
    # Caller-facing layout matches the PyTorch module: (B, max_time+1, D).
    return jnp.transpose(out_tbd, (1, 0, 2))


def _init_params(key, latent_dim, hidden_size):
    """Deterministic init of the 4-layer drift MLP (weights stored already
    transposed as (in, out); biases as (1, out))."""
    dims = [(latent_dim, hidden_size),
            (hidden_size, hidden_size),
            (hidden_size, hidden_size),
            (hidden_size, latent_dim)]
    params = []
    for (fan_in, fan_out) in dims:
        key, kw, kb = jax.random.split(key, 3)
        bound = 1.0 / jnp.sqrt(fan_in)
        w = jax.random.uniform(kw, (fan_in, fan_out), jnp.float32, -bound, bound)
        b = jax.random.uniform(kb, (1, fan_out), jnp.float32, -bound, bound)
        params.extend([w, b])
    return params


def _reference(latents, dt, params, *, max_time, n_euler_steps):
    """Pure-JAX reference mirroring the PyTorch forward."""
    w1, b1, w2, b2, w3, b3, w4, b4 = params

    def drift(v):
        h = jnp.maximum(v @ w1 + b1, 0.0)
        h = jnp.maximum(h @ w2 + b2, 0.0)
        h = jnp.maximum(h @ w3 + b3, 0.0)
        return h @ w4 + b4

    all_latents = [latents]
    for _ in range(max_time):
        x = all_latents[-1]
        for _ in range(n_euler_steps):
            x = x + drift(x) * dt
        all_latents.append(x)
    return jnp.stack(all_latents, axis=1)


if __name__ == "__main__":
    latent_dim = 16
    hidden_size = 32

    key = jax.random.PRNGKey(0)
    k_lat1, k_lat2, k_dt2, k_par = jax.random.split(key, 4)
    params = _init_params(k_par, latent_dim, hidden_size)

    # Config 1: small batch, short horizon -> one grid block, two interleaved
    # sub-chains, statically unrolled outer time loop.
    B1, max_time1, n_steps1 = 16, 4, 10
    lat1 = jax.random.normal(k_lat1, (B1, latent_dim), jnp.float32)
    dt1 = 0.05 * jnp.ones((B1, 1), jnp.float32)
    out1 = jax.block_until_ready(
        ode_transition_time_indep(lat1, dt1, params,
                                  max_time=max_time1, n_euler_steps=n_steps1))
    ref1 = _reference(lat1, dt1, params,
                      max_time=max_time1, n_euler_steps=n_steps1)
    assert out1.shape == (B1, max_time1 + 1, latent_dim), out1.shape
    assert jnp.allclose(out1, ref1, atol=1e-4, rtol=1e-4), \
        float(jnp.max(jnp.abs(out1 - ref1)))

    # Config 2: larger batch, longer horizon -> two grid blocks ("parallel"
    # across v7x's TCs), fori_loop outer time loop with dynamic slab stores,
    # per-row dt.
    B2, max_time2, n_steps2 = 32, 12, 5
    lat2 = jax.random.normal(k_lat2, (B2, latent_dim), jnp.float32)
    dt2 = 0.02 + 0.03 * jax.random.uniform(k_dt2, (B2, 1), jnp.float32)
    out2 = jax.block_until_ready(
        ode_transition_time_indep(lat2, dt2, params,
                                  max_time=max_time2, n_euler_steps=n_steps2))
    ref2 = _reference(lat2, dt2, params,
                      max_time=max_time2, n_euler_steps=n_steps2)
    assert out2.shape == (B2, max_time2 + 1, latent_dim), out2.shape
    assert jnp.allclose(out2, ref2, atol=1e-4, rtol=1e-4), \
        float(jnp.max(jnp.abs(out2 - ref2)))

    print("KERNEL_OK")
</pallas_src>

<mosaic_0001>
module attributes {stable_mosaic.version = 11 : i64} {
  func.func @_ode_transition_kernel(%arg0: i32, %arg1: memref<16x16xf32, #tpu.memory_space<vmem>>, %arg2: memref<16x1xf32, #tpu.memory_space<vmem>>, %arg3: memref<16x32xf32, #tpu.memory_space<vmem>>, %arg4: memref<1x32xf32, #tpu.memory_space<vmem>>, %arg5: memref<32x32xf32, #tpu.memory_space<vmem>>, %arg6: memref<1x32xf32, #tpu.memory_space<vmem>>, %arg7: memref<32x32xf32, #tpu.memory_space<vmem>>, %arg8: memref<1x32xf32, #tpu.memory_space<vmem>>, %arg9: memref<32x16xf32, #tpu.memory_space<vmem>>, %arg10: memref<1x16xf32, #tpu.memory_space<vmem>>, %arg11: memref<5x16x16xf32, #tpu.memory_space<vmem>>) attributes {dimension_semantics = [#tpu.dimension_semantics<parallel>], iteration_bounds = array<i64: 1>, scalar_prefetch = 0 : i64, scratch_operands = 0 : i64, tpu.core_type = #tpu.core_type<tc>, window_params = [{transform_indices = @transform_0, window_bounds = array<i64: 16, 16>}, {transform_indices = @transform_1, window_bounds = array<i64: 16, 1>}, {pipeline_mode = #tpu.pipeline_mode<synchronous>, transform_indices = @transform_2, window_bounds = array<i64: 16, 32>}, {pipeline_mode = #tpu.pipeline_mode<synchronous>, transform_indices = @transform_3, window_bounds = array<i64: 1, 32>}, {pipeline_mode = #tpu.pipeline_mode<synchronous>, transform_indices = @transform_4, window_bounds = array<i64: 32, 32>}, {pipeline_mode = #tpu.pipeline_mode<synchronous>, transform_indices = @transform_5, window_bounds = array<i64: 1, 32>}, {pipeline_mode = #tpu.pipeline_mode<synchronous>, transform_indices = @transform_6, window_bounds = array<i64: 32, 32>}, {pipeline_mode = #tpu.pipeline_mode<synchronous>, transform_indices = @transform_7, window_bounds = array<i64: 1, 32>}, {pipeline_mode = #tpu.pipeline_mode<synchronous>, transform_indices = @transform_8, window_bounds = array<i64: 32, 16>}, {pipeline_mode = #tpu.pipeline_mode<synchronous>, transform_indices = @transform_9, window_bounds = array<i64: 1, 16>}, {transform_indices = @transform_10, window_bounds = array<i64: 5, 16, 16>}]} {
    %c0 = arith.constant 0 : index
    %c0_0 = arith.constant 0 : index
    %0 = vector.load %arg3[%c0, %c0_0] : memref<16x32xf32, #tpu.memory_space<vmem>>, vector<16x32xf32>
    %c0_1 = arith.constant 0 : index
    %c0_2 = arith.constant 0 : index
    %1 = vector.load %arg5[%c0_1, %c0_2] : memref<32x32xf32, #tpu.memory_space<vmem>>, vector<32x32xf32>
    %c0_3 = arith.constant 0 : index
    %c0_4 = arith.constant 0 : index
    %2 = vector.load %arg7[%c0_3, %c0_4] : memref<32x32xf32, #tpu.memory_space<vmem>>, vector<32x32xf32>
    %c0_5 = arith.constant 0 : index
    %c0_6 = arith.constant 0 : index
    %3 = vector.load %arg9[%c0_5, %c0_6] : memref<32x16xf32, #tpu.memory_space<vmem>>, vector<32x16xf32>
    %c0_7 = arith.constant 0 : index
    %c0_8 = arith.constant 0 : index
    %4 = vector.load %arg4[%c0_7, %c0_8] : memref<1x32xf32, #tpu.memory_space<vmem>>, vector<1x32xf32>
    %5 = vector.shape_cast %4 : vector<1x32xf32> to vector<1x32xf32>
    %6 = vector.broadcast %5 : vector<1x32xf32> to vector<8x32xf32>
    %c0_9 = arith.constant 0 : index
    %c0_10 = arith.constant 0 : index
    %7 = vector.load %arg6[%c0_9, %c0_10] : memref<1x32xf32, #tpu.memory_space<vmem>>, vector<1x32xf32>
    %8 = vector.shape_cast %7 : vector<1x32xf32> to vector<1x32xf32>
    %9 = vector.broadcast %8 : vector<1x32xf32> to vector<8x32xf32>
    %c0_11 = arith.constant 0 : index
    %c0_12 = arith.constant 0 : index
    %10 = vector.load %arg8[%c0_11, %c0_12] : memref<1x32xf32, #tpu.memory_space<vmem>>, vector<1x32xf32>
    %11 = vector.shape_cast %10 : vector<1x32xf32> to vector<1x32xf32>
    %12 = vector.broadcast %11 : vector<1x32xf32> to vector<8x32xf32>
    %c0_13 = arith.constant 0 : index
    %c0_14 = arith.constant 0 : index
    %13 = vector.load %arg10[%c0_13, %c0_14] : memref<1x16xf32, #tpu.memory_space<vmem>>, vector<1x16xf32>
    %14 = vector.shape_cast %13 : vector<1x16xf32> to vector<1x16xf32>
    %15 = vector.broadcast %14 : vector<1x16xf32> to vector<8x16xf32>
    %c0_15 = arith.constant 0 : index
    %c0_16 = arith.constant 0 : index
    %16 = vector.load %arg1[%c0_15, %c0_16] : memref<16x16xf32, #tpu.memory_space<vmem>>, vector<16x16xf32>
    %c0_17 = arith.constant 0 : index
    %c0_18 = arith.constant 0 : index
    %17 = vector.load %arg2[%c0_17, %c0_18] : memref<16x1xf32, #tpu.memory_space<vmem>>, vector<16x1xf32>
    %18 = vector.shape_cast %17 : vector<16x1xf32> to vector<16x1xf32>
    %19 = vector.broadcast %18 : vector<16x1xf32> to vector<16x16xf32>
    %20 = vector.extract_strided_slice %16 {offsets = [0, 0], sizes = [8, 16], strides = [1, 1]} : vector<16x16xf32> to vector<8x16xf32>
    %21 = vector.extract_strided_slice %16 {offsets = [8, 0], sizes = [8, 16], strides = [1, 1]} : vector<16x16xf32> to vector<8x16xf32>
    %22 = vector.extract_strided_slice %19 {offsets = [0, 0], sizes = [8, 16], strides = [1, 1]} : vector<16x16xf32> to vector<8x16xf32>
    %23 = vector.extract_strided_slice %19 {offsets = [8, 0], sizes = [8, 16], strides = [1, 1]} : vector<16x16xf32> to vector<8x16xf32>
    %c0_19 = arith.constant 0 : index
    %c0_20 = arith.constant 0 : index
    %c0_21 = arith.constant 0 : index
    %24 = vector.load %arg11[%c0_19, %c0_20, %c0_21] : memref<5x16x16xf32, #tpu.memory_space<vmem>>, vector<1x16x16xf32>
    %25 = vector.shape_cast %24 : vector<1x16x16xf32> to vector<16x16xf32>
    %26 = vector.shape_cast %16 : vector<16x16xf32> to vector<1x16x16xf32>
    tpu.vector_store %arg11[%c0_19, %c0_20, %c0_21], %26 {strides = array<i32>} : memref<5x16x16xf32, #tpu.memory_space<vmem>>, vector<1x16x16xf32>,
    %c0_i32 = arith.constant 0 : i32
    %cst = arith.constant dense<0.000000e+00> : vector<8x32xf32>
    %27 = tpu.matmul %20, %0, %cst {dimension_numbers = #tpu.dot_dimension_numbers<[1], [0], [0], [1], [0, 0, 1, 1], [], []>} : vector<8x16xf32>, vector<16x32xf32>, vector<8x32xf32> -> vector<8x32xf32>
    %28 = arith.addf %27, %6 : vector<8x32xf32>
    %cst_22 = arith.constant 0.000000e+00 : f32
    %29 = vector.broadcast %cst_22 : f32 to vector<8x32xf32>
    %30 = arith.maximumf %28, %29 : vector<8x32xf32>
    %cst_23 = arith.constant dense<0.000000e+00> : vector<8x32xf32>
    %31 = tpu.matmul %21, %0, %cst_23 {dimension_numbers = #tpu.dot_dimension_numbers<[1], [0], [0], [1], [0, 0, 1, 1], [], []>} : vector<8x16xf32>, vector<16x32xf32>, vector<8x32xf32> -> vector<8x32xf32>
    %32 = arith.addf %31, %6 : vector<8x32xf32>
    %cst_24 = arith.constant 0.000000e+00 : f32
    %33 = vector.broadcast %cst_24 : f32 to vector<8x32xf32>
    %34 = arith.maximumf %32, %33 : vector<8x32xf32>
    %cst_25 = arith.constant dense<0.000000e+00> : vector<8x32xf32>
    %35 = tpu.matmul %30, %1, %cst_25 {dimension_numbers = #tpu.dot_dimension_numbers<[1], [0], [0], [1], [0, 0, 1, 1], [], []>} : vector<8x32xf32>, vector<32x32xf32>, vector<8x32xf32> -> vector<8x32xf32>
    %36 = arith.addf %35, %9 : vector<8x32xf32>
    %cst_26 = arith.constant 0.000000e+00 : f32
    %37 = vector.broadcast %cst_26 : f32 to vector<8x32xf32>
    %38 = arith.maximumf %36, %37 : vector<8x32xf32>
    %cst_27 = arith.constant dense<0.000000e+00> : vector<8x32xf32>
    %39 = tpu.matmul %34, %1, %cst_27 {dimension_numbers = #tpu.dot_dimension_numbers<[1], [0], [0], [1], [0, 0, 1, 1], [], []>} : vector<8x32xf32>, vector<32x32xf32>, vector<8x32xf32> -> vector<8x32xf32>
    %40 = arith.addf %39, %9 : vector<8x32xf32>
    %cst_28 = arith.constant 0.000000e+00 : f32
    %41 = vector.broadcast %cst_28 : f32 to vector<8x32xf32>
    %42 = arith.maximumf %40, %41 : vector<8x32xf32>
    %cst_29 = arith.constant dense<0.000000e+00> : vector<8x32xf32>
    %43 = tpu.matmul %38, %2, %cst_29 {dimension_numbers = #tpu.dot_dimension_numbers<[1], [0], [0], [1], [0, 0, 1, 1], [], []>} : vector<8x32xf32>, vector<32x32xf32>, vector<8x32xf32> -> vector<8x32xf32>
    %44 = arith.addf %43, %12 : vector<8x32xf32>
    %cst_30 = arith.constant 0.000000e+00 : f32
    %45 = vector.broadcast %cst_30 : f32 to vector<8x32xf32>
    %46 = arith.maximumf %44, %45 : vector<8x32xf32>
    %cst_31 = arith.constant dense<0.000000e+00> : vector<8x32xf32>
    %47 = tpu.matmul %42, %2, %cst_31 {dimension_numbers = #tpu.dot_dimension_numbers<[1], [0], [0], [1], [0, 0, 1, 1], [], []>} : vector<8x32xf32>, vector<32x32xf32>, vector<8x32xf32> -> vector<8x32xf32>
    %48 = arith.addf %47, %12 : vector<8x32xf32>
    %cst_32 = arith.constant 0.000000e+00 : f32
    %49 = vector.broadcast %cst_32 : f32 to vector<8x32xf32>
    %50 = arith.maximumf %48, %49 : vector<8x32xf32>
    %cst_33 = arith.constant dense<0.000000e+00> : vector<8x16xf32>
    %51 = tpu.matmul %46, %3, %cst_33 {dimension_numbers = #tpu.dot_dimension_numbers<[1], [0], [0], [1], [0, 0, 1, 1], [], []>} : vector<8x32xf32>, vector<32x16xf32>, vector<8x16xf32> -> vector<8x16xf32>
    %52 = arith.addf %51, %15 : vector<8x16xf32>
    %cst_34 = arith.constant dense<0.000000e+00> : vector<8x16xf32>
    %53 = tpu.matmul %50, %3, %cst_34 {dimension_numbers = #tpu.dot_dimension_numbers<[1], [0], [0], [1], [0, 0, 1, 1], [], []>} : vector<8x32xf32>, vector<32x16xf32>, vector<8x16xf32> -> vector<8x16xf32>
    %54 = arith.addf %53, %15 : vector<8x16xf32>
    %55 = arith.mulf %52, %22 : vector<8x16xf32>
    %56 = arith.addf %20, %55 : vector<8x16xf32>
    %57 = arith.mulf %54, %23 : vector<8x16xf32>
    %58 = arith.addf %21, %57 : vector<8x16xf32>
    %c1_i32 = arith.constant 1 : i32
    %cst_35 = arith.constant dense<0.000000e+00> : vector<8x32xf32>
    %59 = tpu.matmul %56, %0, %cst_35 {dimension_numbers = #tpu.dot_dimension_numbers<[1], [0], [0], [1], [0, 0, 1, 1], [], []>} : vector<8x16xf32>, vector<16x32xf32>, vector<8x32xf32> -> vector<8x32xf32>
    %60 = arith.addf %59, %6 : vector<8x32xf32>
    %cst_36 = arith.constant 0.000000e+00 : f32
    %61 = vector.broadcast %cst_36 : f32 to vector<8x32xf32>
    %62 = arith.maximumf %60, %61 : vector<8x32xf32>
    %cst_37 = arith.constant dense<0.000000e+00> : vector<8x32xf32>
    %63 = tpu.matmul %58, %0, %cst_37 {dimension_numbers = #tpu.dot_dimension_numbers<[1], [0], [0], [1], [0, 0, 1, 1], [], []>} : vector<8x16xf32>, vector<16x32xf32>, vector<8x32xf32> -> vector<8x32xf32>
    %64 = arith.addf %63, %6 : vector<8x32xf32>
    %cst_38 = arith.constant 0.000000e+00 : f32
    %65 = vector.broadcast %cst_38 : f32 to vector<8x32xf32>
    %66 = arith.maximumf %64, %65 : vector<8x32xf32>
    %cst_39 = arith.constant dense<0.000000e+00> : vector<8x32xf32>
    %67 = tpu.matmul %62, %1, %cst_39 {dimension_numbers = #tpu.dot_dimension_numbers<[1], [0], [0], [1], [0, 0, 1, 1], [], []>} : vector<8x32xf32>, vector<32x32xf32>, vector<8x32xf32> -> vector<8x32xf32>
    %68 = arith.addf %67, %9 : vector<8x32xf32>
    %cst_40 = arith.constant 0.000000e+00 : f32
    %69 = vector.broadcast %cst_40 : f32 to vector<8x32xf32>
    %70 = arith.maximumf %68, %69 : vector<8x32xf32>
    %cst_41 = arith.constant dense<0.000000e+00> : vector<8x32xf32>
    %71 = tpu.matmul %66, %1, %cst_41 {dimension_numbers = #tpu.dot_dimension_numbers<[1], [0], [0], [1], [0, 0, 1, 1], [], []>} : vector<8x32xf32>, vector<32x32xf32>, vector<8x32xf32> -> vector<8x32xf32>
    %72 = arith.addf %71, %9 : vector<8x32xf32>
    %cst_42 = arith.constant 0.000000e+00 : f32
    %73 = vector.broadcast %cst_42 : f32 to vector<8x32xf32>
    %74 = arith.maximumf %72, %73 : vector<8x32xf32>
    %cst_43 = arith.constant dense<0.000000e+00> : vector<8x32xf32>
    %75 = tpu.matmul %70, %2, %cst_43 {dimension_numbers = #tpu.dot_dimension_numbers<[1], [0], [0], [1], [0, 0, 1, 1], [], []>} : vector<8x32xf32>, vector<32x32xf32>, vector<8x32xf32> -> vector<8x32xf32>
    %76 = arith.addf %75, %12 : vector<8x32xf32>
    %cst_44 = arith.constant 0.000000e+00 : f32
    %77 = vector.broadcast %cst_44 : f32 to vector<8x32xf32>
    %78 = arith.maximumf %76, %77 : vector<8x32xf32>
    %cst_45 = arith.constant dense<0.000000e+00> : vector<8x32xf32>
    %79 = tpu.matmul %74, %2, %cst_45 {dimension_numbers = #tpu.dot_dimension_numbers<[1], [0], [0], [1], [0, 0, 1, 1], [], []>} : vector<8x32xf32>, vector<32x32xf32>, vector<8x32xf32> -> vector<8x32xf32>
    %80 = arith.addf %79, %12 : vector<8x32xf32>
    %cst_46 = arith.constant 0.000000e+00 : f32
    %81 = vector.broadcast %cst_46 : f32 to vector<8x32xf32>
    %82 = arith.maximumf %80, %81 : vector<8x32xf32>
    %cst_47 = arith.constant dense<0.000000e+00> : vector<8x16xf32>
    %83 = tpu.matmul %78, %3, %cst_47 {dimension_numbers = #tpu.dot_dimension_numbers<[1], [0], [0], [1], [0, 0, 1, 1], [], []>} : vector<8x32xf32>, vector<32x16xf32>, vector<8x16xf32> -> vector<8x16xf32>
    %84 = arith.addf %83, %15 : vector<8x16xf32>
    %cst_48 = arith.constant dense<0.000000e+00> : vector<8x16xf32>
    %85 = tpu.matmul %82, %3, %cst_48 {dimension_numbers = #tpu.dot_dimension_numbers<[1], [0], [0], [1], [0, 0, 1, 1], [], []>} : vector<8x32xf32>, vector<32x16xf32>, vector<8x16xf32> -> vector<8x16xf32>
    %86 = arith.addf %85, %15 : vector<8x16xf32>
    %87 = arith.mulf %84, %22 : vector<8x16xf32>
    %88 = arith.addf %56, %87 : vector<8x16xf32>
    %89 = arith.mulf %86, %23 : vector<8x16xf32>
    %90 = arith.addf %58, %89 : vector<8x16xf32>
    %c2_i32 = arith.constant 2 : i32
    %cst_49 = arith.constant dense<0.000000e+00> : vector<8x32xf32>
    %91 = tpu.matmul %88, %0, %cst_49 {dimension_numbers = #tpu.dot_dimension_numbers<[1], [0], [0], [1], [0, 0, 1, 1], [], []>} : vector<8x16xf32>, vector<16x32xf32>, vector<8x32xf32> -> vector<8x32xf32>
    %92 = arith.addf %91, %6 : vector<8x32xf32>
    %cst_50 = arith.constant 0.000000e+00 : f32
    %93 = vector.broadcast %cst_50 : f32 to vector<8x32xf32>
    %94 = arith.maximumf %92, %93 : vector<8x32xf32>
    %cst_51 = arith.constant dense<0.000000e+00> : vector<8x32xf32>
    %95 = tpu.matmul %90, %0, %cst_51 {dimension_numbers = #tpu.dot_dimension_numbers<[1], [0], [0], [1], [0, 0, 1, 1], [], []>} : vector<8x16xf32>, vector<16x32xf32>, vector<8x32xf32> -> vector<8x32xf32>
    %96 = arith.addf %95, %6 : vector<8x32xf32>
    %cst_52 = arith.constant 0.000000e+00 : f32
    %97 = vector.broadcast %cst_52 : f32 to vector<8x32xf32>
    %98 = arith.maximumf %96, %97 : vector<8x32xf32>
    %cst_53 = arith.constant dense<0.000000e+00> : vector<8x32xf32>
    %99 = tpu.matmul %94, %1, %cst_53 {dimension_numbers = #tpu.dot_dimension_numbers<[1], [0], [0], [1], [0, 0, 1, 1], [], []>} : vector<8x32xf32>, vector<32x32xf32>, vector<8x32xf32> -> vector<8x32xf32>
    %100 = arith.addf %99, %9 : vector<8x32xf32>
    %cst_54 = arith.constant 0.000000e+00 : f32
    %101 = vector.broadcast %cst_54 : f32 to vector<8x32xf32>
    %102 = arith.maximumf %100, %101 : vector<8x32xf32>
    %cst_55 = arith.constant dense<0.000000e+00> : vector<8x32xf32>
    %103 = tpu.matmul %98, %1, %cst_55 {dimension_numbers = #tpu.dot_dimension_numbers<[1], [0], [0], [1], [0, 0, 1, 1], [], []>} : vector<8x32xf32>, vector<32x32xf32>, vector<8x32xf32> -> vector<8x32xf32>
    %104 = arith.addf %103, %9 : vector<8x32xf32>
    %cst_56 = arith.constant 0.000000e+00 : f32
    %105 = vector.broadcast %cst_56 : f32 to vector<8x32xf32>
    %106 = arith.maximumf %104, %105 : vector<8x32xf32>
    %cst_57 = arith.constant dense<0.000000e+00> : vector<8x32xf32>
    %107 = tpu.matmul %102, %2, %cst_57 {dimension_numbers = #tpu.dot_dimension_numbers<[1], [0], [0], [1], [0, 0, 1, 1], [], []>} : vector<8x32xf32>, vector<32x32xf32>, vector<8x32xf32> -> vector<8x32xf32>
    %108 = arith.addf %107, %12 : vector<8x32xf32>
    %cst_58 = arith.constant 0.000000e+00 : f32
    %109 = vector.broadcast %cst_58 : f32 to vector<8x32xf32>
    %110 = arith.maximumf %108, %109 : vector<8x32xf32>
    %cst_59 = arith.constant dense<0.000000e+00> : vector<8x32xf32>
    %111 = tpu.matmul %106, %2, %cst_59 {dimension_numbers = #tpu.dot_dimension_numbers<[1], [0], [0], [1], [0, 0, 1, 1], [], []>} : vector<8x32xf32>, vector<32x32xf32>, vector<8x32xf32> -> vector<8x32xf32>
    %112 = arith.addf %111, %12 : vector<8x32xf32>
    %cst_60 = arith.constant 0.000000e+00 : f32
    %113 = vector.broadcast %cst_60 : f32 to vector<8x32xf32>
    %114 = arith.maximumf %112, %113 : vector<8x32xf32>
    %cst_61 = arith.constant dense<0.000000e+00> : vector<8x16xf32>
    %115 = tpu.matmul %110, %3, %cst_61 {dimension_numbers = #tpu.dot_dimension_numbers<[1], [0], [0], [1], [0, 0, 1, 1], [], []>} : vector<8x32xf32>, vector<32x16xf32>, vector<8x16xf32> -> vector<8x16xf32>
    %116 = arith.addf %115, %15 : vector<8x16xf32>
    %cst_62 = arith.constant dense<0.000000e+00> : vector<8x16xf32>
    %117 = tpu.matmul %114, %3, %cst_62 {dimension_numbers = #tpu.dot_dimension_numbers<[1], [0], [0], [1], [0, 0, 1, 1], [], []>} : vector<8x32xf32>, vector<32x16xf32>, vector<8x16xf32> -> vector<8x16xf32>
    %118 = arith.addf %117, %15 : vector<8x16xf32>
    %119 = arith.mulf %116, %22 : vector<8x16xf32>
    %120 = arith.addf %88, %119 : vector<8x16xf32>
    %121 = arith.mulf %118, %23 : vector<8x16xf32>
    %122 = arith.addf %90, %121 : vector<8x16xf32>
    %c3_i32 = arith.constant 3 : i32
    %cst_63 = arith.constant dense<0.000000e+00> : vector<8x32xf32>
    %123 = tpu.matmul %120, %0, %cst_63 {dimension_numbers = #tpu.dot_dimension_numbers<[1], [0], [0], [1], [0, 0, 1, 1], [], []>} : vector<8x16xf32>, vector<16x32xf32>, vector<8x32xf32> -> vector<8x32xf32>
    %124 = arith.addf %123, %6 : vector<8x32xf32>
    %cst_64 = arith.constant 0.000000e+00 : f32
    %125 = vector.broadcast %cst_64 : f32 to vector<8x32xf32>
    %126 = arith.maximumf %124, %125 : vector<8x32xf32>
    %cst_65 = arith.constant dense<0.000000e+00> : vector<8x32xf32>
    %127 = tpu.matmul %122, %0, %cst_65 {dimension_numbers = #tpu.dot_dimension_numbers<[1], [0], [0], [1], [0, 0, 1, 1], [], []>} : vector<8x16xf32>, vector<16x32xf32>, vector<8x32xf32> -> vector<8x32xf32>
    %128 = arith.addf %127, %6 : vector<8x32xf32>
    %cst_66 = arith.constant 0.000000e+00 : f32
    %129 = vector.broadcast %cst_66 : f32 to vector<8x32xf32>
    %130 = arith.maximumf %128, %129 : vector<8x32xf32>
    %cst_67 = arith.constant dense<0.000000e+00> : vector<8x32xf32>
    %131 = tpu.matmul %126, %1, %cst_67 {dimension_numbers = #tpu.dot_dimension_numbers<[1], [0], [0], [1], [0, 0, 1, 1], [], []>} : vector<8x32xf32>, vector<32x32xf32>, vector<8x32xf32> -> vector<8x32xf32>
    %132 = arith.addf %131, %9 : vector<8x32xf32>
    %cst_68 = arith.constant 0.000000e+00 : f32
    %133 = vector.broadcast %cst_68 : f32 to vector<8x32xf32>
    %134 = arith.maximumf %132, %133 : vector<8x32xf32>
    %cst_69 = arith.constant dense<0.000000e+00> : vector<8x32xf32>
    %135 = tpu.matmul %130, %1, %cst_69 {dimension_numbers = #tpu.dot_dimension_numbers<[1], [0], [0], [1], [0, 0, 1, 1], [], []>} : vector<8x32xf32>, vector<32x32xf32>, vector<8x32xf32> -> vector<8x32xf32>
    %136 = arith.addf %135, %9 : vector<8x32xf32>
    %cst_70 = arith.constant 0.000000e+00 : f32
    %137 = vector.broadcast %cst_70 : f32 to vector<8x32xf32>
    %138 = arith.maximumf %136, %137 : vector<8x32xf32>
    %cst_71 = arith.constant dense<0.000000e+00> : vector<8x32xf32>
    %139 = tpu.matmul %134, %2, %cst_71 {dimension_numbers = #tpu.dot_dimension_numbers<[1], [0], [0], [1], [0, 0, 1, 1], [], []>} : vector<8x32xf32>, vector<32x32xf32>, vector<8x32xf32> -> vector<8x32xf32>
    %140 = arith.addf %139, %12 : vector<8x32xf32>
    %cst_72 = arith.constant 0.000000e+00 : f32
    %141 = vector.broadcast %cst_72 : f32 to vector<8x32xf32>
    %142 = arith.maximumf %140, %141 : vector<8x32xf32>
    %cst_73 = arith.constant dense<0.000000e+00> : vector<8x32xf32>
    %143 = tpu.matmul %138, %2, %cst_73 {dimension_numbers = #tpu.dot_dimension_numbers<[1], [0], [0], [1], [0, 0, 1, 1], [], []>} : vector<8x32xf32>, vector<32x32xf32>, vector<8x32xf32> -> vector<8x32xf32>
    %144 = arith.addf %143, %12 : vector<8x32xf32>
    %cst_74 = arith.constant 0.000000e+00 : f32
    %145 = vector.broadcast %cst_74 : f32 to vector<8x32xf32>
    %146 = arith.maximumf %144, %145 : vector<8x32xf32>
    %cst_75 = arith.constant dense<0.000000e+00> : vector<8x16xf32>
    %147 = tpu.matmul %142, %3, %cst_75 {dimension_numbers = #tpu.dot_dimension_numbers<[1], [0], [0], [1], [0, 0, 1, 1], [], []>} : vector<8x32xf32>, vector<32x16xf32>, vector<8x16xf32> -> vector<8x16xf32>
    %148 = arith.addf %147, %15 : vector<8x16xf32>
    %cst_76 = arith.constant dense<0.000000e+00> : vector<8x16xf32>
    %149 = tpu.matmul %146, %3, %cst_76 {dimension_numbers = #tpu.dot_dimension_numbers<[1], [0], [0], [1], [0, 0, 1, 1], [], []>} : vector<8x32xf32>, vector<32x16xf32>, vector<8x16xf32> -> vector<8x16xf32>
    %150 = arith.addf %149, %15 : vector<8x16xf32>
    %151 = arith.mulf %148, %22 : vector<8x16xf32>
    %152 = arith.addf %120, %151 : vector<8x16xf32>
    %153 = arith.mulf %150, %23 : vector<8x16xf32>
    %154 = arith.addf %122, %153 : vector<8x16xf32>
    %c4_i32 = arith.constant 4 : i32
    %cst_77 = arith.constant dense<0.000000e+00> : vector<8x32xf32>
    %155 = tpu.matmul %152, %0, %cst_77 {dimension_numbers = #tpu.dot_dimension_numbers<[1], [0], [0], [1], [0, 0, 1, 1], [], []>} : vector<8x16xf32>, vector<16x32xf32>, vector<8x32xf32> -> vector<8x32xf32>
    %156 = arith.addf %155, %6 : vector<8x32xf32>
    %cst_78 = arith.constant 0.000000e+00 : f32
    %157 = vector.broadcast %cst_78 : f32 to vector<8x32xf32>
    %158 = arith.maximumf %156, %157 : vector<8x32xf32>
    %cst_79 = arith.constant dense<0.000000e+00> : vector<8x32xf32>
    %159 = tpu.matmul %154, %0, %cst_79 {dimension_numbers = #tpu.dot_dimension_numbers<[1], [0], [0], [1], [0, 0, 1, 1], [], []>} : vector<8x16xf32>, vector<16x32xf32>, vector<8x32xf32> -> vector<8x32xf32>
    %160 = arith.addf %159, %6 : vector<8x32xf32>
    %cst_80 = arith.constant 0.000000e+00 : f32
    %161 = vector.broadcast %cst_80 : f32 to vector<8x32xf32>
    %162 = arith.maximumf %160, %161 : vector<8x32xf32>
    %cst_81 = arith.constant dense<0.000000e+00> : vector<8x32xf32>
    %163 = tpu.matmul %158, %1, %cst_81 {dimension_numbers = #tpu.dot_dimension_numbers<[1], [0], [0], [1], [0, 0, 1, 1], [], []>} : vector<8x32xf32>, vector<32x32xf32>, vector<8x32xf32> -> vector<8x32xf32>
    %164 = arith.addf %163, %9 : vector<8x32xf32>
    %cst_82 = arith.constant 0.000000e+00 : f32
    %165 = vector.broadcast %cst_82 : f32 to vector<8x32xf32>
    %166 = arith.maximumf %164, %165 : vector<8x32xf32>
    %cst_83 = arith.constant dense<0.000000e+00> : vector<8x32xf32>
    %167 = tpu.matmul %162, %1, %cst_83 {dimension_numbers = #tpu.dot_dimension_numbers<[1], [0], [0], [1], [0, 0, 1, 1], [], []>} : vector<8x32xf32>, vector<32x32xf32>, vector<8x32xf32> -> vector<8x32xf32>
    %168 = arith.addf %167, %9 : vector<8x32xf32>
    %cst_84 = arith.constant 0.000000e+00 : f32
    %169 = vector.broadcast %cst_84 : f32 to vector<8x32xf32>
    %170 = arith.maximumf %168, %169 : vector<8x32xf32>
    %cst_85 = arith.constant dense<0.000000e+00> : vector<8x32xf32>
    %171 = tpu.matmul %166, %2, %cst_85 {dimension_numbers = #tpu.dot_dimension_numbers<[1], [0], [0], [1], [0, 0, 1, 1], [], []>} : vector<8x32xf32>, vector<32x32xf32>, vector<8x32xf32> -> vector<8x32xf32>
    %172 = arith.addf %171, %12 : vector<8x32xf32>
    %cst_86 = arith.constant 0.000000e+00 : f32
    %173 = vector.broadcast %cst_86 : f32 to vector<8x32xf32>
    %174 = arith.maximumf %172, %173 : vector<8x32xf32>
    %cst_87 = arith.constant dense<0.000000e+00> : vector<8x32xf32>
    %175 = tpu.matmul %170, %2, %cst_87 {dimension_numbers = #tpu.dot_dimension_numbers<[1], [0], [0], [1], [0, 0, 1, 1], [], []>} : vector<8x32xf32>, vector<32x32xf32>, vector<8x32xf32> -> vector<8x32xf32>
    %176 = arith.addf %175, %12 : vector<8x32xf32>
    %cst_88 = arith.constant 0.000000e+00 : f32
    %177 = vector.broadcast %cst_88 : f32 to vector<8x32xf32>
    %178 = arith.maximumf %176, %177 : vector<8x32xf32>
    %cst_89 = arith.constant dense<0.000000e+00> : vector<8x16xf32>
    %179 = tpu.matmul %174, %3, %cst_89 {dimension_numbers = #tpu.dot_dimension_numbers<[1], [0], [0], [1], [0, 0, 1, 1], [], []>} : vector<8x32xf32>, vector<32x16xf32>, vector<8x16xf32> -> vector<8x16xf32>
    %180 = arith.addf %179, %15 : vector<8x16xf32>
    %cst_90 = arith.constant dense<0.000000e+00> : vector<8x16xf32>
    %181 = tpu.matmul %178, %3, %cst_90 {dimension_numbers = #tpu.dot_dimension_numbers<[1], [0], [0], [1], [0, 0, 1, 1], [], []>} : vector<8x32xf32>, vector<32x16xf32>, vector<8x16xf32> -> vector<8x16xf32>
    %182 = arith.addf %181, %15 : vector<8x16xf32>
    %183 = arith.mulf %180, %22 : vector<8x16xf32>
    %184 = arith.addf %152, %183 : vector<8x16xf32>
    %185 = arith.mulf %182, %23 : vector<8x16xf32>
    %186 = arith.addf %154, %185 : vector<8x16xf32>
    %c5_i32 = arith.constant 5 : i32
    %cst_91 = arith.constant dense<0.000000e+00> : vector<8x32xf32>
    %187 = tpu.matmul %184, %0, %cst_91 {dimension_numbers = #tpu.dot_dimension_numbers<[1], [0], [0], [1], [0, 0, 1, 1], [], []>} : vector<8x16xf32>, vector<16x32xf32>, vector<8x32xf32> -> vector<8x32xf32>
    %188 = arith.addf %187, %6 : vector<8x32xf32>
    %cst_92 = arith.constant 0.000000e+00 : f32
    %189 = vector.broadcast %cst_92 : f32 to vector<8x32xf32>
    %190 = arith.maximumf %188, %189 : vector<8x32xf32>
    %cst_93 = arith.constant dense<0.000000e+00> : vector<8x32xf32>
    %191 = tpu.matmul %186, %0, %cst_93 {dimension_numbers = #tpu.dot_dimension_numbers<[1], [0], [0], [1], [0, 0, 1, 1], [], []>} : vector<8x16xf32>, vector<16x32xf32>, vector<8x32xf32> -> vector<8x32xf32>
    %192 = arith.addf %191, %6 : vector<8x32xf32>
    %cst_94 = arith.constant 0.000000e+00 : f32
    %193 = vector.broadcast %cst_94 : f32 to vector<8x32xf32>
    %194 = arith.maximumf %192, %193 : vector<8x32xf32>
    %cst_95 = arith.constant dense<0.000000e+00> : vector<8x32xf32>
    %195 = tpu.matmul %190, %1, %cst_95 {dimension_numbers = #tpu.dot_dimension_numbers<[1], [0], [0], [1], [0, 0, 1, 1], [], []>} : vector<8x32xf32>, vector<32x32xf32>, vector<8x32xf32> -> vector<8x32xf32>
    %196 = arith.addf %195, %9 : vector<8x32xf32>
    %cst_96 = arith.constant 0.000000e+00 : f32
    %197 = vector.broadcast %cst_96 : f32 to vector<8x32xf32>
    %198 = arith.maximumf %196, %197 : vector<8x32xf32>
    %cst_97 = arith.constant dense<0.000000e+00> : vector<8x32xf32>
    %199 = tpu.matmul %194, %1, %cst_97 {dimension_numbers = #tpu.dot_dimension_numbers<[1], [0], [0], [1], [0, 0, 1, 1], [], []>} : vector<8x32xf32>, vector<32x32xf32>, vector<8x32xf32> -> vector<8x32xf32>
    %200 = arith.addf %199, %9 : vector<8x32xf32>
    %cst_98 = arith.constant 0.000000e+00 : f32
    %201 = vector.broadcast %cst_98 : f32 to vector<8x32xf32>
    %202 = arith.maximumf %200, %201 : vector<8x32xf32>
    %cst_99 = arith.constant dense<0.000000e+00> : vector<8x32xf32>
    %203 = tpu.matmul %198, %2, %cst_99 {dimension_numbers = #tpu.dot_dimension_numbers<[1], [0], [0], [1], [0, 0, 1, 1], [], []>} : vector<8x32xf32>, vector<32x32xf32>, vector<8x32xf32> -> vector<8x32xf32>
    %204 = arith.addf %203, %12 : vector<8x32xf32>
    %cst_100 = arith.constant 0.000000e+00 : f32
    %205 = vector.broadcast %cst_100 : f32 to vector<8x32xf32>
    %206 = arith.maximumf %204, %205 : vector<8x32xf32>
    %cst_101 = arith.constant dense<0.000000e+00> : vector<8x32xf32>
    %207 = tpu.matmul %202, %2, %cst_101 {dimension_numbers = #tpu.dot_dimension_numbers<[1], [0], [0], [1], [0, 0, 1, 1], [], []>} : vector<8x32xf32>, vector<32x32xf32>, vector<8x32xf32> -> vector<8x32xf32>
    %208 = arith.addf %207, %12 : vector<8x32xf32>
    %cst_102 = arith.constant 0.000000e+00 : f32
    %209 = vector.broadcast %cst_102 : f32 to vector<8x32xf32>
    %210 = arith.maximumf %208, %209 : vector<8x32xf32>
    %cst_103 = arith.constant dense<0.000000e+00> : vector<8x16xf32>
    %211 = tpu.matmul %206, %3, %cst_103 {dimension_numbers = #tpu.dot_dimension_numbers<[1], [0], [0], [1], [0, 0, 1, 1], [], []>} : vector<8x32xf32>, vector<32x16xf32>, vector<8x16xf32> -> vector<8x16xf32>
    %212 = arith.addf %211, %15 : vector<8x16xf32>
    %cst_104 = arith.constant dense<0.000000e+00> : vector<8x16xf32>
    %213 = tpu.matmul %210, %3, %cst_104 {dimension_numbers = #tpu.dot_dimension_numbers<[1], [0], [0], [1], [0, 0, 1, 1], [], []>} : vector<8x32xf32>, vector<32x16xf32>, vector<8x16xf32> -> vector<8x16xf32>
    %214 = arith.addf %213, %15 : vector<8x16xf32>
    %215 = arith.mulf %212, %22 : vector<8x16xf32>
    %216 = arith.addf %184, %215 : vector<8x16xf32>
    %217 = arith.mulf %214, %23 : vector<8x16xf32>
    %218 = arith.addf %186, %217 : vector<8x16xf32>
    %c6_i32 = arith.constant 6 : i32
    %cst_105 = arith.constant dense<0.000000e+00> : vector<8x32xf32>
    %219 = tpu.matmul %216, %0, %cst_105 {dimension_numbers = #tpu.dot_dimension_numbers<[1], [0], [0], [1], [0, 0, 1, 1], [], []>} : vector<8x16xf32>, vector<16x32xf32>, vector<8x32xf32> -> vector<8x32xf32>
    %220 = arith.addf %219, %6 : vector<8x32xf32>
    %cst_106 = arith.constant 0.000000e+00 : f32
    %221 = vector.broadcast %cst_106 : f32 to vector<8x32xf32>
    %222 = arith.maximumf %220, %221 : vector<8x32xf32>
    %cst_107 = arith.constant dense<0.000000e+00> : vector<8x32xf32>
    %223 = tpu.matmul %218, %0, %cst_107 {dimension_numbers = #tpu.dot_dimension_numbers<[1], [0], [0], [1], [0, 0, 1, 1], [], []>} : vector<8x16xf32>, vector<16x32xf32>, vector<8x32xf32> -> vector<8x32xf32>
    %224 = arith.addf %223, %6 : vector<8x32xf32>
    %cst_108 = arith.constant 0.000000e+00 : f32
    %225 = vector.broadcast %cst_108 : f32 to vector<8x32xf32>
    %226 = arith.maximumf %224, %225 : vector<8x32xf32>
    %cst_109 = arith.constant dense<0.000000e+00> : vector<8x32xf32>
    %227 = tpu.matmul %222, %1, %cst_109 {dimension_numbers = #tpu.dot_dimension_numbers<[1], [0], [0], [1], [0, 0, 1, 1], [], []>} : vector<8x32xf32>, vector<32x32xf32>, vector<8x32xf32> -> vector<8x32xf32>
    %228 = arith.addf %227, %9 : vector<8x32xf32>
    %cst_110 = arith.constant 0.000000e+00 : f32
    %229 = vector.broadcast %cst_110 : f32 to vector<8x32xf32>
    %230 = arith.maximumf %228, %229 : vector<8x32xf32>
    %cst_111 = arith.constant dense<0.000000e+00> : vector<8x32xf32>
    %231 = tpu.matmul %226, %1, %cst_111 {dimension_numbers = #tpu.dot_dimension_numbers<[1], [0], [0], [1], [0, 0, 1, 1], [], []>} : vector<8x32xf32>, vector<32x32xf32>, vector<8x32xf32> -> vector<8x32xf32>
    %232 = arith.addf %231, %9 : vector<8x32xf32>
    %cst_112 = arith.constant 0.000000e+00 : f32
    %233 = vector.broadcast %cst_112 : f32 to vector<8x32xf32>
    %234 = arith.maximumf %232, %233 : vector<8x32xf32>
    %cst_113 = arith.constant dense<0.000000e+00> : vector<8x32xf32>
    %235 = tpu.matmul %230, %2, %cst_113 {dimension_numbers = #tpu.dot_dimension_numbers<[1], [0], [0], [1], [0, 0, 1, 1], [], []>} : vector<8x32xf32>, vector<32x32xf32>, vector<8x32xf32> -> vector<8x32xf32>
    %236 = arith.addf %235, %12 : vector<8x32xf32>
    %cst_114 = arith.constant 0.000000e+00 : f32
    %237 = vector.broadcast %cst_114 : f32 to vector<8x32xf32>
    %238 = arith.maximumf %236, %237 : vector<8x32xf32>
    %cst_115 = arith.constant dense<0.000000e+00> : vector<8x32xf32>
    %239 = tpu.matmul %234, %2, %cst_115 {dimension_numbers = #tpu.dot_dimension_numbers<[1], [0], [0], [1], [0, 0, 1, 1], [], []>} : vector<8x32xf32>, vector<32x32xf32>, vector<8x32xf32> -> vector<8x32xf32>
    %240 = arith.addf %239, %12 : vector<8x32xf32>
    %cst_116 = arith.constant 0.000000e+00 : f32
    %241 = vector.broadcast %cst_116 : f32 to vector<8x32xf32>
    %242 = arith.maximumf %240, %241 : vector<8x32xf32>
    %cst_117 = arith.constant dense<0.000000e+00> : vector<8x16xf32>
    %243 = tpu.matmul %238, %3, %cst_117 {dimension_numbers = #tpu.dot_dimension_numbers<[1], [0], [0], [1], [0, 0, 1, 1], [], []>} : vector<8x32xf32>, vector<32x16xf32>, vector<8x16xf32> -> vector<8x16xf32>
    %244 = arith.addf %243, %15 : vector<8x16xf32>
    %cst_118 = arith.constant dense<0.000000e+00> : vector<8x16xf32>
    %245 = tpu.matmul %242, %3, %cst_118 {dimension_numbers = #tpu.dot_dimension_numbers<[1], [0], [0], [1], [0, 0, 1, 1], [], []>} : vector<8x32xf32>, vector<32x16xf32>, vector<8x16xf32> -> vector<8x16xf32>
    %246 = arith.addf %245, %15 : vector<8x16xf32>
    %247 = arith.mulf %244, %22 : vector<8x16xf32>
    %248 = arith.addf %216, %247 : vector<8x16xf32>
    %249 = arith.mulf %246, %23 : vector<8x16xf32>
    %250 = arith.addf %218, %249 : vector<8x16xf32>
    %c7_i32 = arith.constant 7 : i32
    %cst_119 = arith.constant dense<0.000000e+00> : vector<8x32xf32>
    %251 = tpu.matmul %248, %0, %cst_119 {dimension_numbers = #tpu.dot_dimension_numbers<[1], [0], [0], [1], [0, 0, 1, 1], [], []>} : vector<8x16xf32>, vector<16x32xf32>, vector<8x32xf32> -> vector<8x32xf32>
    %252 = arith.addf %251, %6 : vector<8x32xf32>
    %cst_120 = arith.constant 0.000000e+00 : f32
    %253 = vector.broadcast %cst_120 : f32 to vector<8x32xf32>
    %254 = arith.maximumf %252, %253 : vector<8x32xf32>
    %cst_121 = arith.constant dense<0.000000e+00> : vector<8x32xf32>
    %255 = tpu.matmul %250, %0, %cst_121 {dimension_numbers = #tpu.dot_dimension_numbers<[1], [0], [0], [1], [0, 0, 1, 1], [], []>} : vector<8x16xf32>, vector<16x32xf32>, vector<8x32xf32> -> vector<8x32xf32>
    %256 = arith.addf %255, %6 : vector<8x32xf32>
    %cst_122 = arith.constant 0.000000e+00 : f32
    %257 = vector.broadcast %cst_122 : f32 to vector<8x32xf32>
    %258 = arith.maximumf %256, %257 : vector<8x32xf32>
    %cst_123 = arith.constant dense<0.000000e+00> : vector<8x32xf32>
    %259 = tpu.matmul %254, %1, %cst_123 {dimension_numbers = #tpu.dot_dimension_numbers<[1], [0], [0], [1], [0, 0, 1, 1], [], []>} : vector<8x32xf32>, vector<32x32xf32>, vector<8x32xf32> -> vector<8x32xf32>
    %260 = arith.addf %259, %9 : vector<8x32xf32>
    %cst_124 = arith.constant 0.000000e+00 : f32
    %261 = vector.broadcast %cst_124 : f32 to vector<8x32xf32>
    %262 = arith.maximumf %260, %261 : vector<8x32xf32>
    %cst_125 = arith.constant dense<0.000000e+00> : vector<8x32xf32>
    %263 = tpu.matmul %258, %1, %cst_125 {dimension_numbers = #tpu.dot_dimension_numbers<[1], [0], [0], [1], [0, 0, 1, 1], [], []>} : vector<8x32xf32>, vector<32x32xf32>, vector<8x32xf32> -> vector<8x32xf32>
    %264 = arith.addf %263, %9 : vector<8x32xf32>
    %cst_126 = arith.constant 0.000000e+00 : f32
    %265 = vector.broadcast %cst_126 : f32 to vector<8x32xf32>
    %266 = arith.maximumf %264, %265 : vector<8x32xf32>
    %cst_127 = arith.constant dense<0.000000e+00> : vector<8x32xf32>
    %267 = tpu.matmul %262, %2, %cst_127 {dimension_numbers = #tpu.dot_dimension_numbers<[1], [0], [0], [1], [0, 0, 1, 1], [], []>} : vector<8x32xf32>, vector<32x32xf32>, vector<8x32xf32> -> vector<8x32xf32>
    %268 = arith.addf %267, %12 : vector<8x32xf32>
    %cst_128 = arith.constant 0.000000e+00 : f32
    %269 = vector.broadcast %cst_128 : f32 to vector<8x32xf32>
    %270 = arith.maximumf %268, %269 : vector<8x32xf32>
    %cst_129 = arith.constant dense<0.000000e+00> : vector<8x32xf32>
    %271 = tpu.matmul %266, %2, %cst_129 {dimension_numbers = #tpu.dot_dimension_numbers<[1], [0], [0], [1], [0, 0, 1, 1], [], []>} : vector<8x32xf32>, vector<32x32xf32>, vector<8x32xf32> -> vector<8x32xf32>
    %272 = arith.addf %271, %12 : vector<8x32xf32>
    %cst_130 = arith.constant 0.000000e+00 : f32
    %273 = vector.broadcast %cst_130 : f32 to vector<8x32xf32>
    %274 = arith.maximumf %272, %273 : vector<8x32xf32>
    %cst_131 = arith.constant dense<0.000000e+00> : vector<8x16xf32>
    %275 = tpu.matmul %270, %3, %cst_131 {dimension_numbers = #tpu.dot_dimension_numbers<[1], [0], [0], [1], [0, 0, 1, 1], [], []>} : vector<8x32xf32>, vector<32x16xf32>, vector<8x16xf32> -> vector<8x16xf32>
    %276 = arith.addf %275, %15 : vector<8x16xf32>
    %cst_132 = arith.constant dense<0.000000e+00> : vector<8x16xf32>
    %277 = tpu.matmul %274, %3, %cst_132 {dimension_numbers = #tpu.dot_dimension_numbers<[1], [0], [0], [1], [0, 0, 1, 1], [], []>} : vector<8x32xf32>, vector<32x16xf32>, vector<8x16xf32> -> vector<8x16xf32>
    %278 = arith.addf %277, %15 : vector<8x16xf32>
    %279 = arith.mulf %276, %22 : vector<8x16xf32>
    %280 = arith.addf %248, %279 : vector<8x16xf32>
    %281 = arith.mulf %278, %23 : vector<8x16xf32>
    %282 = arith.addf %250, %281 : vector<8x16xf32>
    %c8_i32 = arith.constant 8 : i32
    %cst_133 = arith.constant dense<0.000000e+00> : vector<8x32xf32>
    %283 = tpu.matmul %280, %0, %cst_133 {dimension_numbers = #tpu.dot_dimension_numbers<[1], [0], [0], [1], [0, 0, 1, 1], [], []>} : vector<8x16xf32>, vector<16x32xf32>, vector<8x32xf32> -> vector<8x32xf32>
    %284 = arith.addf %283, %6 : vector<8x32xf32>
    %cst_134 = arith.constant 0.000000e+00 : f32
    %285 = vector.broadcast %cst_134 : f32 to vector<8x32xf32>
    %286 = arith.maximumf %284, %285 : vector<8x32xf32>
    %cst_135 = arith.constant dense<0.000000e+00> : vector<8x32xf32>
    %287 = tpu.matmul %282, %0, %cst_135 {dimension_numbers = #tpu.dot_dimension_numbers<[1], [0], [0], [1], [0, 0, 1, 1], [], []>} : vector<8x16xf32>, vector<16x32xf32>, vector<8x32xf32> -> vector<8x32xf32>
    %288 = arith.addf %287, %6 : vector<8x32xf32>
    %cst_136 = arith.constant 0.000000e+00 : f32
    %289 = vector.broadcast %cst_136 : f32 to vector<8x32xf32>
    %290 = arith.maximumf %288, %289 : vector<8x32xf32>
    %cst_137 = arith.constant dense<0.000000e+00> : vector<8x32xf32>
    %291 = tpu.matmul %286, %1, %cst_137 {dimension_numbers = #tpu.dot_dimension_numbers<[1], [0], [0], [1], [0, 0, 1, 1], [], []>} : vector<8x32xf32>, vector<32x32xf32>, vector<8x32xf32> -> vector<8x32xf32>
    %292 = arith.addf %291, %9 : vector<8x32xf32>
    %cst_138 = arith.constant 0.000000e+00 : f32
    %293 = vector.broadcast %cst_138 : f32 to vector<8x32xf32>
    %294 = arith.maximumf %292, %293 : vector<8x32xf32>
    %cst_139 = arith.constant dense<0.000000e+00> : vector<8x32xf32>
    %295 = tpu.matmul %290, %1, %cst_139 {dimension_numbers = #tpu.dot_dimension_numbers<[1], [0], [0], [1], [0, 0, 1, 1], [], []>} : vector<8x32xf32>, vector<32x32xf32>, vector<8x32xf32> -> vector<8x32xf32>
    %296 = arith.addf %295, %9 : vector<8x32xf32>
    %cst_140 = arith.constant 0.000000e+00 : f32
    %297 = vector.broadcast %cst_140 : f32 to vector<8x32xf32>
    %298 = arith.maximumf %296, %297 : vector<8x32xf32>
    %cst_141 = arith.constant dense<0.000000e+00> : vector<8x32xf32>
    %299 = tpu.matmul %294, %2, %cst_141 {dimension_numbers = #tpu.dot_dimension_numbers<[1], [0], [0], [1], [0, 0, 1, 1], [], []>} : vector<8x32xf32>, vector<32x32xf32>, vector<8x32xf32> -> vector<8x32xf32>
    %300 = arith.addf %299, %12 : vector<8x32xf32>
    %cst_142 = arith.constant 0.000000e+00 : f32
    %301 = vector.broadcast %cst_142 : f32 to vector<8x32xf32>
    %302 = arith.maximumf %300, %301 : vector<8x32xf32>
    %cst_143 = arith.constant dense<0.000000e+00> : vector<8x32xf32>
    %303 = tpu.matmul %298, %2, %cst_143 {dimension_numbers = #tpu.dot_dimension_numbers<[1], [0], [0], [1], [0, 0, 1, 1], [], []>} : vector<8x32xf32>, vector<32x32xf32>, vector<8x32xf32> -> vector<8x32xf32>
    %304 = arith.addf %303, %12 : vector<8x32xf32>
    %cst_144 = arith.constant 0.000000e+00 : f32
    %305 = vector.broadcast %cst_144 : f32 to vector<8x32xf32>
    %306 = arith.maximumf %304, %305 : vector<8x32xf32>
    %cst_145 = arith.constant dense<0.000000e+00> : vector<8x16xf32>
    %307 = tpu.matmul %302, %3, %cst_145 {dimension_numbers = #tpu.dot_dimension_numbers<[1], [0], [0], [1], [0, 0, 1, 1], [], []>} : vector<8x32xf32>, vector<32x16xf32>, vector<8x16xf32> -> vector<8x16xf32>
    %308 = arith.addf %307, %15 : vector<8x16xf32>
    %cst_146 = arith.constant dense<0.000000e+00> : vector<8x16xf32>
    %309 = tpu.matmul %306, %3, %cst_146 {dimension_numbers = #tpu.dot_dimension_numbers<[1], [0], [0], [1], [0, 0, 1, 1], [], []>} : vector<8x32xf32>, vector<32x16xf32>, vector<8x16xf32> -> vector<8x16xf32>
    %310 = arith.addf %309, %15 : vector<8x16xf32>
    %311 = arith.mulf %308, %22 : vector<8x16xf32>
    %312 = arith.addf %280, %311 : vector<8x16xf32>
    %313 = arith.mulf %310, %23 : vector<8x16xf32>
    %314 = arith.addf %282, %313 : vector<8x16xf32>
    %c9_i32 = arith.constant 9 : i32
    %cst_147 = arith.constant dense<0.000000e+00> : vector<8x32xf32>
    %315 = tpu.matmul %312, %0, %cst_147 {dimension_numbers = #tpu.dot_dimension_numbers<[1], [0], [0], [1], [0, 0, 1, 1], [], []>} : vector<8x16xf32>, vector<16x32xf32>, vector<8x32xf32> -> vector<8x32xf32>
    %316 = arith.addf %315, %6 : vector<8x32xf32>
    %cst_148 = arith.constant 0.000000e+00 : f32
    %317 = vector.broadcast %cst_148 : f32 to vector<8x32xf32>
    %318 = arith.maximumf %316, %317 : vector<8x32xf32>
    %cst_149 = arith.constant dense<0.000000e+00> : vector<8x32xf32>
    %319 = tpu.matmul %314, %0, %cst_149 {dimension_numbers = #tpu.dot_dimension_numbers<[1], [0], [0], [1], [0, 0, 1, 1], [], []>} : vector<8x16xf32>, vector<16x32xf32>, vector<8x32xf32> -> vector<8x32xf32>
    %320 = arith.addf %319, %6 : vector<8x32xf32>
    %cst_150 = arith.constant 0.000000e+00 : f32
    %321 = vector.broadcast %cst_150 : f32 to vector<8x32xf32>
    %322 = arith.maximumf %320, %321 : vector<8x32xf32>
    %cst_151 = arith.constant dense<0.000000e+00> : vector<8x32xf32>
    %323 = tpu.matmul %318, %1, %cst_151 {dimension_numbers = #tpu.dot_dimension_numbers<[1], [0], [0], [1], [0, 0, 1, 1], [], []>} : vector<8x32xf32>, vector<32x32xf32>, vector<8x32xf32> -> vector<8x32xf32>
    %324 = arith.addf %323, %9 : vector<8x32xf32>
    %cst_152 = arith.constant 0.000000e+00 : f32
    %325 = vector.broadcast %cst_152 : f32 to vector<8x32xf32>
    %326 = arith.maximumf %324, %325 : vector<8x32xf32>
    %cst_153 = arith.constant dense<0.000000e+00> : vector<8x32xf32>
    %327 = tpu.matmul %322, %1, %cst_153 {dimension_numbers = #tpu.dot_dimension_numbers<[1], [0], [0], [1], [0, 0, 1, 1], [], []>} : vector<8x32xf32>, vector<32x32xf32>, vector<8x32xf32> -> vector<8x32xf32>
    %328 = arith.addf %327, %9 : vector<8x32xf32>
    %cst_154 = arith.constant 0.000000e+00 : f32
    %329 = vector.broadcast %cst_154 : f32 to vector<8x32xf32>
    %330 = arith.maximumf %328, %329 : vector<8x32xf32>
    %cst_155 = arith.constant dense<0.000000e+00> : vector<8x32xf32>
    %331 = tpu.matmul %326, %2, %cst_155 {dimension_numbers = #tpu.dot_dimension_numbers<[1], [0], [0], [1], [0, 0, 1, 1], [], []>} : vector<8x32xf32>, vector<32x32xf32>, vector<8x32xf32> -> vector<8x32xf32>
    %332 = arith.addf %331, %12 : vector<8x32xf32>
    %cst_156 = arith.constant 0.000000e+00 : f32
    %333 = vector.broadcast %cst_156 : f32 to vector<8x32xf32>
    %334 = arith.maximumf %332, %333 : vector<8x32xf32>
    %cst_157 = arith.constant dense<0.000000e+00> : vector<8x32xf32>
    %335 = tpu.matmul %330, %2, %cst_157 {dimension_numbers = #tpu.dot_dimension_numbers<[1], [0], [0], [1], [0, 0, 1, 1], [], []>} : vector<8x32xf32>, vector<32x32xf32>, vector<8x32xf32> -> vector<8x32xf32>
    %336 = arith.addf %335, %12 : vector<8x32xf32>
    %cst_158 = arith.constant 0.000000e+00 : f32
    %337 = vector.broadcast %cst_158 : f32 to vector<8x32xf32>
    %338 = arith.maximumf %336, %337 : vector<8x32xf32>
    %cst_159 = arith.constant dense<0.000000e+00> : vector<8x16xf32>
    %339 = tpu.matmul %334, %3, %cst_159 {dimension_numbers = #tpu.dot_dimension_numbers<[1], [0], [0], [1], [0, 0, 1, 1], [], []>} : vector<8x32xf32>, vector<32x16xf32>, vector<8x16xf32> -> vector<8x16xf32>
    %340 = arith.addf %339, %15 : vector<8x16xf32>
    %cst_160 = arith.constant dense<0.000000e+00> : vector<8x16xf32>
    %341 = tpu.matmul %338, %3, %cst_160 {dimension_numbers = #tpu.dot_dimension_numbers<[1], [0], [0], [1], [0, 0, 1, 1], [], []>} : vector<8x32xf32>, vector<32x16xf32>, vector<8x16xf32> -> vector<8x16xf32>
    %342 = arith.addf %341, %15 : vector<8x16xf32>
    %343 = arith.mulf %340, %22 : vector<8x16xf32>
    %344 = arith.addf %312, %343 : vector<8x16xf32>
    %345 = arith.mulf %342, %23 : vector<8x16xf32>
    %346 = arith.addf %314, %345 : vector<8x16xf32>
    %347 = tpu.concatenate %344, %346 in 0 : vector<8x16xf32>, vector<8x16xf32> -> vector<16x16xf32>
    %c1 = arith.constant 1 : index
    %c0_161 = arith.constant 0 : index
    %c0_162 = arith.constant 0 : index
    %348 = vector.load %arg11[%c1, %c0_161, %c0_162] : memref<5x16x16xf32, #tpu.memory_space<vmem>>, vector<1x16x16xf32>
    %349 = vector.shape_cast %348 : vector<1x16x16xf32> to vector<16x16xf32>
    %350 = vector.shape_cast %347 : vector<16x16xf32> to vector<1x16x16xf32>
    tpu.vector_store %arg11[%c1, %c0_161, %c0_162], %350 {strides = array<i32>} : memref<5x16x16xf32, #tpu.memory_space<vmem>>, vector<1x16x16xf32>,
    %c0_i32_163 = arith.constant 0 : i32
    %cst_164 = arith.constant dense<0.000000e+00> : vector<8x32xf32>
    %351 = tpu.matmul %344, %0, %cst_164 {dimension_numbers = #tpu.dot_dimension_numbers<[1], [0], [0], [1], [0, 0, 1, 1], [], []>} : vector<8x16xf32>, vector<16x32xf32>, vector<8x32xf32> -> vector<8x32xf32>
    %352 = arith.addf %351, %6 : vector<8x32xf32>
    %cst_165 = arith.constant 0.000000e+00 : f32
    %353 = vector.broadcast %cst_165 : f32 to vector<8x32xf32>
    %354 = arith.maximumf %352, %353 : vector<8x32xf32>
    %cst_166 = arith.constant dense<0.000000e+00> : vector<8x32xf32>
    %355 = tpu.matmul %346, %0, %cst_166 {dimension_numbers = #tpu.dot_dimension_numbers<[1], [0], [0], [1], [0, 0, 1, 1], [], []>} : vector<8x16xf32>, vector<16x32xf32>, vector<8x32xf32> -> vector<8x32xf32>
    %356 = arith.addf %355, %6 : vector<8x32xf32>
    %cst_167 = arith.constant 0.000000e+00 : f32
    %357 = vector.broadcast %cst_167 : f32 to vector<8x32xf32>
    %358 = arith.maximumf %356, %357 : vector<8x32xf32>
    %cst_168 = arith.constant dense<0.000000e+00> : vector<8x32xf32>
    %359 = tpu.matmul %354, %1, %cst_168 {dimension_numbers = #tpu.dot_dimension_numbers<[1], [0], [0], [1], [0, 0, 1, 1], [], []>} : vector<8x32xf32>, vector<32x32xf32>, vector<8x32xf32> -> vector<8x32xf32>
    %360 = arith.addf %359, %9 : vector<8x32xf32>
    %cst_169 = arith.constant 0.000000e+00 : f32
    %361 = vector.broadcast %cst_169 : f32 to vector<8x32xf32>
    %362 = arith.maximumf %360, %361 : vector<8x32xf32>
    %cst_170 = arith.constant dense<0.000000e+00> : vector<8x32xf32>
    %363 = tpu.matmul %358, %1, %cst_170 {dimension_numbers = #tpu.dot_dimension_numbers<[1], [0], [0], [1], [0, 0, 1, 1], [], []>} : vector<8x32xf32>, vector<32x32xf32>, vector<8x32xf32> -> vector<8x32xf32>
    %364 = arith.addf %363, %9 : vector<8x32xf32>
    %cst_171 = arith.constant 0.000000e+00 : f32
    %365 = vector.broadcast %cst_171 : f32 to vector<8x32xf32>
    %366 = arith.maximumf %364, %365 : vector<8x32xf32>
    %cst_172 = arith.constant dense<0.000000e+00> : vector<8x32xf32>
    %367 = tpu.matmul %362, %2, %cst_172 {dimension_numbers = #tpu.dot_dimension_numbers<[1], [0], [0], [1], [0, 0, 1, 1], [], []>} : vector<8x32xf32>, vector<32x32xf32>, vector<8x32xf32> -> vector<8x32xf32>
    %368 = arith.addf %367, %12 : vector<8x32xf32>
    %cst_173 = arith.constant 0.000000e+00 : f32
    %369 = vector.broadcast %cst_173 : f32 to vector<8x32xf32>
    %370 = arith.maximumf %368, %369 : vector<8x32xf32>
    %cst_174 = arith.constant dense<0.000000e+00> : vector<8x32xf32>
    %371 = tpu.matmul %366, %2, %cst_174 {dimension_numbers = #tpu.dot_dimension_numbers<[1], [0], [0], [1], [0, 0, 1, 1], [], []>} : vector<8x32xf32>, vector<32x32xf32>, vector<8x32xf32> -> vector<8x32xf32>
    %372 = arith.addf %371, %12 : vector<8x32xf32>
    %cst_175 = arith.constant 0.000000e+00 : f32
    %373 = vector.broadcast %cst_175 : f32 to vector<8x32xf32>
    %374 = arith.maximumf %372, %373 : vector<8x32xf32>
    %cst_176 = arith.constant dense<0.000000e+00> : vector<8x16xf32>
    %375 = tpu.matmul %370, %3, %cst_176 {dimension_numbers = #tpu.dot_dimension_numbers<[1], [0], [0], [1], [0, 0, 1, 1], [], []>} : vector<8x32xf32>, vector<32x16xf32>, vector<8x16xf32> -> vector<8x16xf32>
    %376 = arith.addf %375, %15 : vector<8x16xf32>
    %cst_177 = arith.constant dense<0.000000e+00> : vector<8x16xf32>
    %377 = tpu.matmul %374, %3, %cst_177 {dimension_numbers = #tpu.dot_dimension_numbers<[1], [0], [0], [1], [0, 0, 1, 1], [], []>} : vector<8x32xf32>, vector<32x16xf32>, vector<8x16xf32> -> vector<8x16xf32>
    %378 = arith.addf %377, %15 : vector<8x16xf32>
    %379 = arith.mulf %376, %22 : vector<8x16xf32>
    %380 = arith.addf %344, %379 : vector<8x16xf32>
    %381 = arith.mulf %378, %23 : vector<8x16xf32>
    %382 = arith.addf %346, %381 : vector<8x16xf32>
    %c1_i32_178 = arith.constant 1 : i32
    %cst_179 = arith.constant dense<0.000000e+00> : vector<8x32xf32>
    %383 = tpu.matmul %380, %0, %cst_179 {dimension_numbers = #tpu.dot_dimension_numbers<[1], [0], [0], [1], [0, 0, 1, 1], [], []>} : vector<8x16xf32>, vector<16x32xf32>, vector<8x32xf32> -> vector<8x32xf32>
    %384 = arith.addf %383, %6 : vector<8x32xf32>
    %cst_180 = arith.constant 0.000000e+00 : f32
    %385 = vector.broadcast %cst_180 : f32 to vector<8x32xf32>
    %386 = arith.maximumf %384, %385 : vector<8x32xf32>
    %cst_181 = arith.constant dense<0.000000e+00> : vector<8x32xf32>
    %387 = tpu.matmul %382, %0, %cst_181 {dimension_numbers = #tpu.dot_dimension_numbers<[1], [0], [0], [1], [0, 0, 1, 1], [], []>} : vector<8x16xf32>, vector<16x32xf32>, vector<8x32xf32> -> vector<8x32xf32>
    %388 = arith.addf %387, %6 : vector<8x32xf32>
    %cst_182 = arith.constant 0.000000e+00 : f32
    %389 = vector.broadcast %cst_182 : f32 to vector<8x32xf32>
    %390 = arith.maximumf %388, %389 : vector<8x32xf32>
    %cst_183 = arith.constant dense<0.000000e+00> : vector<8x32xf32>
    %391 = tpu.matmul %386, %1, %cst_183 {dimension_numbers = #tpu.dot_dimension_numbers<[1], [0], [0], [1], [0, 0, 1, 1], [], []>} : vector<8x32xf32>, vector<32x32xf32>, vector<8x32xf32> -> vector<8x32xf32>
    %392 = arith.addf %391, %9 : vector<8x32xf32>
    %cst_184 = arith.constant 0.000000e+00 : f32
    %393 = vector.broadcast %cst_184 : f32 to vector<8x32xf32>
    %394 = arith.maximumf %392, %393 : vector<8x32xf32>
    %cst_185 = arith.constant dense<0.000000e+00> : vector<8x32xf32>
    %395 = tpu.matmul %390, %1, %cst_185 {dimension_numbers = #tpu.dot_dimension_numbers<[1], [0], [0], [1], [0, 0, 1, 1], [], []>} : vector<8x32xf32>, vector<32x32xf32>, vector<8x32xf32> -> vector<8x32xf32>
    %396 = arith.addf %395, %9 : vector<8x32xf32>
    %cst_186 = arith.constant 0.000000e+00 : f32
    %397 = vector.broadcast %cst_186 : f32 to vector<8x32xf32>
    %398 = arith.maximumf %396, %397 : vector<8x32xf32>
    %cst_187 = arith.constant dense<0.000000e+00> : vector<8x32xf32>
    %399 = tpu.matmul %394, %2, %cst_187 {dimension_numbers = #tpu.dot_dimension_numbers<[1], [0], [0], [1], [0, 0, 1, 1], [], []>} : vector<8x32xf32>, vector<32x32xf32>, vector<8x32xf32> -> vector<8x32xf32>
    %400 = arith.addf %399, %12 : vector<8x32xf32>
    %cst_188 = arith.constant 0.000000e+00 : f32
    %401 = vector.broadcast %cst_188 : f32 to vector<8x32xf32>
    %402 = arith.maximumf %400, %401 : vector<8x32xf32>
    %cst_189 = arith.constant dense<0.000000e+00> : vector<8x32xf32>
    %403 = tpu.matmul %398, %2, %cst_189 {dimension_numbers = #tpu.dot_dimension_numbers<[1], [0], [0], [1], [0, 0, 1, 1], [], []>} : vector<8x32xf32>, vector<32x32xf32>, vector<8x32xf32> -> vector<8x32xf32>
    %404 = arith.addf %403, %12 : vector<8x32xf32>
    %cst_190 = arith.constant 0.000000e+00 : f32
    %405 = vector.broadcast %cst_190 : f32 to vector<8x32xf32>
    %406 = arith.maximumf %404, %405 : vector<8x32xf32>
    %cst_191 = arith.constant dense<0.000000e+00> : vector<8x16xf32>
    %407 = tpu.matmul %402, %3, %cst_191 {dimension_numbers = #tpu.dot_dimension_numbers<[1], [0], [0], [1], [0, 0, 1, 1], [], []>} : vector<8x32xf32>, vector<32x16xf32>, vector<8x16xf32> -> vector<8x16xf32>
    %408 = arith.addf %407, %15 : vector<8x16xf32>
    %cst_192 = arith.constant dense<0.000000e+00> : vector<8x16xf32>
    %409 = tpu.matmul %406, %3, %cst_192 {dimension_numbers = #tpu.dot_dimension_numbers<[1], [0], [0], [1], [0, 0, 1, 1], [], []>} : vector<8x32xf32>, vector<32x16xf32>, vector<8x16xf32> -> vector<8x16xf32>
    %410 = arith.addf %409, %15 : vector<8x16xf32>
    %411 = arith.mulf %408, %22 : vector<8x16xf32>
    %412 = arith.addf %380, %411 : vector<8x16xf32>
    %413 = arith.mulf %410, %23 : vector<8x16xf32>
    %414 = arith.addf %382, %413 : vector<8x16xf32>
    %c2_i32_193 = arith.constant 2 : i32
    %cst_194 = arith.constant dense<0.000000e+00> : vector<8x32xf32>
    %415 = tpu.matmul %412, %0, %cst_194 {dimension_numbers = #tpu.dot_dimension_numbers<[1], [0], [0], [1], [0, 0, 1, 1], [], []>} : vector<8x16xf32>, vector<16x32xf32>, vector<8x32xf32> -> vector<8x32xf32>
    %416 = arith.addf %415, %6 : vector<8x32xf32>
    %cst_195 = arith.constant 0.000000e+00 : f32
    %417 = vector.broadcast %cst_195 : f32 to vector<8x32xf32>
    %418 = arith.maximumf %416, %417 : vector<8x32xf32>
    %cst_196 = arith.constant dense<0.000000e+00> : vector<8x32xf32>
    %419 = tpu.matmul %414, %0, %cst_196 {dimension_numbers = #tpu.dot_dimension_numbers<[1], [0], [0], [1], [0, 0, 1, 1], [], []>} : vector<8x16xf32>, vector<16x32xf32>, vector<8x32xf32> -> vector<8x32xf32>
    %420 = arith.addf %419, %6 : vector<8x32xf32>
    %cst_197 = arith.constant 0.000000e+00 : f32
    %421 = vector.broadcast %cst_197 : f32 to vector<8x32xf32>
    %422 = arith.maximumf %420, %421 : vector<8x32xf32>
    %cst_198 = arith.constant dense<0.000000e+00> : vector<8x32xf32>
    %423 = tpu.matmul %418, %1, %cst_198 {dimension_numbers = #tpu.dot_dimension_numbers<[1], [0], [0], [1], [0, 0, 1, 1], [], []>} : vector<8x32xf32>, vector<32x32xf32>, vector<8x32xf32> -> vector<8x32xf32>
    %424 = arith.addf %423, %9 : vector<8x32xf32>
    %cst_199 = arith.constant 0.000000e+00 : f32
    %425 = vector.broadcast %cst_199 : f32 to vector<8x32xf32>
    %426 = arith.maximumf %424, %425 : vector<8x32xf32>
    %cst_200 = arith.constant dense<0.000000e+00> : vector<8x32xf32>
    %427 = tpu.matmul %422, %1, %cst_200 {dimension_numbers = #tpu.dot_dimension_numbers<[1], [0], [0], [1], [0, 0, 1, 1], [], []>} : vector<8x32xf32>, vector<32x32xf32>, vector<8x32xf32> -> vector<8x32xf32>
    %428 = arith.addf %427, %9 : vector<8x32xf32>
    %cst_201 = arith.constant 0.000000e+00 : f32
    %429 = vector.broadcast %cst_201 : f32 to vector<8x32xf32>
    %430 = arith.maximumf %428, %429 : vector<8x32xf32>
    %cst_202 = arith.constant dense<0.000000e+00> : vector<8x32xf32>
    %431 = tpu.matmul %426, %2, %cst_202 {dimension_numbers = #tpu.dot_dimension_numbers<[1], [0], [0], [1], [0, 0, 1, 1], [], []>} : vector<8x32xf32>, vector<32x32xf32>, vector<8x32xf32> -> vector<8x32xf32>
    %432 = arith.addf %431, %12 : vector<8x32xf32>
    %cst_203 = arith.constant 0.000000e+00 : f32
    %433 = vector.broadcast %cst_203 : f32 to vector<8x32xf32>
    %434 = arith.maximumf %432, %433 : vector<8x32xf32>
    %cst_204 = arith.constant dense<0.000000e+00> : vector<8x32xf32>
    %435 = tpu.matmul %430, %2, %cst_204 {dimension_numbers = #tpu.dot_dimension_numbers<[1], [0], [0], [1], [0, 0, 1, 1], [], []>} : vector<8x32xf32>, vector<32x32xf32>, vector<8x32xf32> -> vector<8x32xf32>
    %436 = arith.addf %435, %12 : vector<8x32xf32>
    %cst_205 = arith.constant 0.000000e+00 : f32
    %437 = vector.broadcast %cst_205 : f32 to vector<8x32xf32>
    %438 = arith.maximumf %436, %437 : vector<8x32xf32>
    %cst_206 = arith.constant dense<0.000000e+00> : vector<8x16xf32>
    %439 = tpu.matmul %434, %3, %cst_206 {dimension_numbers = #tpu.dot_dimension_numbers<[1], [0], [0], [1], [0, 0, 1, 1], [], []>} : vector<8x32xf32>, vector<32x16xf32>, vector<8x16xf32> -> vector<8x16xf32>
    %440 = arith.addf %439, %15 : vector<8x16xf32>
    %cst_207 = arith.constant dense<0.000000e+00> : vector<8x16xf32>
    %441 = tpu.matmul %438, %3, %cst_207 {dimension_numbers = #tpu.dot_dimension_numbers<[1], [0], [0], [1], [0, 0, 1, 1], [], []>} : vector<8x32xf32>, vector<32x16xf32>, vector<8x16xf32> -> vector<8x16xf32>
    %442 = arith.addf %441, %15 : vector<8x16xf32>
    %443 = arith.mulf %440, %22 : vector<8x16xf32>
    %444 = arith.addf %412, %443 : vector<8x16xf32>
    %445 = arith.mulf %442, %23 : vector<8x16xf32>
    %446 = arith.addf %414, %445 : vector<8x16xf32>
    %c3_i32_208 = arith.constant 3 : i32
    %cst_209 = arith.constant dense<0.000000e+00> : vector<8x32xf32>
    %447 = tpu.matmul %444, %0, %cst_209 {dimension_numbers = #tpu.dot_dimension_numbers<[1], [0], [0], [1], [0, 0, 1, 1], [], []>} : vector<8x16xf32>, vector<16x32xf32>, vector<8x32xf32> -> vector<8x32xf32>
    %448 = arith.addf %447, %6 : vector<8x32xf32>
    %cst_210 = arith.constant 0.000000e+00 : f32
    %449 = vector.broadcast %cst_210 : f32 to vector<8x32xf32>
    %450 = arith.maximumf %448, %449 : vector<8x32xf32>
    %cst_211 = arith.constant dense<0.000000e+00> : vector<8x32xf32>
    %451 = tpu.matmul %446, %0, %cst_211 {dimension_numbers = #tpu.dot_dimension_numbers<[1], [0], [0], [1], [0, 0, 1, 1], [], []>} : vector<8x16xf32>, vector<16x32xf32>, vector<8x32xf32> -> vector<8x32xf32>
    %452 = arith.addf %451, %6 : vector<8x32xf32>
    %cst_212 = arith.constant 0.000000e+00 : f32
    %453 = vector.broadcast %cst_212 : f32 to vector<8x32xf32>
    %454 = arith.maximumf %452, %453 : vector<8x32xf32>
    %cst_213 = arith.constant dense<0.000000e+00> : vector<8x32xf32>
    %455 = tpu.matmul %450, %1, %cst_213 {dimension_numbers = #tpu.dot_dimension_numbers<[1], [0], [0], [1], [0, 0, 1, 1], [], []>} : vector<8x32xf32>, vector<32x32xf32>, vector<8x32xf32> -> vector<8x32xf32>
    %456 = arith.addf %455, %9 : vector<8x32xf32>
    %cst_214 = arith.constant 0.000000e+00 : f32
    %457 = vector.broadcast %cst_214 : f32 to vector<8x32xf32>
    %458 = arith.maximumf %456, %457 : vector<8x32xf32>
    %cst_215 = arith.constant dense<0.000000e+00> : vector<8x32xf32>
    %459 = tpu.matmul %454, %1, %cst_215 {dimension_numbers = #tpu.dot_dimension_numbers<[1], [0], [0], [1], [0, 0, 1, 1], [], []>} : vector<8x32xf32>, vector<32x32xf32>, vector<8x32xf32> -> vector<8x32xf32>
    %460 = arith.addf %459, %9 : vector<8x32xf32>
    %cst_216 = arith.constant 0.000000e+00 : f32
    %461 = vector.broadcast %cst_216 : f32 to vector<8x32xf32>
    %462 = arith.maximumf %460, %461 : vector<8x32xf32>
    %cst_217 = arith.constant dense<0.000000e+00> : vector<8x32xf32>
    %463 = tpu.matmul %458, %2, %cst_217 {dimension_numbers = #tpu.dot_dimension_numbers<[1], [0], [0], [1], [0, 0, 1, 1], [], []>} : vector<8x32xf32>, vector<32x32xf32>, vector<8x32xf32> -> vector<8x32xf32>
    %464 = arith.addf %463, %12 : vector<8x32xf32>
    %cst_218 = arith.constant 0.000000e+00 : f32
    %465 = vector.broadcast %cst_218 : f32 to vector<8x32xf32>
    %466 = arith.maximumf %464, %465 : vector<8x32xf32>
    %cst_219 = arith.constant dense<0.000000e+00> : vector<8x32xf32>
    %467 = tpu.matmul %462, %2, %cst_219 {dimension_numbers = #tpu.dot_dimension_numbers<[1], [0], [0], [1], [0, 0, 1, 1], [], []>} : vector<8x32xf32>, vector<32x32xf32>, vector<8x32xf32> -> vector<8x32xf32>
    %468 = arith.addf %467, %12 : vector<8x32xf32>
    %cst_220 = arith.constant 0.000000e+00 : f32
    %469 = vector.broadcast %cst_220 : f32 to vector<8x32xf32>
    %470 = arith.maximumf %468, %469 : vector<8x32xf32>
    %cst_221 = arith.constant dense<0.000000e+00> : vector<8x16xf32>
    %471 = tpu.matmul %466, %3, %cst_221 {dimension_numbers = #tpu.dot_dimension_numbers<[1], [0], [0], [1], [0, 0, 1, 1], [], []>} : vector<8x32xf32>, vector<32x16xf32>, vector<8x16xf32> -> vector<8x16xf32>
    %472 = arith.addf %471, %15 : vector<8x16xf32>
    %cst_222 = arith.constant dense<0.000000e+00> : vector<8x16xf32>
    %473 = tpu.matmul %470, %3, %cst_222 {dimension_numbers = #tpu.dot_dimension_numbers<[1], [0], [0], [1], [0, 0, 1, 1], [], []>} : vector<8x32xf32>, vector<32x16xf32>, vector<8x16xf32> -> vector<8x16xf32>
    %474 = arith.addf %473, %15 : vector<8x16xf32>
    %475 = arith.mulf %472, %22 : vector<8x16xf32>
    %476 = arith.addf %444, %475 : vector<8x16xf32>
    %477 = arith.mulf %474, %23 : vector<8x16xf32>
    %478 = arith.addf %446, %477 : vector<8x16xf32>
    %c4_i32_223 = arith.constant 4 : i32
    %cst_224 = arith.constant dense<0.000000e+00> : vector<8x32xf32>
    %479 = tpu.matmul %476, %0, %cst_224 {dimension_numbers = #tpu.dot_dimension_numbers<[1], [0], [0], [1], [0, 0, 1, 1], [], []>} : vector<8x16xf32>, vector<16x32xf32>, vector<8x32xf32> -> vector<8x32xf32>
    %480 = arith.addf %479, %6 : vector<8x32xf32>
    %cst_225 = arith.constant 0.000000e+00 : f32
    %481 = vector.broadcast %cst_225 : f32 to vector<8x32xf32>
    %482 = arith.maximumf %480, %481 : vector<8x32xf32>
    %cst_226 = arith.constant dense<0.000000e+00> : vector<8x32xf32>
    %483 = tpu.matmul %478, %0, %cst_226 {dimension_numbers = #tpu.dot_dimension_numbers<[1], [0], [0], [1], [0, 0, 1, 1], [], []>} : vector<8x16xf32>, vector<16x32xf32>, vector<8x32xf32> -> vector<8x32xf32>
    %484 = arith.addf %483, %6 : vector<8x32xf32>
    %cst_227 = arith.constant 0.000000e+00 : f32
    %485 = vector.broadcast %cst_227 : f32 to vector<8x32xf32>
    %486 = arith.maximumf %484, %485 : vector<8x32xf32>
    %cst_228 = arith.constant dense<0.000000e+00> : vector<8x32xf32>
    %487 = tpu.matmul %482, %1, %cst_228 {dimension_numbers = #tpu.dot_dimension_numbers<[1], [0], [0], [1], [0, 0, 1, 1], [], []>} : vector<8x32xf32>, vector<32x32xf32>, vector<8x32xf32> -> vector<8x32xf32>
    %488 = arith.addf %487, %9 : vector<8x32xf32>
    %cst_229 = arith.constant 0.000000e+00 : f32
    %489 = vector.broadcast %cst_229 : f32 to vector<8x32xf32>
    %490 = arith.maximumf %488, %489 : vector<8x32xf32>
    %cst_230 = arith.constant dense<0.000000e+00> : vector<8x32xf32>
    %491 = tpu.matmul %486, %1, %cst_230 {dimension_numbers = #tpu.dot_dimension_numbers<[1], [0], [0], [1], [0, 0, 1, 1], [], []>} : vector<8x32xf32>, vector<32x32xf32>, vector<8x32xf32> -> vector<8x32xf32>
    %492 = arith.addf %491, %9 : vector<8x32xf32>
    %cst_231 = arith.constant 0.000000e+00 : f32
    %493 = vector.broadcast %cst_231 : f32 to vector<8x32xf32>
    %494 = arith.maximumf %492, %493 : vector<8x32xf32>
    %cst_232 = arith.constant dense<0.000000e+00> : vector<8x32xf32>
    %495 = tpu.matmul %490, %2, %cst_232 {dimension_numbers = #tpu.dot_dimension_numbers<[1], [0], [0], [1], [0, 0, 1, 1], [], []>} : vector<8x32xf32>, vector<32x32xf32>, vector<8x32xf32> -> vector<8x32xf32>
    %496 = arith.addf %495, %12 : vector<8x32xf32>
    %cst_233 = arith.constant 0.000000e+00 : f32
    %497 = vector.broadcast %cst_233 : f32 to vector<8x32xf32>
    %498 = arith.maximumf %496, %497 : vector<8x32xf32>
    %cst_234 = arith.constant dense<0.000000e+00> : vector<8x32xf32>
    %499 = tpu.matmul %494, %2, %cst_234 {dimension_numbers = #tpu.dot_dimension_numbers<[1], [0], [0], [1], [0, 0, 1, 1], [], []>} : vector<8x32xf32>, vector<32x32xf32>, vector<8x32xf32> -> vector<8x32xf32>
    %500 = arith.addf %499, %12 : vector<8x32xf32>
    %cst_235 = arith.constant 0.000000e+00 : f32
    %501 = vector.broadcast %cst_235 : f32 to vector<8x32xf32>
    %502 = arith.maximumf %500, %501 : vector<8x32xf32>
    %cst_236 = arith.constant dense<0.000000e+00> : vector<8x16xf32>
    %503 = tpu.matmul %498, %3, %cst_236 {dimension_numbers = #tpu.dot_dimension_numbers<[1], [0], [0], [1], [0, 0, 1, 1], [], []>} : vector<8x32xf32>, vector<32x16xf32>, vector<8x16xf32> -> vector<8x16xf32>
    %504 = arith.addf %503, %15 : vector<8x16xf32>
    %cst_237 = arith.constant dense<0.000000e+00> : vector<8x16xf32>
    %505 = tpu.matmul %502, %3, %cst_237 {dimension_numbers = #tpu.dot_dimension_numbers<[1], [0], [0], [1], [0, 0, 1, 1], [], []>} : vector<8x32xf32>, vector<32x16xf32>, vector<8x16xf32> -> vector<8x16xf32>
    %506 = arith.addf %505, %15 : vector<8x16xf32>
    %507 = arith.mulf %504, %22 : vector<8x16xf32>
    %508 = arith.addf %476, %507 : vector<8x16xf32>
    %509 = arith.mulf %506, %23 : vector<8x16xf32>
    %510 = arith.addf %478, %509 : vector<8x16xf32>
    %c5_i32_238 = arith.constant 5 : i32
    %cst_239 = arith.constant dense<0.000000e+00> : vector<8x32xf32>
    %511 = tpu.matmul %508, %0, %cst_239 {dimension_numbers = #tpu.dot_dimension_numbers<[1], [0], [0], [1], [0, 0, 1, 1], [], []>} : vector<8x16xf32>, vector<16x32xf32>, vector<8x32xf32> -> vector<8x32xf32>
    %512 = arith.addf %511, %6 : vector<8x32xf32>
    %cst_240 = arith.constant 0.000000e+00 : f32
    %513 = vector.broadcast %cst_240 : f32 to vector<8x32xf32>
    %514 = arith.maximumf %512, %513 : vector<8x32xf32>
    %cst_241 = arith.constant dense<0.000000e+00> : vector<8x32xf32>
    %515 = tpu.matmul %510, %0, %cst_241 {dimension_numbers = #tpu.dot_dimension_numbers<[1], [0], [0], [1], [0, 0, 1, 1], [], []>} : vector<8x16xf32>, vector<16x32xf32>, vector<8x32xf32> -> vector<8x32xf32>
    %516 = arith.addf %515, %6 : vector<8x32xf32>
    %cst_242 = arith.constant 0.000000e+00 : f32
    %517 = vector.broadcast %cst_242 : f32 to vector<8x32xf32>
    %518 = arith.maximumf %516, %517 : vector<8x32xf32>
    %cst_243 = arith.constant dense<0.000000e+00> : vector<8x32xf32>
    %519 = tpu.matmul %514, %1, %cst_243 {dimension_numbers = #tpu.dot_dimension_numbers<[1], [0], [0], [1], [0, 0, 1, 1], [], []>} : vector<8x32xf32>, vector<32x32xf32>, vector<8x32xf32> -> vector<8x32xf32>
    %520 = arith.addf %519, %9 : vector<8x32xf32>
    %cst_244 = arith.constant 0.000000e+00 : f32
    %521 = vector.broadcast %cst_244 : f32 to vector<8x32xf32>
    %522 = arith.maximumf %520, %521 : vector<8x32xf32>
    %cst_245 = arith.constant dense<0.000000e+00> : vector<8x32xf32>
    %523 = tpu.matmul %518, %1, %cst_245 {dimension_numbers = #tpu.dot_dimension_numbers<[1], [0], [0], [1], [0, 0, 1, 1], [], []>} : vector<8x32xf32>, vector<32x32xf32>, vector<8x32xf32> -> vector<8x32xf32>
    %524 = arith.addf %523, %9 : vector<8x32xf32>
    %cst_246 = arith.constant 0.000000e+00 : f32
    %525 = vector.broadcast %cst_246 : f32 to vector<8x32xf32>
    %526 = arith.maximumf %524, %525 : vector<8x32xf32>
    %cst_247 = arith.constant dense<0.000000e+00> : vector<8x32xf32>
    %527 = tpu.matmul %522, %2, %cst_247 {dimension_numbers = #tpu.dot_dimension_numbers<[1], [0], [0], [1], [0, 0, 1, 1], [], []>} : vector<8x32xf32>, vector<32x32xf32>, vector<8x32xf32> -> vector<8x32xf32>
    %528 = arith.addf %527, %12 : vector<8x32xf32>
    %cst_248 = arith.constant 0.000000e+00 : f32
    %529 = vector.broadcast %cst_248 : f32 to vector<8x32xf32>
    %530 = arith.maximumf %528, %529 : vector<8x32xf32>
    %cst_249 = arith.constant dense<0.000000e+00> : vector<8x32xf32>
    %531 = tpu.matmul %526, %2, %cst_249 {dimension_numbers = #tpu.dot_dimension_numbers<[1], [0], [0], [1], [0, 0, 1, 1], [], []>} : vector<8x32xf32>, vector<32x32xf32>, vector<8x32xf32> -> vector<8x32xf32>
    %532 = arith.addf %531, %12 : vector<8x32xf32>
    %cst_250 = arith.constant 0.000000e+00 : f32
    %533 = vector.broadcast %cst_250 : f32 to vector<8x32xf32>
    %534 = arith.maximumf %532, %533 : vector<8x32xf32>
    %cst_251 = arith.constant dense<0.000000e+00> : vector<8x16xf32>
    %535 = tpu.matmul %530, %3, %cst_251 {dimension_numbers = #tpu.dot_dimension_numbers<[1], [0], [0], [1], [0, 0, 1, 1], [], []>} : vector<8x32xf32>, vector<32x16xf32>, vector<8x16xf32> -> vector<8x16xf32>
    %536 = arith.addf %535, %15 : vector<8x16xf32>
    %cst_252 = arith.constant dense<0.000000e+00> : vector<8x16xf32>
    %537 = tpu.matmul %534, %3, %cst_252 {dimension_numbers = #tpu.dot_dimension_numbers<[1], [0], [0], [1], [0, 0, 1, 1], [], []>} : vector<8x32xf32>, vector<32x16xf32>, vector<8x16xf32> -> vector<8x16xf32>
    %538 = arith.addf %537, %15 : vector<8x16xf32>
    %539 = arith.mulf %536, %22 : vector<8x16xf32>
    %540 = arith.addf %508, %539 : vector<8x16xf32>
    %541 = arith.mulf %538, %23 : vector<8x16xf32>
    %542 = arith.addf %510, %541 : vector<8x16xf32>
    %c6_i32_253 = arith.constant 6 : i32
    %cst_254 = arith.constant dense<0.000000e+00> : vector<8x32xf32>
    %543 = tpu.matmul %540, %0, %cst_254 {dimension_numbers = #tpu.dot_dimension_numbers<[1], [0], [0], [1], [0, 0, 1, 1], [], []>} : vector<8x16xf32>, vector<16x32xf32>, vector<8x32xf32> -> vector<8x32xf32>
    %544 = arith.addf %543, %6 : vector<8x32xf32>
    %cst_255 = arith.constant 0.000000e+00 : f32
    %545 = vector.broadcast %cst_255 : f32 to vector<8x32xf32>
    %546 = arith.maximumf %544, %545 : vector<8x32xf32>
    %cst_256 = arith.constant dense<0.000000e+00> : vector<8x32xf32>
    %547 = tpu.matmul %542, %0, %cst_256 {dimension_numbers = #tpu.dot_dimension_numbers<[1], [0], [0], [1], [0, 0, 1, 1], [], []>} : vector<8x16xf32>, vector<16x32xf32>, vector<8x32xf32> -> vector<8x32xf32>
    %548 = arith.addf %547, %6 : vector<8x32xf32>
    %cst_257 = arith.constant 0.000000e+00 : f32
    %549 = vector.broadcast %cst_257 : f32 to vector<8x32xf32>
    %550 = arith.maximumf %548, %549 : vector<8x32xf32>
    %cst_258 = arith.constant dense<0.000000e+00> : vector<8x32xf32>
    %551 = tpu.matmul %546, %1, %cst_258 {dimension_numbers = #tpu.dot_dimension_numbers<[1], [0], [0], [1], [0, 0, 1, 1], [], []>} : vector<8x32xf32>, vector<32x32xf32>, vector<8x32xf32> -> vector<8x32xf32>
    %552 = arith.addf %551, %9 : vector<8x32xf32>
    %cst_259 = arith.constant 0.000000e+00 : f32
    %553 = vector.broadcast %cst_259 : f32 to vector<8x32xf32>
    %554 = arith.maximumf %552, %553 : vector<8x32xf32>
    %cst_260 = arith.constant dense<0.000000e+00> : vector<8x32xf32>
    %555 = tpu.matmul %550, %1, %cst_260 {dimension_numbers = #tpu.dot_dimension_numbers<[1], [0], [0], [1], [0, 0, 1, 1], [], []>} : vector<8x32xf32>, vector<32x32xf32>, vector<8x32xf32> -> vector<8x32xf32>
    %556 = arith.addf %555, %9 : vector<8x32xf32>
    %cst_261 = arith.constant 0.000000e+00 : f32
    %557 = vector.broadcast %cst_261 : f32 to vector<8x32xf32>
    %558 = arith.maximumf %556, %557 : vector<8x32xf32>
    %cst_262 = arith.constant dense<0.000000e+00> : vector<8x32xf32>
    %559 = tpu.matmul %554, %2, %cst_262 {dimension_numbers = #tpu.dot_dimension_numbers<[1], [0], [0], [1], [0, 0, 1, 1], [], []>} : vector<8x32xf32>, vector<32x32xf32>, vector<8x32xf32> -> vector<8x32xf32>
    %560 = arith.addf %559, %12 : vector<8x32xf32>
    %cst_263 = arith.constant 0.000000e+00 : f32
    %561 = vector.broadcast %cst_263 : f32 to vector<8x32xf32>
    %562 = arith.maximumf %560, %561 : vector<8x32xf32>
    %cst_264 = arith.constant dense<0.000000e+00> : vector<8x32xf32>
    %563 = tpu.matmul %558, %2, %cst_264 {dimension_numbers = #tpu.dot_dimension_numbers<[1], [0], [0], [1], [0, 0, 1, 1], [], []>} : vector<8x32xf32>, vector<32x32xf32>, vector<8x32xf32> -> vector<8x32xf32>
    %564 = arith.addf %563, %12 : vector<8x32xf32>
    %cst_265 = arith.constant 0.000000e+00 : f32
    %565 = vector.broadcast %cst_265 : f32 to vector<8x32xf32>
    %566 = arith.maximumf %564, %565 : vector<8x32xf32>
    %cst_266 = arith.constant dense<0.000000e+00> : vector<8x16xf32>
    %567 = tpu.matmul %562, %3, %cst_266 {dimension_numbers = #tpu.dot_dimension_numbers<[1], [0], [0], [1], [0, 0, 1, 1], [], []>} : vector<8x32xf32>, vector<32x16xf32>, vector<8x16xf32> -> vector<8x16xf32>
    %568 = arith.addf %567, %15 : vector<8x16xf32>
    %cst_267 = arith.constant dense<0.000000e+00> : vector<8x16xf32>
    %569 = tpu.matmul %566, %3, %cst_267 {dimension_numbers = #tpu.dot_dimension_numbers<[1], [0], [0], [1], [0, 0, 1, 1], [], []>} : vector<8x32xf32>, vector<32x16xf32>, vector<8x16xf32> -> vector<8x16xf32>
    %570 = arith.addf %569, %15 : vector<8x16xf32>
    %571 = arith.mulf %568, %22 : vector<8x16xf32>
    %572 = arith.addf %540, %571 : vector<8x16xf32>
    %573 = arith.mulf %570, %23 : vector<8x16xf32>
    %574 = arith.addf %542, %573 : vector<8x16xf32>
    %c7_i32_268 = arith.constant 7 : i32
    %cst_269 = arith.constant dense<0.000000e+00> : vector<8x32xf32>
    %575 = tpu.matmul %572, %0, %cst_269 {dimension_numbers = #tpu.dot_dimension_numbers<[1], [0], [0], [1], [0, 0, 1, 1], [], []>} : vector<8x16xf32>, vector<16x32xf32>, vector<8x32xf32> -> vector<8x32xf32>
    %576 = arith.addf %575, %6 : vector<8x32xf32>
    %cst_270 = arith.constant 0.000000e+00 : f32
    %577 = vector.broadcast %cst_270 : f32 to vector<8x32xf32>
    %578 = arith.maximumf %576, %577 : vector<8x32xf32>
    %cst_271 = arith.constant dense<0.000000e+00> : vector<8x32xf32>
    %579 = tpu.matmul %574, %0, %cst_271 {dimension_numbers = #tpu.dot_dimension_numbers<[1], [0], [0], [1], [0, 0, 1, 1], [], []>} : vector<8x16xf32>, vector<16x32xf32>, vector<8x32xf32> -> vector<8x32xf32>
    %580 = arith.addf %579, %6 : vector<8x32xf32>
    %cst_272 = arith.constant 0.000000e+00 : f32
    %581 = vector.broadcast %cst_272 : f32 to vector<8x32xf32>
    %582 = arith.maximumf %580, %581 : vector<8x32xf32>
    %cst_273 = arith.constant dense<0.000000e+00> : vector<8x32xf32>
    %583 = tpu.matmul %578, %1, %cst_273 {dimension_numbers = #tpu.dot_dimension_numbers<[1], [0], [0], [1], [0, 0, 1, 1], [], []>} : vector<8x32xf32>, vector<32x32xf32>, vector<8x32xf32> -> vector<8x32xf32>
    %584 = arith.addf %583, %9 : vector<8x32xf32>
    %cst_274 = arith.constant 0.000000e+00 : f32
    %585 = vector.broadcast %cst_274 : f32 to vector<8x32xf32>
    %586 = arith.maximumf %584, %585 : vector<8x32xf32>
    %cst_275 = arith.constant dense<0.000000e+00> : vector<8x32xf32>
    %587 = tpu.matmul %582, %1, %cst_275 {dimension_numbers = #tpu.dot_dimension_numbers<[1], [0], [0], [1], [0, 0, 1, 1], [], []>} : vector<8x32xf32>, vector<32x32xf32>, vector<8x32xf32> -> vector<8x32xf32>
    %588 = arith.addf %587, %9 : vector<8x32xf32>
    %cst_276 = arith.constant 0.000000e+00 : f32
    %589 = vector.broadcast %cst_276 : f32 to vector<8x32xf32>
    %590 = arith.maximumf %588, %589 : vector<8x32xf32>
    %cst_277 = arith.constant dense<0.000000e+00> : vector<8x32xf32>
    %591 = tpu.matmul %586, %2, %cst_277 {dimension_numbers = #tpu.dot_dimension_numbers<[1], [0], [0], [1], [0, 0, 1, 1], [], []>} : vector<8x32xf32>, vector<32x32xf32>, vector<8x32xf32> -> vector<8x32xf32>
    %592 = arith.addf %591, %12 : vector<8x32xf32>
    %cst_278 = arith.constant 0.000000e+00 : f32
    %593 = vector.broadcast %cst_278 : f32 to vector<8x32xf32>
    %594 = arith.maximumf %592, %593 : vector<8x32xf32>
    %cst_279 = arith.constant dense<0.000000e+00> : vector<8x32xf32>
    %595 = tpu.matmul %590, %2, %cst_279 {dimension_numbers = #tpu.dot_dimension_numbers<[1], [0], [0], [1], [0, 0, 1, 1], [], []>} : vector<8x32xf32>, vector<32x32xf32>, vector<8x32xf32> -> vector<8x32xf32>
    %596 = arith.addf %595, %12 : vector<8x32xf32>
    %cst_280 = arith.constant 0.000000e+00 : f32
    %597 = vector.broadcast %cst_280 : f32 to vector<8x32xf32>
    %598 = arith.maximumf %596, %597 : vector<8x32xf32>
    %cst_281 = arith.constant dense<0.000000e+00> : vector<8x16xf32>
    %599 = tpu.matmul %594, %3, %cst_281 {dimension_numbers = #tpu.dot_dimension_numbers<[1], [0], [0], [1], [0, 0, 1, 1], [], []>} : vector<8x32xf32>, vector<32x16xf32>, vector<8x16xf32> -> vector<8x16xf32>
    %600 = arith.addf %599, %15 : vector<8x16xf32>
    %cst_282 = arith.constant dense<0.000000e+00> : vector<8x16xf32>
    %601 = tpu.matmul %598, %3, %cst_282 {dimension_numbers = #tpu.dot_dimension_numbers<[1], [0], [0], [1], [0, 0, 1, 1], [], []>} : vector<8x32xf32>, vector<32x16xf32>, vector<8x16xf32> -> vector<8x16xf32>
    %602 = arith.addf %601, %15 : vector<8x16xf32>
    %603 = arith.mulf %600, %22 : vector<8x16xf32>
    %604 = arith.addf %572, %603 : vector<8x16xf32>
    %605 = arith.mulf %602, %23 : vector<8x16xf32>
    %606 = arith.addf %574, %605 : vector<8x16xf32>
    %c8_i32_283 = arith.constant 8 : i32
    %cst_284 = arith.constant dense<0.000000e+00> : vector<8x32xf32>
    %607 = tpu.matmul %604, %0, %cst_284 {dimension_numbers = #tpu.dot_dimension_numbers<[1], [0], [0], [1], [0, 0, 1, 1], [], []>} : vector<8x16xf32>, vector<16x32xf32>, vector<8x32xf32> -> vector<8x32xf32>
    %608 = arith.addf %607, %6 : vector<8x32xf32>
    %cst_285 = arith.constant 0.000000e+00 : f32
    %609 = vector.broadcast %cst_285 : f32 to vector<8x32xf32>
    %610 = arith.maximumf %608, %609 : vector<8x32xf32>
    %cst_286 = arith.constant dense<0.000000e+00> : vector<8x32xf32>
    %611 = tpu.matmul %606, %0, %cst_286 {dimension_numbers = #tpu.dot_dimension_numbers<[1], [0], [0], [1], [0, 0, 1, 1], [], []>} : vector<8x16xf32>, vector<16x32xf32>, vector<8x32xf32> -> vector<8x32xf32>
    %612 = arith.addf %611, %6 : vector<8x32xf32>
    %cst_287 = arith.constant 0.000000e+00 : f32
    %613 = vector.broadcast %cst_287 : f32 to vector<8x32xf32>
    %614 = arith.maximumf %612, %613 : vector<8x32xf32>
    %cst_288 = arith.constant dense<0.000000e+00> : vector<8x32xf32>
    %615 = tpu.matmul %610, %1, %cst_288 {dimension_numbers = #tpu.dot_dimension_numbers<[1], [0], [0], [1], [0, 0, 1, 1], [], []>} : vector<8x32xf32>, vector<32x32xf32>, vector<8x32xf32> -> vector<8x32xf32>
    %616 = arith.addf %615, %9 : vector<8x32xf32>
    %cst_289 = arith.constant 0.000000e+00 : f32
    %617 = vector.broadcast %cst_289 : f32 to vector<8x32xf32>
    %618 = arith.maximumf %616, %617 : vector<8x32xf32>
    %cst_290 = arith.constant dense<0.000000e+00> : vector<8x32xf32>
    %619 = tpu.matmul %614, %1, %cst_290 {dimension_numbers = #tpu.dot_dimension_numbers<[1], [0], [0], [1], [0, 0, 1, 1], [], []>} : vector<8x32xf32>, vector<32x32xf32>, vector<8x32xf32> -> vector<8x32xf32>
    %620 = arith.addf %619, %9 : vector<8x32xf32>
    %cst_291 = arith.constant 0.000000e+00 : f32
    %621 = vector.broadcast %cst_291 : f32 to vector<8x32xf32>
    %622 = arith.maximumf %620, %621 : vector<8x32xf32>
    %cst_292 = arith.constant dense<0.000000e+00> : vector<8x32xf32>
    %623 = tpu.matmul %618, %2, %cst_292 {dimension_numbers = #tpu.dot_dimension_numbers<[1], [0], [0], [1], [0, 0, 1, 1], [], []>} : vector<8x32xf32>, vector<32x32xf32>, vector<8x32xf32> -> vector<8x32xf32>
    %624 = arith.addf %623, %12 : vector<8x32xf32>
    %cst_293 = arith.constant 0.000000e+00 : f32
    %625 = vector.broadcast %cst_293 : f32 to vector<8x32xf32>
    %626 = arith.maximumf %624, %625 : vector<8x32xf32>
    %cst_294 = arith.constant dense<0.000000e+00> : vector<8x32xf32>
    %627 = tpu.matmul %622, %2, %cst_294 {dimension_numbers = #tpu.dot_dimension_numbers<[1], [0], [0], [1], [0, 0, 1, 1], [], []>} : vector<8x32xf32>, vector<32x32xf32>, vector<8x32xf32> -> vector<8x32xf32>
    %628 = arith.addf %627, %12 : vector<8x32xf32>
    %cst_295 = arith.constant 0.000000e+00 : f32
    %629 = vector.broadcast %cst_295 : f32 to vector<8x32xf32>
    %630 = arith.maximumf %628, %629 : vector<8x32xf32>
    %cst_296 = arith.constant dense<0.000000e+00> : vector<8x16xf32>
    %631 = tpu.matmul %626, %3, %cst_296 {dimension_numbers = #tpu.dot_dimension_numbers<[1], [0], [0], [1], [0, 0, 1, 1], [], []>} : vector<8x32xf32>, vector<32x16xf32>, vector<8x16xf32> -> vector<8x16xf32>
    %632 = arith.addf %631, %15 : vector<8x16xf32>
    %cst_297 = arith.constant dense<0.000000e+00> : vector<8x16xf32>
    %633 = tpu.matmul %630, %3, %cst_297 {dimension_numbers = #tpu.dot_dimension_numbers<[1], [0], [0], [1], [0, 0, 1, 1], [], []>} : vector<8x32xf32>, vector<32x16xf32>, vector<8x16xf32> -> vector<8x16xf32>
    %634 = arith.addf %633, %15 : vector<8x16xf32>
    %635 = arith.mulf %632, %22 : vector<8x16xf32>
    %636 = arith.addf %604, %635 : vector<8x16xf32>
    %637 = arith.mulf %634, %23 : vector<8x16xf32>
    %638 = arith.addf %606, %637 : vector<8x16xf32>
    %c9_i32_298 = arith.constant 9 : i32
    %cst_299 = arith.constant dense<0.000000e+00> : vector<8x32xf32>
    %639 = tpu.matmul %636, %0, %cst_299 {dimension_numbers = #tpu.dot_dimension_numbers<[1], [0], [0], [1], [0, 0, 1, 1], [], []>} : vector<8x16xf32>, vector<16x32xf32>, vector<8x32xf32> -> vector<8x32xf32>
    %640 = arith.addf %639, %6 : vector<8x32xf32>
    %cst_300 = arith.constant 0.000000e+00 : f32
    %641 = vector.broadcast %cst_300 : f32 to vector<8x32xf32>
    %642 = arith.maximumf %640, %641 : vector<8x32xf32>
    %cst_301 = arith.constant dense<0.000000e+00> : vector<8x32xf32>
    %643 = tpu.matmul %638, %0, %cst_301 {dimension_numbers = #tpu.dot_dimension_numbers<[1], [0], [0], [1], [0, 0, 1, 1], [], []>} : vector<8x16xf32>, vector<16x32xf32>, vector<8x32xf32> -> vector<8x32xf32>
    %644 = arith.addf %643, %6 : vector<8x32xf32>
    %cst_302 = arith.constant 0.000000e+00 : f32
    %645 = vector.broadcast %cst_302 : f32 to vector<8x32xf32>
    %646 = arith.maximumf %644, %645 : vector<8x32xf32>
    %cst_303 = arith.constant dense<0.000000e+00> : vector<8x32xf32>
    %647 = tpu.matmul %642, %1, %cst_303 {dimension_numbers = #tpu.dot_dimension_numbers<[1], [0], [0], [1], [0, 0, 1, 1], [], []>} : vector<8x32xf32>, vector<32x32xf32>, vector<8x32xf32> -> vector<8x32xf32>
    %648 = arith.addf %647, %9 : vector<8x32xf32>
    %cst_304 = arith.constant 0.000000e+00 : f32
    %649 = vector.broadcast %cst_304 : f32 to vector<8x32xf32>
    %650 = arith.maximumf %648, %649 : vector<8x32xf32>
    %cst_305 = arith.constant dense<0.000000e+00> : vector<8x32xf32>
    %651 = tpu.matmul %646, %1, %cst_305 {dimension_numbers = #tpu.dot_dimension_numbers<[1], [0], [0], [1], [0, 0, 1, 1], [], []>} : vector<8x32xf32>, vector<32x32xf32>, vector<8x32xf32> -> vector<8x32xf32>
    %652 = arith.addf %651, %9 : vector<8x32xf32>
    %cst_306 = arith.constant 0.000000e+00 : f32
    %653 = vector.broadcast %cst_306 : f32 to vector<8x32xf32>
    %654 = arith.maximumf %652, %653 : vector<8x32xf32>
    %cst_307 = arith.constant dense<0.000000e+00> : vector<8x32xf32>
    %655 = tpu.matmul %650, %2, %cst_307 {dimension_numbers = #tpu.dot_dimension_numbers<[1], [0], [0], [1], [0, 0, 1, 1], [], []>} : vector<8x32xf32>, vector<32x32xf32>, vector<8x32xf32> -> vector<8x32xf32>
    %656 = arith.addf %655, %12 : vector<8x32xf32>
    %cst_308 = arith.constant 0.000000e+00 : f32
    %657 = vector.broadcast %cst_308 : f32 to vector<8x32xf32>
    %658 = arith.maximumf %656, %657 : vector<8x32xf32>
    %cst_309 = arith.constant dense<0.000000e+00> : vector<8x32xf32>
    %659 = tpu.matmul %654, %2, %cst_309 {dimension_numbers = #tpu.dot_dimension_numbers<[1], [0], [0], [1], [0, 0, 1, 1], [], []>} : vector<8x32xf32>, vector<32x32xf32>, vector<8x32xf32> -> vector<8x32xf32>
    %660 = arith.addf %659, %12 : vector<8x32xf32>
    %cst_310 = arith.constant 0.000000e+00 : f32
    %661 = vector.broadcast %cst_310 : f32 to vector<8x32xf32>
    %662 = arith.maximumf %660, %661 : vector<8x32xf32>
    %cst_311 = arith.constant dense<0.000000e+00> : vector<8x16xf32>
    %663 = tpu.matmul %658, %3, %cst_311 {dimension_numbers = #tpu.dot_dimension_numbers<[1], [0], [0], [1], [0, 0, 1, 1], [], []>} : vector<8x32xf32>, vector<32x16xf32>, vector<8x16xf32> -> vector<8x16xf32>
    %664 = arith.addf %663, %15 : vector<8x16xf32>
    %cst_312 = arith.constant dense<0.000000e+00> : vector<8x16xf32>
    %665 = tpu.matmul %662, %3, %cst_312 {dimension_numbers = #tpu.dot_dimension_numbers<[1], [0], [0], [1], [0, 0, 1, 1], [], []>} : vector<8x32xf32>, vector<32x16xf32>, vector<8x16xf32> -> vector<8x16xf32>
    %666 = arith.addf %665, %15 : vector<8x16xf32>
    %667 = arith.mulf %664, %22 : vector<8x16xf32>
    %668 = arith.addf %636, %667 : vector<8x16xf32>
    %669 = arith.mulf %666, %23 : vector<8x16xf32>
    %670 = arith.addf %638, %669 : vector<8x16xf32>
    %671 = tpu.concatenate %668, %670 in 0 : vector<8x16xf32>, vector<8x16xf32> -> vector<16x16xf32>
    %c2 = arith.constant 2 : index
    %c0_313 = arith.constant 0 : index
    %c0_314 = arith.constant 0 : index
    %672 = vector.load %arg11[%c2, %c0_313, %c0_314] : memref<5x16x16xf32, #tpu.memory_space<vmem>>, vector<1x16x16xf32>
    %673 = vector.shape_cast %672 : vector<1x16x16xf32> to vector<16x16xf32>
    %674 = vector.shape_cast %671 : vector<16x16xf32> to vector<1x16x16xf32>
    tpu.vector_store %arg11[%c2, %c0_313, %c0_314], %674 {strides = array<i32>} : memref<5x16x16xf32, #tpu.memory_space<vmem>>, vector<1x16x16xf32>,
    %c0_i32_315 = arith.constant 0 : i32
    %cst_316 = arith.constant dense<0.000000e+00> : vector<8x32xf32>
    %675 = tpu.matmul %668, %0, %cst_316 {dimension_numbers = #tpu.dot_dimension_numbers<[1], [0], [0], [1], [0, 0, 1, 1], [], []>} : vector<8x16xf32>, vector<16x32xf32>, vector<8x32xf32> -> vector<8x32xf32>
    %676 = arith.addf %675, %6 : vector<8x32xf32>
    %cst_317 = arith.constant 0.000000e+00 : f32
    %677 = vector.broadcast %cst_317 : f32 to vector<8x32xf32>
    %678 = arith.maximumf %676, %677 : vector<8x32xf32>
    %cst_318 = arith.constant dense<0.000000e+00> : vector<8x32xf32>
    %679 = tpu.matmul %670, %0, %cst_318 {dimension_numbers = #tpu.dot_dimension_numbers<[1], [0], [0], [1], [0, 0, 1, 1], [], []>} : vector<8x16xf32>, vector<16x32xf32>, vector<8x32xf32> -> vector<8x32xf32>
    %680 = arith.addf %679, %6 : vector<8x32xf32>
    %cst_319 = arith.constant 0.000000e+00 : f32
    %681 = vector.broadcast %cst_319 : f32 to vector<8x32xf32>
    %682 = arith.maximumf %680, %681 : vector<8x32xf32>
    %cst_320 = arith.constant dense<0.000000e+00> : vector<8x32xf32>
    %683 = tpu.matmul %678, %1, %cst_320 {dimension_numbers = #tpu.dot_dimension_numbers<[1], [0], [0], [1], [0, 0, 1, 1], [], []>} : vector<8x32xf32>, vector<32x32xf32>, vector<8x32xf32> -> vector<8x32xf32>
    %684 = arith.addf %683, %9 : vector<8x32xf32>
    %cst_321 = arith.constant 0.000000e+00 : f32
    %685 = vector.broadcast %cst_321 : f32 to vector<8x32xf32>
    %686 = arith.maximumf %684, %685 : vector<8x32xf32>
    %cst_322 = arith.constant dense<0.000000e+00> : vector<8x32xf32>
    %687 = tpu.matmul %682, %1, %cst_322 {dimension_numbers = #tpu.dot_dimension_numbers<[1], [0], [0], [1], [0, 0, 1, 1], [], []>} : vector<8x32xf32>, vector<32x32xf32>, vector<8x32xf32> -> vector<8x32xf32>
    %688 = arith.addf %687, %9 : vector<8x32xf32>
    %cst_323 = arith.constant 0.000000e+00 : f32
    %689 = vector.broadcast %cst_323 : f32 to vector<8x32xf32>
    %690 = arith.maximumf %688, %689 : vector<8x32xf32>
    %cst_324 = arith.constant dense<0.000000e+00> : vector<8x32xf32>
    %691 = tpu.matmul %686, %2, %cst_324 {dimension_numbers = #tpu.dot_dimension_numbers<[1], [0], [0], [1], [0, 0, 1, 1], [], []>} : vector<8x32xf32>, vector<32x32xf32>, vector<8x32xf32> -> vector<8x32xf32>
    %692 = arith.addf %691, %12 : vector<8x32xf32>
    %cst_325 = arith.constant 0.000000e+00 : f32
    %693 = vector.broadcast %cst_325 : f32 to vector<8x32xf32>
    %694 = arith.maximumf %692, %693 : vector<8x32xf32>
    %cst_326 = arith.constant dense<0.000000e+00> : vector<8x32xf32>
    %695 = tpu.matmul %690, %2, %cst_326 {dimension_numbers = #tpu.dot_dimension_numbers<[1], [0], [0], [1], [0, 0, 1, 1], [], []>} : vector<8x32xf32>, vector<32x32xf32>, vector<8x32xf32> -> vector<8x32xf32>
    %696 = arith.addf %695, %12 : vector<8x32xf32>
    %cst_327 = arith.constant 0.000000e+00 : f32
    %697 = vector.broadcast %cst_327 : f32 to vector<8x32xf32>
    %698 = arith.maximumf %696, %697 : vector<8x32xf32>
    %cst_328 = arith.constant dense<0.000000e+00> : vector<8x16xf32>
    %699 = tpu.matmul %694, %3, %cst_328 {dimension_numbers = #tpu.dot_dimension_numbers<[1], [0], [0], [1], [0, 0, 1, 1], [], []>} : vector<8x32xf32>, vector<32x16xf32>, vector<8x16xf32> -> vector<8x16xf32>
    %700 = arith.addf %699, %15 : vector<8x16xf32>
    %cst_329 = arith.constant dense<0.000000e+00> : vector<8x16xf32>
    %701 = tpu.matmul %698, %3, %cst_329 {dimension_numbers = #tpu.dot_dimension_numbers<[1], [0], [0], [1], [0, 0, 1, 1], [], []>} : vector<8x32xf32>, vector<32x16xf32>, vector<8x16xf32> -> vector<8x16xf32>
    %702 = arith.addf %701, %15 : vector<8x16xf32>
    %703 = arith.mulf %700, %22 : vector<8x16xf32>
    %704 = arith.addf %668, %703 : vector<8x16xf32>
    %705 = arith.mulf %702, %23 : vector<8x16xf32>
    %706 = arith.addf %670, %705 : vector<8x16xf32>
    %c1_i32_330 = arith.constant 1 : i32
    %cst_331 = arith.constant dense<0.000000e+00> : vector<8x32xf32>
    %707 = tpu.matmul %704, %0, %cst_331 {dimension_numbers = #tpu.dot_dimension_numbers<[1], [0], [0], [1], [0, 0, 1, 1], [], []>} : vector<8x16xf32>, vector<16x32xf32>, vector<8x32xf32> -> vector<8x32xf32>
    %708 = arith.addf %707, %6 : vector<8x32xf32>
    %cst_332 = arith.constant 0.000000e+00 : f32
    %709 = vector.broadcast %cst_332 : f32 to vector<8x32xf32>
    %710 = arith.maximumf %708, %709 : vector<8x32xf32>
    %cst_333 = arith.constant dense<0.000000e+00> : vector<8x32xf32>
    %711 = tpu.matmul %706, %0, %cst_333 {dimension_numbers = #tpu.dot_dimension_numbers<[1], [0], [0], [1], [0, 0, 1, 1], [], []>} : vector<8x16xf32>, vector<16x32xf32>, vector<8x32xf32> -> vector<8x32xf32>
    %712 = arith.addf %711, %6 : vector<8x32xf32>
    %cst_334 = arith.constant 0.000000e+00 : f32
    %713 = vector.broadcast %cst_334 : f32 to vector<8x32xf32>
    %714 = arith.maximumf %712, %713 : vector<8x32xf32>
    %cst_335 = arith.constant dense<0.000000e+00> : vector<8x32xf32>
    %715 = tpu.matmul %710, %1, %cst_335 {dimension_numbers = #tpu.dot_dimension_numbers<[1], [0], [0], [1], [0, 0, 1, 1], [], []>} : vector<8x32xf32>, vector<32x32xf32>, vector<8x32xf32> -> vector<8x32xf32>
    %716 = arith.addf %715, %9 : vector<8x32xf32>
    %cst_336 = arith.constant 0.000000e+00 : f32
    %717 = vector.broadcast %cst_336 : f32 to vector<8x32xf32>
    %718 = arith.maximumf %716, %717 : vector<8x32xf32>
    %cst_337 = arith.constant dense<0.000000e+00> : vector<8x32xf32>
    %719 = tpu.matmul %714, %1, %cst_337 {dimension_numbers = #tpu.dot_dimension_numbers<[1], [0], [0], [1], [0, 0, 1, 1], [], []>} : vector<8x32xf32>, vector<32x32xf32>, vector<8x32xf32> -> vector<8x32xf32>
    %720 = arith.addf %719, %9 : vector<8x32xf32>
    %cst_338 = arith.constant 0.000000e+00 : f32
    %721 = vector.broadcast %cst_338 : f32 to vector<8x32xf32>
    %722 = arith.maximumf %720, %721 : vector<8x32xf32>
    %cst_339 = arith.constant dense<0.000000e+00> : vector<8x32xf32>
    %723 = tpu.matmul %718, %2, %cst_339 {dimension_numbers = #tpu.dot_dimension_numbers<[1], [0], [0], [1], [0, 0, 1, 1], [], []>} : vector<8x32xf32>, vector<32x32xf32>, vector<8x32xf32> -> vector<8x32xf32>
    %724 = arith.addf %723, %12 : vector<8x32xf32>
    %cst_340 = arith.constant 0.000000e+00 : f32
    %725 = vector.broadcast %cst_340 : f32 to vector<8x32xf32>
    %726 = arith.maximumf %724, %725 : vector<8x32xf32>
    %cst_341 = arith.constant dense<0.000000e+00> : vector<8x32xf32>
    %727 = tpu.matmul %722, %2, %cst_341 {dimension_numbers = #tpu.dot_dimension_numbers<[1], [0], [0], [1], [0, 0, 1, 1], [], []>} : vector<8x32xf32>, vector<32x32xf32>, vector<8x32xf32> -> vector<8x32xf32>
    %728 = arith.addf %727, %12 : vector<8x32xf32>
    %cst_342 = arith.constant 0.000000e+00 : f32
    %729 = vector.broadcast %cst_342 : f32 to vector<8x32xf32>
    %730 = arith.maximumf %728, %729 : vector<8x32xf32>
    %cst_343 = arith.constant dense<0.000000e+00> : vector<8x16xf32>
    %731 = tpu.matmul %726, %3, %cst_343 {dimension_numbers = #tpu.dot_dimension_numbers<[1], [0], [0], [1], [0, 0, 1, 1], [], []>} : vector<8x32xf32>, vector<32x16xf32>, vector<8x16xf32> -> vector<8x16xf32>
    %732 = arith.addf %731, %15 : vector<8x16xf32>
    %cst_344 = arith.constant dense<0.000000e+00> : vector<8x16xf32>
    %733 = tpu.matmul %730, %3, %cst_344 {dimension_numbers = #tpu.dot_dimension_numbers<[1], [0], [0], [1], [0, 0, 1, 1], [], []>} : vector<8x32xf32>, vector<32x16xf32>, vector<8x16xf32> -> vector<8x16xf32>
    %734 = arith.addf %733, %15 : vector<8x16xf32>
    %735 = arith.mulf %732, %22 : vector<8x16xf32>
    %736 = arith.addf %704, %735 : vector<8x16xf32>
    %737 = arith.mulf %734, %23 : vector<8x16xf32>
    %738 = arith.addf %706, %737 : vector<8x16xf32>
    %c2_i32_345 = arith.constant 2 : i32
    %cst_346 = arith.constant dense<0.000000e+00> : vector<8x32xf32>
    %739 = tpu.matmul %736, %0, %cst_346 {dimension_numbers = #tpu.dot_dimension_numbers<[1], [0], [0], [1], [0, 0, 1, 1], [], []>} : vector<8x16xf32>, vector<16x32xf32>, vector<8x32xf32> -> vector<8x32xf32>
    %740 = arith.addf %739, %6 : vector<8x32xf32>
    %cst_347 = arith.constant 0.000000e+00 : f32
    %741 = vector.broadcast %cst_347 : f32 to vector<8x32xf32>
    %742 = arith.maximumf %740, %741 : vector<8x32xf32>
    %cst_348 = arith.constant dense<0.000000e+00> : vector<8x32xf32>
    %743 = tpu.matmul %738, %0, %cst_348 {dimension_numbers = #tpu.dot_dimension_numbers<[1], [0], [0], [1], [0, 0, 1, 1], [], []>} : vector<8x16xf32>, vector<16x32xf32>, vector<8x32xf32> -> vector<8x32xf32>
    %744 = arith.addf %743, %6 : vector<8x32xf32>
    %cst_349 = arith.constant 0.000000e+00 : f32
    %745 = vector.broadcast %cst_349 : f32 to vector<8x32xf32>
    %746 = arith.maximumf %744, %745 : vector<8x32xf32>
    %cst_350 = arith.constant dense<0.000000e+00> : vector<8x32xf32>
    %747 = tpu.matmul %742, %1, %cst_350 {dimension_numbers = #tpu.dot_dimension_numbers<[1], [0], [0], [1], [0, 0, 1, 1], [], []>} : vector<8x32xf32>, vector<32x32xf32>, vector<8x32xf32> -> vector<8x32xf32>
    %748 = arith.addf %747, %9 : vector<8x32xf32>
    %cst_351 = arith.constant 0.000000e+00 : f32
    %749 = vector.broadcast %cst_351 : f32 to vector<8x32xf32>
    %750 = arith.maximumf %748, %749 : vector<8x32xf32>
    %cst_352 = arith.constant dense<0.000000e+00> : vector<8x32xf32>
    %751 = tpu.matmul %746, %1, %cst_352 {dimension_numbers = #tpu.dot_dimension_numbers<[1], [0], [0], [1], [0, 0, 1, 1], [], []>} : vector<8x32xf32>, vector<32x32xf32>, vector<8x32xf32> -> vector<8x32xf32>
    %752 = arith.addf %751, %9 : vector<8x32xf32>
    %cst_353 = arith.constant 0.000000e+00 : f32
    %753 = vector.broadcast %cst_353 : f32 to vector<8x32xf32>
    %754 = arith.maximumf %752, %753 : vector<8x32xf32>
    %cst_354 = arith.constant dense<0.000000e+00> : vector<8x32xf32>
    %755 = tpu.matmul %750, %2, %cst_354 {dimension_numbers = #tpu.dot_dimension_numbers<[1], [0], [0], [1], [0, 0, 1, 1], [], []>} : vector<8x32xf32>, vector<32x32xf32>, vector<8x32xf32> -> vector<8x32xf32>
    %756 = arith.addf %755, %12 : vector<8x32xf32>
    %cst_355 = arith.constant 0.000000e+00 : f32
    %757 = vector.broadcast %cst_355 : f32 to vector<8x32xf32>
    %758 = arith.maximumf %756, %757 : vector<8x32xf32>
    %cst_356 = arith.constant dense<0.000000e+00> : vector<8x32xf32>
    %759 = tpu.matmul %754, %2, %cst_356 {dimension_numbers = #tpu.dot_dimension_numbers<[1], [0], [0], [1], [0, 0, 1, 1], [], []>} : vector<8x32xf32>, vector<32x32xf32>, vector<8x32xf32> -> vector<8x32xf32>
    %760 = arith.addf %759, %12 : vector<8x32xf32>
    %cst_357 = arith.constant 0.000000e+00 : f32
    %761 = vector.broadcast %cst_357 : f32 to vector<8x32xf32>
    %762 = arith.maximumf %760, %761 : vector<8x32xf32>
    %cst_358 = arith.constant dense<0.000000e+00> : vector<8x16xf32>
    %763 = tpu.matmul %758, %3, %cst_358 {dimension_numbers = #tpu.dot_dimension_numbers<[1], [0], [0], [1], [0, 0, 1, 1], [], []>} : vector<8x32xf32>, vector<32x16xf32>, vector<8x16xf32> -> vector<8x16xf32>
    %764 = arith.addf %763, %15 : vector<8x16xf32>
    %cst_359 = arith.constant dense<0.000000e+00> : vector<8x16xf32>
    %765 = tpu.matmul %762, %3, %cst_359 {dimension_numbers = #tpu.dot_dimension_numbers<[1], [0], [0], [1], [0, 0, 1, 1], [], []>} : vector<8x32xf32>, vector<32x16xf32>, vector<8x16xf32> -> vector<8x16xf32>
    %766 = arith.addf %765, %15 : vector<8x16xf32>
    %767 = arith.mulf %764, %22 : vector<8x16xf32>
    %768 = arith.addf %736, %767 : vector<8x16xf32>
    %769 = arith.mulf %766, %23 : vector<8x16xf32>
    %770 = arith.addf %738, %769 : vector<8x16xf32>
    %c3_i32_360 = arith.constant 3 : i32
    %cst_361 = arith.constant dense<0.000000e+00> : vector<8x32xf32>
    %771 = tpu.matmul %768, %0, %cst_361 {dimension_numbers = #tpu.dot_dimension_numbers<[1], [0], [0], [1], [0, 0, 1, 1], [], []>} : vector<8x16xf32>, vector<16x32xf32>, vector<8x32xf32> -> vector<8x32xf32>
    %772 = arith.addf %771, %6 : vector<8x32xf32>
    %cst_362 = arith.constant 0.000000e+00 : f32
    %773 = vector.broadcast %cst_362 : f32 to vector<8x32xf32>
    %774 = arith.maximumf %772, %773 : vector<8x32xf32>
    %cst_363 = arith.constant dense<0.000000e+00> : vector<8x32xf32>
    %775 = tpu.matmul %770, %0, %cst_363 {dimension_numbers = #tpu.dot_dimension_numbers<[1], [0], [0], [1], [0, 0, 1, 1], [], []>} : vector<8x16xf32>, vector<16x32xf32>, vector<8x32xf32> -> vector<8x32xf32>
    %776 = arith.addf %775, %6 : vector<8x32xf32>
    %cst_364 = arith.constant 0.000000e+00 : f32
    %777 = vector.broadcast %cst_364 : f32 to vector<8x32xf32>
    %778 = arith.maximumf %776, %777 : vector<8x32xf32>
    %cst_365 = arith.constant dense<0.000000e+00> : vector<8x32xf32>
    %779 = tpu.matmul %774, %1, %cst_365 {dimension_numbers = #tpu.dot_dimension_numbers<[1], [0], [0], [1], [0, 0, 1, 1], [], []>} : vector<8x32xf32>, vector<32x32xf32>, vector<8x32xf32> -> vector<8x32xf32>
    %780 = arith.addf %779, %9 : vector<8x32xf32>
    %cst_366 = arith.constant 0.000000e+00 : f32
    %781 = vector.broadcast %cst_366 : f32 to vector<8x32xf32>
    %782 = arith.maximumf %780, %781 : vector<8x32xf32>
    %cst_367 = arith.constant dense<0.000000e+00> : vector<8x32xf32>
    %783 = tpu.matmul %778, %1, %cst_367 {dimension_numbers = #tpu.dot_dimension_numbers<[1], [0], [0], [1], [0, 0, 1, 1], [], []>} : vector<8x32xf32>, vector<32x32xf32>, vector<8x32xf32> -> vector<8x32xf32>
    %784 = arith.addf %783, %9 : vector<8x32xf32>
    %cst_368 = arith.constant 0.000000e+00 : f32
    %785 = vector.broadcast %cst_368 : f32 to vector<8x32xf32>
    %786 = arith.maximumf %784, %785 : vector<8x32xf32>
    %cst_369 = arith.constant dense<0.000000e+00> : vector<8x32xf32>
    %787 = tpu.matmul %782, %2, %cst_369 {dimension_numbers = #tpu.dot_dimension_numbers<[1], [0], [0], [1], [0, 0, 1, 1], [], []>} : vector<8x32xf32>, vector<32x32xf32>, vector<8x32xf32> -> vector<8x32xf32>
    %788 = arith.addf %787, %12 : vector<8x32xf32>
    %cst_370 = arith.constant 0.000000e+00 : f32
    %789 = vector.broadcast %cst_370 : f32 to vector<8x32xf32>
    %790 = arith.maximumf %788, %789 : vector<8x32xf32>
    %cst_371 = arith.constant dense<0.000000e+00> : vector<8x32xf32>
    %791 = tpu.matmul %786, %2, %cst_371 {dimension_numbers = #tpu.dot_dimension_numbers<[1], [0], [0], [1], [0, 0, 1, 1], [], []>} : vector<8x32xf32>, vector<32x32xf32>, vector<8x32xf32> -> vector<8x32xf32>
    %792 = arith.addf %791, %12 : vector<8x32xf32>
    %cst_372 = arith.constant 0.000000e+00 : f32
    %793 = vector.broadcast %cst_372 : f32 to vector<8x32xf32>
    %794 = arith.maximumf %792, %793 : vector<8x32xf32>
    %cst_373 = arith.constant dense<0.000000e+00> : vector<8x16xf32>
    %795 = tpu.matmul %790, %3, %cst_373 {dimension_numbers = #tpu.dot_dimension_numbers<[1], [0], [0], [1], [0, 0, 1, 1], [], []>} : vector<8x32xf32>, vector<32x16xf32>, vector<8x16xf32> -> vector<8x16xf32>
    %796 = arith.addf %795, %15 : vector<8x16xf32>
    %cst_374 = arith.constant dense<0.000000e+00> : vector<8x16xf32>
    %797 = tpu.matmul %794, %3, %cst_374 {dimension_numbers = #tpu.dot_dimension_numbers<[1], [0], [0], [1], [0, 0, 1, 1], [], []>} : vector<8x32xf32>, vector<32x16xf32>, vector<8x16xf32> -> vector<8x16xf32>
    %798 = arith.addf %797, %15 : vector<8x16xf32>
    %799 = arith.mulf %796, %22 : vector<8x16xf32>
    %800 = arith.addf %768, %799 : vector<8x16xf32>
    %801 = arith.mulf %798, %23 : vector<8x16xf32>
    %802 = arith.addf %770, %801 : vector<8x16xf32>
    %c4_i32_375 = arith.constant 4 : i32
    %cst_376 = arith.constant dense<0.000000e+00> : vector<8x32xf32>
    %803 = tpu.matmul %800, %0, %cst_376 {dimension_numbers = #tpu.dot_dimension_numbers<[1], [0], [0], [1], [0, 0, 1, 1], [], []>} : vector<8x16xf32>, vector<16x32xf32>, vector<8x32xf32> -> vector<8x32xf32>
    %804 = arith.addf %803, %6 : vector<8x32xf32>
    %cst_377 = arith.constant 0.000000e+00 : f32
    %805 = vector.broadcast %cst_377 : f32 to vector<8x32xf32>
    %806 = arith.maximumf %804, %805 : vector<8x32xf32>
    %cst_378 = arith.constant dense<0.000000e+00> : vector<8x32xf32>
    %807 = tpu.matmul %802, %0, %cst_378 {dimension_numbers = #tpu.dot_dimension_numbers<[1], [0], [0], [1], [0, 0, 1, 1], [], []>} : vector<8x16xf32>, vector<16x32xf32>, vector<8x32xf32> -> vector<8x32xf32>
    %808 = arith.addf %807, %6 : vector<8x32xf32>
    %cst_379 = arith.constant 0.000000e+00 : f32
    %809 = vector.broadcast %cst_379 : f32 to vector<8x32xf32>
    %810 = arith.maximumf %808, %809 : vector<8x32xf32>
    %cst_380 = arith.constant dense<0.000000e+00> : vector<8x32xf32>
    %811 = tpu.matmul %806, %1, %cst_380 {dimension_numbers = #tpu.dot_dimension_numbers<[1], [0], [0], [1], [0, 0, 1, 1], [], []>} : vector<8x32xf32>, vector<32x32xf32>, vector<8x32xf32> -> vector<8x32xf32>
    %812 = arith.addf %811, %9 : vector<8x32xf32>
    %cst_381 = arith.constant 0.000000e+00 : f32
    %813 = vector.broadcast %cst_381 : f32 to vector<8x32xf32>
    %814 = arith.maximumf %812, %813 : vector<8x32xf32>
    %cst_382 = arith.constant dense<0.000000e+00> : vector<8x32xf32>
    %815 = tpu.matmul %810, %1, %cst_382 {dimension_numbers = #tpu.dot_dimension_numbers<[1], [0], [0], [1], [0, 0, 1, 1], [], []>} : vector<8x32xf32>, vector<32x32xf32>, vector<8x32xf32> -> vector<8x32xf32>
    %816 = arith.addf %815, %9 : vector<8x32xf32>
    %cst_383 = arith.constant 0.000000e+00 : f32
    %817 = vector.broadcast %cst_383 : f32 to vector<8x32xf32>
    %818 = arith.maximumf %816, %817 : vector<8x32xf32>
    %cst_384 = arith.constant dense<0.000000e+00> : vector<8x32xf32>
    %819 = tpu.matmul %814, %2, %cst_384 {dimension_numbers = #tpu.dot_dimension_numbers<[1], [0], [0], [1], [0, 0, 1, 1], [], []>} : vector<8x32xf32>, vector<32x32xf32>, vector<8x32xf32> -> vector<8x32xf32>
    %820 = arith.addf %819, %12 : vector<8x32xf32>
    %cst_385 = arith.constant 0.000000e+00 : f32
    %821 = vector.broadcast %cst_385 : f32 to vector<8x32xf32>
    %822 = arith.maximumf %820, %821 : vector<8x32xf32>
    %cst_386 = arith.constant dense<0.000000e+00> : vector<8x32xf32>
    %823 = tpu.matmul %818, %2, %cst_386 {dimension_numbers = #tpu.dot_dimension_numbers<[1], [0], [0], [1], [0, 0, 1, 1], [], []>} : vector<8x32xf32>, vector<32x32xf32>, vector<8x32xf32> -> vector<8x32xf32>
    %824 = arith.addf %823, %12 : vector<8x32xf32>
    %cst_387 = arith.constant 0.000000e+00 : f32
    %825 = vector.broadcast %cst_387 : f32 to vector<8x32xf32>
    %826 = arith.maximumf %824, %825 : vector<8x32xf32>
    %cst_388 = arith.constant dense<0.000000e+00> : vector<8x16xf32>
    %827 = tpu.matmul %822, %3, %cst_388 {dimension_numbers = #tpu.dot_dimension_numbers<[1], [0], [0], [1], [0, 0, 1, 1], [], []>} : vector<8x32xf32>, vector<32x16xf32>, vector<8x16xf32> -> vector<8x16xf32>
    %828 = arith.addf %827, %15 : vector<8x16xf32>
    %cst_389 = arith.constant dense<0.000000e+00> : vector<8x16xf32>
    %829 = tpu.matmul %826, %3, %cst_389 {dimension_numbers = #tpu.dot_dimension_numbers<[1], [0], [0], [1], [0, 0, 1, 1], [], []>} : vector<8x32xf32>, vector<32x16xf32>, vector<8x16xf32> -> vector<8x16xf32>
    %830 = arith.addf %829, %15 : vector<8x16xf32>
    %831 = arith.mulf %828, %22 : vector<8x16xf32>
    %832 = arith.addf %800, %831 : vector<8x16xf32>
    %833 = arith.mulf %830, %23 : vector<8x16xf32>
    %834 = arith.addf %802, %833 : vector<8x16xf32>
    %c5_i32_390 = arith.constant 5 : i32
    %cst_391 = arith.constant dense<0.000000e+00> : vector<8x32xf32>
    %835 = tpu.matmul %832, %0, %cst_391 {dimension_numbers = #tpu.dot_dimension_numbers<[1], [0], [0], [1], [0, 0, 1, 1], [], []>} : vector<8x16xf32>, vector<16x32xf32>, vector<8x32xf32> -> vector<8x32xf32>
    %836 = arith.addf %835, %6 : vector<8x32xf32>
    %cst_392 = arith.constant 0.000000e+00 : f32
    %837 = vector.broadcast %cst_392 : f32 to vector<8x32xf32>
    %838 = arith.maximumf %836, %837 : vector<8x32xf32>
    %cst_393 = arith.constant dense<0.000000e+00> : vector<8x32xf32>
    %839 = tpu.matmul %834, %0, %cst_393 {dimension_numbers = #tpu.dot_dimension_numbers<[1], [0], [0], [1], [0, 0, 1, 1], [], []>} : vector<8x16xf32>, vector<16x32xf32>, vector<8x32xf32> -> vector<8x32xf32>
    %840 = arith.addf %839, %6 : vector<8x32xf32>
    %cst_394 = arith.constant 0.000000e+00 : f32
    %841 = vector.broadcast %cst_394 : f32 to vector<8x32xf32>
    %842 = arith.maximumf %840, %841 : vector<8x32xf32>
    %cst_395 = arith.constant dense<0.000000e+00> : vector<8x32xf32>
    %843 = tpu.matmul %838, %1, %cst_395 {dimension_numbers = #tpu.dot_dimension_numbers<[1], [0], [0], [1], [0, 0, 1, 1], [], []>} : vector<8x32xf32>, vector<32x32xf32>, vector<8x32xf32> -> vector<8x32xf32>
    %844 = arith.addf %843, %9 : vector<8x32xf32>
    %cst_396 = arith.constant 0.000000e+00 : f32
    %845 = vector.broadcast %cst_396 : f32 to vector<8x32xf32>
    %846 = arith.maximumf %844, %845 : vector<8x32xf32>
    %cst_397 = arith.constant dense<0.000000e+00> : vector<8x32xf32>
    %847 = tpu.matmul %842, %1, %cst_397 {dimension_numbers = #tpu.dot_dimension_numbers<[1], [0], [0], [1], [0, 0, 1, 1], [], []>} : vector<8x32xf32>, vector<32x32xf32>, vector<8x32xf32> -> vector<8x32xf32>
    %848 = arith.addf %847, %9 : vector<8x32xf32>
    %cst_398 = arith.constant 0.000000e+00 : f32
    %849 = vector.broadcast %cst_398 : f32 to vector<8x32xf32>
    %850 = arith.maximumf %848, %849 : vector<8x32xf32>
    %cst_399 = arith.constant dense<0.000000e+00> : vector<8x32xf32>
    %851 = tpu.matmul %846, %2, %cst_399 {dimension_numbers = #tpu.dot_dimension_numbers<[1], [0], [0], [1], [0, 0, 1, 1], [], []>} : vector<8x32xf32>, vector<32x32xf32>, vector<8x32xf32> -> vector<8x32xf32>
    %852 = arith.addf %851, %12 : vector<8x32xf32>
    %cst_400 = arith.constant 0.000000e+00 : f32
    %853 = vector.broadcast %cst_400 : f32 to vector<8x32xf32>
    %854 = arith.maximumf %852, %853 : vector<8x32xf32>
    %cst_401 = arith.constant dense<0.000000e+00> : vector<8x32xf32>
    %855 = tpu.matmul %850, %2, %cst_401 {dimension_numbers = #tpu.dot_dimension_numbers<[1], [0], [0], [1], [0, 0, 1, 1], [], []>} : vector<8x32xf32>, vector<32x32xf32>, vector<8x32xf32> -> vector<8x32xf32>
    %856 = arith.addf %855, %12 : vector<8x32xf32>
    %cst_402 = arith.constant 0.000000e+00 : f32
    %857 = vector.broadcast %cst_402 : f32 to vector<8x32xf32>
    %858 = arith.maximumf %856, %857 : vector<8x32xf32>
    %cst_403 = arith.constant dense<0.000000e+00> : vector<8x16xf32>
    %859 = tpu.matmul %854, %3, %cst_403 {dimension_numbers = #tpu.dot_dimension_numbers<[1], [0], [0], [1], [0, 0, 1, 1], [], []>} : vector<8x32xf32>, vector<32x16xf32>, vector<8x16xf32> -> vector<8x16xf32>
    %860 = arith.addf %859, %15 : vector<8x16xf32>
    %cst_404 = arith.constant dense<0.000000e+00> : vector<8x16xf32>
    %861 = tpu.matmul %858, %3, %cst_404 {dimension_numbers = #tpu.dot_dimension_numbers<[1], [0], [0], [1], [0, 0, 1, 1], [], []>} : vector<8x32xf32>, vector<32x16xf32>, vector<8x16xf32> -> vector<8x16xf32>
    %862 = arith.addf %861, %15 : vector<8x16xf32>
    %863 = arith.mulf %860, %22 : vector<8x16xf32>
    %864 = arith.addf %832, %863 : vector<8x16xf32>
    %865 = arith.mulf %862, %23 : vector<8x16xf32>
    %866 = arith.addf %834, %865 : vector<8x16xf32>
    %c6_i32_405 = arith.constant 6 : i32
    %cst_406 = arith.constant dense<0.000000e+00> : vector<8x32xf32>
    %867 = tpu.matmul %864, %0, %cst_406 {dimension_numbers = #tpu.dot_dimension_numbers<[1], [0], [0], [1], [0, 0, 1, 1], [], []>} : vector<8x16xf32>, vector<16x32xf32>, vector<8x32xf32> -> vector<8x32xf32>
    %868 = arith.addf %867, %6 : vector<8x32xf32>
    %cst_407 = arith.constant 0.000000e+00 : f32
    %869 = vector.broadcast %cst_407 : f32 to vector<8x32xf32>
    %870 = arith.maximumf %868, %869 : vector<8x32xf32>
    %cst_408 = arith.constant dense<0.000000e+00> : vector<8x32xf32>
    %871 = tpu.matmul %866, %0, %cst_408 {dimension_numbers = #tpu.dot_dimension_numbers<[1], [0], [0], [1], [0, 0, 1, 1], [], []>} : vector<8x16xf32>, vector<16x32xf32>, vector<8x32xf32> -> vector<8x32xf32>
    %872 = arith.addf %871, %6 : vector<8x32xf32>
    %cst_409 = arith.constant 0.000000e+00 : f32
    %873 = vector.broadcast %cst_409 : f32 to vector<8x32xf32>
    %874 = arith.maximumf %872, %873 : vector<8x32xf32>
    %cst_410 = arith.constant dense<0.000000e+00> : vector<8x32xf32>
    %875 = tpu.matmul %870, %1, %cst_410 {dimension_numbers = #tpu.dot_dimension_numbers<[1], [0], [0], [1], [0, 0, 1, 1], [], []>} : vector<8x32xf32>, vector<32x32xf32>, vector<8x32xf32> -> vector<8x32xf32>
    %876 = arith.addf %875, %9 : vector<8x32xf32>
    %cst_411 = arith.constant 0.000000e+00 : f32
    %877 = vector.broadcast %cst_411 : f32 to vector<8x32xf32>
    %878 = arith.maximumf %876, %877 : vector<8x32xf32>
    %cst_412 = arith.constant dense<0.000000e+00> : vector<8x32xf32>
    %879 = tpu.matmul %874, %1, %cst_412 {dimension_numbers = #tpu.dot_dimension_numbers<[1], [0], [0], [1], [0, 0, 1, 1], [], []>} : vector<8x32xf32>, vector<32x32xf32>, vector<8x32xf32> -> vector<8x32xf32>
    %880 = arith.addf %879, %9 : vector<8x32xf32>
    %cst_413 = arith.constant 0.000000e+00 : f32
    %881 = vector.broadcast %cst_413 : f32 to vector<8x32xf32>
    %882 = arith.maximumf %880, %881 : vector<8x32xf32>
    %cst_414 = arith.constant dense<0.000000e+00> : vector<8x32xf32>
    %883 = tpu.matmul %878, %2, %cst_414 {dimension_numbers = #tpu.dot_dimension_numbers<[1], [0], [0], [1], [0, 0, 1, 1], [], []>} : vector<8x32xf32>, vector<32x32xf32>, vector<8x32xf32> -> vector<8x32xf32>
    %884 = arith.addf %883, %12 : vector<8x32xf32>
    %cst_415 = arith.constant 0.000000e+00 : f32
    %885 = vector.broadcast %cst_415 : f32 to vector<8x32xf32>
    %886 = arith.maximumf %884, %885 : vector<8x32xf32>
    %cst_416 = arith.constant dense<0.000000e+00> : vector<8x32xf32>
    %887 = tpu.matmul %882, %2, %cst_416 {dimension_numbers = #tpu.dot_dimension_numbers<[1], [0], [0], [1], [0, 0, 1, 1], [], []>} : vector<8x32xf32>, vector<32x32xf32>, vector<8x32xf32> -> vector<8x32xf32>
    %888 = arith.addf %887, %12 : vector<8x32xf32>
    %cst_417 = arith.constant 0.000000e+00 : f32
    %889 = vector.broadcast %cst_417 : f32 to vector<8x32xf32>
    %890 = arith.maximumf %888, %889 : vector<8x32xf32>
    %cst_418 = arith.constant dense<0.000000e+00> : vector<8x16xf32>
    %891 = tpu.matmul %886, %3, %cst_418 {dimension_numbers = #tpu.dot_dimension_numbers<[1], [0], [0], [1], [0, 0, 1, 1], [], []>} : vector<8x32xf32>, vector<32x16xf32>, vector<8x16xf32> -> vector<8x16xf32>
    %892 = arith.addf %891, %15 : vector<8x16xf32>
    %cst_419 = arith.constant dense<0.000000e+00> : vector<8x16xf32>
    %893 = tpu.matmul %890, %3, %cst_419 {dimension_numbers = #tpu.dot_dimension_numbers<[1], [0], [0], [1], [0, 0, 1, 1], [], []>} : vector<8x32xf32>, vector<32x16xf32>, vector<8x16xf32> -> vector<8x16xf32>
    %894 = arith.addf %893, %15 : vector<8x16xf32>
    %895 = arith.mulf %892, %22 : vector<8x16xf32>
    %896 = arith.addf %864, %895 : vector<8x16xf32>
    %897 = arith.mulf %894, %23 : vector<8x16xf32>
    %898 = arith.addf %866, %897 : vector<8x16xf32>
    %c7_i32_420 = arith.constant 7 : i32
    %cst_421 = arith.constant dense<0.000000e+00> : vector<8x32xf32>
    %899 = tpu.matmul %896, %0, %cst_421 {dimension_numbers = #tpu.dot_dimension_numbers<[1], [0], [0], [1], [0, 0, 1, 1], [], []>} : vector<8x16xf32>, vector<16x32xf32>, vector<8x32xf32> -> vector<8x32xf32>
    %900 = arith.addf %899, %6 : vector<8x32xf32>
    %cst_422 = arith.constant 0.000000e+00 : f32
    %901 = vector.broadcast %cst_422 : f32 to vector<8x32xf32>
    %902 = arith.maximumf %900, %901 : vector<8x32xf32>
    %cst_423 = arith.constant dense<0.000000e+00> : vector<8x32xf32>
    %903 = tpu.matmul %898, %0, %cst_423 {dimension_numbers = #tpu.dot_dimension_numbers<[1], [0], [0], [1], [0, 0, 1, 1], [], []>} : vector<8x16xf32>, vector<16x32xf32>, vector<8x32xf32> -> vector<8x32xf32>
    %904 = arith.addf %903, %6 : vector<8x32xf32>
    %cst_424 = arith.constant 0.000000e+00 : f32
    %905 = vector.broadcast %cst_424 : f32 to vector<8x32xf32>
    %906 = arith.maximumf %904, %905 : vector<8x32xf32>
    %cst_425 = arith.constant dense<0.000000e+00> : vector<8x32xf32>
    %907 = tpu.matmul %902, %1, %cst_425 {dimension_numbers = #tpu.dot_dimension_numbers<[1], [0], [0], [1], [0, 0, 1, 1], [], []>} : vector<8x32xf32>, vector<32x32xf32>, vector<8x32xf32> -> vector<8x32xf32>
    %908 = arith.addf %907, %9 : vector<8x32xf32>
    %cst_426 = arith.constant 0.000000e+00 : f32
    %909 = vector.broadcast %cst_426 : f32 to vector<8x32xf32>
    %910 = arith.maximumf %908, %909 : vector<8x32xf32>
    %cst_427 = arith.constant dense<0.000000e+00> : vector<8x32xf32>
    %911 = tpu.matmul %906, %1, %cst_427 {dimension_numbers = #tpu.dot_dimension_numbers<[1], [0], [0], [1], [0, 0, 1, 1], [], []>} : vector<8x32xf32>, vector<32x32xf32>, vector<8x32xf32> -> vector<8x32xf32>
    %912 = arith.addf %911, %9 : vector<8x32xf32>
    %cst_428 = arith.constant 0.000000e+00 : f32
    %913 = vector.broadcast %cst_428 : f32 to vector<8x32xf32>
    %914 = arith.maximumf %912, %913 : vector<8x32xf32>
    %cst_429 = arith.constant dense<0.000000e+00> : vector<8x32xf32>
    %915 = tpu.matmul %910, %2, %cst_429 {dimension_numbers = #tpu.dot_dimension_numbers<[1], [0], [0], [1], [0, 0, 1, 1], [], []>} : vector<8x32xf32>, vector<32x32xf32>, vector<8x32xf32> -> vector<8x32xf32>
    %916 = arith.addf %915, %12 : vector<8x32xf32>
    %cst_430 = arith.constant 0.000000e+00 : f32
    %917 = vector.broadcast %cst_430 : f32 to vector<8x32xf32>
    %918 = arith.maximumf %916, %917 : vector<8x32xf32>
    %cst_431 = arith.constant dense<0.000000e+00> : vector<8x32xf32>
    %919 = tpu.matmul %914, %2, %cst_431 {dimension_numbers = #tpu.dot_dimension_numbers<[1], [0], [0], [1], [0, 0, 1, 1], [], []>} : vector<8x32xf32>, vector<32x32xf32>, vector<8x32xf32> -> vector<8x32xf32>
    %920 = arith.addf %919, %12 : vector<8x32xf32>
    %cst_432 = arith.constant 0.000000e+00 : f32
    %921 = vector.broadcast %cst_432 : f32 to vector<8x32xf32>
    %922 = arith.maximumf %920, %921 : vector<8x32xf32>
    %cst_433 = arith.constant dense<0.000000e+00> : vector<8x16xf32>
    %923 = tpu.matmul %918, %3, %cst_433 {dimension_numbers = #tpu.dot_dimension_numbers<[1], [0], [0], [1], [0, 0, 1, 1], [], []>} : vector<8x32xf32>, vector<32x16xf32>, vector<8x16xf32> -> vector<8x16xf32>
    %924 = arith.addf %923, %15 : vector<8x16xf32>
    %cst_434 = arith.constant dense<0.000000e+00> : vector<8x16xf32>
    %925 = tpu.matmul %922, %3, %cst_434 {dimension_numbers = #tpu.dot_dimension_numbers<[1], [0], [0], [1], [0, 0, 1, 1], [], []>} : vector<8x32xf32>, vector<32x16xf32>, vector<8x16xf32> -> vector<8x16xf32>
    %926 = arith.addf %925, %15 : vector<8x16xf32>
    %927 = arith.mulf %924, %22 : vector<8x16xf32>
    %928 = arith.addf %896, %927 : vector<8x16xf32>
    %929 = arith.mulf %926, %23 : vector<8x16xf32>
    %930 = arith.addf %898, %929 : vector<8x16xf32>
    %c8_i32_435 = arith.constant 8 : i32
    %cst_436 = arith.constant dense<0.000000e+00> : vector<8x32xf32>
    %931 = tpu.matmul %928, %0, %cst_436 {dimension_numbers = #tpu.dot_dimension_numbers<[1], [0], [0], [1], [0, 0, 1, 1], [], []>} : vector<8x16xf32>, vector<16x32xf32>, vector<8x32xf32> -> vector<8x32xf32>
    %932 = arith.addf %931, %6 : vector<8x32xf32>
    %cst_437 = arith.constant 0.000000e+00 : f32
    %933 = vector.broadcast %cst_437 : f32 to vector<8x32xf32>
    %934 = arith.maximumf %932, %933 : vector<8x32xf32>
    %cst_438 = arith.constant dense<0.000000e+00> : vector<8x32xf32>
    %935 = tpu.matmul %930, %0, %cst_438 {dimension_numbers = #tpu.dot_dimension_numbers<[1], [0], [0], [1], [0, 0, 1, 1], [], []>} : vector<8x16xf32>, vector<16x32xf32>, vector<8x32xf32> -> vector<8x32xf32>
    %936 = arith.addf %935, %6 : vector<8x32xf32>
    %cst_439 = arith.constant 0.000000e+00 : f32
    %937 = vector.broadcast %cst_439 : f32 to vector<8x32xf32>
    %938 = arith.maximumf %936, %937 : vector<8x32xf32>
    %cst_440 = arith.constant dense<0.000000e+00> : vector<8x32xf32>
    %939 = tpu.matmul %934, %1, %cst_440 {dimension_numbers = #tpu.dot_dimension_numbers<[1], [0], [0], [1], [0, 0, 1, 1], [], []>} : vector<8x32xf32>, vector<32x32xf32>, vector<8x32xf32> -> vector<8x32xf32>
    %940 = arith.addf %939, %9 : vector<8x32xf32>
    %cst_441 = arith.constant 0.000000e+00 : f32
    %941 = vector.broadcast %cst_441 : f32 to vector<8x32xf32>
    %942 = arith.maximumf %940, %941 : vector<8x32xf32>
    %cst_442 = arith.constant dense<0.000000e+00> : vector<8x32xf32>
    %943 = tpu.matmul %938, %1, %cst_442 {dimension_numbers = #tpu.dot_dimension_numbers<[1], [0], [0], [1], [0, 0, 1, 1], [], []>} : vector<8x32xf32>, vector<32x32xf32>, vector<8x32xf32> -> vector<8x32xf32>
    %944 = arith.addf %943, %9 : vector<8x32xf32>
    %cst_443 = arith.constant 0.000000e+00 : f32
    %945 = vector.broadcast %cst_443 : f32 to vector<8x32xf32>
    %946 = arith.maximumf %944, %945 : vector<8x32xf32>
    %cst_444 = arith.constant dense<0.000000e+00> : vector<8x32xf32>
    %947 = tpu.matmul %942, %2, %cst_444 {dimension_numbers = #tpu.dot_dimension_numbers<[1], [0], [0], [1], [0, 0, 1, 1], [], []>} : vector<8x32xf32>, vector<32x32xf32>, vector<8x32xf32> -> vector<8x32xf32>
    %948 = arith.addf %947, %12 : vector<8x32xf32>
    %cst_445 = arith.constant 0.000000e+00 : f32
    %949 = vector.broadcast %cst_445 : f32 to vector<8x32xf32>
    %950 = arith.maximumf %948, %949 : vector<8x32xf32>
    %cst_446 = arith.constant dense<0.000000e+00> : vector<8x32xf32>
    %951 = tpu.matmul %946, %2, %cst_446 {dimension_numbers = #tpu.dot_dimension_numbers<[1], [0], [0], [1], [0, 0, 1, 1], [], []>} : vector<8x32xf32>, vector<32x32xf32>, vector<8x32xf32> -> vector<8x32xf32>
    %952 = arith.addf %951, %12 : vector<8x32xf32>
    %cst_447 = arith.constant 0.000000e+00 : f32
    %953 = vector.broadcast %cst_447 : f32 to vector<8x32xf32>
    %954 = arith.maximumf %952, %953 : vector<8x32xf32>
    %cst_448 = arith.constant dense<0.000000e+00> : vector<8x16xf32>
    %955 = tpu.matmul %950, %3, %cst_448 {dimension_numbers = #tpu.dot_dimension_numbers<[1], [0], [0], [1], [0, 0, 1, 1], [], []>} : vector<8x32xf32>, vector<32x16xf32>, vector<8x16xf32> -> vector<8x16xf32>
    %956 = arith.addf %955, %15 : vector<8x16xf32>
    %cst_449 = arith.constant dense<0.000000e+00> : vector<8x16xf32>
    %957 = tpu.matmul %954, %3, %cst_449 {dimension_numbers = #tpu.dot_dimension_numbers<[1], [0], [0], [1], [0, 0, 1, 1], [], []>} : vector<8x32xf32>, vector<32x16xf32>, vector<8x16xf32> -> vector<8x16xf32>
    %958 = arith.addf %957, %15 : vector<8x16xf32>
    %959 = arith.mulf %956, %22 : vector<8x16xf32>
    %960 = arith.addf %928, %959 : vector<8x16xf32>
    %961 = arith.mulf %958, %23 : vector<8x16xf32>
    %962 = arith.addf %930, %961 : vector<8x16xf32>
    %c9_i32_450 = arith.constant 9 : i32
    %cst_451 = arith.constant dense<0.000000e+00> : vector<8x32xf32>
    %963 = tpu.matmul %960, %0, %cst_451 {dimension_numbers = #tpu.dot_dimension_numbers<[1], [0], [0], [1], [0, 0, 1, 1], [], []>} : vector<8x16xf32>, vector<16x32xf32>, vector<8x32xf32> -> vector<8x32xf32>
    %964 = arith.addf %963, %6 : vector<8x32xf32>
    %cst_452 = arith.constant 0.000000e+00 : f32
    %965 = vector.broadcast %cst_452 : f32 to vector<8x32xf32>
    %966 = arith.maximumf %964, %965 : vector<8x32xf32>
    %cst_453 = arith.constant dense<0.000000e+00> : vector<8x32xf32>
    %967 = tpu.matmul %962, %0, %cst_453 {dimension_numbers = #tpu.dot_dimension_numbers<[1], [0], [0], [1], [0, 0, 1, 1], [], []>} : vector<8x16xf32>, vector<16x32xf32>, vector<8x32xf32> -> vector<8x32xf32>
    %968 = arith.addf %967, %6 : vector<8x32xf32>
    %cst_454 = arith.constant 0.000000e+00 : f32
    %969 = vector.broadcast %cst_454 : f32 to vector<8x32xf32>
    %970 = arith.maximumf %968, %969 : vector<8x32xf32>
    %cst_455 = arith.constant dense<0.000000e+00> : vector<8x32xf32>
    %971 = tpu.matmul %966, %1, %cst_455 {dimension_numbers = #tpu.dot_dimension_numbers<[1], [0], [0], [1], [0, 0, 1, 1], [], []>} : vector<8x32xf32>, vector<32x32xf32>, vector<8x32xf32> -> vector<8x32xf32>
    %972 = arith.addf %971, %9 : vector<8x32xf32>
    %cst_456 = arith.constant 0.000000e+00 : f32
    %973 = vector.broadcast %cst_456 : f32 to vector<8x32xf32>
    %974 = arith.maximumf %972, %973 : vector<8x32xf32>
    %cst_457 = arith.constant dense<0.000000e+00> : vector<8x32xf32>
    %975 = tpu.matmul %970, %1, %cst_457 {dimension_numbers = #tpu.dot_dimension_numbers<[1], [0], [0], [1], [0, 0, 1, 1], [], []>} : vector<8x32xf32>, vector<32x32xf32>, vector<8x32xf32> -> vector<8x32xf32>
    %976 = arith.addf %975, %9 : vector<8x32xf32>
    %cst_458 = arith.constant 0.000000e+00 : f32
    %977 = vector.broadcast %cst_458 : f32 to vector<8x32xf32>
    %978 = arith.maximumf %976, %977 : vector<8x32xf32>
    %cst_459 = arith.constant dense<0.000000e+00> : vector<8x32xf32>
    %979 = tpu.matmul %974, %2, %cst_459 {dimension_numbers = #tpu.dot_dimension_numbers<[1], [0], [0], [1], [0, 0, 1, 1], [], []>} : vector<8x32xf32>, vector<32x32xf32>, vector<8x32xf32> -> vector<8x32xf32>
    %980 = arith.addf %979, %12 : vector<8x32xf32>
    %cst_460 = arith.constant 0.000000e+00 : f32
    %981 = vector.broadcast %cst_460 : f32 to vector<8x32xf32>
    %982 = arith.maximumf %980, %981 : vector<8x32xf32>
    %cst_461 = arith.constant dense<0.000000e+00> : vector<8x32xf32>
    %983 = tpu.matmul %978, %2, %cst_461 {dimension_numbers = #tpu.dot_dimension_numbers<[1], [0], [0], [1], [0, 0, 1, 1], [], []>} : vector<8x32xf32>, vector<32x32xf32>, vector<8x32xf32> -> vector<8x32xf32>
    %984 = arith.addf %983, %12 : vector<8x32xf32>
    %cst_462 = arith.constant 0.000000e+00 : f32
    %985 = vector.broadcast %cst_462 : f32 to vector<8x32xf32>
    %986 = arith.maximumf %984, %985 : vector<8x32xf32>
    %cst_463 = arith.constant dense<0.000000e+00> : vector<8x16xf32>
    %987 = tpu.matmul %982, %3, %cst_463 {dimension_numbers = #tpu.dot_dimension_numbers<[1], [0], [0], [1], [0, 0, 1, 1], [], []>} : vector<8x32xf32>, vector<32x16xf32>, vector<8x16xf32> -> vector<8x16xf32>
    %988 = arith.addf %987, %15 : vector<8x16xf32>
    %cst_464 = arith.constant dense<0.000000e+00> : vector<8x16xf32>
    %989 = tpu.matmul %986, %3, %cst_464 {dimension_numbers = #tpu.dot_dimension_numbers<[1], [0], [0], [1], [0, 0, 1, 1], [], []>} : vector<8x32xf32>, vector<32x16xf32>, vector<8x16xf32> -> vector<8x16xf32>
    %990 = arith.addf %989, %15 : vector<8x16xf32>
    %991 = arith.mulf %988, %22 : vector<8x16xf32>
    %992 = arith.addf %960, %991 : vector<8x16xf32>
    %993 = arith.mulf %990, %23 : vector<8x16xf32>
    %994 = arith.addf %962, %993 : vector<8x16xf32>
    %995 = tpu.concatenate %992, %994 in 0 : vector<8x16xf32>, vector<8x16xf32> -> vector<16x16xf32>
    %c3 = arith.constant 3 : index
    %c0_465 = arith.constant 0 : index
    %c0_466 = arith.constant 0 : index
    %996 = vector.load %arg11[%c3, %c0_465, %c0_466] : memref<5x16x16xf32, #tpu.memory_space<vmem>>, vector<1x16x16xf32>
    %997 = vector.shape_cast %996 : vector<1x16x16xf32> to vector<16x16xf32>
    %998 = vector.shape_cast %995 : vector<16x16xf32> to vector<1x16x16xf32>
    tpu.vector_store %arg11[%c3, %c0_465, %c0_466], %998 {strides = array<i32>} : memref<5x16x16xf32, #tpu.memory_space<vmem>>, vector<1x16x16xf32>,
    %c0_i32_467 = arith.constant 0 : i32
    %cst_468 = arith.constant dense<0.000000e+00> : vector<8x32xf32>
    %999 = tpu.matmul %992, %0, %cst_468 {dimension_numbers = #tpu.dot_dimension_numbers<[1], [0], [0], [1], [0, 0, 1, 1], [], []>} : vector<8x16xf32>, vector<16x32xf32>, vector<8x32xf32> -> vector<8x32xf32>
    %1000 = arith.addf %999, %6 : vector<8x32xf32>
    %cst_469 = arith.constant 0.000000e+00 : f32
    %1001 = vector.broadcast %cst_469 : f32 to vector<8x32xf32>
    %1002 = arith.maximumf %1000, %1001 : vector<8x32xf32>
    %cst_470 = arith.constant dense<0.000000e+00> : vector<8x32xf32>
    %1003 = tpu.matmul %994, %0, %cst_470 {dimension_numbers = #tpu.dot_dimension_numbers<[1], [0], [0], [1], [0, 0, 1, 1], [], []>} : vector<8x16xf32>, vector<16x32xf32>, vector<8x32xf32> -> vector<8x32xf32>
    %1004 = arith.addf %1003, %6 : vector<8x32xf32>
    %cst_471 = arith.constant 0.000000e+00 : f32
    %1005 = vector.broadcast %cst_471 : f32 to vector<8x32xf32>
    %1006 = arith.maximumf %1004, %1005 : vector<8x32xf32>
    %cst_472 = arith.constant dense<0.000000e+00> : vector<8x32xf32>
    %1007 = tpu.matmul %1002, %1, %cst_472 {dimension_numbers = #tpu.dot_dimension_numbers<[1], [0], [0], [1], [0, 0, 1, 1], [], []>} : vector<8x32xf32>, vector<32x32xf32>, vector<8x32xf32> -> vector<8x32xf32>
    %1008 = arith.addf %1007, %9 : vector<8x32xf32>
    %cst_473 = arith.constant 0.000000e+00 : f32
    %1009 = vector.broadcast %cst_473 : f32 to vector<8x32xf32>
    %1010 = arith.maximumf %1008, %1009 : vector<8x32xf32>
    %cst_474 = arith.constant dense<0.000000e+00> : vector<8x32xf32>
    %1011 = tpu.matmul %1006, %1, %cst_474 {dimension_numbers = #tpu.dot_dimension_numbers<[1], [0], [0], [1], [0, 0, 1, 1], [], []>} : vector<8x32xf32>, vector<32x32xf32>, vector<8x32xf32> -> vector<8x32xf32>
    %1012 = arith.addf %1011, %9 : vector<8x32xf32>
    %cst_475 = arith.constant 0.000000e+00 : f32
    %1013 = vector.broadcast %cst_475 : f32 to vector<8x32xf32>
    %1014 = arith.maximumf %1012, %1013 : vector<8x32xf32>
    %cst_476 = arith.constant dense<0.000000e+00> : vector<8x32xf32>
    %1015 = tpu.matmul %1010, %2, %cst_476 {dimension_numbers = #tpu.dot_dimension_numbers<[1], [0], [0], [1], [0, 0, 1, 1], [], []>} : vector<8x32xf32>, vector<32x32xf32>, vector<8x32xf32> -> vector<8x32xf32>
    %1016 = arith.addf %1015, %12 : vector<8x32xf32>
    %cst_477 = arith.constant 0.000000e+00 : f32
    %1017 = vector.broadcast %cst_477 : f32 to vector<8x32xf32>
    %1018 = arith.maximumf %1016, %1017 : vector<8x32xf32>
    %cst_478 = arith.constant dense<0.000000e+00> : vector<8x32xf32>
    %1019 = tpu.matmul %1014, %2, %cst_478 {dimension_numbers = #tpu.dot_dimension_numbers<[1], [0], [0], [1], [0, 0, 1, 1], [], []>} : vector<8x32xf32>, vector<32x32xf32>, vector<8x32xf32> -> vector<8x32xf32>
    %1020 = arith.addf %1019, %12 : vector<8x32xf32>
    %cst_479 = arith.constant 0.000000e+00 : f32
    %1021 = vector.broadcast %cst_479 : f32 to vector<8x32xf32>
    %1022 = arith.maximumf %1020, %1021 : vector<8x32xf32>
    %cst_480 = arith.constant dense<0.000000e+00> : vector<8x16xf32>
    %1023 = tpu.matmul %1018, %3, %cst_480 {dimension_numbers = #tpu.dot_dimension_numbers<[1], [0], [0], [1], [0, 0, 1, 1], [], []>} : vector<8x32xf32>, vector<32x16xf32>, vector<8x16xf32> -> vector<8x16xf32>
    %1024 = arith.addf %1023, %15 : vector<8x16xf32>
    %cst_481 = arith.constant dense<0.000000e+00> : vector<8x16xf32>
    %1025 = tpu.matmul %1022, %3, %cst_481 {dimension_numbers = #tpu.dot_dimension_numbers<[1], [0], [0], [1], [0, 0, 1, 1], [], []>} : vector<8x32xf32>, vector<32x16xf32>, vector<8x16xf32> -> vector<8x16xf32>
    %1026 = arith.addf %1025, %15 : vector<8x16xf32>
    %1027 = arith.mulf %1024, %22 : vector<8x16xf32>
    %1028 = arith.addf %992, %1027 : vector<8x16xf32>
    %1029 = arith.mulf %1026, %23 : vector<8x16xf32>
    %1030 = arith.addf %994, %1029 : vector<8x16xf32>
    %c1_i32_482 = arith.constant 1 : i32
    %cst_483 = arith.constant dense<0.000000e+00> : vector<8x32xf32>
    %1031 = tpu.matmul %1028, %0, %cst_483 {dimension_numbers = #tpu.dot_dimension_numbers<[1], [0], [0], [1], [0, 0, 1, 1], [], []>} : vector<8x16xf32>, vector<16x32xf32>, vector<8x32xf32> -> vector<8x32xf32>
    %1032 = arith.addf %1031, %6 : vector<8x32xf32>
    %cst_484 = arith.constant 0.000000e+00 : f32
    %1033 = vector.broadcast %cst_484 : f32 to vector<8x32xf32>
    %1034 = arith.maximumf %1032, %1033 : vector<8x32xf32>
    %cst_485 = arith.constant dense<0.000000e+00> : vector<8x32xf32>
    %1035 = tpu.matmul %1030, %0, %cst_485 {dimension_numbers = #tpu.dot_dimension_numbers<[1], [0], [0], [1], [0, 0, 1, 1], [], []>} : vector<8x16xf32>, vector<16x32xf32>, vector<8x32xf32> -> vector<8x32xf32>
    %1036 = arith.addf %1035, %6 : vector<8x32xf32>
    %cst_486 = arith.constant 0.000000e+00 : f32
    %1037 = vector.broadcast %cst_486 : f32 to vector<8x32xf32>
    %1038 = arith.maximumf %1036, %1037 : vector<8x32xf32>
    %cst_487 = arith.constant dense<0.000000e+00> : vector<8x32xf32>
    %1039 = tpu.matmul %1034, %1, %cst_487 {dimension_numbers = #tpu.dot_dimension_numbers<[1], [0], [0], [1], [0, 0, 1, 1], [], []>} : vector<8x32xf32>, vector<32x32xf32>, vector<8x32xf32> -> vector<8x32xf32>
    %1040 = arith.addf %1039, %9 : vector<8x32xf32>
    %cst_488 = arith.constant 0.000000e+00 : f32
    %1041 = vector.broadcast %cst_488 : f32 to vector<8x32xf32>
    %1042 = arith.maximumf %1040, %1041 : vector<8x32xf32>
    %cst_489 = arith.constant dense<0.000000e+00> : vector<8x32xf32>
    %1043 = tpu.matmul %1038, %1, %cst_489 {dimension_numbers = #tpu.dot_dimension_numbers<[1], [0], [0], [1], [0, 0, 1, 1], [], []>} : vector<8x32xf32>, vector<32x32xf32>, vector<8x32xf32> -> vector<8x32xf32>
    %1044 = arith.addf %1043, %9 : vector<8x32xf32>
    %cst_490 = arith.constant 0.000000e+00 : f32
    %1045 = vector.broadcast %cst_490 : f32 to vector<8x32xf32>
    %1046 = arith.maximumf %1044, %1045 : vector<8x32xf32>
    %cst_491 = arith.constant dense<0.000000e+00> : vector<8x32xf32>
    %1047 = tpu.matmul %1042, %2, %cst_491 {dimension_numbers = #tpu.dot_dimension_numbers<[1], [0], [0], [1], [0, 0, 1, 1], [], []>} : vector<8x32xf32>, vector<32x32xf32>, vector<8x32xf32> -> vector<8x32xf32>
    %1048 = arith.addf %1047, %12 : vector<8x32xf32>
    %cst_492 = arith.constant 0.000000e+00 : f32
    %1049 = vector.broadcast %cst_492 : f32 to vector<8x32xf32>
    %1050 = arith.maximumf %1048, %1049 : vector<8x32xf32>
    %cst_493 = arith.constant dense<0.000000e+00> : vector<8x32xf32>
    %1051 = tpu.matmul %1046, %2, %cst_493 {dimension_numbers = #tpu.dot_dimension_numbers<[1], [0], [0], [1], [0, 0, 1, 1], [], []>} : vector<8x32xf32>, vector<32x32xf32>, vector<8x32xf32> -> vector<8x32xf32>
    %1052 = arith.addf %1051, %12 : vector<8x32xf32>
    %cst_494 = arith.constant 0.000000e+00 : f32
    %1053 = vector.broadcast %cst_494 : f32 to vector<8x32xf32>
    %1054 = arith.maximumf %1052, %1053 : vector<8x32xf32>
    %cst_495 = arith.constant dense<0.000000e+00> : vector<8x16xf32>
    %1055 = tpu.matmul %1050, %3, %cst_495 {dimension_numbers = #tpu.dot_dimension_numbers<[1], [0], [0], [1], [0, 0, 1, 1], [], []>} : vector<8x32xf32>, vector<32x16xf32>, vector<8x16xf32> -> vector<8x16xf32>
    %1056 = arith.addf %1055, %15 : vector<8x16xf32>
    %cst_496 = arith.constant dense<0.000000e+00> : vector<8x16xf32>
    %1057 = tpu.matmul %1054, %3, %cst_496 {dimension_numbers = #tpu.dot_dimension_numbers<[1], [0], [0], [1], [0, 0, 1, 1], [], []>} : vector<8x32xf32>, vector<32x16xf32>, vector<8x16xf32> -> vector<8x16xf32>
    %1058 = arith.addf %1057, %15 : vector<8x16xf32>
    %1059 = arith.mulf %1056, %22 : vector<8x16xf32>
    %1060 = arith.addf %1028, %1059 : vector<8x16xf32>
    %1061 = arith.mulf %1058, %23 : vector<8x16xf32>
    %1062 = arith.addf %1030, %1061 : vector<8x16xf32>
    %c2_i32_497 = arith.constant 2 : i32
    %cst_498 = arith.constant dense<0.000000e+00> : vector<8x32xf32>
    %1063 = tpu.matmul %1060, %0, %cst_498 {dimension_numbers = #tpu.dot_dimension_numbers<[1], [0], [0], [1], [0, 0, 1, 1], [], []>} : vector<8x16xf32>, vector<16x32xf32>, vector<8x32xf32> -> vector<8x32xf32>
    %1064 = arith.addf %1063, %6 : vector<8x32xf32>
    %cst_499 = arith.constant 0.000000e+00 : f32
    %1065 = vector.broadcast %cst_499 : f32 to vector<8x32xf32>
    %1066 = arith.maximumf %1064, %1065 : vector<8x32xf32>
    %cst_500 = arith.constant dense<0.000000e+00> : vector<8x32xf32>
    %1067 = tpu.matmul %1062, %0, %cst_500 {dimension_numbers = #tpu.dot_dimension_numbers<[1], [0], [0], [1], [0, 0, 1, 1], [], []>} : vector<8x16xf32>, vector<16x32xf32>, vector<8x32xf32> -> vector<8x32xf32>
    %1068 = arith.addf %1067, %6 : vector<8x32xf32>
    %cst_501 = arith.constant 0.000000e+00 : f32
    %1069 = vector.broadcast %cst_501 : f32 to vector<8x32xf32>
    %1070 = arith.maximumf %1068, %1069 : vector<8x32xf32>
    %cst_502 = arith.constant dense<0.000000e+00> : vector<8x32xf32>
    %1071 = tpu.matmul %1066, %1, %cst_502 {dimension_numbers = #tpu.dot_dimension_numbers<[1], [0], [0], [1], [0, 0, 1, 1], [], []>} : vector<8x32xf32>, vector<32x32xf32>, vector<8x32xf32> -> vector<8x32xf32>
    %1072 = arith.addf %1071, %9 : vector<8x32xf32>
    %cst_503 = arith.constant 0.000000e+00 : f32
    %1073 = vector.broadcast %cst_503 : f32 to vector<8x32xf32>
    %1074 = arith.maximumf %1072, %1073 : vector<8x32xf32>
    %cst_504 = arith.constant dense<0.000000e+00> : vector<8x32xf32>
    %1075 = tpu.matmul %1070, %1, %cst_504 {dimension_numbers = #tpu.dot_dimension_numbers<[1], [0], [0], [1], [0, 0, 1, 1], [], []>} : vector<8x32xf32>, vector<32x32xf32>, vector<8x32xf32> -> vector<8x32xf32>
    %1076 = arith.addf %1075, %9 : vector<8x32xf32>
    %cst_505 = arith.constant 0.000000e+00 : f32
    %1077 = vector.broadcast %cst_505 : f32 to vector<8x32xf32>
    %1078 = arith.maximumf %1076, %1077 : vector<8x32xf32>
    %cst_506 = arith.constant dense<0.000000e+00> : vector<8x32xf32>
    %1079 = tpu.matmul %1074, %2, %cst_506 {dimension_numbers = #tpu.dot_dimension_numbers<[1], [0], [0], [1], [0, 0, 1, 1], [], []>} : vector<8x32xf32>, vector<32x32xf32>, vector<8x32xf32> -> vector<8x32xf32>
    %1080 = arith.addf %1079, %12 : vector<8x32xf32>
    %cst_507 = arith.constant 0.000000e+00 : f32
    %1081 = vector.broadcast %cst_507 : f32 to vector<8x32xf32>
    %1082 = arith.maximumf %1080, %1081 : vector<8x32xf32>
    %cst_508 = arith.constant dense<0.000000e+00> : vector<8x32xf32>
    %1083 = tpu.matmul %1078, %2, %cst_508 {dimension_numbers = #tpu.dot_dimension_numbers<[1], [0], [0], [1], [0, 0, 1, 1], [], []>} : vector<8x32xf32>, vector<32x32xf32>, vector<8x32xf32> -> vector<8x32xf32>
    %1084 = arith.addf %1083, %12 : vector<8x32xf32>
    %cst_509 = arith.constant 0.000000e+00 : f32
    %1085 = vector.broadcast %cst_509 : f32 to vector<8x32xf32>
    %1086 = arith.maximumf %1084, %1085 : vector<8x32xf32>
    %cst_510 = arith.constant dense<0.000000e+00> : vector<8x16xf32>
    %1087 = tpu.matmul %1082, %3, %cst_510 {dimension_numbers = #tpu.dot_dimension_numbers<[1], [0], [0], [1], [0, 0, 1, 1], [], []>} : vector<8x32xf32>, vector<32x16xf32>, vector<8x16xf32> -> vector<8x16xf32>
    %1088 = arith.addf %1087, %15 : vector<8x16xf32>
    %cst_511 = arith.constant dense<0.000000e+00> : vector<8x16xf32>
    %1089 = tpu.matmul %1086, %3, %cst_511 {dimension_numbers = #tpu.dot_dimension_numbers<[1], [0], [0], [1], [0, 0, 1, 1], [], []>} : vector<8x32xf32>, vector<32x16xf32>, vector<8x16xf32> -> vector<8x16xf32>
    %1090 = arith.addf %1089, %15 : vector<8x16xf32>
    %1091 = arith.mulf %1088, %22 : vector<8x16xf32>
    %1092 = arith.addf %1060, %1091 : vector<8x16xf32>
    %1093 = arith.mulf %1090, %23 : vector<8x16xf32>
    %1094 = arith.addf %1062, %1093 : vector<8x16xf32>
    %c3_i32_512 = arith.constant 3 : i32
    %cst_513 = arith.constant dense<0.000000e+00> : vector<8x32xf32>
    %1095 = tpu.matmul %1092, %0, %cst_513 {dimension_numbers = #tpu.dot_dimension_numbers<[1], [0], [0], [1], [0, 0, 1, 1], [], []>} : vector<8x16xf32>, vector<16x32xf32>, vector<8x32xf32> -> vector<8x32xf32>
    %1096 = arith.addf %1095, %6 : vector<8x32xf32>
    %cst_514 = arith.constant 0.000000e+00 : f32
    %1097 = vector.broadcast %cst_514 : f32 to vector<8x32xf32>
    %1098 = arith.maximumf %1096, %1097 : vector<8x32xf32>
    %cst_515 = arith.constant dense<0.000000e+00> : vector<8x32xf32>
    %1099 = tpu.matmul %1094, %0, %cst_515 {dimension_numbers = #tpu.dot_dimension_numbers<[1], [0], [0], [1], [0, 0, 1, 1], [], []>} : vector<8x16xf32>, vector<16x32xf32>, vector<8x32xf32> -> vector<8x32xf32>
    %1100 = arith.addf %1099, %6 : vector<8x32xf32>
    %cst_516 = arith.constant 0.000000e+00 : f32
    %1101 = vector.broadcast %cst_516 : f32 to vector<8x32xf32>
    %1102 = arith.maximumf %1100, %1101 : vector<8x32xf32>
    %cst_517 = arith.constant dense<0.000000e+00> : vector<8x32xf32>
    %1103 = tpu.matmul %1098, %1, %cst_517 {dimension_numbers = #tpu.dot_dimension_numbers<[1], [0], [0], [1], [0, 0, 1, 1], [], []>} : vector<8x32xf32>, vector<32x32xf32>, vector<8x32xf32> -> vector<8x32xf32>
    %1104 = arith.addf %1103, %9 : vector<8x32xf32>
    %cst_518 = arith.constant 0.000000e+00 : f32
    %1105 = vector.broadcast %cst_518 : f32 to vector<8x32xf32>
    %1106 = arith.maximumf %1104, %1105 : vector<8x32xf32>
    %cst_519 = arith.constant dense<0.000000e+00> : vector<8x32xf32>
    %1107 = tpu.matmul %1102, %1, %cst_519 {dimension_numbers = #tpu.dot_dimension_numbers<[1], [0], [0], [1], [0, 0, 1, 1], [], []>} : vector<8x32xf32>, vector<32x32xf32>, vector<8x32xf32> -> vector<8x32xf32>
    %1108 = arith.addf %1107, %9 : vector<8x32xf32>
    %cst_520 = arith.constant 0.000000e+00 : f32
    %1109 = vector.broadcast %cst_520 : f32 to vector<8x32xf32>
    %1110 = arith.maximumf %1108, %1109 : vector<8x32xf32>
    %cst_521 = arith.constant dense<0.000000e+00> : vector<8x32xf32>
    %1111 = tpu.matmul %1106, %2, %cst_521 {dimension_numbers = #tpu.dot_dimension_numbers<[1], [0], [0], [1], [0, 0, 1, 1], [], []>} : vector<8x32xf32>, vector<32x32xf32>, vector<8x32xf32> -> vector<8x32xf32>
    %1112 = arith.addf %1111, %12 : vector<8x32xf32>
    %cst_522 = arith.constant 0.000000e+00 : f32
    %1113 = vector.broadcast %cst_522 : f32 to vector<8x32xf32>
    %1114 = arith.maximumf %1112, %1113 : vector<8x32xf32>
    %cst_523 = arith.constant dense<0.000000e+00> : vector<8x32xf32>
    %1115 = tpu.matmul %1110, %2, %cst_523 {dimension_numbers = #tpu.dot_dimension_numbers<[1], [0], [0], [1], [0, 0, 1, 1], [], []>} : vector<8x32xf32>, vector<32x32xf32>, vector<8x32xf32> -> vector<8x32xf32>
    %1116 = arith.addf %1115, %12 : vector<8x32xf32>
    %cst_524 = arith.constant 0.000000e+00 : f32
    %1117 = vector.broadcast %cst_524 : f32 to vector<8x32xf32>
    %1118 = arith.maximumf %1116, %1117 : vector<8x32xf32>
    %cst_525 = arith.constant dense<0.000000e+00> : vector<8x16xf32>
    %1119 = tpu.matmul %1114, %3, %cst_525 {dimension_numbers = #tpu.dot_dimension_numbers<[1], [0], [0], [1], [0, 0, 1, 1], [], []>} : vector<8x32xf32>, vector<32x16xf32>, vector<8x16xf32> -> vector<8x16xf32>
    %1120 = arith.addf %1119, %15 : vector<8x16xf32>
    %cst_526 = arith.constant dense<0.000000e+00> : vector<8x16xf32>
    %1121 = tpu.matmul %1118, %3, %cst_526 {dimension_numbers = #tpu.dot_dimension_numbers<[1], [0], [0], [1], [0, 0, 1, 1], [], []>} : vector<8x32xf32>, vector<32x16xf32>, vector<8x16xf32> -> vector<8x16xf32>
    %1122 = arith.addf %1121, %15 : vector<8x16xf32>
    %1123 = arith.mulf %1120, %22 : vector<8x16xf32>
    %1124 = arith.addf %1092, %1123 : vector<8x16xf32>
    %1125 = arith.mulf %1122, %23 : vector<8x16xf32>
    %1126 = arith.addf %1094, %1125 : vector<8x16xf32>
    %c4_i32_527 = arith.constant 4 : i32
    %cst_528 = arith.constant dense<0.000000e+00> : vector<8x32xf32>
    %1127 = tpu.matmul %1124, %0, %cst_528 {dimension_numbers = #tpu.dot_dimension_numbers<[1], [0], [0], [1], [0, 0, 1, 1], [], []>} : vector<8x16xf32>, vector<16x32xf32>, vector<8x32xf32> -> vector<8x32xf32>
    %1128 = arith.addf %1127, %6 : vector<8x32xf32>
    %cst_529 = arith.constant 0.000000e+00 : f32
    %1129 = vector.broadcast %cst_529 : f32 to vector<8x32xf32>
    %1130 = arith.maximumf %1128, %1129 : vector<8x32xf32>
    %cst_530 = arith.constant dense<0.000000e+00> : vector<8x32xf32>
    %1131 = tpu.matmul %1126, %0, %cst_530 {dimension_numbers = #tpu.dot_dimension_numbers<[1], [0], [0], [1], [0, 0, 1, 1], [], []>} : vector<8x16xf32>, vector<16x32xf32>, vector<8x32xf32> -> vector<8x32xf32>
    %1132 = arith.addf %1131, %6 : vector<8x32xf32>
    %cst_531 = arith.constant 0.000000e+00 : f32
    %1133 = vector.broadcast %cst_531 : f32 to vector<8x32xf32>
    %1134 = arith.maximumf %1132, %1133 : vector<8x32xf32>
    %cst_532 = arith.constant dense<0.000000e+00> : vector<8x32xf32>
    %1135 = tpu.matmul %1130, %1, %cst_532 {dimension_numbers = #tpu.dot_dimension_numbers<[1], [0], [0], [1], [0, 0, 1, 1], [], []>} : vector<8x32xf32>, vector<32x32xf32>, vector<8x32xf32> -> vector<8x32xf32>
    %1136 = arith.addf %1135, %9 : vector<8x32xf32>
    %cst_533 = arith.constant 0.000000e+00 : f32
    %1137 = vector.broadcast %cst_533 : f32 to vector<8x32xf32>
    %1138 = arith.maximumf %1136, %1137 : vector<8x32xf32>
    %cst_534 = arith.constant dense<0.000000e+00> : vector<8x32xf32>
    %1139 = tpu.matmul %1134, %1, %cst_534 {dimension_numbers = #tpu.dot_dimension_numbers<[1], [0], [0], [1], [0, 0, 1, 1], [], []>} : vector<8x32xf32>, vector<32x32xf32>, vector<8x32xf32> -> vector<8x32xf32>
    %1140 = arith.addf %1139, %9 : vector<8x32xf32>
    %cst_535 = arith.constant 0.000000e+00 : f32
    %1141 = vector.broadcast %cst_535 : f32 to vector<8x32xf32>
    %1142 = arith.maximumf %1140, %1141 : vector<8x32xf32>
    %cst_536 = arith.constant dense<0.000000e+00> : vector<8x32xf32>
    %1143 = tpu.matmul %1138, %2, %cst_536 {dimension_numbers = #tpu.dot_dimension_numbers<[1], [0], [0], [1], [0, 0, 1, 1], [], []>} : vector<8x32xf32>, vector<32x32xf32>, vector<8x32xf32> -> vector<8x32xf32>
    %1144 = arith.addf %1143, %12 : vector<8x32xf32>
    %cst_537 = arith.constant 0.000000e+00 : f32
    %1145 = vector.broadcast %cst_537 : f32 to vector<8x32xf32>
    %1146 = arith.maximumf %1144, %1145 : vector<8x32xf32>
    %cst_538 = arith.constant dense<0.000000e+00> : vector<8x32xf32>
    %1147 = tpu.matmul %1142, %2, %cst_538 {dimension_numbers = #tpu.dot_dimension_numbers<[1], [0], [0], [1], [0, 0, 1, 1], [], []>} : vector<8x32xf32>, vector<32x32xf32>, vector<8x32xf32> -> vector<8x32xf32>
    %1148 = arith.addf %1147, %12 : vector<8x32xf32>
    %cst_539 = arith.constant 0.000000e+00 : f32
    %1149 = vector.broadcast %cst_539 : f32 to vector<8x32xf32>
    %1150 = arith.maximumf %1148, %1149 : vector<8x32xf32>
    %cst_540 = arith.constant dense<0.000000e+00> : vector<8x16xf32>
    %1151 = tpu.matmul %1146, %3, %cst_540 {dimension_numbers = #tpu.dot_dimension_numbers<[1], [0], [0], [1], [0, 0, 1, 1], [], []>} : vector<8x32xf32>, vector<32x16xf32>, vector<8x16xf32> -> vector<8x16xf32>
    %1152 = arith.addf %1151, %15 : vector<8x16xf32>
    %cst_541 = arith.constant dense<0.000000e+00> : vector<8x16xf32>
    %1153 = tpu.matmul %1150, %3, %cst_541 {dimension_numbers = #tpu.dot_dimension_numbers<[1], [0], [0], [1], [0, 0, 1, 1], [], []>} : vector<8x32xf32>, vector<32x16xf32>, vector<8x16xf32> -> vector<8x16xf32>
    %1154 = arith.addf %1153, %15 : vector<8x16xf32>
    %1155 = arith.mulf %1152, %22 : vector<8x16xf32>
    %1156 = arith.addf %1124, %1155 : vector<8x16xf32>
    %1157 = arith.mulf %1154, %23 : vector<8x16xf32>
    %1158 = arith.addf %1126, %1157 : vector<8x16xf32>
    %c5_i32_542 = arith.constant 5 : i32
    %cst_543 = arith.constant dense<0.000000e+00> : vector<8x32xf32>
    %1159 = tpu.matmul %1156, %0, %cst_543 {dimension_numbers = #tpu.dot_dimension_numbers<[1], [0], [0], [1], [0, 0, 1, 1], [], []>} : vector<8x16xf32>, vector<16x32xf32>, vector<8x32xf32> -> vector<8x32xf32>
    %1160 = arith.addf %1159, %6 : vector<8x32xf32>
    %cst_544 = arith.constant 0.000000e+00 : f32
    %1161 = vector.broadcast %cst_544 : f32 to vector<8x32xf32>
    %1162 = arith.maximumf %1160, %1161 : vector<8x32xf32>
    %cst_545 = arith.constant dense<0.000000e+00> : vector<8x32xf32>
    %1163 = tpu.matmul %1158, %0, %cst_545 {dimension_numbers = #tpu.dot_dimension_numbers<[1], [0], [0], [1], [0, 0, 1, 1], [], []>} : vector<8x16xf32>, vector<16x32xf32>, vector<8x32xf32> -> vector<8x32xf32>
    %1164 = arith.addf %1163, %6 : vector<8x32xf32>
    %cst_546 = arith.constant 0.000000e+00 : f32
    %1165 = vector.broadcast %cst_546 : f32 to vector<8x32xf32>
    %1166 = arith.maximumf %1164, %1165 : vector<8x32xf32>
    %cst_547 = arith.constant dense<0.000000e+00> : vector<8x32xf32>
    %1167 = tpu.matmul %1162, %1, %cst_547 {dimension_numbers = #tpu.dot_dimension_numbers<[1], [0], [0], [1], [0, 0, 1, 1], [], []>} : vector<8x32xf32>, vector<32x32xf32>, vector<8x32xf32> -> vector<8x32xf32>
    %1168 = arith.addf %1167, %9 : vector<8x32xf32>
    %cst_548 = arith.constant 0.000000e+00 : f32
    %1169 = vector.broadcast %cst_548 : f32 to vector<8x32xf32>
    %1170 = arith.maximumf %1168, %1169 : vector<8x32xf32>
    %cst_549 = arith.constant dense<0.000000e+00> : vector<8x32xf32>
    %1171 = tpu.matmul %1166, %1, %cst_549 {dimension_numbers = #tpu.dot_dimension_numbers<[1], [0], [0], [1], [0, 0, 1, 1], [], []>} : vector<8x32xf32>, vector<32x32xf32>, vector<8x32xf32> -> vector<8x32xf32>
    %1172 = arith.addf %1171, %9 : vector<8x32xf32>
    %cst_550 = arith.constant 0.000000e+00 : f32
    %1173 = vector.broadcast %cst_550 : f32 to vector<8x32xf32>
    %1174 = arith.maximumf %1172, %1173 : vector<8x32xf32>
    %cst_551 = arith.constant dense<0.000000e+00> : vector<8x32xf32>
    %1175 = tpu.matmul %1170, %2, %cst_551 {dimension_numbers = #tpu.dot_dimension_numbers<[1], [0], [0], [1], [0, 0, 1, 1], [], []>} : vector<8x32xf32>, vector<32x32xf32>, vector<8x32xf32> -> vector<8x32xf32>
    %1176 = arith.addf %1175, %12 : vector<8x32xf32>
    %cst_552 = arith.constant 0.000000e+00 : f32
    %1177 = vector.broadcast %cst_552 : f32 to vector<8x32xf32>
    %1178 = arith.maximumf %1176, %1177 : vector<8x32xf32>
    %cst_553 = arith.constant dense<0.000000e+00> : vector<8x32xf32>
    %1179 = tpu.matmul %1174, %2, %cst_553 {dimension_numbers = #tpu.dot_dimension_numbers<[1], [0], [0], [1], [0, 0, 1, 1], [], []>} : vector<8x32xf32>, vector<32x32xf32>, vector<8x32xf32> -> vector<8x32xf32>
    %1180 = arith.addf %1179, %12 : vector<8x32xf32>
    %cst_554 = arith.constant 0.000000e+00 : f32
    %1181 = vector.broadcast %cst_554 : f32 to vector<8x32xf32>
    %1182 = arith.maximumf %1180, %1181 : vector<8x32xf32>
    %cst_555 = arith.constant dense<0.000000e+00> : vector<8x16xf32>
    %1183 = tpu.matmul %1178, %3, %cst_555 {dimension_numbers = #tpu.dot_dimension_numbers<[1], [0], [0], [1], [0, 0, 1, 1], [], []>} : vector<8x32xf32>, vector<32x16xf32>, vector<8x16xf32> -> vector<8x16xf32>
    %1184 = arith.addf %1183, %15 : vector<8x16xf32>
    %cst_556 = arith.constant dense<0.000000e+00> : vector<8x16xf32>
    %1185 = tpu.matmul %1182, %3, %cst_556 {dimension_numbers = #tpu.dot_dimension_numbers<[1], [0], [0], [1], [0, 0, 1, 1], [], []>} : vector<8x32xf32>, vector<32x16xf32>, vector<8x16xf32> -> vector<8x16xf32>
    %1186 = arith.addf %1185, %15 : vector<8x16xf32>
    %1187 = arith.mulf %1184, %22 : vector<8x16xf32>
    %1188 = arith.addf %1156, %1187 : vector<8x16xf32>
    %1189 = arith.mulf %1186, %23 : vector<8x16xf32>
    %1190 = arith.addf %1158, %1189 : vector<8x16xf32>
    %c6_i32_557 = arith.constant 6 : i32
    %cst_558 = arith.constant dense<0.000000e+00> : vector<8x32xf32>
    %1191 = tpu.matmul %1188, %0, %cst_558 {dimension_numbers = #tpu.dot_dimension_numbers<[1], [0], [0], [1], [0, 0, 1, 1], [], []>} : vector<8x16xf32>, vector<16x32xf32>, vector<8x32xf32> -> vector<8x32xf32>
    %1192 = arith.addf %1191, %6 : vector<8x32xf32>
    %cst_559 = arith.constant 0.000000e+00 : f32
    %1193 = vector.broadcast %cst_559 : f32 to vector<8x32xf32>
    %1194 = arith.maximumf %1192, %1193 : vector<8x32xf32>
    %cst_560 = arith.constant dense<0.000000e+00> : vector<8x32xf32>
    %1195 = tpu.matmul %1190, %0, %cst_560 {dimension_numbers = #tpu.dot_dimension_numbers<[1], [0], [0], [1], [0, 0, 1, 1], [], []>} : vector<8x16xf32>, vector<16x32xf32>, vector<8x32xf32> -> vector<8x32xf32>
    %1196 = arith.addf %1195, %6 : vector<8x32xf32>
    %cst_561 = arith.constant 0.000000e+00 : f32
    %1197 = vector.broadcast %cst_561 : f32 to vector<8x32xf32>
    %1198 = arith.maximumf %1196, %1197 : vector<8x32xf32>
    %cst_562 = arith.constant dense<0.000000e+00> : vector<8x32xf32>
    %1199 = tpu.matmul %1194, %1, %cst_562 {dimension_numbers = #tpu.dot_dimension_numbers<[1], [0], [0], [1], [0, 0, 1, 1], [], []>} : vector<8x32xf32>, vector<32x32xf32>, vector<8x32xf32> -> vector<8x32xf32>
    %1200 = arith.addf %1199, %9 : vector<8x32xf32>
    %cst_563 = arith.constant 0.000000e+00 : f32
    %1201 = vector.broadcast %cst_563 : f32 to vector<8x32xf32>
    %1202 = arith.maximumf %1200, %1201 : vector<8x32xf32>
    %cst_564 = arith.constant dense<0.000000e+00> : vector<8x32xf32>
    %1203 = tpu.matmul %1198, %1, %cst_564 {dimension_numbers = #tpu.dot_dimension_numbers<[1], [0], [0], [1], [0, 0, 1, 1], [], []>} : vector<8x32xf32>, vector<32x32xf32>, vector<8x32xf32> -> vector<8x32xf32>
    %1204 = arith.addf %1203, %9 : vector<8x32xf32>
    %cst_565 = arith.constant 0.000000e+00 : f32
    %1205 = vector.broadcast %cst_565 : f32 to vector<8x32xf32>
    %1206 = arith.maximumf %1204, %1205 : vector<8x32xf32>
    %cst_566 = arith.constant dense<0.000000e+00> : vector<8x32xf32>
    %1207 = tpu.matmul %1202, %2, %cst_566 {dimension_numbers = #tpu.dot_dimension_numbers<[1], [0], [0], [1], [0, 0, 1, 1], [], []>} : vector<8x32xf32>, vector<32x32xf32>, vector<8x32xf32> -> vector<8x32xf32>
    %1208 = arith.addf %1207, %12 : vector<8x32xf32>
    %cst_567 = arith.constant 0.000000e+00 : f32
    %1209 = vector.broadcast %cst_567 : f32 to vector<8x32xf32>
    %1210 = arith.maximumf %1208, %1209 : vector<8x32xf32>
    %cst_568 = arith.constant dense<0.000000e+00> : vector<8x32xf32>
    %1211 = tpu.matmul %1206, %2, %cst_568 {dimension_numbers = #tpu.dot_dimension_numbers<[1], [0], [0], [1], [0, 0, 1, 1], [], []>} : vector<8x32xf32>, vector<32x32xf32>, vector<8x32xf32> -> vector<8x32xf32>
    %1212 = arith.addf %1211, %12 : vector<8x32xf32>
    %cst_569 = arith.constant 0.000000e+00 : f32
    %1213 = vector.broadcast %cst_569 : f32 to vector<8x32xf32>
    %1214 = arith.maximumf %1212, %1213 : vector<8x32xf32>
    %cst_570 = arith.constant dense<0.000000e+00> : vector<8x16xf32>
    %1215 = tpu.matmul %1210, %3, %cst_570 {dimension_numbers = #tpu.dot_dimension_numbers<[1], [0], [0], [1], [0, 0, 1, 1], [], []>} : vector<8x32xf32>, vector<32x16xf32>, vector<8x16xf32> -> vector<8x16xf32>
    %1216 = arith.addf %1215, %15 : vector<8x16xf32>
    %cst_571 = arith.constant dense<0.000000e+00> : vector<8x16xf32>
    %1217 = tpu.matmul %1214, %3, %cst_571 {dimension_numbers = #tpu.dot_dimension_numbers<[1], [0], [0], [1], [0, 0, 1, 1], [], []>} : vector<8x32xf32>, vector<32x16xf32>, vector<8x16xf32> -> vector<8x16xf32>
    %1218 = arith.addf %1217, %15 : vector<8x16xf32>
    %1219 = arith.mulf %1216, %22 : vector<8x16xf32>
    %1220 = arith.addf %1188, %1219 : vector<8x16xf32>
    %1221 = arith.mulf %1218, %23 : vector<8x16xf32>
    %1222 = arith.addf %1190, %1221 : vector<8x16xf32>
    %c7_i32_572 = arith.constant 7 : i32
    %cst_573 = arith.constant dense<0.000000e+00> : vector<8x32xf32>
    %1223 = tpu.matmul %1220, %0, %cst_573 {dimension_numbers = #tpu.dot_dimension_numbers<[1], [0], [0], [1], [0, 0, 1, 1], [], []>} : vector<8x16xf32>, vector<16x32xf32>, vector<8x32xf32> -> vector<8x32xf32>
    %1224 = arith.addf %1223, %6 : vector<8x32xf32>
    %cst_574 = arith.constant 0.000000e+00 : f32
    %1225 = vector.broadcast %cst_574 : f32 to vector<8x32xf32>
    %1226 = arith.maximumf %1224, %1225 : vector<8x32xf32>
    %cst_575 = arith.constant dense<0.000000e+00> : vector<8x32xf32>
    %1227 = tpu.matmul %1222, %0, %cst_575 {dimension_numbers = #tpu.dot_dimension_numbers<[1], [0], [0], [1], [0, 0, 1, 1], [], []>} : vector<8x16xf32>, vector<16x32xf32>, vector<8x32xf32> -> vector<8x32xf32>
    %1228 = arith.addf %1227, %6 : vector<8x32xf32>
    %cst_576 = arith.constant 0.000000e+00 : f32
    %1229 = vector.broadcast %cst_576 : f32 to vector<8x32xf32>
    %1230 = arith.maximumf %1228, %1229 : vector<8x32xf32>
    %cst_577 = arith.constant dense<0.000000e+00> : vector<8x32xf32>
    %1231 = tpu.matmul %1226, %1, %cst_577 {dimension_numbers = #tpu.dot_dimension_numbers<[1], [0], [0], [1], [0, 0, 1, 1], [], []>} : vector<8x32xf32>, vector<32x32xf32>, vector<8x32xf32> -> vector<8x32xf32>
    %1232 = arith.addf %1231, %9 : vector<8x32xf32>
    %cst_578 = arith.constant 0.000000e+00 : f32
    %1233 = vector.broadcast %cst_578 : f32 to vector<8x32xf32>
    %1234 = arith.maximumf %1232, %1233 : vector<8x32xf32>
    %cst_579 = arith.constant dense<0.000000e+00> : vector<8x32xf32>
    %1235 = tpu.matmul %1230, %1, %cst_579 {dimension_numbers = #tpu.dot_dimension_numbers<[1], [0], [0], [1], [0, 0, 1, 1], [], []>} : vector<8x32xf32>, vector<32x32xf32>, vector<8x32xf32> -> vector<8x32xf32>
    %1236 = arith.addf %1235, %9 : vector<8x32xf32>
    %cst_580 = arith.constant 0.000000e+00 : f32
    %1237 = vector.broadcast %cst_580 : f32 to vector<8x32xf32>
    %1238 = arith.maximumf %1236, %1237 : vector<8x32xf32>
    %cst_581 = arith.constant dense<0.000000e+00> : vector<8x32xf32>
    %1239 = tpu.matmul %1234, %2, %cst_581 {dimension_numbers = #tpu.dot_dimension_numbers<[1], [0], [0], [1], [0, 0, 1, 1], [], []>} : vector<8x32xf32>, vector<32x32xf32>, vector<8x32xf32> -> vector<8x32xf32>
    %1240 = arith.addf %1239, %12 : vector<8x32xf32>
    %cst_582 = arith.constant 0.000000e+00 : f32
    %1241 = vector.broadcast %cst_582 : f32 to vector<8x32xf32>
    %1242 = arith.maximumf %1240, %1241 : vector<8x32xf32>
    %cst_583 = arith.constant dense<0.000000e+00> : vector<8x32xf32>
    %1243 = tpu.matmul %1238, %2, %cst_583 {dimension_numbers = #tpu.dot_dimension_numbers<[1], [0], [0], [1], [0, 0, 1, 1], [], []>} : vector<8x32xf32>, vector<32x32xf32>, vector<8x32xf32> -> vector<8x32xf32>
    %1244 = arith.addf %1243, %12 : vector<8x32xf32>
    %cst_584 = arith.constant 0.000000e+00 : f32
    %1245 = vector.broadcast %cst_584 : f32 to vector<8x32xf32>
    %1246 = arith.maximumf %1244, %1245 : vector<8x32xf32>
    %cst_585 = arith.constant dense<0.000000e+00> : vector<8x16xf32>
    %1247 = tpu.matmul %1242, %3, %cst_585 {dimension_numbers = #tpu.dot_dimension_numbers<[1], [0], [0], [1], [0, 0, 1, 1], [], []>} : vector<8x32xf32>, vector<32x16xf32>, vector<8x16xf32> -> vector<8x16xf32>
    %1248 = arith.addf %1247, %15 : vector<8x16xf32>
    %cst_586 = arith.constant dense<0.000000e+00> : vector<8x16xf32>
    %1249 = tpu.matmul %1246, %3, %cst_586 {dimension_numbers = #tpu.dot_dimension_numbers<[1], [0], [0], [1], [0, 0, 1, 1], [], []>} : vector<8x32xf32>, vector<32x16xf32>, vector<8x16xf32> -> vector<8x16xf32>
    %1250 = arith.addf %1249, %15 : vector<8x16xf32>
    %1251 = arith.mulf %1248, %22 : vector<8x16xf32>
    %1252 = arith.addf %1220, %1251 : vector<8x16xf32>
    %1253 = arith.mulf %1250, %23 : vector<8x16xf32>
    %1254 = arith.addf %1222, %1253 : vector<8x16xf32>
    %c8_i32_587 = arith.constant 8 : i32
    %cst_588 = arith.constant dense<0.000000e+00> : vector<8x32xf32>
    %1255 = tpu.matmul %1252, %0, %cst_588 {dimension_numbers = #tpu.dot_dimension_numbers<[1], [0], [0], [1], [0, 0, 1, 1], [], []>} : vector<8x16xf32>, vector<16x32xf32>, vector<8x32xf32> -> vector<8x32xf32>
    %1256 = arith.addf %1255, %6 : vector<8x32xf32>
    %cst_589 = arith.constant 0.000000e+00 : f32
    %1257 = vector.broadcast %cst_589 : f32 to vector<8x32xf32>
    %1258 = arith.maximumf %1256, %1257 : vector<8x32xf32>
    %cst_590 = arith.constant dense<0.000000e+00> : vector<8x32xf32>
    %1259 = tpu.matmul %1254, %0, %cst_590 {dimension_numbers = #tpu.dot_dimension_numbers<[1], [0], [0], [1], [0, 0, 1, 1], [], []>} : vector<8x16xf32>, vector<16x32xf32>, vector<8x32xf32> -> vector<8x32xf32>
    %1260 = arith.addf %1259, %6 : vector<8x32xf32>
    %cst_591 = arith.constant 0.000000e+00 : f32
    %1261 = vector.broadcast %cst_591 : f32 to vector<8x32xf32>
    %1262 = arith.maximumf %1260, %1261 : vector<8x32xf32>
    %cst_592 = arith.constant dense<0.000000e+00> : vector<8x32xf32>
    %1263 = tpu.matmul %1258, %1, %cst_592 {dimension_numbers = #tpu.dot_dimension_numbers<[1], [0], [0], [1], [0, 0, 1, 1], [], []>} : vector<8x32xf32>, vector<32x32xf32>, vector<8x32xf32> -> vector<8x32xf32>
    %1264 = arith.addf %1263, %9 : vector<8x32xf32>
    %cst_593 = arith.constant 0.000000e+00 : f32
    %1265 = vector.broadcast %cst_593 : f32 to vector<8x32xf32>
    %1266 = arith.maximumf %1264, %1265 : vector<8x32xf32>
    %cst_594 = arith.constant dense<0.000000e+00> : vector<8x32xf32>
    %1267 = tpu.matmul %1262, %1, %cst_594 {dimension_numbers = #tpu.dot_dimension_numbers<[1], [0], [0], [1], [0, 0, 1, 1], [], []>} : vector<8x32xf32>, vector<32x32xf32>, vector<8x32xf32> -> vector<8x32xf32>
    %1268 = arith.addf %1267, %9 : vector<8x32xf32>
    %cst_595 = arith.constant 0.000000e+00 : f32
    %1269 = vector.broadcast %cst_595 : f32 to vector<8x32xf32>
    %1270 = arith.maximumf %1268, %1269 : vector<8x32xf32>
    %cst_596 = arith.constant dense<0.000000e+00> : vector<8x32xf32>
    %1271 = tpu.matmul %1266, %2, %cst_596 {dimension_numbers = #tpu.dot_dimension_numbers<[1], [0], [0], [1], [0, 0, 1, 1], [], []>} : vector<8x32xf32>, vector<32x32xf32>, vector<8x32xf32> -> vector<8x32xf32>
    %1272 = arith.addf %1271, %12 : vector<8x32xf32>
    %cst_597 = arith.constant 0.000000e+00 : f32
    %1273 = vector.broadcast %cst_597 : f32 to vector<8x32xf32>
    %1274 = arith.maximumf %1272, %1273 : vector<8x32xf32>
    %cst_598 = arith.constant dense<0.000000e+00> : vector<8x32xf32>
    %1275 = tpu.matmul %1270, %2, %cst_598 {dimension_numbers = #tpu.dot_dimension_numbers<[1], [0], [0], [1], [0, 0, 1, 1], [], []>} : vector<8x32xf32>, vector<32x32xf32>, vector<8x32xf32> -> vector<8x32xf32>
    %1276 = arith.addf %1275, %12 : vector<8x32xf32>
    %cst_599 = arith.constant 0.000000e+00 : f32
    %1277 = vector.broadcast %cst_599 : f32 to vector<8x32xf32>
    %1278 = arith.maximumf %1276, %1277 : vector<8x32xf32>
    %cst_600 = arith.constant dense<0.000000e+00> : vector<8x16xf32>
    %1279 = tpu.matmul %1274, %3, %cst_600 {dimension_numbers = #tpu.dot_dimension_numbers<[1], [0], [0], [1], [0, 0, 1, 1], [], []>} : vector<8x32xf32>, vector<32x16xf32>, vector<8x16xf32> -> vector<8x16xf32>
    %1280 = arith.addf %1279, %15 : vector<8x16xf32>
    %cst_601 = arith.constant dense<0.000000e+00> : vector<8x16xf32>
    %1281 = tpu.matmul %1278, %3, %cst_601 {dimension_numbers = #tpu.dot_dimension_numbers<[1], [0], [0], [1], [0, 0, 1, 1], [], []>} : vector<8x32xf32>, vector<32x16xf32>, vector<8x16xf32> -> vector<8x16xf32>
    %1282 = arith.addf %1281, %15 : vector<8x16xf32>
    %1283 = arith.mulf %1280, %22 : vector<8x16xf32>
    %1284 = arith.addf %1252, %1283 : vector<8x16xf32>
    %1285 = arith.mulf %1282, %23 : vector<8x16xf32>
    %1286 = arith.addf %1254, %1285 : vector<8x16xf32>
    %c9_i32_602 = arith.constant 9 : i32
    %cst_603 = arith.constant dense<0.000000e+00> : vector<8x32xf32>
    %1287 = tpu.matmul %1284, %0, %cst_603 {dimension_numbers = #tpu.dot_dimension_numbers<[1], [0], [0], [1], [0, 0, 1, 1], [], []>} : vector<8x16xf32>, vector<16x32xf32>, vector<8x32xf32> -> vector<8x32xf32>
    %1288 = arith.addf %1287, %6 : vector<8x32xf32>
    %cst_604 = arith.constant 0.000000e+00 : f32
    %1289 = vector.broadcast %cst_604 : f32 to vector<8x32xf32>
    %1290 = arith.maximumf %1288, %1289 : vector<8x32xf32>
    %cst_605 = arith.constant dense<0.000000e+00> : vector<8x32xf32>
    %1291 = tpu.matmul %1286, %0, %cst_605 {dimension_numbers = #tpu.dot_dimension_numbers<[1], [0], [0], [1], [0, 0, 1, 1], [], []>} : vector<8x16xf32>, vector<16x32xf32>, vector<8x32xf32> -> vector<8x32xf32>
    %1292 = arith.addf %1291, %6 : vector<8x32xf32>
    %cst_606 = arith.constant 0.000000e+00 : f32
    %1293 = vector.broadcast %cst_606 : f32 to vector<8x32xf32>
    %1294 = arith.maximumf %1292, %1293 : vector<8x32xf32>
    %cst_607 = arith.constant dense<0.000000e+00> : vector<8x32xf32>
    %1295 = tpu.matmul %1290, %1, %cst_607 {dimension_numbers = #tpu.dot_dimension_numbers<[1], [0], [0], [1], [0, 0, 1, 1], [], []>} : vector<8x32xf32>, vector<32x32xf32>, vector<8x32xf32> -> vector<8x32xf32>
    %1296 = arith.addf %1295, %9 : vector<8x32xf32>
    %cst_608 = arith.constant 0.000000e+00 : f32
    %1297 = vector.broadcast %cst_608 : f32 to vector<8x32xf32>
    %1298 = arith.maximumf %1296, %1297 : vector<8x32xf32>
    %cst_609 = arith.constant dense<0.000000e+00> : vector<8x32xf32>
    %1299 = tpu.matmul %1294, %1, %cst_609 {dimension_numbers = #tpu.dot_dimension_numbers<[1], [0], [0], [1], [0, 0, 1, 1], [], []>} : vector<8x32xf32>, vector<32x32xf32>, vector<8x32xf32> -> vector<8x32xf32>
    %1300 = arith.addf %1299, %9 : vector<8x32xf32>
    %cst_610 = arith.constant 0.000000e+00 : f32
    %1301 = vector.broadcast %cst_610 : f32 to vector<8x32xf32>
    %1302 = arith.maximumf %1300, %1301 : vector<8x32xf32>
    %cst_611 = arith.constant dense<0.000000e+00> : vector<8x32xf32>
    %1303 = tpu.matmul %1298, %2, %cst_611 {dimension_numbers = #tpu.dot_dimension_numbers<[1], [0], [0], [1], [0, 0, 1, 1], [], []>} : vector<8x32xf32>, vector<32x32xf32>, vector<8x32xf32> -> vector<8x32xf32>
    %1304 = arith.addf %1303, %12 : vector<8x32xf32>
    %cst_612 = arith.constant 0.000000e+00 : f32
    %1305 = vector.broadcast %cst_612 : f32 to vector<8x32xf32>
    %1306 = arith.maximumf %1304, %1305 : vector<8x32xf32>
    %cst_613 = arith.constant dense<0.000000e+00> : vector<8x32xf32>
    %1307 = tpu.matmul %1302, %2, %cst_613 {dimension_numbers = #tpu.dot_dimension_numbers<[1], [0], [0], [1], [0, 0, 1, 1], [], []>} : vector<8x32xf32>, vector<32x32xf32>, vector<8x32xf32> -> vector<8x32xf32>
    %1308 = arith.addf %1307, %12 : vector<8x32xf32>
    %cst_614 = arith.constant 0.000000e+00 : f32
    %1309 = vector.broadcast %cst_614 : f32 to vector<8x32xf32>
    %1310 = arith.maximumf %1308, %1309 : vector<8x32xf32>
    %cst_615 = arith.constant dense<0.000000e+00> : vector<8x16xf32>
    %1311 = tpu.matmul %1306, %3, %cst_615 {dimension_numbers = #tpu.dot_dimension_numbers<[1], [0], [0], [1], [0, 0, 1, 1], [], []>} : vector<8x32xf32>, vector<32x16xf32>, vector<8x16xf32> -> vector<8x16xf32>
    %1312 = arith.addf %1311, %15 : vector<8x16xf32>
    %cst_616 = arith.constant dense<0.000000e+00> : vector<8x16xf32>
    %1313 = tpu.matmul %1310, %3, %cst_616 {dimension_numbers = #tpu.dot_dimension_numbers<[1], [0], [0], [1], [0, 0, 1, 1], [], []>} : vector<8x32xf32>, vector<32x16xf32>, vector<8x16xf32> -> vector<8x16xf32>
    %1314 = arith.addf %1313, %15 : vector<8x16xf32>
    %1315 = arith.mulf %1312, %22 : vector<8x16xf32>
    %1316 = arith.addf %1284, %1315 : vector<8x16xf32>
    %1317 = arith.mulf %1314, %23 : vector<8x16xf32>
    %1318 = arith.addf %1286, %1317 : vector<8x16xf32>
    %1319 = tpu.concatenate %1316, %1318 in 0 : vector<8x16xf32>, vector<8x16xf32> -> vector<16x16xf32>
    %c4 = arith.constant 4 : index
    %c0_617 = arith.constant 0 : index
    %c0_618 = arith.constant 0 : index
    %1320 = vector.load %arg11[%c4, %c0_617, %c0_618] : memref<5x16x16xf32, #tpu.memory_space<vmem>>, vector<1x16x16xf32>
    %1321 = vector.shape_cast %1320 : vector<1x16x16xf32> to vector<16x16xf32>
    %1322 = vector.shape_cast %1319 : vector<16x16xf32> to vector<1x16x16xf32>
    tpu.vector_store %arg11[%c4, %c0_617, %c0_618], %1322 {strides = array<i32>} : memref<5x16x16xf32, #tpu.memory_space<vmem>>, vector<1x16x16xf32>,
    return
  }
  func.func @transform_0(%arg0: i32) -> (i32, i32) {
    %c0_i32 = arith.constant 0 : i32
    %c0_i32_0 = arith.constant 0 : i32
    return %arg0, %c0_i32 : i32, i32
  }
  func.func @transform_1(%arg0: i32) -> (i32, i32) {
    %c0_i32 = arith.constant 0 : i32
    %c0_i32_0 = arith.constant 0 : i32
    return %arg0, %c0_i32 : i32, i32
  }
  func.func @transform_2(%arg0: i32) -> (i32, i32) {
    %c0_i32 = arith.constant 0 : i32
    %c0_i32_0 = arith.constant 0 : i32
    %c0_i32_1 = arith.constant 0 : i32
    return %c0_i32, %c0_i32_0 : i32, i32
  }
  func.func @transform_3(%arg0: i32) -> (i32, i32) {
    %c0_i32 = arith.constant 0 : i32
    %c0_i32_0 = arith.constant 0 : i32
    %c0_i32_1 = arith.constant 0 : i32
    return %c0_i32, %c0_i32_0 : i32, i32
  }
  func.func @transform_4(%arg0: i32) -> (i32, i32) {
    %c0_i32 = arith.constant 0 : i32
    %c0_i32_0 = arith.constant 0 : i32
    %c0_i32_1 = arith.constant 0 : i32
    return %c0_i32, %c0_i32_0 : i32, i32
  }
  func.func @transform_5(%arg0: i32) -> (i32, i32) {
    %c0_i32 = arith.constant 0 : i32
    %c0_i32_0 = arith.constant 0 : i32
    %c0_i32_1 = arith.constant 0 : i32
    return %c0_i32, %c0_i32_0 : i32, i32
  }
  func.func @transform_6(%arg0: i32) -> (i32, i32) {
    %c0_i32 = arith.constant 0 : i32
    %c0_i32_0 = arith.constant 0 : i32
    %c0_i32_1 = arith.constant 0 : i32
    return %c0_i32, %c0_i32_0 : i32, i32
  }
  func.func @transform_7(%arg0: i32) -> (i32, i32) {
    %c0_i32 = arith.constant 0 : i32
    %c0_i32_0 = arith.constant 0 : i32
    %c0_i32_1 = arith.constant 0 : i32
    return %c0_i32, %c0_i32_0 : i32, i32
  }
  func.func @transform_8(%arg0: i32) -> (i32, i32) {
    %c0_i32 = arith.constant 0 : i32
    %c0_i32_0 = arith.constant 0 : i32
    %c0_i32_1 = arith.constant 0 : i32
    return %c0_i32, %c0_i32_0 : i32, i32
  }
  func.func @transform_9(%arg0: i32) -> (i32, i32) {
    %c0_i32 = arith.constant 0 : i32
    %c0_i32_0 = arith.constant 0 : i32
    %c0_i32_1 = arith.constant 0 : i32
    return %c0_i32, %c0_i32_0 : i32, i32
  }
  func.func @transform_10(%arg0: i32) -> (i32, i32, i32) {
    %c0_i32 = arith.constant 0 : i32
    %c0_i32_0 = arith.constant 0 : i32
    %c0_i32_1 = arith.constant 0 : i32
    return %c0_i32, %arg0, %c0_i32_0 : i32, i32, i32
  }
}

</mosaic_0001>

<bundles_post_ra>
// kernel: tpu_custom_call.1
= control target key start
LH: loop header
LB: loop body
LE: loop exit
PB: predicated region body
PF: predicated region fallthrough
CT: control target
= control target key end

     0   :  { %15 = vsyncpa [#allocation3], 0  ;;  %s33803_s0 = inlined_call_operand.hbm [shape: f32[16,16], index: 0, kind: input, shape index: {}]   ;;  %s33804_s1 = inlined_call_operand.vmem [shape: f32[16,1], index: 1, kind: input, shape index: {}]   ;;  %s33805_s2 = inlined_call_operand.hbm [shape: f32[16,32], index: 2, kind: input, shape index: {}]   ;;  %s33806_s3 = inlined_call_operand.hbm [shape: f32[1,32], index: 3, kind: input, shape index: {}]   ;;  %s33807_s4 = inlined_call_operand.vmem [shape: f32[32,32], index: 4, kind: input, shape index: {}]   ;;  %s33808_s5 = inlined_call_operand.vmem [shape: f32[1,32], index: 5, kind: input, shape index: {}]   ;;  %s33809_s6 = inlined_call_operand.vmem [shape: f32[32,32], index: 6, kind: input, shape index: {}]   ;;  %s33810_s7 = inlined_call_operand.vmem [shape: f32[1,32], index: 7, kind: input, shape index: {}]   ;;  %s33811_s8 = inlined_call_operand.vmem [shape: f32[32,16], index: 8, kind: input, shape index: {}]   ;;  %s33812_s9 = inlined_call_operand.vmem [shape: f32[1,16], index: 9, kind: input, shape index: {}]   ;;  %s33813_s10 = inlined_call_operand.hbm [shape: f32[5,16,16], index: 10, kind: output, shape index: {}]  }
   0x1   :  { %16 = vsyncpa [#allocation6], 0 }
   0x2   :  { %17 = vsyncpa [#allocation4], 0  ;;  %s30694_s13 = smov [#allocation5]   ;;  %s30695_s15 = smov [#allocation2]  }
   0x3   :  { %s37_s14 = sshll.u32 %s30694_s13, 4  ;;  %s23_s16 = sshll.u32 %s30695_s15, 4  ;;  %s38_s14 = int_to_ptr.vmem [resolvable:$true] %s37_s14  ;;  %s30759_s16 = int_to_ptr.vmem [resolvable:$true] %s23_s16 }
   0x4   :  { %s30600_s19 = scalar_lea.hbm %s33805_s2, 256 }
   0x5   :  { %p30601_p0 = scmp.ne.s32.totalorder %s33805_s2, %s30600_s19  ;;  %p30604_p1 = scmp.lt.u32.totalorder %s30600_s19, %s33805_s2 }
   0x7   :  { %p30606_p2 = pnand %p30604_p1, %p30601_p0 }
   0x9   :  { %30609 = shalt.err (!%p30606_p2)
}
   0xa   :  { %s30610_s24 = scalar_lea.vmem %s38_s14, 256  ;;  %p30615_p4 = scmp.lt.s32.totalorder %s38_s14, %s38_s14 }
   0xb   :  { %p30611_p3 = scmp.ne.s32.totalorder %s38_s14, %s30610_s24  ;;  %p30616_p5 = scmp.lt.s32.totalorder %s30610_s24, %s30610_s24 }
   0xd   :  { %p30617_p6 = por %p30616_p5, %p30615_p4 }
   0xf   :  { %p30618_p7 = pnand %p30617_p6, %p30611_p3 }
  0x11   :  { %30621 = shalt.err (!%p30618_p7)
}
  0x12   :  { %s30696_s25 = smov 128   ;;  %s30697_s26 = smov 8  }
  0x13   :  { %43 = dma.hbm_to_vmem [thread:$0]  %s33805_s2, 256, %s38_s14, [#allocation6], %s30696_s25, %s30696_s25, %s30697_s26  }
  0x14   :  { %s30622_s11 = scalar_lea.hbm %s33803_s0, 256 }
  0x15   :  { %p30623_p8 = scmp.ne.s32.totalorder %s33803_s0, %s30622_s11  ;;  %p30626_p9 = scmp.lt.u32.totalorder %s30622_s11, %s33803_s0 }
  0x17   :  { %p30628_p10 = pnand %p30626_p9, %p30623_p8 }
  0x19   :  { %30631 = shalt.err (!%p30628_p10)
}
  0x1a   :  { %s30632_s18 = scalar_lea.vmem %s30759_s16, 256  ;;  %p30637_p12 = scmp.lt.s32.totalorder %s30759_s16, %s30759_s16 }
  0x1b   :  { %p30633_p11 = scmp.ne.s32.totalorder %s30759_s16, %s30632_s18  ;;  %p30638_p13 = scmp.lt.s32.totalorder %s30632_s18, %s30632_s18 }
  0x1d   :  { %p30639_p0 = por %p30638_p13, %p30637_p12 }
  0x1f   :  { %p30640_p1 = pnand %p30639_p0, %p30633_p11 }
  0x21   :  { %30643 = shalt.err (!%p30640_p1)
}
  0x22   :  { %29 = dma.hbm_to_vmem [thread:$0]  %s33803_s0, 256, %s30759_s16, [#allocation3], %s30696_s25, %s30696_s25, %s30697_s26  }
  0x23   :  { %s30698_s19 = smov [#allocation7]   ;;  %s30644_s23 = scalar_lea.hbm %s33806_s3, 16 }
  0x24   :  { %s50_s20 = sshll.u32 %s30698_s19, 4  ;;  %p30645_p2 = scmp.ne.s32.totalorder %s33806_s3, %s30644_s23  ;;  %s51_s20 = int_to_ptr.vmem [resolvable:$true] %s50_s20 }
  0x25   :  { %p30648_p3 = scmp.lt.u32.totalorder %s30644_s23, %s33806_s3 }
  0x27   :  { %p30650_p4 = pnand %p30648_p3, %p30645_p2 }
  0x29   :  { %30653 = shalt.err (!%p30650_p4)
}
  0x2a   :  { %s30654_s30 = scalar_lea.vmem %s51_s20, 16  ;;  %s30658_s0 = scalar_lea.vmem %s51_s20, 32 }
  0x2b   :  { %p30655_p5 = scmp.ne.s32.totalorder %s51_s20, %s30654_s30  ;;  %p30659_p6 = scmp.lt.s32.totalorder %s51_s20, %s51_s20 }
  0x2c   :  { %p30660_p7 = scmp.lt.s32.totalorder %s30658_s0, %s30654_s30 }
  0x2e   :  { %p30661_p8 = por %p30660_p7, %p30659_p6 }
  0x30   :  { %p30662_p9 = pnand %p30661_p8, %p30655_p5 }
  0x32   :  { %30665 = shalt.err (!%p30662_p9)
}
  0x33   :  { %53 = dma.hbm_to_vmem [thread:$0]  %s33806_s3, 16, %s51_s20, [#allocation6]  }
  0x34   :  { %30688 = dma.done.wait [#allocation3], 256  }
  0x35   :  { %30689 = vsyncadd [#allocation3], 4294967040 }
  0x36   :  { %30690 = dma.done.wait [#allocation6], 272  }
  0x37   :  { %30691 = vsyncadd [#allocation6], 4294967024  ;;  %v30699_v0 = vmov 0.0|0.0   ;;  %vm30700_vm0 = vmmov 0   ;;  %v30701_v1 = vmov 0.0   ;;  %v75_v2 = vld [vmem:[#allocation5] sm:$0xff] }
  0x38   :  { %28889 = vmatprep.subr.bf16.mxu0 %v30699_v0  ;;  %28892 = vmatprep.subr.bf16.mxu1 %v30699_v0  ;;  %v76_v3 = vld [vmem:[#allocation5 + $0x8] sm:$0xff]  ;;  %v77_v4 = vld [vmem:[%s33807_s4] sm:$0xff]  ;;  %v78_v5 = vld [vmem:[%s33807_s4 + $0x8] sm:$0xff]  ;;  %vm131_vm1 = vcmask 130048   ;;  %vm282_vm2 = vcmask 261120   ;;  %v30702_v44 = vmov 0  }
  0x39   :  { %25693 = vmatprep.mubr.msk.f32.mxu0 %vm30700_vm0, %v30701_v1  ;;  %25700 = vmatprep.mubr.msk.f32.mxu1 %vm30700_vm0, %v30701_v1  ;;  %v30820_v6 = vpack.c.bf16 %v76_v3, %v75_v2  ;;  %v30822_v7 = vpack.c.bf16 %v78_v5, %v77_v4  ;;  %v79_v8 = vld [vmem:[%s33807_s4 + $0x10] sm:$0xff]  ;;  %v80_v9 = vld [vmem:[%s33807_s4 + $0x18] sm:$0xff]  ;;  %v30832_v10 = vld [vmem:[#allocation2] sm:$0xff] }
  0x3a   :  { %132 = vst.msk [vmem:[#allocation8] sm:$0xff] %vm131_vm1, %v30832_v10  ;;  %v30838_v11 = vld [vmem:[#allocation2 + $0x8] sm:$0xff]  ;;  %v30846_v12 = vpack.c.bf16 %v80_v9, %v79_v8  ;;  %v30860_v13 = vld [vmem:[#allocation7] ss:$0 sm:$0xff]  ;;  %v83_v23 = vld [vmem:[%s33809_s6 + $0x10] sm:$0xff]  ;;  %30579 = vset.pattern.permute.xlu0 %v30702_v44 }
  0x3b   :  { %28891 = vmatpush3.bf16.msra.mxu0 %v30820_v6  ;;  %28894 = vmatpush3.bf16.msra.mxu1 %v30820_v6  ;;  %133 = vst.msk [vmem:[#allocation8 + $0x8] sm:$0xff] %vm131_vm1, %v30838_v11  ;;  %v81_v14 = vld [vmem:[%s33809_s6] sm:$0xff]  ;;  %v82_v15 = vld [vmem:[%s33809_s6 + $0x8] sm:$0xff]  ;;  %v84_v24 = vld [vmem:[%s33809_s6 + $0x18] sm:$0xff] }
  0x3c   :  { %28895 = vmatprep.subr.bf16.mxu0 %v30699_v0  ;;  %28901 = vmatprep.subr.bf16.mxu1 %v30699_v0  ;;  %v30870_v22 = vpack.c.bf16 %v82_v15, %v81_v14  ;;  %v30880_v27 = vpack.c.bf16 %v84_v24, %v83_v23  ;;  %v30897_v28 = vld [vmem:[%s33808_s5] ss:$0 sm:$0xff]  ;;  %v86_v30 = vld [vmem:[%s33811_s8 + $0x8] sm:$0xff]  ;;  %v87_v38 = vld [vmem:[%s33811_s8 + $0x10] sm:$0xff] }
  0x3d   :  { %v85_v29 = vld [vmem:[%s33811_s8] sm:$0xff]  ;;  %v88_v39 = vld [vmem:[%s33811_s8 + $0x18] sm:$0xff]  ;;  %v120_v45 = vld [vmem:[%s33804_s1 + $0x8] sm:$0xff] }
  0x3e   :  { %25694 = vmatmul.mubr.msk.f32.vlgmr.msra.gmra.mrb[0].mxu0 %vm131_vm1, %v30832_v10  ;;  %25701 = vmatmul.mubr.msk.f32.vlgmr.msra.gmra.mrb[0].mxu1 %vm131_vm1, %v30838_v11  ;;  %v30907_v37 = vpack.c.bf16 %v86_v30, %v85_v29  ;;  %v30917_v42 = vpack.c.bf16 %v88_v39, %v87_v38  ;;  %v119_v43 = vld [vmem:[%s33804_s1] sm:$0xff] }
  0x3f   :  { %28897 = vmatpush3.bf16.msra.mxu0 %v30822_v7  ;;  %28903 = vmatpush3.bf16.msra.mxu1 %v30822_v7  ;;  %v30940_v46 = vld [vmem:[%s33810_s7] ss:$0 sm:$0xff] }
  0x40   :  { %28898 = vmatprep.subr.bf16.mxu0 %v30699_v0  ;;  %28904 = vmatprep.subr.bf16.mxu1 %v30699_v0  ;;  %v30959_v56 = vld [vmem:[%s33812_s9] ss:$0 sm:$0xff] }
  0x41   :  { %25711 = vmatprep.mubr.msk.f32.mxu0 %vm30700_vm0, %v30701_v1  ;;  %25722 = vmatprep.mubr.msk.f32.mxu1 %vm30700_vm0, %v30701_v1 }
  0x42   :  { %123 = vperm.xlu0 %30579, %v119_v43  }
  0x43   :  { %28900 = vmatpush3.bf16.msra.mxu0 %v30846_v12  ;;  %28906 = vmatpush3.bf16.msra.mxu1 %v30846_v12 }
  0x44   :  { %28907 = vmatprep.subr.bf16.mxu0 %v30699_v0  ;;  %28913 = vmatprep.subr.bf16.mxu1 %v30699_v0 }
  0x46   :  { %128 = vperm.xlu0 %30579, %v120_v45  }
  0xc1   :  { %v30954_v55 = vpop.permute.xlu0 %123 }
  0xc5   :  { %v30963_v63 = vpop.permute.xlu0 %128 }
 0x111   :  { %v203_v16 = vpop.f32.mrb[0].mxu0  ;;  %v277_v17 = vpop.f32.mrb[0].mxu1 }
 0x112   :  { %v204_v18 = vadd.f32 %v30860_v13, %v203_v16  ;;  %v278_v19 = vadd.f32 %v30860_v13, %v277_v17  ;;  %v25695_v20 = vpop.f32.mrb[1].mxu0  ;;  %v25702_v21 = vpop.f32.mrb[1].mxu1 }
 0x114   :  { %v207_v25 = vmax.f32 %v204_v18, 0.0  ;;  %v281_v26 = vmax.f32 %v278_v19, 0.0 }
 0x116   :  { %25712 = vmatmul.mubr.msk.f32.vlgmr.msra.gmra.mrb[2].mxu0 %vm282_vm2, %v207_v25  ;;  %25723 = vmatmul.mubr.msk.f32.vlgmr.msra.gmra.mrb[2].mxu1 %vm282_vm2, %v281_v26 }
 0x117   :  { %28909 = vmatpush3.bf16.msra.mxu0 %v30870_v22  ;;  %28915 = vmatpush3.bf16.msra.mxu1 %v30870_v22 }
 0x118   :  { %28910 = vmatprep.subr.bf16.mxu0 %v30699_v0  ;;  %28916 = vmatprep.subr.bf16.mxu1 %v30699_v0 }
 0x119   :  { %25733 = vmatprep.mubr.msk.f32.mxu0 %vm30700_vm0, %v30701_v1  ;;  %25744 = vmatprep.mubr.msk.f32.mxu1 %vm30700_vm0, %v30701_v1 }
 0x11b   :  { %28912 = vmatpush3.bf16.msra.mxu0 %v30880_v27  ;;  %28918 = vmatpush3.bf16.msra.mxu1 %v30880_v27 }
 0x11c   :  { %28919 = vmatprep.subr.bf16.mxu0 %v30699_v0  ;;  %28925 = vmatprep.subr.bf16.mxu1 %v30699_v0 }
 0x1e9   :  { %v352_v31 = vpop.f32.mrb[2].mxu0  ;;  %v426_v32 = vpop.f32.mrb[2].mxu1 }
 0x1ea   :  { %v353_v33 = vadd.f32 %v30897_v28, %v352_v31  ;;  %v427_v34 = vadd.f32 %v30897_v28, %v426_v32  ;;  %v25713_v35 = vpop.f32.mrb[3].mxu0  ;;  %v25724_v36 = vpop.f32.mrb[3].mxu1 }
 0x1ec   :  { %v356_v40 = vmax.f32 %v353_v33, 0.0  ;;  %v430_v41 = vmax.f32 %v427_v34, 0.0 }
 0x1ee   :  { %25734 = vmatmul.mubr.msk.f32.vlgmr.msra.gmra.mrb[4].mxu0 %vm282_vm2, %v356_v40  ;;  %25745 = vmatmul.mubr.msk.f32.vlgmr.msra.gmra.mrb[4].mxu1 %vm282_vm2, %v430_v41 }
 0x1ef   :  { %28921 = vmatpush3.bf16.msra.mxu0 %v30907_v37  ;;  %28927 = vmatpush3.bf16.msra.mxu1 %v30907_v37 }
 0x1f0   :  { %28922 = vmatprep.subr.bf16.mxu0 %v30699_v0  ;;  %28928 = vmatprep.subr.bf16.mxu1 %v30699_v0 }
 0x1f1   :  { %25755 = vmatprep.mubr.msk.f32.mxu0 %vm30700_vm0, %v30701_v1  ;;  %25766 = vmatprep.mubr.msk.f32.mxu1 %vm30700_vm0, %v30701_v1 }
 0x1f3   :  { %28924 = vmatpush3.bf16.msra.mxu0 %v30917_v42  ;;  %28930 = vmatpush3.bf16.msra.mxu1 %v30917_v42 }
 0x1f4   :  { %28931 = vmatprep.subr.bf16.mxu0 %v30699_v0  ;;  %28934 = vmatprep.subr.bf16.mxu1 %v30699_v0 }
 0x2c1   :  { %v500_v47 = vpop.f32.mrb[4].mxu0  ;;  %v574_v48 = vpop.f32.mrb[4].mxu1 }
 0x2c2   :  { %v501_v49 = vadd.f32 %v30940_v46, %v500_v47  ;;  %v575_v50 = vadd.f32 %v30940_v46, %v574_v48  ;;  %v25735_v51 = vpop.f32.mrb[5].mxu0  ;;  %v25746_v52 = vpop.f32.mrb[5].mxu1 }
 0x2c4   :  { %v504_v53 = vmax.f32 %v501_v49, 0.0  ;;  %v578_v54 = vmax.f32 %v575_v50, 0.0 }
 0x2c6   :  { %25756 = vmatmul.mubr.msk.f32.vlgmr.msra.gmra.mrb[6].mxu0 %vm282_vm2, %v504_v53  ;;  %25767 = vmatmul.mubr.msk.f32.vlgmr.msra.gmra.mrb[6].mxu1 %vm282_vm2, %v578_v54 }
 0x2c7   :  { %28933 = vmatpush3.bf16.msra.mxu0 %v30820_v6  ;;  %28936 = vmatpush3.bf16.msra.mxu1 %v30820_v6 }
 0x2c8   :  { %25773 = vmatprep.mubr.msk.f32.mxu0 %vm30700_vm0, %v30701_v1  ;;  %25780 = vmatprep.mubr.msk.f32.mxu1 %vm30700_vm0, %v30701_v1 }
 0x2c9   :  { %28937 = vmatprep.subr.bf16.mxu0 %v30699_v0  ;;  %28943 = vmatprep.subr.bf16.mxu1 %v30699_v0 }
 0x399   :  { %v648_v57 = vpop.f32.mrb[6].mxu0  ;;  %v721_v58 = vpop.f32.mrb[6].mxu1 }
 0x39a   :  { %v649_v59 = vadd.f32 %v30959_v56, %v648_v57  ;;  %v722_v60 = vadd.f32 %v30959_v56, %v721_v58  ;;  %v25757_v61 = vpop.f32.mrb[7].mxu0  ;;  %v25768_v62 = vpop.f32.mrb[7].mxu1 }
 0x39c   :  { %v725_v2 = vmul.f32 %v649_v59, %v30954_v55  ;;  %v727_v3 = vmul.f32 %v722_v60, %v30963_v63 }
 0x39e   :  { %v30968_v4 = vadd.f32 %v725_v2, %v30832_v10  ;;  %v30971_v5 = vadd.f32 %v727_v3, %v30838_v11 }
 0x3a0   :  { %25774 = vmatmul.mubr.msk.f32.vlgmr.msra.gmra.mrb[8].mxu0 %vm131_vm1, %v30968_v4  ;;  %25781 = vmatmul.mubr.msk.f32.vlgmr.msra.gmra.mrb[8].mxu1 %vm131_vm1, %v30971_v5 }
 0x3a1   :  { %28939 = vmatpush3.bf16.msra.mxu0 %v30822_v7  ;;  %28945 = vmatpush3.bf16.msra.mxu1 %v30822_v7 }
 0x3a2   :  { %28940 = vmatprep.subr.bf16.mxu0 %v30699_v0  ;;  %28946 = vmatprep.subr.bf16.mxu1 %v30699_v0 }
 0x3a3   :  { %25791 = vmatprep.mubr.msk.f32.mxu0 %vm30700_vm0, %v30701_v1  ;;  %25802 = vmatprep.mubr.msk.f32.mxu1 %vm30700_vm0, %v30701_v1 }
 0x3a5   :  { %28942 = vmatpush3.bf16.msra.mxu0 %v30846_v12  ;;  %28948 = vmatpush3.bf16.msra.mxu1 %v30846_v12 }
 0x3a6   :  { %28949 = vmatprep.subr.bf16.mxu0 %v30699_v0  ;;  %28955 = vmatprep.subr.bf16.mxu1 %v30699_v0 }
 0x473   :  { %v798_v8 = vpop.f32.mrb[8].mxu0  ;;  %v872_v9 = vpop.f32.mrb[8].mxu1 }
 0x474   :  { %v799_v10 = vadd.f32 %v30860_v13, %v798_v8  ;;  %v873_v11 = vadd.f32 %v30860_v13, %v872_v9  ;;  %v25775_v14 = vpop.f32.mrb[9].mxu0  ;;  %v25782_v15 = vpop.f32.mrb[9].mxu1 }
 0x476   :  { %v802_v16 = vmax.f32 %v799_v10, 0.0  ;;  %v876_v17 = vmax.f32 %v873_v11, 0.0 }
 0x478   :  { %25792 = vmatmul.mubr.msk.f32.vlgmr.msra.gmra.mrb[10].mxu0 %vm282_vm2, %v802_v16  ;;  %25803 = vmatmul.mubr.msk.f32.vlgmr.msra.gmra.mrb[10].mxu1 %vm282_vm2, %v876_v17 }
 0x479   :  { %28951 = vmatpush3.bf16.msra.mxu0 %v30870_v22  ;;  %28957 = vmatpush3.bf16.msra.mxu1 %v30870_v22 }
 0x47a   :  { %28952 = vmatprep.subr.bf16.mxu0 %v30699_v0  ;;  %28958 = vmatprep.subr.bf16.mxu1 %v30699_v0 }
 0x47b   :  { %25813 = vmatprep.mubr.msk.f32.mxu0 %vm30700_vm0, %v30701_v1  ;;  %25824 = vmatprep.mubr.msk.f32.mxu1 %vm30700_vm0, %v30701_v1 }
 0x47d   :  { %28954 = vmatpush3.bf16.msra.mxu0 %v30880_v27  ;;  %28960 = vmatpush3.bf16.msra.mxu1 %v30880_v27 }
 0x47e   :  { %28961 = vmatprep.subr.bf16.mxu0 %v30699_v0  ;;  %28967 = vmatprep.subr.bf16.mxu1 %v30699_v0 }
 0x54b   :  { %v946_v18 = vpop.f32.mrb[10].mxu0  ;;  %v1020_v19 = vpop.f32.mrb[10].mxu1 }
 0x54c   :  { %v947_v20 = vadd.f32 %v30897_v28, %v946_v18  ;;  %v1021_v21 = vadd.f32 %v30897_v28, %v1020_v19  ;;  %v25793_v23 = vpop.f32.mrb[11].mxu0  ;;  %v25804_v24 = vpop.f32.mrb[11].mxu1 }
 0x54e   :  { %v950_v25 = vmax.f32 %v947_v20, 0.0  ;;  %v1024_v26 = vmax.f32 %v1021_v21, 0.0 }
 0x550   :  { %25814 = vmatmul.mubr.msk.f32.vlgmr.msra.gmra.mrb[12].mxu0 %vm282_vm2, %v950_v25  ;;  %25825 = vmatmul.mubr.msk.f32.vlgmr.msra.gmra.mrb[12].mxu1 %vm282_vm2, %v1024_v26 }
 0x551   :  { %28963 = vmatpush3.bf16.msra.mxu0 %v30907_v37  ;;  %28969 = vmatpush3.bf16.msra.mxu1 %v30907_v37 }
 0x552   :  { %28964 = vmatprep.subr.bf16.mxu0 %v30699_v0  ;;  %28970 = vmatprep.subr.bf16.mxu1 %v30699_v0 }
 0x553   :  { %25835 = vmatprep.mubr.msk.f32.mxu0 %vm30700_vm0, %v30701_v1  ;;  %25846 = vmatprep.mubr.msk.f32.mxu1 %vm30700_vm0, %v30701_v1 }
 0x555   :  { %28966 = vmatpush3.bf16.msra.mxu0 %v30917_v42  ;;  %28972 = vmatpush3.bf16.msra.mxu1 %v30917_v42 }
 0x556   :  { %28973 = vmatprep.subr.bf16.mxu0 %v30699_v0  ;;  %28976 = vmatprep.subr.bf16.mxu1 %v30699_v0 }
 0x623   :  { %v1094_v29 = vpop.f32.mrb[12].mxu0  ;;  %v1168_v30 = vpop.f32.mrb[12].mxu1 }
 0x624   :  { %v1095_v31 = vadd.f32 %v30940_v46, %v1094_v29  ;;  %v1169_v32 = vadd.f32 %v30940_v46, %v1168_v30  ;;  %v25815_v33 = vpop.f32.mrb[13].mxu0  ;;  %v25826_v34 = vpop.f32.mrb[13].mxu1 }
 0x626   :  { %v1098_v35 = vmax.f32 %v1095_v31, 0.0  ;;  %v1172_v36 = vmax.f32 %v1169_v32, 0.0 }
 0x628   :  { %25836 = vmatmul.mubr.msk.f32.vlgmr.msra.gmra.mrb[14].mxu0 %vm282_vm2, %v1098_v35  ;;  %25847 = vmatmul.mubr.msk.f32.vlgmr.msra.gmra.mrb[14].mxu1 %vm282_vm2, %v1172_v36 }
 0x629   :  { %28975 = vmatpush3.bf16.msra.mxu0 %v30820_v6  ;;  %28978 = vmatpush3.bf16.msra.mxu1 %v30820_v6 }
 0x62a   :  { %25853 = vmatprep.mubr.msk.f32.mxu0 %vm30700_vm0, %v30701_v1  ;;  %25860 = vmatprep.mubr.msk.f32.mxu1 %vm30700_vm0, %v30701_v1 }
 0x62b   :  { %28979 = vmatprep.subr.bf16.mxu0 %v30699_v0  ;;  %28985 = vmatprep.subr.bf16.mxu1 %v30699_v0 }
 0x6fb   :  { %v1242_v38 = vpop.f32.mrb[14].mxu0  ;;  %v1315_v39 = vpop.f32.mrb[14].mxu1 }
 0x6fc   :  { %v1243_v40 = vadd.f32 %v30959_v56, %v1242_v38  ;;  %v1316_v41 = vadd.f32 %v30959_v56, %v1315_v39  ;;  %v25837_v43 = vpop.f32.mrb[15].mxu0  ;;  %v25848_v44 = vpop.f32.mrb[15].mxu1 }
 0x6fe   :  { %v1319_v45 = vmul.f32 %v1243_v40, %v30954_v55  ;;  %v1321_v47 = vmul.f32 %v1316_v41, %v30963_v63 }
 0x700   :  { %v31038_v48 = vadd.f32 %v1319_v45, %v30968_v4  ;;  %v31041_v49 = vadd.f32 %v1321_v47, %v30971_v5 }
 0x702   :  { %25854 = vmatmul.mubr.msk.f32.vlgmr.msra.gmra.mrb[16].mxu0 %vm131_vm1, %v31038_v48  ;;  %25861 = vmatmul.mubr.msk.f32.vlgmr.msra.gmra.mrb[16].mxu1 %vm131_vm1, %v31041_v49 }
 0x703   :  { %28981 = vmatpush3.bf16.msra.mxu0 %v30822_v7  ;;  %28987 = vmatpush3.bf16.msra.mxu1 %v30822_v7 }
 0x704   :  { %28982 = vmatprep.subr.bf16.mxu0 %v30699_v0  ;;  %28988 = vmatprep.subr.bf16.mxu1 %v30699_v0 }
 0x705   :  { %25871 = vmatprep.mubr.msk.f32.mxu0 %vm30700_vm0, %v30701_v1  ;;  %25882 = vmatprep.mubr.msk.f32.mxu1 %vm30700_vm0, %v30701_v1 }
 0x707   :  { %28984 = vmatpush3.bf16.msra.mxu0 %v30846_v12  ;;  %28990 = vmatpush3.bf16.msra.mxu1 %v30846_v12 }
 0x708   :  { %28991 = vmatprep.subr.bf16.mxu0 %v30699_v0  ;;  %28997 = vmatprep.subr.bf16.mxu1 %v30699_v0 }
 0x7d5   :  { %v1392_v50 = vpop.f32.mrb[16].mxu0  ;;  %v1466_v51 = vpop.f32.mrb[16].mxu1 }
 0x7d6   :  { %v1393_v52 = vadd.f32 %v30860_v13, %v1392_v50  ;;  %v1467_v53 = vadd.f32 %v30860_v13, %v1466_v51  ;;  %v25855_v54 = vpop.f32.mrb[17].mxu0  ;;  %v25862_v57 = vpop.f32.mrb[17].mxu1 }
 0x7d8   :  { %v1396_v58 = vmax.f32 %v1393_v52, 0.0  ;;  %v1470_v59 = vmax.f32 %v1467_v53, 0.0 }
 0x7da   :  { %25872 = vmatmul.mubr.msk.f32.vlgmr.msra.gmra.mrb[18].mxu0 %vm282_vm2, %v1396_v58  ;;  %25883 = vmatmul.mubr.msk.f32.vlgmr.msra.gmra.mrb[18].mxu1 %vm282_vm2, %v1470_v59 }
 0x7db   :  { %28993 = vmatpush3.bf16.msra.mxu0 %v30870_v22  ;;  %28999 = vmatpush3.bf16.msra.mxu1 %v30870_v22 }
 0x7dc   :  { %28994 = vmatprep.subr.bf16.mxu0 %v30699_v0  ;;  %29000 = vmatprep.subr.bf16.mxu1 %v30699_v0 }
 0x7dd   :  { %25893 = vmatprep.mubr.msk.f32.mxu0 %vm30700_vm0, %v30701_v1  ;;  %25904 = vmatprep.mubr.msk.f32.mxu1 %vm30700_vm0, %v30701_v1 }
 0x7df   :  { %28996 = vmatpush3.bf16.msra.mxu0 %v30880_v27  ;;  %29002 = vmatpush3.bf16.msra.mxu1 %v30880_v27 }
 0x7e0   :  { %29003 = vmatprep.subr.bf16.mxu0 %v30699_v0  ;;  %29009 = vmatprep.subr.bf16.mxu1 %v30699_v0 }
 0x8ad   :  { %v1540_v60 = vpop.f32.mrb[18].mxu0  ;;  %v1614_v61 = vpop.f32.mrb[18].mxu1 }
 0x8ae   :  { %v1541_v62 = vadd.f32 %v30897_v28, %v1540_v60  ;;  %v1615_v2 = vadd.f32 %v30897_v28, %v1614_v61  ;;  %v25873_v3 = vpop.f32.mrb[19].mxu0  ;;  %v25884_v4 = vpop.f32.mrb[19].mxu1 }
 0x8b0   :  { %v1544_v5 = vmax.f32 %v1541_v62, 0.0  ;;  %v1618_v8 = vmax.f32 %v1615_v2, 0.0 }
 0x8b2   :  { %25894 = vmatmul.mubr.msk.f32.vlgmr.msra.gmra.mrb[20].mxu0 %vm282_vm2, %v1544_v5  ;;  %25905 = vmatmul.mubr.msk.f32.vlgmr.msra.gmra.mrb[20].mxu1 %vm282_vm2, %v1618_v8 }
 0x8b3   :  { %29005 = vmatpush3.bf16.msra.mxu0 %v30907_v37  ;;  %29011 = vmatpush3.bf16.msra.mxu1 %v30907_v37 }
 0x8b4   :  { %29006 = vmatprep.subr.bf16.mxu0 %v30699_v0  ;;  %29012 = vmatprep.subr.bf16.mxu1 %v30699_v0 }
 0x8b5   :  { %25915 = vmatprep.mubr.msk.f32.mxu0 %vm30700_vm0, %v30701_v1  ;;  %25926 = vmatprep.mubr.msk.f32.mxu1 %vm30700_vm0, %v30701_v1 }
 0x8b7   :  { %29008 = vmatpush3.bf16.msra.mxu0 %v30917_v42  ;;  %29014 = vmatpush3.bf16.msra.mxu1 %v30917_v42 }
 0x8b8   :  { %29015 = vmatprep.subr.bf16.mxu0 %v30699_v0  ;;  %29018 = vmatprep.subr.bf16.mxu1 %v30699_v0 }
 0x985   :  { %v1688_v9 = vpop.f32.mrb[20].mxu0  ;;  %v1762_v10 = vpop.f32.mrb[20].mxu1 }
 0x986   :  { %v1689_v11 = vadd.f32 %v30940_v46, %v1688_v9  ;;  %v1763_v14 = vadd.f32 %v30940_v46, %v1762_v10  ;;  %v25895_v15 = vpop.f32.mrb[21].mxu0  ;;  %v25906_v16 = vpop.f32.mrb[21].mxu1 }
 0x988   :  { %v1692_v17 = vmax.f32 %v1689_v11, 0.0  ;;  %v1766_v18 = vmax.f32 %v1763_v14, 0.0 }
 0x98a   :  { %25916 = vmatmul.mubr.msk.f32.vlgmr.msra.gmra.mrb[22].mxu0 %vm282_vm2, %v1692_v17  ;;  %25927 = vmatmul.mubr.msk.f32.vlgmr.msra.gmra.mrb[22].mxu1 %vm282_vm2, %v1766_v18 }
 0x98b   :  { %29017 = vmatpush3.bf16.msra.mxu0 %v30820_v6  ;;  %29020 = vmatpush3.bf16.msra.mxu1 %v30820_v6 }
 0x98c   :  { %25933 = vmatprep.mubr.msk.f32.mxu0 %vm30700_vm0, %v30701_v1  ;;  %25940 = vmatprep.mubr.msk.f32.mxu1 %vm30700_vm0, %v30701_v1 }
 0x98d   :  { %29021 = vmatprep.subr.bf16.mxu0 %v30699_v0  ;;  %29027 = vmatprep.subr.bf16.mxu1 %v30699_v0 }
 0xa5d   :  { %v1836_v19 = vpop.f32.mrb[22].mxu0  ;;  %v1909_v20 = vpop.f32.mrb[22].mxu1 }
 0xa5e   :  { %v1837_v21 = vadd.f32 %v30959_v56, %v1836_v19  ;;  %v1910_v23 = vadd.f32 %v30959_v56, %v1909_v20  ;;  %v25917_v24 = vpop.f32.mrb[23].mxu0  ;;  %v25928_v25 = vpop.f32.mrb[23].mxu1 }
 0xa60   :  { %v1913_v26 = vmul.f32 %v1837_v21, %v30954_v55  ;;  %v1915_v29 = vmul.f32 %v1910_v23, %v30963_v63 }
 0xa62   :  { %v31108_v30 = vadd.f32 %v1913_v26, %v31038_v48  ;;  %v31111_v31 = vadd.f32 %v1915_v29, %v31041_v49 }
 0xa64   :  { %25934 = vmatmul.mubr.msk.f32.vlgmr.msra.gmra.mrb[24].mxu0 %vm131_vm1, %v31108_v30  ;;  %25941 = vmatmul.mubr.msk.f32.vlgmr.msra.gmra.mrb[24].mxu1 %vm131_vm1, %v31111_v31 }
 0xa65   :  { %29023 = vmatpush3.bf16.msra.mxu0 %v30822_v7  ;;  %29029 = vmatpush3.bf16.msra.mxu1 %v30822_v7 }
 0xa66   :  { %29024 = vmatprep.subr.bf16.mxu0 %v30699_v0  ;;  %29030 = vmatprep.subr.bf16.mxu1 %v30699_v0 }
 0xa67   :  { %25951 = vmatprep.mubr.msk.f32.mxu0 %vm30700_vm0, %v30701_v1  ;;  %25962 = vmatprep.mubr.msk.f32.mxu1 %vm30700_vm0, %v30701_v1 }
 0xa69   :  { %29026 = vmatpush3.bf16.msra.mxu0 %v30846_v12  ;;  %29032 = vmatpush3.bf16.msra.mxu1 %v30846_v12 }
 0xa6a   :  { %29033 = vmatprep.subr.bf16.mxu0 %v30699_v0  ;;  %29039 = vmatprep.subr.bf16.mxu1 %v30699_v0 }
 0xb37   :  { %v1986_v32 = vpop.f32.mrb[24].mxu0  ;;  %v2060_v33 = vpop.f32.mrb[24].mxu1 }
 0xb38   :  { %v1987_v34 = vadd.f32 %v30860_v13, %v1986_v32  ;;  %v2061_v35 = vadd.f32 %v30860_v13, %v2060_v33  ;;  %v25935_v36 = vpop.f32.mrb[25].mxu0  ;;  %v25942_v38 = vpop.f32.mrb[25].mxu1 }
 0xb3a   :  { %v1990_v39 = vmax.f32 %v1987_v34, 0.0  ;;  %v2064_v40 = vmax.f32 %v2061_v35, 0.0 }
 0xb3c   :  { %25952 = vmatmul.mubr.msk.f32.vlgmr.msra.gmra.mrb[26].mxu0 %vm282_vm2, %v1990_v39  ;;  %25963 = vmatmul.mubr.msk.f32.vlgmr.msra.gmra.mrb[26].mxu1 %vm282_vm2, %v2064_v40 }
 0xb3d   :  { %29035 = vmatpush3.bf16.msra.mxu0 %v30870_v22  ;;  %29041 = vmatpush3.bf16.msra.mxu1 %v30870_v22 }
 0xb3e   :  { %29036 = vmatprep.subr.bf16.mxu0 %v30699_v0  ;;  %29042 = vmatprep.subr.bf16.mxu1 %v30699_v0 }
 0xb3f   :  { %25973 = vmatprep.mubr.msk.f32.mxu0 %vm30700_vm0, %v30701_v1  ;;  %25984 = vmatprep.mubr.msk.f32.mxu1 %vm30700_vm0, %v30701_v1 }
 0xb41   :  { %29038 = vmatpush3.bf16.msra.mxu0 %v30880_v27  ;;  %29044 = vmatpush3.bf16.msra.mxu1 %v30880_v27 }
 0xb42   :  { %29045 = vmatprep.subr.bf16.mxu0 %v30699_v0  ;;  %29051 = vmatprep.subr.bf16.mxu1 %v30699_v0 }
 0xc0f   :  { %v2134_v41 = vpop.f32.mrb[26].mxu0  ;;  %v2208_v43 = vpop.f32.mrb[26].mxu1 }
 0xc10   :  { %v2135_v44 = vadd.f32 %v30897_v28, %v2134_v41  ;;  %v2209_v45 = vadd.f32 %v30897_v28, %v2208_v43  ;;  %v25953_v47 = vpop.f32.mrb[27].mxu0  ;;  %v25964_v48 = vpop.f32.mrb[27].mxu1 }
 0xc12   :  { %v2138_v49 = vmax.f32 %v2135_v44, 0.0  ;;  %v2212_v50 = vmax.f32 %v2209_v45, 0.0 }
 0xc14   :  { %25974 = vmatmul.mubr.msk.f32.vlgmr.msra.gmra.mrb[28].mxu0 %vm282_vm2, %v2138_v49  ;;  %25985 = vmatmul.mubr.msk.f32.vlgmr.msra.gmra.mrb[28].mxu1 %vm282_vm2, %v2212_v50 }
 0xc15   :  { %29047 = vmatpush3.bf16.msra.mxu0 %v30907_v37  ;;  %29053 = vmatpush3.bf16.msra.mxu1 %v30907_v37 }
 0xc16   :  { %29048 = vmatprep.subr.bf16.mxu0 %v30699_v0  ;;  %29054 = vmatprep.subr.bf16.mxu1 %v30699_v0 }
 0xc17   :  { %25995 = vmatprep.mubr.msk.f32.mxu0 %vm30700_vm0, %v30701_v1  ;;  %26006 = vmatprep.mubr.msk.f32.mxu1 %vm30700_vm0, %v30701_v1 }
 0xc19   :  { %29050 = vmatpush3.bf16.msra.mxu0 %v30917_v42  ;;  %29056 = vmatpush3.bf16.msra.mxu1 %v30917_v42 }
 0xc1a   :  { %29057 = vmatprep.subr.bf16.mxu0 %v30699_v0  ;;  %29060 = vmatprep.subr.bf16.mxu1 %v30699_v0 }
 0xce7   :  { %v2282_v51 = vpop.f32.mrb[28].mxu0  ;;  %v2356_v52 = vpop.f32.mrb[28].mxu1 }
 0xce8   :  { %v2283_v53 = vadd.f32 %v30940_v46, %v2282_v51  ;;  %v2357_v54 = vadd.f32 %v30940_v46, %v2356_v52  ;;  %v25975_v57 = vpop.f32.mrb[29].mxu0  ;;  %v25986_v58 = vpop.f32.mrb[29].mxu1 }
 0xcea   :  { %v2286_v59 = vmax.f32 %v2283_v53, 0.0  ;;  %v2360_v60 = vmax.f32 %v2357_v54, 0.0 }
 0xcec   :  { %25996 = vmatmul.mubr.msk.f32.vlgmr.msra.gmra.mrb[30].mxu0 %vm282_vm2, %v2286_v59  ;;  %26007 = vmatmul.mubr.msk.f32.vlgmr.msra.gmra.mrb[30].mxu1 %vm282_vm2, %v2360_v60 }
 0xced   :  { %29059 = vmatpush3.bf16.msra.mxu0 %v30820_v6  ;;  %29062 = vmatpush3.bf16.msra.mxu1 %v30820_v6 }
 0xcee   :  { %26013 = vmatprep.mubr.msk.f32.mxu0 %vm30700_vm0, %v30701_v1  ;;  %26020 = vmatprep.mubr.msk.f32.mxu1 %vm30700_vm0, %v30701_v1 }
 0xcef   :  { %29063 = vmatprep.subr.bf16.mxu0 %v30699_v0  ;;  %29069 = vmatprep.subr.bf16.mxu1 %v30699_v0 }
 0xdbf   :  { %v2430_v61 = vpop.f32.mrb[30].mxu0  ;;  %v2503_v62 = vpop.f32.mrb[30].mxu1 }
 0xdc0   :  { %v2431_v2 = vadd.f32 %v30959_v56, %v2430_v61  ;;  %v2504_v3 = vadd.f32 %v30959_v56, %v2503_v62  ;;  %v25997_v4 = vpop.f32.mrb[31].mxu0  ;;  %v26008_v5 = vpop.f32.mrb[31].mxu1 }
 0xdc2   :  { %v2507_v8 = vmul.f32 %v2431_v2, %v30954_v55  ;;  %v2509_v9 = vmul.f32 %v2504_v3, %v30963_v63 }
 0xdc4   :  { %v31178_v10 = vadd.f32 %v2507_v8, %v31108_v30  ;;  %v31181_v11 = vadd.f32 %v2509_v9, %v31111_v31 }
 0xdc6   :  { %26014 = vmatmul.mubr.msk.f32.vlgmr.msra.gmra.mrb[32].mxu0 %vm131_vm1, %v31178_v10  ;;  %26021 = vmatmul.mubr.msk.f32.vlgmr.msra.gmra.mrb[32].mxu1 %vm131_vm1, %v31181_v11 }
 0xdc7   :  { %29065 = vmatpush3.bf16.msra.mxu0 %v30822_v7  ;;  %29071 = vmatpush3.bf16.msra.mxu1 %v30822_v7 }
 0xdc8   :  { %29066 = vmatprep.subr.bf16.mxu0 %v30699_v0  ;;  %29072 = vmatprep.subr.bf16.mxu1 %v30699_v0 }
 0xdc9   :  { %26031 = vmatprep.mubr.msk.f32.mxu0 %vm30700_vm0, %v30701_v1  ;;  %26042 = vmatprep.mubr.msk.f32.mxu1 %vm30700_vm0, %v30701_v1 }
 0xdcb   :  { %29068 = vmatpush3.bf16.msra.mxu0 %v30846_v12  ;;  %29074 = vmatpush3.bf16.msra.mxu1 %v30846_v12 }
 0xdcc   :  { %29075 = vmatprep.subr.bf16.mxu0 %v30699_v0  ;;  %29081 = vmatprep.subr.bf16.mxu1 %v30699_v0 }
 0xe99   :  { %v2580_v14 = vpop.f32.mrb[32].mxu0  ;;  %v2654_v15 = vpop.f32.mrb[32].mxu1 }
 0xe9a   :  { %v2581_v16 = vadd.f32 %v30860_v13, %v2580_v14  ;;  %v2655_v17 = vadd.f32 %v30860_v13, %v2654_v15  ;;  %v26015_v18 = vpop.f32.mrb[33].mxu0  ;;  %v26022_v19 = vpop.f32.mrb[33].mxu1 }
 0xe9c   :  { %v2584_v20 = vmax.f32 %v2581_v16, 0.0  ;;  %v2658_v21 = vmax.f32 %v2655_v17, 0.0 }
 0xe9e   :  { %26032 = vmatmul.mubr.msk.f32.vlgmr.msra.gmra.mrb[34].mxu0 %vm282_vm2, %v2584_v20  ;;  %26043 = vmatmul.mubr.msk.f32.vlgmr.msra.gmra.mrb[34].mxu1 %vm282_vm2, %v2658_v21 }
 0xe9f   :  { %29077 = vmatpush3.bf16.msra.mxu0 %v30870_v22  ;;  %29083 = vmatpush3.bf16.msra.mxu1 %v30870_v22 }
 0xea0   :  { %29078 = vmatprep.subr.bf16.mxu0 %v30699_v0  ;;  %29084 = vmatprep.subr.bf16.mxu1 %v30699_v0 }
 0xea1   :  { %26053 = vmatprep.mubr.msk.f32.mxu0 %vm30700_vm0, %v30701_v1  ;;  %26064 = vmatprep.mubr.msk.f32.mxu1 %vm30700_vm0, %v30701_v1 }
 0xea3   :  { %29080 = vmatpush3.bf16.msra.mxu0 %v30880_v27  ;;  %29086 = vmatpush3.bf16.msra.mxu1 %v30880_v27 }
 0xea4   :  { %29087 = vmatprep.subr.bf16.mxu0 %v30699_v0  ;;  %29093 = vmatprep.subr.bf16.mxu1 %v30699_v0 }
 0xf71   :  { %v2728_v23 = vpop.f32.mrb[34].mxu0  ;;  %v2802_v24 = vpop.f32.mrb[34].mxu1 }
 0xf72   :  { %v2729_v25 = vadd.f32 %v30897_v28, %v2728_v23  ;;  %v2803_v26 = vadd.f32 %v30897_v28, %v2802_v24  ;;  %v26033_v29 = vpop.f32.mrb[35].mxu0  ;;  %v26044_v30 = vpop.f32.mrb[35].mxu1 }
 0xf74   :  { %v2732_v31 = vmax.f32 %v2729_v25, 0.0  ;;  %v2806_v32 = vmax.f32 %v2803_v26, 0.0 }
 0xf76   :  { %26054 = vmatmul.mubr.msk.f32.vlgmr.msra.gmra.mrb[36].mxu0 %vm282_vm2, %v2732_v31  ;;  %26065 = vmatmul.mubr.msk.f32.vlgmr.msra.gmra.mrb[36].mxu1 %vm282_vm2, %v2806_v32 }
 0xf77   :  { %29089 = vmatpush3.bf16.msra.mxu0 %v30907_v37  ;;  %29095 = vmatpush3.bf16.msra.mxu1 %v30907_v37 }
 0xf78   :  { %29090 = vmatprep.subr.bf16.mxu0 %v30699_v0  ;;  %29096 = vmatprep.subr.bf16.mxu1 %v30699_v0 }
 0xf79   :  { %26075 = vmatprep.mubr.msk.f32.mxu0 %vm30700_vm0, %v30701_v1  ;;  %26086 = vmatprep.mubr.msk.f32.mxu1 %vm30700_vm0, %v30701_v1 }
 0xf7b   :  { %29092 = vmatpush3.bf16.msra.mxu0 %v30917_v42  ;;  %29098 = vmatpush3.bf16.msra.mxu1 %v30917_v42 }
 0xf7c   :  { %29099 = vmatprep.subr.bf16.mxu0 %v30699_v0  ;;  %29102 = vmatprep.subr.bf16.mxu1 %v30699_v0 }
0x1049   :  { %v2876_v33 = vpop.f32.mrb[36].mxu0  ;;  %v2950_v34 = vpop.f32.mrb[36].mxu1 }
0x104a   :  { %v2877_v35 = vadd.f32 %v30940_v46, %v2876_v33  ;;  %v2951_v36 = vadd.f32 %v30940_v46, %v2950_v34  ;;  %v26055_v38 = vpop.f32.mrb[37].mxu0  ;;  %v26066_v39 = vpop.f32.mrb[37].mxu1 }
0x104c   :  { %v2880_v40 = vmax.f32 %v2877_v35, 0.0  ;;  %v2954_v41 = vmax.f32 %v2951_v36, 0.0 }
0x104e   :  { %26076 = vmatmul.mubr.msk.f32.vlgmr.msra.gmra.mrb[38].mxu0 %vm282_vm2, %v2880_v40  ;;  %26087 = vmatmul.mubr.msk.f32.vlgmr.msra.gmra.mrb[38].mxu1 %vm282_vm2, %v2954_v41 }
0x104f   :  { %29101 = vmatpush3.bf16.msra.mxu0 %v30820_v6  ;;  %29104 = vmatpush3.bf16.msra.mxu1 %v30820_v6 }
0x1050   :  { %26093 = vmatprep.mubr.msk.f32.mxu0 %vm30700_vm0, %v30701_v1  ;;  %26100 = vmatprep.mubr.msk.f32.mxu1 %vm30700_vm0, %v30701_v1 }
0x1051   :  { %29105 = vmatprep.subr.bf16.mxu0 %v30699_v0  ;;  %29111 = vmatprep.subr.bf16.mxu1 %v30699_v0 }
0x1121   :  { %v3024_v43 = vpop.f32.mrb[38].mxu0  ;;  %v3097_v44 = vpop.f32.mrb[38].mxu1 }
0x1122   :  { %v3025_v45 = vadd.f32 %v30959_v56, %v3024_v43  ;;  %v3098_v47 = vadd.f32 %v30959_v56, %v3097_v44  ;;  %v26077_v48 = vpop.f32.mrb[39].mxu0  ;;  %v26088_v49 = vpop.f32.mrb[39].mxu1 }
0x1124   :  { %v3101_v50 = vmul.f32 %v3025_v45, %v30954_v55  ;;  %v3103_v51 = vmul.f32 %v3098_v47, %v30963_v63 }
0x1126   :  { %v31248_v52 = vadd.f32 %v3101_v50, %v31178_v10  ;;  %v31251_v53 = vadd.f32 %v3103_v51, %v31181_v11 }
0x1128   :  { %26094 = vmatmul.mubr.msk.f32.vlgmr.msra.gmra.mrb[40].mxu0 %vm131_vm1, %v31248_v52  ;;  %26101 = vmatmul.mubr.msk.f32.vlgmr.msra.gmra.mrb[40].mxu1 %vm131_vm1, %v31251_v53 }
0x1129   :  { %29107 = vmatpush3.bf16.msra.mxu0 %v30822_v7  ;;  %29113 = vmatpush3.bf16.msra.mxu1 %v30822_v7 }
0x112a   :  { %29108 = vmatprep.subr.bf16.mxu0 %v30699_v0  ;;  %29114 = vmatprep.subr.bf16.mxu1 %v30699_v0 }
0x112b   :  { %26111 = vmatprep.mubr.msk.f32.mxu0 %vm30700_vm0, %v30701_v1  ;;  %26122 = vmatprep.mubr.msk.f32.mxu1 %vm30700_vm0, %v30701_v1 }
0x112d   :  { %29110 = vmatpush3.bf16.msra.mxu0 %v30846_v12  ;;  %29116 = vmatpush3.bf16.msra.mxu1 %v30846_v12 }
0x112e   :  { %29117 = vmatprep.subr.bf16.mxu0 %v30699_v0  ;;  %29123 = vmatprep.subr.bf16.mxu1 %v30699_v0 }
0x11fb   :  { %v3174_v54 = vpop.f32.mrb[40].mxu0  ;;  %v3248_v57 = vpop.f32.mrb[40].mxu1 }
0x11fc   :  { %v3175_v58 = vadd.f32 %v30860_v13, %v3174_v54  ;;  %v3249_v59 = vadd.f32 %v30860_v13, %v3248_v57  ;;  %v26095_v60 = vpop.f32.mrb[41].mxu0  ;;  %v26102_v61 = vpop.f32.mrb[41].mxu1 }
0x11fe   :  { %v3178_v62 = vmax.f32 %v3175_v58, 0.0  ;;  %v3252_v2 = vmax.f32 %v3249_v59, 0.0 }
0x1200   :  { %26112 = vmatmul.mubr.msk.f32.vlgmr.msra.gmra.mrb[42].mxu0 %vm282_vm2, %v3178_v62  ;;  %26123 = vmatmul.mubr.msk.f32.vlgmr.msra.gmra.mrb[42].mxu1 %vm282_vm2, %v3252_v2 }
0x1201   :  { %29119 = vmatpush3.bf16.msra.mxu0 %v30870_v22  ;;  %29125 = vmatpush3.bf16.msra.mxu1 %v30870_v22 }
0x1202   :  { %29120 = vmatprep.subr.bf16.mxu0 %v30699_v0  ;;  %29126 = vmatprep.subr.bf16.mxu1 %v30699_v0 }
0x1203   :  { %26133 = vmatprep.mubr.msk.f32.mxu0 %vm30700_vm0, %v30701_v1  ;;  %26144 = vmatprep.mubr.msk.f32.mxu1 %vm30700_vm0, %v30701_v1 }
0x1205   :  { %29122 = vmatpush3.bf16.msra.mxu0 %v30880_v27  ;;  %29128 = vmatpush3.bf16.msra.mxu1 %v30880_v27 }
0x1206   :  { %29129 = vmatprep.subr.bf16.mxu0 %v30699_v0  ;;  %29135 = vmatprep.subr.bf16.mxu1 %v30699_v0 }
0x12d3   :  { %v3322_v3 = vpop.f32.mrb[42].mxu0  ;;  %v3396_v4 = vpop.f32.mrb[42].mxu1 }
0x12d4   :  { %v3323_v5 = vadd.f32 %v30897_v28, %v3322_v3  ;;  %v3397_v8 = vadd.f32 %v30897_v28, %v3396_v4  ;;  %v26113_v9 = vpop.f32.mrb[43].mxu0  ;;  %v26124_v10 = vpop.f32.mrb[43].mxu1 }
0x12d6   :  { %v3326_v11 = vmax.f32 %v3323_v5, 0.0  ;;  %v3400_v14 = vmax.f32 %v3397_v8, 0.0 }
0x12d8   :  { %26134 = vmatmul.mubr.msk.f32.vlgmr.msra.gmra.mrb[44].mxu0 %vm282_vm2, %v3326_v11  ;;  %26145 = vmatmul.mubr.msk.f32.vlgmr.msra.gmra.mrb[44].mxu1 %vm282_vm2, %v3400_v14 }
0x12d9   :  { %29131 = vmatpush3.bf16.msra.mxu0 %v30907_v37  ;;  %29137 = vmatpush3.bf16.msra.mxu1 %v30907_v37 }
0x12da   :  { %29132 = vmatprep.subr.bf16.mxu0 %v30699_v0  ;;  %29138 = vmatprep.subr.bf16.mxu1 %v30699_v0 }
0x12db   :  { %26155 = vmatprep.mubr.msk.f32.mxu0 %vm30700_vm0, %v30701_v1  ;;  %26166 = vmatprep.mubr.msk.f32.mxu1 %vm30700_vm0, %v30701_v1 }
0x12dd   :  { %29134 = vmatpush3.bf16.msra.mxu0 %v30917_v42  ;;  %29140 = vmatpush3.bf16.msra.mxu1 %v30917_v42 }
0x12de   :  { %29141 = vmatprep.subr.bf16.mxu0 %v30699_v0  ;;  %29144 = vmatprep.subr.bf16.mxu1 %v30699_v0 }
0x13ab   :  { %v3470_v15 = vpop.f32.mrb[44].mxu0  ;;  %v3544_v16 = vpop.f32.mrb[44].mxu1 }
0x13ac   :  { %v3471_v17 = vadd.f32 %v30940_v46, %v3470_v15  ;;  %v3545_v18 = vadd.f32 %v30940_v46, %v3544_v16  ;;  %v26135_v19 = vpop.f32.mrb[45].mxu0  ;;  %v26146_v20 = vpop.f32.mrb[45].mxu1  ;;  %v31409_v16 = vld [vmem:[#allocation7] ss:$0 sm:$0xff] }
0x13ae   :  { %v3474_v21 = vmax.f32 %v3471_v17, 0.0  ;;  %v3548_v23 = vmax.f32 %v3545_v18, 0.0 }
0x13b0   :  { %26156 = vmatmul.mubr.msk.f32.vlgmr.msra.gmra.mrb[46].mxu0 %vm282_vm2, %v3474_v21  ;;  %26167 = vmatmul.mubr.msk.f32.vlgmr.msra.gmra.mrb[46].mxu1 %vm282_vm2, %v3548_v23 }
0x13b1   :  { %29143 = vmatpush3.bf16.msra.mxu0 %v30820_v6  ;;  %29146 = vmatpush3.bf16.msra.mxu1 %v30820_v6 }
0x13b2   :  { %26173 = vmatprep.mubr.msk.f32.mxu0 %vm30700_vm0, %v30701_v1  ;;  %26180 = vmatprep.mubr.msk.f32.mxu1 %vm30700_vm0, %v30701_v1 }
0x13b3   :  { %29147 = vmatprep.subr.bf16.mxu0 %v30699_v0  ;;  %29153 = vmatprep.subr.bf16.mxu1 %v30699_v0 }
0x1483   :  { %v3618_v24 = vpop.f32.mrb[46].mxu0  ;;  %v3691_v25 = vpop.f32.mrb[46].mxu1 }
0x1484   :  { %v3619_v26 = vadd.f32 %v30959_v56, %v3618_v24  ;;  %v3692_v29 = vadd.f32 %v30959_v56, %v3691_v25  ;;  %v26157_v30 = vpop.f32.mrb[47].mxu0  ;;  %v26168_v31 = vpop.f32.mrb[47].mxu1 }
0x1486   :  { %v3695_v32 = vmul.f32 %v3619_v26, %v30954_v55  ;;  %v3697_v33 = vmul.f32 %v3692_v29, %v30963_v63  ;;  %v31430_v26 = vld [vmem:[%s33808_s5] ss:$0 sm:$0xff] }
0x1488   :  { %v31318_v34 = vadd.f32 %v3695_v32, %v31248_v52  ;;  %v31321_v35 = vadd.f32 %v3697_v33, %v31251_v53 }
0x148a   :  { %26174 = vmatmul.mubr.msk.f32.vlgmr.msra.gmra.mrb[48].mxu0 %vm131_vm1, %v31318_v34  ;;  %26181 = vmatmul.mubr.msk.f32.vlgmr.msra.gmra.mrb[48].mxu1 %vm131_vm1, %v31321_v35 }
0x148b   :  { %29149 = vmatpush3.bf16.msra.mxu0 %v30822_v7  ;;  %29155 = vmatpush3.bf16.msra.mxu1 %v30822_v7 }
0x148c   :  { %29150 = vmatprep.subr.bf16.mxu0 %v30699_v0  ;;  %29156 = vmatprep.subr.bf16.mxu1 %v30699_v0 }
0x148d   :  { %26191 = vmatprep.mubr.msk.f32.mxu0 %vm30700_vm0, %v30701_v1  ;;  %26202 = vmatprep.mubr.msk.f32.mxu1 %vm30700_vm0, %v30701_v1 }
0x148f   :  { %29152 = vmatpush3.bf16.msra.mxu0 %v30846_v12  ;;  %29158 = vmatpush3.bf16.msra.mxu1 %v30846_v12 }
0x1490   :  { %29159 = vmatprep.subr.bf16.mxu0 %v30699_v0  ;;  %29165 = vmatprep.subr.bf16.mxu1 %v30699_v0 }
0x155d   :  { %v3768_v36 = vpop.f32.mrb[48].mxu0  ;;  %v3842_v38 = vpop.f32.mrb[48].mxu1 }
0x155e   :  { %v3769_v39 = vadd.f32 %v30860_v13, %v3768_v36  ;;  %v3843_v40 = vadd.f32 %v30860_v13, %v3842_v38  ;;  %v26175_v41 = vpop.f32.mrb[49].mxu0  ;;  %v26182_v43 = vpop.f32.mrb[49].mxu1  ;;  %v31451_v38 = vld [vmem:[%s33810_s7] ss:$0 sm:$0xff] }
0x1560   :  { %v3772_v44 = vmax.f32 %v3769_v39, 0.0  ;;  %v3846_v45 = vmax.f32 %v3843_v40, 0.0 }
0x1562   :  { %26192 = vmatmul.mubr.msk.f32.vlgmr.msra.gmra.mrb[50].mxu0 %vm282_vm2, %v3772_v44  ;;  %26203 = vmatmul.mubr.msk.f32.vlgmr.msra.gmra.mrb[50].mxu1 %vm282_vm2, %v3846_v45 }
0x1563   :  { %29161 = vmatpush3.bf16.msra.mxu0 %v30870_v22  ;;  %29167 = vmatpush3.bf16.msra.mxu1 %v30870_v22 }
0x1564   :  { %29162 = vmatprep.subr.bf16.mxu0 %v30699_v0  ;;  %29168 = vmatprep.subr.bf16.mxu1 %v30699_v0 }
0x1565   :  { %26213 = vmatprep.mubr.msk.f32.mxu0 %vm30700_vm0, %v30701_v1  ;;  %26224 = vmatprep.mubr.msk.f32.mxu1 %vm30700_vm0, %v30701_v1 }
0x1567   :  { %29164 = vmatpush3.bf16.msra.mxu0 %v30880_v27  ;;  %29170 = vmatpush3.bf16.msra.mxu1 %v30880_v27 }
0x1568   :  { %29171 = vmatprep.subr.bf16.mxu0 %v30699_v0  ;;  %29177 = vmatprep.subr.bf16.mxu1 %v30699_v0 }
0x1635   :  { %v3916_v13 = vpop.f32.mrb[50].mxu0  ;;  %v3990_v47 = vpop.f32.mrb[50].mxu1 }
0x1636   :  { %v3917_v48 = vadd.f32 %v30897_v28, %v3916_v13  ;;  %v3991_v49 = vadd.f32 %v30897_v28, %v3990_v47  ;;  %v26193_v50 = vpop.f32.mrb[51].mxu0  ;;  %v26204_v51 = vpop.f32.mrb[51].mxu1 }
0x1638   :  { %v3920_v52 = vmax.f32 %v3917_v48, 0.0  ;;  %v3994_v53 = vmax.f32 %v3991_v49, 0.0  ;;  %v31468_v48 = vld [vmem:[%s33812_s9] ss:$0 sm:$0xff] }
0x163a   :  { %26214 = vmatmul.mubr.msk.f32.vlgmr.msra.gmra.mrb[52].mxu0 %vm282_vm2, %v3920_v52  ;;  %26225 = vmatmul.mubr.msk.f32.vlgmr.msra.gmra.mrb[52].mxu1 %vm282_vm2, %v3994_v53 }
0x163b   :  { %29173 = vmatpush3.bf16.msra.mxu0 %v30907_v37  ;;  %29179 = vmatpush3.bf16.msra.mxu1 %v30907_v37 }
0x163c   :  { %29174 = vmatprep.subr.bf16.mxu0 %v30699_v0  ;;  %29180 = vmatprep.subr.bf16.mxu1 %v30699_v0 }
0x163d   :  { %26235 = vmatprep.mubr.msk.f32.mxu0 %vm30700_vm0, %v30701_v1  ;;  %26246 = vmatprep.mubr.msk.f32.mxu1 %vm30700_vm0, %v30701_v1 }
0x163f   :  { %29176 = vmatpush3.bf16.msra.mxu0 %v30917_v42  ;;  %29182 = vmatpush3.bf16.msra.mxu1 %v30917_v42 }
0x1640   :  { %29183 = vmatprep.subr.bf16.mxu0 %v30699_v0  ;;  %29186 = vmatprep.subr.bf16.mxu1 %v30699_v0 }
0x170d   :  { %v4064_v28 = vpop.f32.mrb[52].mxu0  ;;  %v4138_v54 = vpop.f32.mrb[52].mxu1 }
0x170e   :  { %v4065_v57 = vadd.f32 %v30940_v46, %v4064_v28  ;;  %v4139_v58 = vadd.f32 %v30940_v46, %v4138_v54  ;;  %v26215_v59 = vpop.f32.mrb[53].mxu0  ;;  %v26226_v60 = vpop.f32.mrb[53].mxu1 }
0x1710   :  { %v4068_v61 = vmax.f32 %v4065_v57, 0.0  ;;  %v4142_v62 = vmax.f32 %v4139_v58, 0.0 }
0x1712   :  { %26236 = vmatmul.mubr.msk.f32.vlgmr.msra.gmra.mrb[54].mxu0 %vm282_vm2, %v4068_v61  ;;  %26247 = vmatmul.mubr.msk.f32.vlgmr.msra.gmra.mrb[54].mxu1 %vm282_vm2, %v4142_v62 }
0x1713   :  { %29185 = vmatpush3.bf16.msra.mxu0 %v30820_v6  ;;  %29188 = vmatpush3.bf16.msra.mxu1 %v30820_v6 }
0x1714   :  { %26253 = vmatprep.mubr.msk.f32.mxu0 %vm30700_vm0, %v30701_v1  ;;  %26260 = vmatprep.mubr.msk.f32.mxu1 %vm30700_vm0, %v30701_v1 }
0x1715   :  { %29189 = vmatprep.subr.bf16.mxu0 %v30699_v0  ;;  %29195 = vmatprep.subr.bf16.mxu1 %v30699_v0 }
0x17e5   :  { %v4212_v46 = vpop.f32.mrb[54].mxu0  ;;  %v4285_v2 = vpop.f32.mrb[54].mxu1 }
0x17e6   :  { %v4213_v3 = vadd.f32 %v30959_v56, %v4212_v46  ;;  %v4286_v4 = vadd.f32 %v30959_v56, %v4285_v2  ;;  %v26237_v5 = vpop.f32.mrb[55].mxu0  ;;  %v26248_v8 = vpop.f32.mrb[55].mxu1 }
0x17e8   :  { %v4289_v9 = vmul.f32 %v4213_v3, %v30954_v55  ;;  %v4291_v10 = vmul.f32 %v4286_v4, %v30963_v63 }
0x17ea   :  { %v31388_v11 = vadd.f32 %v4289_v9, %v31318_v34  ;;  %v31391_v14 = vadd.f32 %v4291_v10, %v31321_v35 }
0x17ec   :  { %26254 = vmatmul.mubr.msk.f32.vlgmr.msra.gmra.mrb[56].mxu0 %vm131_vm1, %v31388_v11  ;;  %26261 = vmatmul.mubr.msk.f32.vlgmr.msra.gmra.mrb[56].mxu1 %vm131_vm1, %v31391_v14 }
0x17ed   :  { %29191 = vmatpush3.bf16.msra.mxu0 %v30822_v7  ;;  %29197 = vmatpush3.bf16.msra.mxu1 %v30822_v7 }
0x17ee   :  { %29192 = vmatprep.subr.bf16.mxu0 %v30699_v0  ;;  %29198 = vmatprep.subr.bf16.mxu1 %v30699_v0 }
0x17ef   :  { %26271 = vmatprep.mubr.msk.f32.mxu0 %vm30700_vm0, %v30701_v1  ;;  %26282 = vmatprep.mubr.msk.f32.mxu1 %vm30700_vm0, %v30701_v1 }
0x17f1   :  { %29194 = vmatpush3.bf16.msra.mxu0 %v30846_v12  ;;  %29200 = vmatpush3.bf16.msra.mxu1 %v30846_v12 }
0x17f2   :  { %29201 = vmatprep.subr.bf16.mxu0 %v30699_v0  ;;  %29207 = vmatprep.subr.bf16.mxu1 %v30699_v0 }
0x18bf   :  { %v4362_v56 = vpop.f32.mrb[56].mxu0  ;;  %v4436_v15 = vpop.f32.mrb[56].mxu1 }
0x18c0   :  { %v4363_v17 = vadd.f32 %v31409_v16, %v4362_v56  ;;  %v4437_v18 = vadd.f32 %v31409_v16, %v4436_v15  ;;  %v26255_v19 = vpop.f32.mrb[57].mxu0  ;;  %v26262_v20 = vpop.f32.mrb[57].mxu1 }
0x18c2   :  { %v4366_v21 = vmax.f32 %v4363_v17, 0.0  ;;  %v4440_v23 = vmax.f32 %v4437_v18, 0.0 }
0x18c4   :  { %26272 = vmatmul.mubr.msk.f32.vlgmr.msra.gmra.mrb[58].mxu0 %vm282_vm2, %v4366_v21  ;;  %26283 = vmatmul.mubr.msk.f32.vlgmr.msra.gmra.mrb[58].mxu1 %vm282_vm2, %v4440_v23 }
0x18c5   :  { %29203 = vmatpush3.bf16.msra.mxu0 %v30870_v22  ;;  %29209 = vmatpush3.bf16.msra.mxu1 %v30870_v22 }
0x18c6   :  { %29204 = vmatprep.subr.bf16.mxu0 %v30699_v0  ;;  %29210 = vmatprep.subr.bf16.mxu1 %v30699_v0 }
0x18c7   :  { %26293 = vmatprep.mubr.msk.f32.mxu0 %vm30700_vm0, %v30701_v1  ;;  %26304 = vmatprep.mubr.msk.f32.mxu1 %vm30700_vm0, %v30701_v1 }
0x18c9   :  { %29206 = vmatpush3.bf16.msra.mxu0 %v30880_v27  ;;  %29212 = vmatpush3.bf16.msra.mxu1 %v30880_v27 }
0x18ca   :  { %29213 = vmatprep.subr.bf16.mxu0 %v30699_v0  ;;  %29219 = vmatprep.subr.bf16.mxu1 %v30699_v0 }
0x1997   :  { %v4510_v24 = vpop.f32.mrb[58].mxu0  ;;  %v4584_v25 = vpop.f32.mrb[58].mxu1 }
0x1998   :  { %v4511_v29 = vadd.f32 %v31430_v26, %v4510_v24  ;;  %v4585_v30 = vadd.f32 %v31430_v26, %v4584_v25  ;;  %v26273_v31 = vpop.f32.mrb[59].mxu0  ;;  %v26284_v32 = vpop.f32.mrb[59].mxu1 }
0x199a   :  { %v4514_v33 = vmax.f32 %v4511_v29, 0.0  ;;  %v4588_v34 = vmax.f32 %v4585_v30, 0.0 }
0x199c   :  { %26294 = vmatmul.mubr.msk.f32.vlgmr.msra.gmra.mrb[60].mxu0 %vm282_vm2, %v4514_v33  ;;  %26305 = vmatmul.mubr.msk.f32.vlgmr.msra.gmra.mrb[60].mxu1 %vm282_vm2, %v4588_v34 }
0x199d   :  { %29215 = vmatpush3.bf16.msra.mxu0 %v30907_v37  ;;  %29221 = vmatpush3.bf16.msra.mxu1 %v30907_v37 }
0x199e   :  { %29216 = vmatprep.subr.bf16.mxu0 %v30699_v0  ;;  %29222 = vmatprep.subr.bf16.mxu1 %v30699_v0 }
0x199f   :  { %26315 = vmatprep.mubr.msk.f32.mxu0 %vm30700_vm0, %v30701_v1  ;;  %26326 = vmatprep.mubr.msk.f32.mxu1 %vm30700_vm0, %v30701_v1 }
0x19a1   :  { %29218 = vmatpush3.bf16.msra.mxu0 %v30917_v42  ;;  %29224 = vmatpush3.bf16.msra.mxu1 %v30917_v42 }
0x19a2   :  { %29225 = vmatprep.subr.bf16.mxu0 %v30699_v0  ;;  %29228 = vmatprep.subr.bf16.mxu1 %v30699_v0 }
0x1a6f   :  { %v4658_v35 = vpop.f32.mrb[60].mxu0  ;;  %v4732_v36 = vpop.f32.mrb[60].mxu1 }
0x1a70   :  { %v4659_v39 = vadd.f32 %v31451_v38, %v4658_v35  ;;  %v4733_v40 = vadd.f32 %v31451_v38, %v4732_v36  ;;  %v26295_v41 = vpop.f32.mrb[61].mxu0  ;;  %v26306_v43 = vpop.f32.mrb[61].mxu1 }
0x1a72   :  { %v4662_v44 = vmax.f32 %v4659_v39, 0.0  ;;  %v4736_v45 = vmax.f32 %v4733_v40, 0.0 }
0x1a74   :  { %26316 = vmatmul.mubr.msk.f32.vlgmr.msra.gmra.mrb[62].mxu0 %vm282_vm2, %v4662_v44  ;;  %26327 = vmatmul.mubr.msk.f32.vlgmr.msra.gmra.mrb[62].mxu1 %vm282_vm2, %v4736_v45 }
0x1a75   :  { %29227 = vmatpush3.bf16.msra.mxu0 %v30820_v6  ;;  %29230 = vmatpush3.bf16.msra.mxu1 %v30820_v6 }
0x1a76   :  { %26333 = vmatprep.mubr.msk.f32.mxu0 %vm30700_vm0, %v30701_v1  ;;  %26340 = vmatprep.mubr.msk.f32.mxu1 %vm30700_vm0, %v30701_v1 }
0x1a77   :  { %29231 = vmatprep.subr.bf16.mxu0 %v30699_v0  ;;  %29237 = vmatprep.subr.bf16.mxu1 %v30699_v0 }
0x1b47   :  { %v4806_v13 = vpop.f32.mrb[62].mxu0  ;;  %v4879_v47 = vpop.f32.mrb[62].mxu1 }
0x1b48   :  { %v4807_v49 = vadd.f32 %v31468_v48, %v4806_v13  ;;  %v4880_v50 = vadd.f32 %v31468_v48, %v4879_v47  ;;  %v26317_v51 = vpop.f32.mrb[63].mxu0  ;;  %v26328_v52 = vpop.f32.mrb[63].mxu1 }
0x1b4a   :  { %v4883_v53 = vmul.f32 %v4807_v49, %v30954_v55  ;;  %v4885_v28 = vmul.f32 %v4880_v50, %v30963_v63 }
0x1b4c   :  { %v31475_v54 = vadd.f32 %v4883_v53, %v31388_v11  ;;  %v31478_v57 = vadd.f32 %v4885_v28, %v31391_v14 }
0x1b4e   :  { %26334 = vmatmul.mubr.msk.f32.vlgmr.msra.gmra.mrb[64].mxu0 %vm131_vm1, %v31475_v54  ;;  %26341 = vmatmul.mubr.msk.f32.vlgmr.msra.gmra.mrb[64].mxu1 %vm131_vm1, %v31478_v57 }
0x1b4f   :  { %29233 = vmatpush3.bf16.msra.mxu0 %v30822_v7  ;;  %29239 = vmatpush3.bf16.msra.mxu1 %v30822_v7 }
0x1b50   :  { %29234 = vmatprep.subr.bf16.mxu0 %v30699_v0  ;;  %29240 = vmatprep.subr.bf16.mxu1 %v30699_v0 }
0x1b51   :  { %26351 = vmatprep.mubr.msk.f32.mxu0 %vm30700_vm0, %v30701_v1  ;;  %26362 = vmatprep.mubr.msk.f32.mxu1 %vm30700_vm0, %v30701_v1 }
0x1b53   :  { %29236 = vmatpush3.bf16.msra.mxu0 %v30846_v12  ;;  %29242 = vmatpush3.bf16.msra.mxu1 %v30846_v12 }
0x1b54   :  { %29243 = vmatprep.subr.bf16.mxu0 %v30699_v0  ;;  %29249 = vmatprep.subr.bf16.mxu1 %v30699_v0 }
0x1c21   :  { %v4956_v58 = vpop.f32.mrb[64].mxu0  ;;  %v5030_v59 = vpop.f32.mrb[64].mxu1 }
0x1c22   :  { %v4957_v60 = vadd.f32 %v31409_v16, %v4956_v58  ;;  %v5031_v61 = vadd.f32 %v31409_v16, %v5030_v59  ;;  %v26335_v62 = vpop.f32.mrb[65].mxu0  ;;  %v26342_v46 = vpop.f32.mrb[65].mxu1 }
0x1c24   :  { %v4960_v2 = vmax.f32 %v4957_v60, 0.0  ;;  %v5034_v3 = vmax.f32 %v5031_v61, 0.0 }
0x1c26   :  { %26352 = vmatmul.mubr.msk.f32.vlgmr.msra.gmra.mrb[66].mxu0 %vm282_vm2, %v4960_v2  ;;  %26363 = vmatmul.mubr.msk.f32.vlgmr.msra.gmra.mrb[66].mxu1 %vm282_vm2, %v5034_v3 }
0x1c27   :  { %29245 = vmatpush3.bf16.msra.mxu0 %v30870_v22  ;;  %29251 = vmatpush3.bf16.msra.mxu1 %v30870_v22 }
0x1c28   :  { %29246 = vmatprep.subr.bf16.mxu0 %v30699_v0  ;;  %29252 = vmatprep.subr.bf16.mxu1 %v30699_v0 }
0x1c29   :  { %26373 = vmatprep.mubr.msk.f32.mxu0 %vm30700_vm0, %v30701_v1  ;;  %26384 = vmatprep.mubr.msk.f32.mxu1 %vm30700_vm0, %v30701_v1 }
0x1c2b   :  { %29248 = vmatpush3.bf16.msra.mxu0 %v30880_v27  ;;  %29254 = vmatpush3.bf16.msra.mxu1 %v30880_v27 }
0x1c2c   :  { %29255 = vmatprep.subr.bf16.mxu0 %v30699_v0  ;;  %29261 = vmatprep.subr.bf16.mxu1 %v30699_v0 }
0x1cf9   :  { %v5104_v4 = vpop.f32.mrb[66].mxu0  ;;  %v5178_v5 = vpop.f32.mrb[66].mxu1 }
0x1cfa   :  { %v5105_v8 = vadd.f32 %v31430_v26, %v5104_v4  ;;  %v5179_v9 = vadd.f32 %v31430_v26, %v5178_v5  ;;  %v26353_v10 = vpop.f32.mrb[67].mxu0  ;;  %v26364_v11 = vpop.f32.mrb[67].mxu1 }
0x1cfc   :  { %v5108_v14 = vmax.f32 %v5105_v8, 0.0  ;;  %v5182_v56 = vmax.f32 %v5179_v9, 0.0 }
0x1cfe   :  { %26374 = vmatmul.mubr.msk.f32.vlgmr.msra.gmra.mrb[68].mxu0 %vm282_vm2, %v5108_v14  ;;  %26385 = vmatmul.mubr.msk.f32.vlgmr.msra.gmra.mrb[68].mxu1 %vm282_vm2, %v5182_v56 }
0x1cff   :  { %29257 = vmatpush3.bf16.msra.mxu0 %v30907_v37  ;;  %29263 = vmatpush3.bf16.msra.mxu1 %v30907_v37 }
0x1d00   :  { %29258 = vmatprep.subr.bf16.mxu0 %v30699_v0  ;;  %29264 = vmatprep.subr.bf16.mxu1 %v30699_v0 }
0x1d01   :  { %26395 = vmatprep.mubr.msk.f32.mxu0 %vm30700_vm0, %v30701_v1  ;;  %26406 = vmatprep.mubr.msk.f32.mxu1 %vm30700_vm0, %v30701_v1 }
0x1d03   :  { %29260 = vmatpush3.bf16.msra.mxu0 %v30917_v42  ;;  %29266 = vmatpush3.bf16.msra.mxu1 %v30917_v42 }
0x1d04   :  { %29267 = vmatprep.subr.bf16.mxu0 %v30699_v0  ;;  %29270 = vmatprep.subr.bf16.mxu1 %v30699_v0 }
0x1dd1   :  { %v5252_v15 = vpop.f32.mrb[68].mxu0  ;;  %v5326_v17 = vpop.f32.mrb[68].mxu1 }
0x1dd2   :  { %v5253_v18 = vadd.f32 %v31451_v38, %v5252_v15  ;;  %v5327_v19 = vadd.f32 %v31451_v38, %v5326_v17  ;;  %v26375_v20 = vpop.f32.mrb[69].mxu0  ;;  %v26386_v21 = vpop.f32.mrb[69].mxu1 }
0x1dd4   :  { %v5256_v23 = vmax.f32 %v5253_v18, 0.0  ;;  %v5330_v24 = vmax.f32 %v5327_v19, 0.0 }
0x1dd6   :  { %26396 = vmatmul.mubr.msk.f32.vlgmr.msra.gmra.mrb[70].mxu0 %vm282_vm2, %v5256_v23  ;;  %26407 = vmatmul.mubr.msk.f32.vlgmr.msra.gmra.mrb[70].mxu1 %vm282_vm2, %v5330_v24 }
0x1dd7   :  { %29269 = vmatpush3.bf16.msra.mxu0 %v30820_v6  ;;  %29272 = vmatpush3.bf16.msra.mxu1 %v30820_v6 }
0x1dd8   :  { %26413 = vmatprep.mubr.msk.f32.mxu0 %vm30700_vm0, %v30701_v1  ;;  %26420 = vmatprep.mubr.msk.f32.mxu1 %vm30700_vm0, %v30701_v1 }
0x1dd9   :  { %29273 = vmatprep.subr.bf16.mxu0 %v30699_v0  ;;  %29279 = vmatprep.subr.bf16.mxu1 %v30699_v0 }
0x1ea9   :  { %v5400_v25 = vpop.f32.mrb[70].mxu0  ;;  %v5473_v29 = vpop.f32.mrb[70].mxu1 }
0x1eaa   :  { %v5401_v30 = vadd.f32 %v31468_v48, %v5400_v25  ;;  %v5474_v31 = vadd.f32 %v31468_v48, %v5473_v29  ;;  %v26397_v32 = vpop.f32.mrb[71].mxu0  ;;  %v26408_v33 = vpop.f32.mrb[71].mxu1 }
0x1eac   :  { %v5477_v34 = vmul.f32 %v5401_v30, %v30954_v55  ;;  %v5479_v35 = vmul.f32 %v5474_v31, %v30963_v63 }
0x1eae   :  { %v31545_v36 = vadd.f32 %v5477_v34, %v31475_v54  ;;  %v31548_v39 = vadd.f32 %v5479_v35, %v31478_v57 }
0x1eb0   :  { %26414 = vmatmul.mubr.msk.f32.vlgmr.msra.gmra.mrb[72].mxu0 %vm131_vm1, %v31545_v36  ;;  %26421 = vmatmul.mubr.msk.f32.vlgmr.msra.gmra.mrb[72].mxu1 %vm131_vm1, %v31548_v39 }
0x1eb1   :  { %29275 = vmatpush3.bf16.msra.mxu0 %v30822_v7  ;;  %29281 = vmatpush3.bf16.msra.mxu1 %v30822_v7 }
0x1eb2   :  { %29276 = vmatprep.subr.bf16.mxu0 %v30699_v0  ;;  %29282 = vmatprep.subr.bf16.mxu1 %v30699_v0 }
0x1eb3   :  { %26431 = vmatprep.mubr.msk.f32.mxu0 %vm30700_vm0, %v30701_v1  ;;  %26442 = vmatprep.mubr.msk.f32.mxu1 %vm30700_vm0, %v30701_v1 }
0x1eb5   :  { %29278 = vmatpush3.bf16.msra.mxu0 %v30846_v12  ;;  %29284 = vmatpush3.bf16.msra.mxu1 %v30846_v12 }
0x1eb6   :  { %29285 = vmatprep.subr.bf16.mxu0 %v30699_v0  ;;  %29291 = vmatprep.subr.bf16.mxu1 %v30699_v0 }
0x1f83   :  { %v5550_v40 = vpop.f32.mrb[72].mxu0  ;;  %v5624_v41 = vpop.f32.mrb[72].mxu1 }
0x1f84   :  { %v5551_v43 = vadd.f32 %v31409_v16, %v5550_v40  ;;  %v5625_v44 = vadd.f32 %v31409_v16, %v5624_v41  ;;  %v26415_v45 = vpop.f32.mrb[73].mxu0  ;;  %v26422_v13 = vpop.f32.mrb[73].mxu1 }
0x1f86   :  { %v5554_v47 = vmax.f32 %v5551_v43, 0.0  ;;  %v5628_v49 = vmax.f32 %v5625_v44, 0.0 }
0x1f88   :  { %26432 = vmatmul.mubr.msk.f32.vlgmr.msra.gmra.mrb[74].mxu0 %vm282_vm2, %v5554_v47  ;;  %26443 = vmatmul.mubr.msk.f32.vlgmr.msra.gmra.mrb[74].mxu1 %vm282_vm2, %v5628_v49 }
0x1f89   :  { %29287 = vmatpush3.bf16.msra.mxu0 %v30870_v22  ;;  %29293 = vmatpush3.bf16.msra.mxu1 %v30870_v22 }
0x1f8a   :  { %29288 = vmatprep.subr.bf16.mxu0 %v30699_v0  ;;  %29294 = vmatprep.subr.bf16.mxu1 %v30699_v0 }
0x1f8b   :  { %26453 = vmatprep.mubr.msk.f32.mxu0 %vm30700_vm0, %v30701_v1  ;;  %26464 = vmatprep.mubr.msk.f32.mxu1 %vm30700_vm0, %v30701_v1 }
0x1f8d   :  { %29290 = vmatpush3.bf16.msra.mxu0 %v30880_v27  ;;  %29296 = vmatpush3.bf16.msra.mxu1 %v30880_v27 }
0x1f8e   :  { %29297 = vmatprep.subr.bf16.mxu0 %v30699_v0  ;;  %29303 = vmatprep.subr.bf16.mxu1 %v30699_v0 }
0x205b   :  { %v5698_v50 = vpop.f32.mrb[74].mxu0  ;;  %v5772_v51 = vpop.f32.mrb[74].mxu1 }
0x205c   :  { %v5699_v52 = vadd.f32 %v31430_v26, %v5698_v50  ;;  %v5773_v53 = vadd.f32 %v31430_v26, %v5772_v51  ;;  %v26433_v28 = vpop.f32.mrb[75].mxu0  ;;  %v26444_v54 = vpop.f32.mrb[75].mxu1 }
0x205e   :  { %v5702_v57 = vmax.f32 %v5699_v52, 0.0  ;;  %v5776_v58 = vmax.f32 %v5773_v53, 0.0 }
0x2060   :  { %26454 = vmatmul.mubr.msk.f32.vlgmr.msra.gmra.mrb[76].mxu0 %vm282_vm2, %v5702_v57  ;;  %26465 = vmatmul.mubr.msk.f32.vlgmr.msra.gmra.mrb[76].mxu1 %vm282_vm2, %v5776_v58 }
0x2061   :  { %29299 = vmatpush3.bf16.msra.mxu0 %v30907_v37  ;;  %29305 = vmatpush3.bf16.msra.mxu1 %v30907_v37 }
0x2062   :  { %29300 = vmatprep.subr.bf16.mxu0 %v30699_v0  ;;  %29306 = vmatprep.subr.bf16.mxu1 %v30699_v0 }
0x2063   :  { %26475 = vmatprep.mubr.msk.f32.mxu0 %vm30700_vm0, %v30701_v1  ;;  %26486 = vmatprep.mubr.msk.f32.mxu1 %vm30700_vm0, %v30701_v1 }
0x2065   :  { %29302 = vmatpush3.bf16.msra.mxu0 %v30917_v42  ;;  %29308 = vmatpush3.bf16.msra.mxu1 %v30917_v42 }
0x2066   :  { %29309 = vmatprep.subr.bf16.mxu0 %v30699_v0  ;;  %29312 = vmatprep.subr.bf16.mxu1 %v30699_v0 }
0x2133   :  { %v5846_v59 = vpop.f32.mrb[76].mxu0  ;;  %v5920_v60 = vpop.f32.mrb[76].mxu1 }
0x2134   :  { %v5847_v61 = vadd.f32 %v31451_v38, %v5846_v59  ;;  %v5921_v62 = vadd.f32 %v31451_v38, %v5920_v60  ;;  %v26455_v46 = vpop.f32.mrb[77].mxu0  ;;  %v26466_v2 = vpop.f32.mrb[77].mxu1 }
0x2136   :  { %v5850_v3 = vmax.f32 %v5847_v61, 0.0  ;;  %v5924_v4 = vmax.f32 %v5921_v62, 0.0 }
0x2138   :  { %26476 = vmatmul.mubr.msk.f32.vlgmr.msra.gmra.mrb[78].mxu0 %vm282_vm2, %v5850_v3  ;;  %26487 = vmatmul.mubr.msk.f32.vlgmr.msra.gmra.mrb[78].mxu1 %vm282_vm2, %v5924_v4 }
0x2139   :  { %29311 = vmatpush3.bf16.msra.mxu0 %v30820_v6  ;;  %29314 = vmatpush3.bf16.msra.mxu1 %v30820_v6 }
0x213a   :  { %26493 = vmatprep.mubr.msk.f32.mxu0 %vm30700_vm0, %v30701_v1  ;;  %26500 = vmatprep.mubr.msk.f32.mxu1 %vm30700_vm0, %v30701_v1 }
0x213b   :  { %29315 = vmatprep.subr.bf16.mxu0 %v30699_v0  ;;  %29321 = vmatprep.subr.bf16.mxu1 %v30699_v0 }
0x220b   :  { %v5994_v5 = vpop.f32.mrb[78].mxu0  ;;  %v6067_v8 = vpop.f32.mrb[78].mxu1 }
0x220c   :  { %v5995_v9 = vadd.f32 %v31468_v48, %v5994_v5  ;;  %v6068_v10 = vadd.f32 %v31468_v48, %v6067_v8  ;;  %v26477_v11 = vpop.f32.mrb[79].mxu0  ;;  %v26488_v14 = vpop.f32.mrb[79].mxu1 }
0x220e   :  { %v6071_v56 = vmul.f32 %v5995_v9, %v30954_v55  ;;  %v6073_v15 = vmul.f32 %v6068_v10, %v30963_v63 }
0x2210   :  { %v31615_v17 = vadd.f32 %v6071_v56, %v31545_v36  ;;  %v31618_v18 = vadd.f32 %v6073_v15, %v31548_v39 }
0x2212   :  { %6076 = vst.msk [vmem:[#allocation8 + $0x10] sm:$0xff] %vm131_vm1, %v31615_v17  ;;  %6077 = vst.msk [vmem:[#allocation8 + $0x18] sm:$0xff] %vm131_vm1, %v31618_v18  ;;  %26494 = vmatmul.mubr.msk.f32.vlgmr.msra.gmra.mrb[80].mxu0 %vm131_vm1, %v31615_v17  ;;  %26501 = vmatmul.mubr.msk.f32.vlgmr.msra.gmra.mrb[80].mxu1 %vm131_vm1, %v31618_v18 }
0x2213   :  { %29317 = vmatpush3.bf16.msra.mxu0 %v30822_v7  ;;  %29323 = vmatpush3.bf16.msra.mxu1 %v30822_v7 }
0x2214   :  { %29318 = vmatprep.subr.bf16.mxu0 %v30699_v0  ;;  %29324 = vmatprep.subr.bf16.mxu1 %v30699_v0 }
0x2215   :  { %26511 = vmatprep.mubr.msk.f32.mxu0 %vm30700_vm0, %v30701_v1  ;;  %26522 = vmatprep.mubr.msk.f32.mxu1 %vm30700_vm0, %v30701_v1 }
0x2217   :  { %29320 = vmatpush3.bf16.msra.mxu0 %v30846_v12  ;;  %29326 = vmatpush3.bf16.msra.mxu1 %v30846_v12 }
0x2218   :  { %29327 = vmatprep.subr.bf16.mxu0 %v30699_v0  ;;  %29333 = vmatprep.subr.bf16.mxu1 %v30699_v0 }
0x22e5   :  { %v6147_v19 = vpop.f32.mrb[80].mxu0  ;;  %v6221_v20 = vpop.f32.mrb[80].mxu1 }
0x22e6   :  { %v6148_v21 = vadd.f32 %v31409_v16, %v6147_v19  ;;  %v6222_v23 = vadd.f32 %v31409_v16, %v6221_v20  ;;  %v26495_v24 = vpop.f32.mrb[81].mxu0  ;;  %v26502_v25 = vpop.f32.mrb[81].mxu1 }
0x22e8   :  { %v6151_v29 = vmax.f32 %v6148_v21, 0.0  ;;  %v6225_v30 = vmax.f32 %v6222_v23, 0.0 }
0x22ea   :  { %26512 = vmatmul.mubr.msk.f32.vlgmr.msra.gmra.mrb[82].mxu0 %vm282_vm2, %v6151_v29  ;;  %26523 = vmatmul.mubr.msk.f32.vlgmr.msra.gmra.mrb[82].mxu1 %vm282_vm2, %v6225_v30 }
0x22eb   :  { %29329 = vmatpush3.bf16.msra.mxu0 %v30870_v22  ;;  %29335 = vmatpush3.bf16.msra.mxu1 %v30870_v22 }
0x22ec   :  { %29330 = vmatprep.subr.bf16.mxu0 %v30699_v0  ;;  %29336 = vmatprep.subr.bf16.mxu1 %v30699_v0 }
0x22ed   :  { %26533 = vmatprep.mubr.msk.f32.mxu0 %vm30700_vm0, %v30701_v1  ;;  %26544 = vmatprep.mubr.msk.f32.mxu1 %vm30700_vm0, %v30701_v1 }
0x22ef   :  { %29332 = vmatpush3.bf16.msra.mxu0 %v30880_v27  ;;  %29338 = vmatpush3.bf16.msra.mxu1 %v30880_v27 }
0x22f0   :  { %29339 = vmatprep.subr.bf16.mxu0 %v30699_v0  ;;  %29345 = vmatprep.subr.bf16.mxu1 %v30699_v0 }
0x23bd   :  { %v6295_v31 = vpop.f32.mrb[82].mxu0  ;;  %v6369_v32 = vpop.f32.mrb[82].mxu1 }
0x23be   :  { %v6296_v33 = vadd.f32 %v31430_v26, %v6295_v31  ;;  %v6370_v34 = vadd.f32 %v31430_v26, %v6369_v32  ;;  %v26513_v35 = vpop.f32.mrb[83].mxu0  ;;  %v26524_v36 = vpop.f32.mrb[83].mxu1 }
0x23c0   :  { %v6299_v39 = vmax.f32 %v6296_v33, 0.0  ;;  %v6373_v40 = vmax.f32 %v6370_v34, 0.0 }
0x23c2   :  { %26534 = vmatmul.mubr.msk.f32.vlgmr.msra.gmra.mrb[84].mxu0 %vm282_vm2, %v6299_v39  ;;  %26545 = vmatmul.mubr.msk.f32.vlgmr.msra.gmra.mrb[84].mxu1 %vm282_vm2, %v6373_v40 }
0x23c3   :  { %29341 = vmatpush3.bf16.msra.mxu0 %v30907_v37  ;;  %29347 = vmatpush3.bf16.msra.mxu1 %v30907_v37 }
0x23c4   :  { %29342 = vmatprep.subr.bf16.mxu0 %v30699_v0  ;;  %29348 = vmatprep.subr.bf16.mxu1 %v30699_v0 }
0x23c5   :  { %26555 = vmatprep.mubr.msk.f32.mxu0 %vm30700_vm0, %v30701_v1  ;;  %26566 = vmatprep.mubr.msk.f32.mxu1 %vm30700_vm0, %v30701_v1 }
0x23c7   :  { %29344 = vmatpush3.bf16.msra.mxu0 %v30917_v42  ;;  %29350 = vmatpush3.bf16.msra.mxu1 %v30917_v42 }
0x23c8   :  { %29351 = vmatprep.subr.bf16.mxu0 %v30699_v0  ;;  %29354 = vmatprep.subr.bf16.mxu1 %v30699_v0 }
0x2495   :  { %v6443_v41 = vpop.f32.mrb[84].mxu0  ;;  %v6517_v43 = vpop.f32.mrb[84].mxu1 }
0x2496   :  { %v6444_v44 = vadd.f32 %v31451_v38, %v6443_v41  ;;  %v6518_v45 = vadd.f32 %v31451_v38, %v6517_v43  ;;  %v26535_v13 = vpop.f32.mrb[85].mxu0  ;;  %v26546_v47 = vpop.f32.mrb[85].mxu1 }
0x2498   :  { %v6447_v49 = vmax.f32 %v6444_v44, 0.0  ;;  %v6521_v50 = vmax.f32 %v6518_v45, 0.0 }
0x249a   :  { %26556 = vmatmul.mubr.msk.f32.vlgmr.msra.gmra.mrb[86].mxu0 %vm282_vm2, %v6447_v49  ;;  %26567 = vmatmul.mubr.msk.f32.vlgmr.msra.gmra.mrb[86].mxu1 %vm282_vm2, %v6521_v50 }
0x249b   :  { %29353 = vmatpush3.bf16.msra.mxu0 %v30820_v6  ;;  %29356 = vmatpush3.bf16.msra.mxu1 %v30820_v6 }
0x249c   :  { %26573 = vmatprep.mubr.msk.f32.mxu0 %vm30700_vm0, %v30701_v1  ;;  %26580 = vmatprep.mubr.msk.f32.mxu1 %vm30700_vm0, %v30701_v1 }
0x249d   :  { %29357 = vmatprep.subr.bf16.mxu0 %v30699_v0  ;;  %29363 = vmatprep.subr.bf16.mxu1 %v30699_v0 }
0x256d   :  { %v6591_v51 = vpop.f32.mrb[86].mxu0  ;;  %v6664_v52 = vpop.f32.mrb[86].mxu1 }
0x256e   :  { %v6592_v53 = vadd.f32 %v31468_v48, %v6591_v51  ;;  %v6665_v28 = vadd.f32 %v31468_v48, %v6664_v52  ;;  %v26557_v54 = vpop.f32.mrb[87].mxu0  ;;  %v26568_v57 = vpop.f32.mrb[87].mxu1 }
0x2570   :  { %v6668_v58 = vmul.f32 %v6592_v53, %v30954_v55  ;;  %v6670_v59 = vmul.f32 %v6665_v28, %v30963_v63 }
0x2572   :  { %v31689_v60 = vadd.f32 %v6668_v58, %v31615_v17  ;;  %v31692_v61 = vadd.f32 %v6670_v59, %v31618_v18 }
0x2574   :  { %26574 = vmatmul.mubr.msk.f32.vlgmr.msra.gmra.mrb[88].mxu0 %vm131_vm1, %v31689_v60  ;;  %26581 = vmatmul.mubr.msk.f32.vlgmr.msra.gmra.mrb[88].mxu1 %vm131_vm1, %v31692_v61 }
0x2575   :  { %29359 = vmatpush3.bf16.msra.mxu0 %v30822_v7  ;;  %29365 = vmatpush3.bf16.msra.mxu1 %v30822_v7 }
0x2576   :  { %29360 = vmatprep.subr.bf16.mxu0 %v30699_v0  ;;  %29366 = vmatprep.subr.bf16.mxu1 %v30699_v0 }
0x2577   :  { %26591 = vmatprep.mubr.msk.f32.mxu0 %vm30700_vm0, %v30701_v1  ;;  %26602 = vmatprep.mubr.msk.f32.mxu1 %vm30700_vm0, %v30701_v1 }
0x2579   :  { %29362 = vmatpush3.bf16.msra.mxu0 %v30846_v12  ;;  %29368 = vmatpush3.bf16.msra.mxu1 %v30846_v12 }
0x257a   :  { %29369 = vmatprep.subr.bf16.mxu0 %v30699_v0  ;;  %29375 = vmatprep.subr.bf16.mxu1 %v30699_v0 }
0x2647   :  { %v6741_v62 = vpop.f32.mrb[88].mxu0  ;;  %v6815_v46 = vpop.f32.mrb[88].mxu1 }
0x2648   :  { %v6742_v2 = vadd.f32 %v31409_v16, %v6741_v62  ;;  %v6816_v3 = vadd.f32 %v31409_v16, %v6815_v46  ;;  %v26575_v4 = vpop.f32.mrb[89].mxu0  ;;  %v26582_v5 = vpop.f32.mrb[89].mxu1 }
0x264a   :  { %v6745_v8 = vmax.f32 %v6742_v2, 0.0  ;;  %v6819_v9 = vmax.f32 %v6816_v3, 0.0 }
0x264c   :  { %26592 = vmatmul.mubr.msk.f32.vlgmr.msra.gmra.mrb[90].mxu0 %vm282_vm2, %v6745_v8  ;;  %26603 = vmatmul.mubr.msk.f32.vlgmr.msra.gmra.mrb[90].mxu1 %vm282_vm2, %v6819_v9 }
0x264d   :  { %29371 = vmatpush3.bf16.msra.mxu0 %v30870_v22  ;;  %29377 = vmatpush3.bf16.msra.mxu1 %v30870_v22 }
0x264e   :  { %29372 = vmatprep.subr.bf16.mxu0 %v30699_v0  ;;  %29378 = vmatprep.subr.bf16.mxu1 %v30699_v0 }
0x264f   :  { %26613 = vmatprep.mubr.msk.f32.mxu0 %vm30700_vm0, %v30701_v1  ;;  %26624 = vmatprep.mubr.msk.f32.mxu1 %vm30700_vm0, %v30701_v1 }
0x2651   :  { %29374 = vmatpush3.bf16.msra.mxu0 %v30880_v27  ;;  %29380 = vmatpush3.bf16.msra.mxu1 %v30880_v27 }
0x2652   :  { %29381 = vmatprep.subr.bf16.mxu0 %v30699_v0  ;;  %29387 = vmatprep.subr.bf16.mxu1 %v30699_v0 }
0x271f   :  { %v6889_v10 = vpop.f32.mrb[90].mxu0  ;;  %v6963_v11 = vpop.f32.mrb[90].mxu1 }
0x2720   :  { %v6890_v14 = vadd.f32 %v31430_v26, %v6889_v10  ;;  %v6964_v56 = vadd.f32 %v31430_v26, %v6963_v11  ;;  %v26593_v15 = vpop.f32.mrb[91].mxu0  ;;  %v26604_v17 = vpop.f32.mrb[91].mxu1 }
0x2722   :  { %v6893_v18 = vmax.f32 %v6890_v14, 0.0  ;;  %v6967_v19 = vmax.f32 %v6964_v56, 0.0 }
0x2724   :  { %26614 = vmatmul.mubr.msk.f32.vlgmr.msra.gmra.mrb[92].mxu0 %vm282_vm2, %v6893_v18  ;;  %26625 = vmatmul.mubr.msk.f32.vlgmr.msra.gmra.mrb[92].mxu1 %vm282_vm2, %v6967_v19 }
0x2725   :  { %29383 = vmatpush3.bf16.msra.mxu0 %v30907_v37  ;;  %29389 = vmatpush3.bf16.msra.mxu1 %v30907_v37 }
0x2726   :  { %29384 = vmatprep.subr.bf16.mxu0 %v30699_v0  ;;  %29390 = vmatprep.subr.bf16.mxu1 %v30699_v0 }
0x2727   :  { %26635 = vmatprep.mubr.msk.f32.mxu0 %vm30700_vm0, %v30701_v1  ;;  %26646 = vmatprep.mubr.msk.f32.mxu1 %vm30700_vm0, %v30701_v1 }
0x2729   :  { %29386 = vmatpush3.bf16.msra.mxu0 %v30917_v42  ;;  %29392 = vmatpush3.bf16.msra.mxu1 %v30917_v42 }
0x272a   :  { %29393 = vmatprep.subr.bf16.mxu0 %v30699_v0  ;;  %29396 = vmatprep.subr.bf16.mxu1 %v30699_v0 }
0x27f7   :  { %v7037_v20 = vpop.f32.mrb[92].mxu0  ;;  %v7111_v21 = vpop.f32.mrb[92].mxu1 }
0x27f8   :  { %v7038_v23 = vadd.f32 %v31451_v38, %v7037_v20  ;;  %v7112_v24 = vadd.f32 %v31451_v38, %v7111_v21  ;;  %v26615_v25 = vpop.f32.mrb[93].mxu0  ;;  %v26626_v29 = vpop.f32.mrb[93].mxu1 }
0x27fa   :  { %v7041_v30 = vmax.f32 %v7038_v23, 0.0  ;;  %v7115_v31 = vmax.f32 %v7112_v24, 0.0 }
0x27fc   :  { %26636 = vmatmul.mubr.msk.f32.vlgmr.msra.gmra.mrb[94].mxu0 %vm282_vm2, %v7041_v30  ;;  %26647 = vmatmul.mubr.msk.f32.vlgmr.msra.gmra.mrb[94].mxu1 %vm282_vm2, %v7115_v31 }
0x27fd   :  { %29395 = vmatpush3.bf16.msra.mxu0 %v30820_v6  ;;  %29398 = vmatpush3.bf16.msra.mxu1 %v30820_v6 }
0x27fe   :  { %26653 = vmatprep.mubr.msk.f32.mxu0 %vm30700_vm0, %v30701_v1  ;;  %26660 = vmatprep.mubr.msk.f32.mxu1 %vm30700_vm0, %v30701_v1 }
0x27ff   :  { %29399 = vmatprep.subr.bf16.mxu0 %v30699_v0  ;;  %29405 = vmatprep.subr.bf16.mxu1 %v30699_v0 }
0x28cf   :  { %v7185_v32 = vpop.f32.mrb[94].mxu0  ;;  %v7258_v33 = vpop.f32.mrb[94].mxu1 }
0x28d0   :  { %v7186_v34 = vadd.f32 %v31468_v48, %v7185_v32  ;;  %v7259_v35 = vadd.f32 %v31468_v48, %v7258_v33  ;;  %v26637_v36 = vpop.f32.mrb[95].mxu0  ;;  %v26648_v39 = vpop.f32.mrb[95].mxu1 }
0x28d2   :  { %v7262_v40 = vmul.f32 %v7186_v34, %v30954_v55  ;;  %v7264_v41 = vmul.f32 %v7259_v35, %v30963_v63 }
0x28d4   :  { %v31759_v43 = vadd.f32 %v7262_v40, %v31689_v60  ;;  %v31762_v44 = vadd.f32 %v7264_v41, %v31692_v61 }
0x28d6   :  { %26654 = vmatmul.mubr.msk.f32.vlgmr.msra.gmra.mrb[96].mxu0 %vm131_vm1, %v31759_v43  ;;  %26661 = vmatmul.mubr.msk.f32.vlgmr.msra.gmra.mrb[96].mxu1 %vm131_vm1, %v31762_v44 }
0x28d7   :  { %29401 = vmatpush3.bf16.msra.mxu0 %v30822_v7  ;;  %29407 = vmatpush3.bf16.msra.mxu1 %v30822_v7 }
0x28d8   :  { %29402 = vmatprep.subr.bf16.mxu0 %v30699_v0  ;;  %29408 = vmatprep.subr.bf16.mxu1 %v30699_v0 }
0x28d9   :  { %26671 = vmatprep.mubr.msk.f32.mxu0 %vm30700_vm0, %v30701_v1  ;;  %26682 = vmatprep.mubr.msk.f32.mxu1 %vm30700_vm0, %v30701_v1 }
0x28db   :  { %29404 = vmatpush3.bf16.msra.mxu0 %v30846_v12  ;;  %29410 = vmatpush3.bf16.msra.mxu1 %v30846_v12 }
0x28dc   :  { %29411 = vmatprep.subr.bf16.mxu0 %v30699_v0  ;;  %29417 = vmatprep.subr.bf16.mxu1 %v30699_v0 }
0x29a9   :  { %v7335_v45 = vpop.f32.mrb[96].mxu0  ;;  %v7409_v13 = vpop.f32.mrb[96].mxu1 }
0x29aa   :  { %v7336_v47 = vadd.f32 %v31409_v16, %v7335_v45  ;;  %v7410_v49 = vadd.f32 %v31409_v16, %v7409_v13  ;;  %v26655_v50 = vpop.f32.mrb[97].mxu0  ;;  %v26662_v51 = vpop.f32.mrb[97].mxu1 }
0x29ac   :  { %v7339_v52 = vmax.f32 %v7336_v47, 0.0  ;;  %v7413_v53 = vmax.f32 %v7410_v49, 0.0 }
0x29ae   :  { %26672 = vmatmul.mubr.msk.f32.vlgmr.msra.gmra.mrb[98].mxu0 %vm282_vm2, %v7339_v52  ;;  %26683 = vmatmul.mubr.msk.f32.vlgmr.msra.gmra.mrb[98].mxu1 %vm282_vm2, %v7413_v53 }
0x29af   :  { %29413 = vmatpush3.bf16.msra.mxu0 %v30870_v22  ;;  %29419 = vmatpush3.bf16.msra.mxu1 %v30870_v22 }
0x29b0   :  { %29414 = vmatprep.subr.bf16.mxu0 %v30699_v0  ;;  %29420 = vmatprep.subr.bf16.mxu1 %v30699_v0 }
0x29b1   :  { %26693 = vmatprep.mubr.msk.f32.mxu0 %vm30700_vm0, %v30701_v1  ;;  %26704 = vmatprep.mubr.msk.f32.mxu1 %vm30700_vm0, %v30701_v1 }
0x29b3   :  { %29416 = vmatpush3.bf16.msra.mxu0 %v30880_v27  ;;  %29422 = vmatpush3.bf16.msra.mxu1 %v30880_v27 }
0x29b4   :  { %29423 = vmatprep.subr.bf16.mxu0 %v30699_v0  ;;  %29429 = vmatprep.subr.bf16.mxu1 %v30699_v0 }
0x2a81   :  { %v7483_v28 = vpop.f32.mrb[98].mxu0  ;;  %v7557_v54 = vpop.f32.mrb[98].mxu1 }
0x2a82   :  { %v7484_v57 = vadd.f32 %v31430_v26, %v7483_v28  ;;  %v7558_v58 = vadd.f32 %v31430_v26, %v7557_v54  ;;  %v26673_v59 = vpop.f32.mrb[99].mxu0  ;;  %v26684_v60 = vpop.f32.mrb[99].mxu1 }
0x2a84   :  { %v7487_v61 = vmax.f32 %v7484_v57, 0.0  ;;  %v7561_v62 = vmax.f32 %v7558_v58, 0.0 }
0x2a86   :  { %26694 = vmatmul.mubr.msk.f32.vlgmr.msra.gmra.mrb[100].mxu0 %vm282_vm2, %v7487_v61  ;;  %26705 = vmatmul.mubr.msk.f32.vlgmr.msra.gmra.mrb[100].mxu1 %vm282_vm2, %v7561_v62 }
0x2a87   :  { %29425 = vmatpush3.bf16.msra.mxu0 %v30907_v37  ;;  %29431 = vmatpush3.bf16.msra.mxu1 %v30907_v37 }
0x2a88   :  { %29426 = vmatprep.subr.bf16.mxu0 %v30699_v0  ;;  %29432 = vmatprep.subr.bf16.mxu1 %v30699_v0 }
0x2a89   :  { %26715 = vmatprep.mubr.msk.f32.mxu0 %vm30700_vm0, %v30701_v1  ;;  %26726 = vmatprep.mubr.msk.f32.mxu1 %vm30700_vm0, %v30701_v1 }
0x2a8b   :  { %29428 = vmatpush3.bf16.msra.mxu0 %v30917_v42  ;;  %29434 = vmatpush3.bf16.msra.mxu1 %v30917_v42 }
0x2a8c   :  { %29435 = vmatprep.subr.bf16.mxu0 %v30699_v0  ;;  %29438 = vmatprep.subr.bf16.mxu1 %v30699_v0 }
0x2b59   :  { %v7631_v46 = vpop.f32.mrb[100].mxu0  ;;  %v7705_v2 = vpop.f32.mrb[100].mxu1 }
0x2b5a   :  { %v7632_v3 = vadd.f32 %v31451_v38, %v7631_v46  ;;  %v7706_v4 = vadd.f32 %v31451_v38, %v7705_v2  ;;  %v26695_v5 = vpop.f32.mrb[101].mxu0  ;;  %v26706_v8 = vpop.f32.mrb[101].mxu1  ;;  %v31920_v2 = vld [vmem:[#allocation7] ss:$0 sm:$0xff] }
0x2b5c   :  { %v7635_v9 = vmax.f32 %v7632_v3, 0.0  ;;  %v7709_v10 = vmax.f32 %v7706_v4, 0.0 }
0x2b5e   :  { %26716 = vmatmul.mubr.msk.f32.vlgmr.msra.gmra.mrb[102].mxu0 %vm282_vm2, %v7635_v9  ;;  %26727 = vmatmul.mubr.msk.f32.vlgmr.msra.gmra.mrb[102].mxu1 %vm282_vm2, %v7709_v10 }
0x2b5f   :  { %29437 = vmatpush3.bf16.msra.mxu0 %v30820_v6  ;;  %29440 = vmatpush3.bf16.msra.mxu1 %v30820_v6 }
0x2b60   :  { %26733 = vmatprep.mubr.msk.f32.mxu0 %vm30700_vm0, %v30701_v1  ;;  %26740 = vmatprep.mubr.msk.f32.mxu1 %vm30700_vm0, %v30701_v1 }
0x2b61   :  { %29441 = vmatprep.subr.bf16.mxu0 %v30699_v0  ;;  %29447 = vmatprep.subr.bf16.mxu1 %v30699_v0 }
0x2c31   :  { %v7779_v11 = vpop.f32.mrb[102].mxu0  ;;  %v7852_v14 = vpop.f32.mrb[102].mxu1 }
0x2c32   :  { %v7780_v56 = vadd.f32 %v31468_v48, %v7779_v11  ;;  %v7853_v15 = vadd.f32 %v31468_v48, %v7852_v14  ;;  %v26717_v17 = vpop.f32.mrb[103].mxu0  ;;  %v26728_v18 = vpop.f32.mrb[103].mxu1 }
0x2c34   :  { %v7856_v19 = vmul.f32 %v7780_v56, %v30954_v55  ;;  %v7858_v20 = vmul.f32 %v7853_v15, %v30963_v63  ;;  %v31941_v56 = vld [vmem:[%s33808_s5] ss:$0 sm:$0xff] }
0x2c36   :  { %v31829_v21 = vadd.f32 %v7856_v19, %v31759_v43  ;;  %v31832_v23 = vadd.f32 %v7858_v20, %v31762_v44 }
0x2c38   :  { %26734 = vmatmul.mubr.msk.f32.vlgmr.msra.gmra.mrb[104].mxu0 %vm131_vm1, %v31829_v21  ;;  %26741 = vmatmul.mubr.msk.f32.vlgmr.msra.gmra.mrb[104].mxu1 %vm131_vm1, %v31832_v23 }
0x2c39   :  { %29443 = vmatpush3.bf16.msra.mxu0 %v30822_v7  ;;  %29449 = vmatpush3.bf16.msra.mxu1 %v30822_v7 }
0x2c3a   :  { %29444 = vmatprep.subr.bf16.mxu0 %v30699_v0  ;;  %29450 = vmatprep.subr.bf16.mxu1 %v30699_v0 }
0x2c3b   :  { %26751 = vmatprep.mubr.msk.f32.mxu0 %vm30700_vm0, %v30701_v1  ;;  %26762 = vmatprep.mubr.msk.f32.mxu1 %vm30700_vm0, %v30701_v1 }
0x2c3d   :  { %29446 = vmatpush3.bf16.msra.mxu0 %v30846_v12  ;;  %29452 = vmatpush3.bf16.msra.mxu1 %v30846_v12 }
0x2c3e   :  { %29453 = vmatprep.subr.bf16.mxu0 %v30699_v0  ;;  %29459 = vmatprep.subr.bf16.mxu1 %v30699_v0 }
0x2d0b   :  { %v7929_v24 = vpop.f32.mrb[104].mxu0  ;;  %v8003_v25 = vpop.f32.mrb[104].mxu1 }
0x2d0c   :  { %v7930_v29 = vadd.f32 %v31409_v16, %v7929_v24  ;;  %v8004_v30 = vadd.f32 %v31409_v16, %v8003_v25  ;;  %v26735_v31 = vpop.f32.mrb[105].mxu0  ;;  %v26742_v32 = vpop.f32.mrb[105].mxu1  ;;  %v31962_v25 = vld [vmem:[%s33810_s7] ss:$0 sm:$0xff] }
0x2d0e   :  { %v7933_v33 = vmax.f32 %v7930_v29, 0.0  ;;  %v8007_v34 = vmax.f32 %v8004_v30, 0.0 }
0x2d10   :  { %26752 = vmatmul.mubr.msk.f32.vlgmr.msra.gmra.mrb[106].mxu0 %vm282_vm2, %v7933_v33  ;;  %26763 = vmatmul.mubr.msk.f32.vlgmr.msra.gmra.mrb[106].mxu1 %vm282_vm2, %v8007_v34 }
0x2d11   :  { %29455 = vmatpush3.bf16.msra.mxu0 %v30870_v22  ;;  %29461 = vmatpush3.bf16.msra.mxu1 %v30870_v22 }
0x2d12   :  { %29456 = vmatprep.subr.bf16.mxu0 %v30699_v0  ;;  %29462 = vmatprep.subr.bf16.mxu1 %v30699_v0 }
0x2d13   :  { %26773 = vmatprep.mubr.msk.f32.mxu0 %vm30700_vm0, %v30701_v1  ;;  %26784 = vmatprep.mubr.msk.f32.mxu1 %vm30700_vm0, %v30701_v1 }
0x2d15   :  { %29458 = vmatpush3.bf16.msra.mxu0 %v30880_v27  ;;  %29464 = vmatpush3.bf16.msra.mxu1 %v30880_v27 }
0x2d16   :  { %29465 = vmatprep.subr.bf16.mxu0 %v30699_v0  ;;  %29471 = vmatprep.subr.bf16.mxu1 %v30699_v0 }
0x2de3   :  { %v8077_v16 = vpop.f32.mrb[106].mxu0  ;;  %v8151_v35 = vpop.f32.mrb[106].mxu1 }
0x2de4   :  { %v8078_v36 = vadd.f32 %v31430_v26, %v8077_v16  ;;  %v8152_v39 = vadd.f32 %v31430_v26, %v8151_v35  ;;  %v26753_v40 = vpop.f32.mrb[107].mxu0  ;;  %v26764_v41 = vpop.f32.mrb[107].mxu1 }
0x2de6   :  { %v8081_v43 = vmax.f32 %v8078_v36, 0.0  ;;  %v8155_v44 = vmax.f32 %v8152_v39, 0.0  ;;  %v31979_v36 = vld [vmem:[%s33812_s9] ss:$0 sm:$0xff] }
0x2de8   :  { %26774 = vmatmul.mubr.msk.f32.vlgmr.msra.gmra.mrb[108].mxu0 %vm282_vm2, %v8081_v43  ;;  %26785 = vmatmul.mubr.msk.f32.vlgmr.msra.gmra.mrb[108].mxu1 %vm282_vm2, %v8155_v44 }
0x2de9   :  { %29467 = vmatpush3.bf16.msra.mxu0 %v30907_v37  ;;  %29473 = vmatpush3.bf16.msra.mxu1 %v30907_v37 }
0x2dea   :  { %29468 = vmatprep.subr.bf16.mxu0 %v30699_v0  ;;  %29474 = vmatprep.subr.bf16.mxu1 %v30699_v0 }
0x2deb   :  { %26795 = vmatprep.mubr.msk.f32.mxu0 %vm30700_vm0, %v30701_v1  ;;  %26806 = vmatprep.mubr.msk.f32.mxu1 %vm30700_vm0, %v30701_v1 }
0x2ded   :  { %29470 = vmatpush3.bf16.msra.mxu0 %v30917_v42  ;;  %29476 = vmatpush3.bf16.msra.mxu1 %v30917_v42 }
0x2dee   :  { %29477 = vmatprep.subr.bf16.mxu0 %v30699_v0  ;;  %29480 = vmatprep.subr.bf16.mxu1 %v30699_v0 }
0x2ebb   :  { %v8225_v26 = vpop.f32.mrb[108].mxu0  ;;  %v8299_v45 = vpop.f32.mrb[108].mxu1 }
0x2ebc   :  { %v8226_v13 = vadd.f32 %v31451_v38, %v8225_v26  ;;  %v8300_v47 = vadd.f32 %v31451_v38, %v8299_v45  ;;  %v26775_v49 = vpop.f32.mrb[109].mxu0  ;;  %v26786_v50 = vpop.f32.mrb[109].mxu1 }
0x2ebe   :  { %v8229_v51 = vmax.f32 %v8226_v13, 0.0  ;;  %v8303_v52 = vmax.f32 %v8300_v47, 0.0 }
0x2ec0   :  { %26796 = vmatmul.mubr.msk.f32.vlgmr.msra.gmra.mrb[110].mxu0 %vm282_vm2, %v8229_v51  ;;  %26807 = vmatmul.mubr.msk.f32.vlgmr.msra.gmra.mrb[110].mxu1 %vm282_vm2, %v8303_v52 }
0x2ec1   :  { %29479 = vmatpush3.bf16.msra.mxu0 %v30820_v6  ;;  %29482 = vmatpush3.bf16.msra.mxu1 %v30820_v6 }
0x2ec2   :  { %26813 = vmatprep.mubr.msk.f32.mxu0 %vm30700_vm0, %v30701_v1  ;;  %26820 = vmatprep.mubr.msk.f32.mxu1 %vm30700_vm0, %v30701_v1 }
0x2ec3   :  { %29483 = vmatprep.subr.bf16.mxu0 %v30699_v0  ;;  %29489 = vmatprep.subr.bf16.mxu1 %v30699_v0 }
0x2f93   :  { %v8373_v38 = vpop.f32.mrb[110].mxu0  ;;  %v8446_v53 = vpop.f32.mrb[110].mxu1 }
0x2f94   :  { %v8374_v28 = vadd.f32 %v31468_v48, %v8373_v38  ;;  %v8447_v54 = vadd.f32 %v31468_v48, %v8446_v53  ;;  %v26797_v57 = vpop.f32.mrb[111].mxu0  ;;  %v26808_v58 = vpop.f32.mrb[111].mxu1 }
0x2f96   :  { %v8450_v59 = vmul.f32 %v8374_v28, %v30954_v55  ;;  %v8452_v60 = vmul.f32 %v8447_v54, %v30963_v63 }
0x2f98   :  { %v31899_v61 = vadd.f32 %v8450_v59, %v31829_v21  ;;  %v31902_v62 = vadd.f32 %v8452_v60, %v31832_v23 }
0x2f9a   :  { %26814 = vmatmul.mubr.msk.f32.vlgmr.msra.gmra.mrb[112].mxu0 %vm131_vm1, %v31899_v61  ;;  %26821 = vmatmul.mubr.msk.f32.vlgmr.msra.gmra.mrb[112].mxu1 %vm131_vm1, %v31902_v62 }
0x2f9b   :  { %29485 = vmatpush3.bf16.msra.mxu0 %v30822_v7  ;;  %29491 = vmatpush3.bf16.msra.mxu1 %v30822_v7 }
0x2f9c   :  { %29486 = vmatprep.subr.bf16.mxu0 %v30699_v0  ;;  %29492 = vmatprep.subr.bf16.mxu1 %v30699_v0 }
0x2f9d   :  { %26831 = vmatprep.mubr.msk.f32.mxu0 %vm30700_vm0, %v30701_v1  ;;  %26842 = vmatprep.mubr.msk.f32.mxu1 %vm30700_vm0, %v30701_v1 }
0x2f9f   :  { %29488 = vmatpush3.bf16.msra.mxu0 %v30846_v12  ;;  %29494 = vmatpush3.bf16.msra.mxu1 %v30846_v12 }
0x2fa0   :  { %29495 = vmatprep.subr.bf16.mxu0 %v30699_v0  ;;  %29501 = vmatprep.subr.bf16.mxu1 %v30699_v0 }
0x306d   :  { %v8523_v48 = vpop.f32.mrb[112].mxu0  ;;  %v8597_v46 = vpop.f32.mrb[112].mxu1 }
0x306e   :  { %v8524_v3 = vadd.f32 %v31920_v2, %v8523_v48  ;;  %v8598_v4 = vadd.f32 %v31920_v2, %v8597_v46  ;;  %v26815_v5 = vpop.f32.mrb[113].mxu0  ;;  %v26822_v8 = vpop.f32.mrb[113].mxu1 }
0x3070   :  { %v8527_v9 = vmax.f32 %v8524_v3, 0.0  ;;  %v8601_v10 = vmax.f32 %v8598_v4, 0.0 }
0x3072   :  { %26832 = vmatmul.mubr.msk.f32.vlgmr.msra.gmra.mrb[114].mxu0 %vm282_vm2, %v8527_v9  ;;  %26843 = vmatmul.mubr.msk.f32.vlgmr.msra.gmra.mrb[114].mxu1 %vm282_vm2, %v8601_v10 }
0x3073   :  { %29497 = vmatpush3.bf16.msra.mxu0 %v30870_v22  ;;  %29503 = vmatpush3.bf16.msra.mxu1 %v30870_v22 }
0x3074   :  { %29498 = vmatprep.subr.bf16.mxu0 %v30699_v0  ;;  %29504 = vmatprep.subr.bf16.mxu1 %v30699_v0 }
0x3075   :  { %26853 = vmatprep.mubr.msk.f32.mxu0 %vm30700_vm0, %v30701_v1  ;;  %26864 = vmatprep.mubr.msk.f32.mxu1 %vm30700_vm0, %v30701_v1 }
0x3077   :  { %29500 = vmatpush3.bf16.msra.mxu0 %v30880_v27  ;;  %29506 = vmatpush3.bf16.msra.mxu1 %v30880_v27 }
0x3078   :  { %29507 = vmatprep.subr.bf16.mxu0 %v30699_v0  ;;  %29513 = vmatprep.subr.bf16.mxu1 %v30699_v0 }
0x3145   :  { %v8671_v11 = vpop.f32.mrb[114].mxu0  ;;  %v8745_v14 = vpop.f32.mrb[114].mxu1 }
0x3146   :  { %v8672_v15 = vadd.f32 %v31941_v56, %v8671_v11  ;;  %v8746_v17 = vadd.f32 %v31941_v56, %v8745_v14  ;;  %v26833_v18 = vpop.f32.mrb[115].mxu0  ;;  %v26844_v19 = vpop.f32.mrb[115].mxu1 }
0x3148   :  { %v8675_v20 = vmax.f32 %v8672_v15, 0.0  ;;  %v8749_v21 = vmax.f32 %v8746_v17, 0.0 }
0x314a   :  { %26854 = vmatmul.mubr.msk.f32.vlgmr.msra.gmra.mrb[116].mxu0 %vm282_vm2, %v8675_v20  ;;  %26865 = vmatmul.mubr.msk.f32.vlgmr.msra.gmra.mrb[116].mxu1 %vm282_vm2, %v8749_v21 }
0x314b   :  { %29509 = vmatpush3.bf16.msra.mxu0 %v30907_v37  ;;  %29515 = vmatpush3.bf16.msra.mxu1 %v30907_v37 }
0x314c   :  { %29510 = vmatprep.subr.bf16.mxu0 %v30699_v0  ;;  %29516 = vmatprep.subr.bf16.mxu1 %v30699_v0 }
0x314d   :  { %26875 = vmatprep.mubr.msk.f32.mxu0 %vm30700_vm0, %v30701_v1  ;;  %26886 = vmatprep.mubr.msk.f32.mxu1 %vm30700_vm0, %v30701_v1 }
0x314f   :  { %29512 = vmatpush3.bf16.msra.mxu0 %v30917_v42  ;;  %29518 = vmatpush3.bf16.msra.mxu1 %v30917_v42 }
0x3150   :  { %29519 = vmatprep.subr.bf16.mxu0 %v30699_v0  ;;  %29522 = vmatprep.subr.bf16.mxu1 %v30699_v0 }
0x321d   :  { %v8819_v23 = vpop.f32.mrb[116].mxu0  ;;  %v8893_v24 = vpop.f32.mrb[116].mxu1 }
0x321e   :  { %v8820_v29 = vadd.f32 %v31962_v25, %v8819_v23  ;;  %v8894_v30 = vadd.f32 %v31962_v25, %v8893_v24  ;;  %v26855_v31 = vpop.f32.mrb[117].mxu0  ;;  %v26866_v32 = vpop.f32.mrb[117].mxu1 }
0x3220   :  { %v8823_v33 = vmax.f32 %v8820_v29, 0.0  ;;  %v8897_v34 = vmax.f32 %v8894_v30, 0.0 }
0x3222   :  { %26876 = vmatmul.mubr.msk.f32.vlgmr.msra.gmra.mrb[118].mxu0 %vm282_vm2, %v8823_v33  ;;  %26887 = vmatmul.mubr.msk.f32.vlgmr.msra.gmra.mrb[118].mxu1 %vm282_vm2, %v8897_v34 }
0x3223   :  { %29521 = vmatpush3.bf16.msra.mxu0 %v30820_v6  ;;  %29524 = vmatpush3.bf16.msra.mxu1 %v30820_v6 }
0x3224   :  { %26893 = vmatprep.mubr.msk.f32.mxu0 %vm30700_vm0, %v30701_v1  ;;  %26900 = vmatprep.mubr.msk.f32.mxu1 %vm30700_vm0, %v30701_v1 }
0x3225   :  { %29525 = vmatprep.subr.bf16.mxu0 %v30699_v0  ;;  %29531 = vmatprep.subr.bf16.mxu1 %v30699_v0 }
0x32f5   :  { %v8967_v16 = vpop.f32.mrb[118].mxu0  ;;  %v9040_v35 = vpop.f32.mrb[118].mxu1 }
0x32f6   :  { %v8968_v39 = vadd.f32 %v31979_v36, %v8967_v16  ;;  %v9041_v40 = vadd.f32 %v31979_v36, %v9040_v35  ;;  %v26877_v41 = vpop.f32.mrb[119].mxu0  ;;  %v26888_v43 = vpop.f32.mrb[119].mxu1 }
0x32f8   :  { %v9044_v44 = vmul.f32 %v8968_v39, %v30954_v55  ;;  %v9046_v26 = vmul.f32 %v9041_v40, %v30963_v63 }
0x32fa   :  { %v31986_v45 = vadd.f32 %v9044_v44, %v31899_v61  ;;  %v31989_v13 = vadd.f32 %v9046_v26, %v31902_v62 }
0x32fc   :  { %26894 = vmatmul.mubr.msk.f32.vlgmr.msra.gmra.mrb[120].mxu0 %vm131_vm1, %v31986_v45  ;;  %26901 = vmatmul.mubr.msk.f32.vlgmr.msra.gmra.mrb[120].mxu1 %vm131_vm1, %v31989_v13 }
0x32fd   :  { %29527 = vmatpush3.bf16.msra.mxu0 %v30822_v7  ;;  %29533 = vmatpush3.bf16.msra.mxu1 %v30822_v7 }
0x32fe   :  { %29528 = vmatprep.subr.bf16.mxu0 %v30699_v0  ;;  %29534 = vmatprep.subr.bf16.mxu1 %v30699_v0 }
0x32ff   :  { %26911 = vmatprep.mubr.msk.f32.mxu0 %vm30700_vm0, %v30701_v1  ;;  %26922 = vmatprep.mubr.msk.f32.mxu1 %vm30700_vm0, %v30701_v1 }
0x3301   :  { %29530 = vmatpush3.bf16.msra.mxu0 %v30846_v12  ;;  %29536 = vmatpush3.bf16.msra.mxu1 %v30846_v12 }
0x3302   :  { %29537 = vmatprep.subr.bf16.mxu0 %v30699_v0  ;;  %29543 = vmatprep.subr.bf16.mxu1 %v30699_v0 }
0x33cf   :  { %v9117_v47 = vpop.f32.mrb[120].mxu0  ;;  %v9191_v49 = vpop.f32.mrb[120].mxu1 }
0x33d0   :  { %v9118_v50 = vadd.f32 %v31920_v2, %v9117_v47  ;;  %v9192_v51 = vadd.f32 %v31920_v2, %v9191_v49  ;;  %v26895_v52 = vpop.f32.mrb[121].mxu0  ;;  %v26902_v38 = vpop.f32.mrb[121].mxu1 }
0x33d2   :  { %v9121_v53 = vmax.f32 %v9118_v50, 0.0  ;;  %v9195_v28 = vmax.f32 %v9192_v51, 0.0 }
0x33d4   :  { %26912 = vmatmul.mubr.msk.f32.vlgmr.msra.gmra.mrb[122].mxu0 %vm282_vm2, %v9121_v53  ;;  %26923 = vmatmul.mubr.msk.f32.vlgmr.msra.gmra.mrb[122].mxu1 %vm282_vm2, %v9195_v28 }
0x33d5   :  { %29539 = vmatpush3.bf16.msra.mxu0 %v30870_v22  ;;  %29545 = vmatpush3.bf16.msra.mxu1 %v30870_v22 }
0x33d6   :  { %29540 = vmatprep.subr.bf16.mxu0 %v30699_v0  ;;  %29546 = vmatprep.subr.bf16.mxu1 %v30699_v0 }
0x33d7   :  { %26933 = vmatprep.mubr.msk.f32.mxu0 %vm30700_vm0, %v30701_v1  ;;  %26944 = vmatprep.mubr.msk.f32.mxu1 %vm30700_vm0, %v30701_v1 }
0x33d9   :  { %29542 = vmatpush3.bf16.msra.mxu0 %v30880_v27  ;;  %29548 = vmatpush3.bf16.msra.mxu1 %v30880_v27 }
0x33da   :  { %29549 = vmatprep.subr.bf16.mxu0 %v30699_v0  ;;  %29555 = vmatprep.subr.bf16.mxu1 %v30699_v0 }
0x34a7   :  { %v9265_v54 = vpop.f32.mrb[122].mxu0  ;;  %v9339_v57 = vpop.f32.mrb[122].mxu1 }
0x34a8   :  { %v9266_v58 = vadd.f32 %v31941_v56, %v9265_v54  ;;  %v9340_v59 = vadd.f32 %v31941_v56, %v9339_v57  ;;  %v26913_v60 = vpop.f32.mrb[123].mxu0  ;;  %v26924_v61 = vpop.f32.mrb[123].mxu1 }
0x34aa   :  { %v9269_v62 = vmax.f32 %v9266_v58, 0.0  ;;  %v9343_v48 = vmax.f32 %v9340_v59, 0.0 }
0x34ac   :  { %26934 = vmatmul.mubr.msk.f32.vlgmr.msra.gmra.mrb[124].mxu0 %vm282_vm2, %v9269_v62  ;;  %26945 = vmatmul.mubr.msk.f32.vlgmr.msra.gmra.mrb[124].mxu1 %vm282_vm2, %v9343_v48 }
0x34ad   :  { %29551 = vmatpush3.bf16.msra.mxu0 %v30907_v37  ;;  %29557 = vmatpush3.bf16.msra.mxu1 %v30907_v37 }
0x34ae   :  { %29552 = vmatprep.subr.bf16.mxu0 %v30699_v0  ;;  %29558 = vmatprep.subr.bf16.mxu1 %v30699_v0 }
0x34af   :  { %26955 = vmatprep.mubr.msk.f32.mxu0 %vm30700_vm0, %v30701_v1  ;;  %26966 = vmatprep.mubr.msk.f32.mxu1 %vm30700_vm0, %v30701_v1 }
0x34b1   :  { %29554 = vmatpush3.bf16.msra.mxu0 %v30917_v42  ;;  %29560 = vmatpush3.bf16.msra.mxu1 %v30917_v42 }
0x34b2   :  { %29561 = vmatprep.subr.bf16.mxu0 %v30699_v0  ;;  %29564 = vmatprep.subr.bf16.mxu1 %v30699_v0 }
0x357f   :  { %v9413_v46 = vpop.f32.mrb[124].mxu0  ;;  %v9487_v3 = vpop.f32.mrb[124].mxu1 }
0x3580   :  { %v9414_v4 = vadd.f32 %v31962_v25, %v9413_v46  ;;  %v9488_v5 = vadd.f32 %v31962_v25, %v9487_v3  ;;  %v26935_v8 = vpop.f32.mrb[125].mxu0  ;;  %v26946_v9 = vpop.f32.mrb[125].mxu1 }
0x3582   :  { %v9417_v10 = vmax.f32 %v9414_v4, 0.0  ;;  %v9491_v11 = vmax.f32 %v9488_v5, 0.0 }
0x3584   :  { %26956 = vmatmul.mubr.msk.f32.vlgmr.msra.gmra.mrb[126].mxu0 %vm282_vm2, %v9417_v10  ;;  %26967 = vmatmul.mubr.msk.f32.vlgmr.msra.gmra.mrb[126].mxu1 %vm282_vm2, %v9491_v11 }
0x3585   :  { %29563 = vmatpush3.bf16.msra.mxu0 %v30820_v6  ;;  %29566 = vmatpush3.bf16.msra.mxu1 %v30820_v6 }
0x3586   :  { %26973 = vmatprep.mubr.msk.f32.mxu0 %vm30700_vm0, %v30701_v1  ;;  %26980 = vmatprep.mubr.msk.f32.mxu1 %vm30700_vm0, %v30701_v1 }
0x3587   :  { %29567 = vmatprep.subr.bf16.mxu0 %v30699_v0  ;;  %29573 = vmatprep.subr.bf16.mxu1 %v30699_v0 }
0x3657   :  { %v9561_v14 = vpop.f32.mrb[126].mxu0  ;;  %v9634_v15 = vpop.f32.mrb[126].mxu1 }
0x3658   :  { %v9562_v17 = vadd.f32 %v31979_v36, %v9561_v14  ;;  %v9635_v18 = vadd.f32 %v31979_v36, %v9634_v15  ;;  %v26957_v19 = vpop.f32.mrb[127].mxu0  ;;  %v26968_v20 = vpop.f32.mrb[127].mxu1 }
0x365a   :  { %v9638_v21 = vmul.f32 %v9562_v17, %v30954_v55  ;;  %v9640_v23 = vmul.f32 %v9635_v18, %v30963_v63 }
0x365c   :  { %v32056_v24 = vadd.f32 %v9638_v21, %v31986_v45  ;;  %v32059_v29 = vadd.f32 %v9640_v23, %v31989_v13 }
0x365e   :  { %26974 = vmatmul.mubr.msk.f32.vlgmr.msra.gmra.mrb[128].mxu0 %vm131_vm1, %v32056_v24  ;;  %26981 = vmatmul.mubr.msk.f32.vlgmr.msra.gmra.mrb[128].mxu1 %vm131_vm1, %v32059_v29 }
0x365f   :  { %29569 = vmatpush3.bf16.msra.mxu0 %v30822_v7  ;;  %29575 = vmatpush3.bf16.msra.mxu1 %v30822_v7 }
0x3660   :  { %29570 = vmatprep.subr.bf16.mxu0 %v30699_v0  ;;  %29576 = vmatprep.subr.bf16.mxu1 %v30699_v0 }
0x3661   :  { %26991 = vmatprep.mubr.msk.f32.mxu0 %vm30700_vm0, %v30701_v1  ;;  %27002 = vmatprep.mubr.msk.f32.mxu1 %vm30700_vm0, %v30701_v1 }
0x3663   :  { %29572 = vmatpush3.bf16.msra.mxu0 %v30846_v12  ;;  %29578 = vmatpush3.bf16.msra.mxu1 %v30846_v12 }
0x3664   :  { %29579 = vmatprep.subr.bf16.mxu0 %v30699_v0  ;;  %29585 = vmatprep.subr.bf16.mxu1 %v30699_v0 }
0x3731   :  { %v9711_v30 = vpop.f32.mrb[128].mxu0  ;;  %v9785_v31 = vpop.f32.mrb[128].mxu1 }
0x3732   :  { %v9712_v32 = vadd.f32 %v31920_v2, %v9711_v30  ;;  %v9786_v33 = vadd.f32 %v31920_v2, %v9785_v31  ;;  %v26975_v34 = vpop.f32.mrb[129].mxu0  ;;  %v26982_v16 = vpop.f32.mrb[129].mxu1 }
0x3734   :  { %v9715_v35 = vmax.f32 %v9712_v32, 0.0  ;;  %v9789_v39 = vmax.f32 %v9786_v33, 0.0 }
0x3736   :  { %26992 = vmatmul.mubr.msk.f32.vlgmr.msra.gmra.mrb[130].mxu0 %vm282_vm2, %v9715_v35  ;;  %27003 = vmatmul.mubr.msk.f32.vlgmr.msra.gmra.mrb[130].mxu1 %vm282_vm2, %v9789_v39 }
0x3737   :  { %29581 = vmatpush3.bf16.msra.mxu0 %v30870_v22  ;;  %29587 = vmatpush3.bf16.msra.mxu1 %v30870_v22 }
0x3738   :  { %29582 = vmatprep.subr.bf16.mxu0 %v30699_v0  ;;  %29588 = vmatprep.subr.bf16.mxu1 %v30699_v0 }
0x3739   :  { %27013 = vmatprep.mubr.msk.f32.mxu0 %vm30700_vm0, %v30701_v1  ;;  %27024 = vmatprep.mubr.msk.f32.mxu1 %vm30700_vm0, %v30701_v1 }
0x373b   :  { %29584 = vmatpush3.bf16.msra.mxu0 %v30880_v27  ;;  %29590 = vmatpush3.bf16.msra.mxu1 %v30880_v27 }
0x373c   :  { %29591 = vmatprep.subr.bf16.mxu0 %v30699_v0  ;;  %29597 = vmatprep.subr.bf16.mxu1 %v30699_v0 }
0x3809   :  { %v9859_v40 = vpop.f32.mrb[130].mxu0  ;;  %v9933_v41 = vpop.f32.mrb[130].mxu1 }
0x380a   :  { %v9860_v43 = vadd.f32 %v31941_v56, %v9859_v40  ;;  %v9934_v44 = vadd.f32 %v31941_v56, %v9933_v41  ;;  %v26993_v26 = vpop.f32.mrb[131].mxu0  ;;  %v27004_v45 = vpop.f32.mrb[131].mxu1 }
0x380c   :  { %v9863_v13 = vmax.f32 %v9860_v43, 0.0  ;;  %v9937_v47 = vmax.f32 %v9934_v44, 0.0 }
0x380e   :  { %27014 = vmatmul.mubr.msk.f32.vlgmr.msra.gmra.mrb[132].mxu0 %vm282_vm2, %v9863_v13  ;;  %27025 = vmatmul.mubr.msk.f32.vlgmr.msra.gmra.mrb[132].mxu1 %vm282_vm2, %v9937_v47 }
0x380f   :  { %29593 = vmatpush3.bf16.msra.mxu0 %v30907_v37  ;;  %29599 = vmatpush3.bf16.msra.mxu1 %v30907_v37 }
0x3810   :  { %29594 = vmatprep.subr.bf16.mxu0 %v30699_v0  ;;  %29600 = vmatprep.subr.bf16.mxu1 %v30699_v0 }
0x3811   :  { %27035 = vmatprep.mubr.msk.f32.mxu0 %vm30700_vm0, %v30701_v1  ;;  %27046 = vmatprep.mubr.msk.f32.mxu1 %vm30700_vm0, %v30701_v1 }
0x3813   :  { %29596 = vmatpush3.bf16.msra.mxu0 %v30917_v42  ;;  %29602 = vmatpush3.bf16.msra.mxu1 %v30917_v42 }
0x3814   :  { %29603 = vmatprep.subr.bf16.mxu0 %v30699_v0  ;;  %29606 = vmatprep.subr.bf16.mxu1 %v30699_v0 }
0x38e1   :  { %v10007_v49 = vpop.f32.mrb[132].mxu0  ;;  %v10081_v50 = vpop.f32.mrb[132].mxu1 }
0x38e2   :  { %v10008_v51 = vadd.f32 %v31962_v25, %v10007_v49  ;;  %v10082_v52 = vadd.f32 %v31962_v25, %v10081_v50  ;;  %v27015_v38 = vpop.f32.mrb[133].mxu0  ;;  %v27026_v53 = vpop.f32.mrb[133].mxu1 }
0x38e4   :  { %v10011_v28 = vmax.f32 %v10008_v51, 0.0  ;;  %v10085_v54 = vmax.f32 %v10082_v52, 0.0 }
0x38e6   :  { %27036 = vmatmul.mubr.msk.f32.vlgmr.msra.gmra.mrb[134].mxu0 %vm282_vm2, %v10011_v28  ;;  %27047 = vmatmul.mubr.msk.f32.vlgmr.msra.gmra.mrb[134].mxu1 %vm282_vm2, %v10085_v54 }
0x38e7   :  { %29605 = vmatpush3.bf16.msra.mxu0 %v30820_v6  ;;  %29608 = vmatpush3.bf16.msra.mxu1 %v30820_v6 }
0x38e8   :  { %27053 = vmatprep.mubr.msk.f32.mxu0 %vm30700_vm0, %v30701_v1  ;;  %27060 = vmatprep.mubr.msk.f32.mxu1 %vm30700_vm0, %v30701_v1 }
0x38e9   :  { %29609 = vmatprep.subr.bf16.mxu0 %v30699_v0  ;;  %29615 = vmatprep.subr.bf16.mxu1 %v30699_v0 }
0x39b9   :  { %v10155_v57 = vpop.f32.mrb[134].mxu0  ;;  %v10228_v58 = vpop.f32.mrb[134].mxu1 }
0x39ba   :  { %v10156_v59 = vadd.f32 %v31979_v36, %v10155_v57  ;;  %v10229_v60 = vadd.f32 %v31979_v36, %v10228_v58  ;;  %v27037_v61 = vpop.f32.mrb[135].mxu0  ;;  %v27048_v62 = vpop.f32.mrb[135].mxu1 }
0x39bc   :  { %v10232_v48 = vmul.f32 %v10156_v59, %v30954_v55  ;;  %v10234_v46 = vmul.f32 %v10229_v60, %v30963_v63 }
0x39be   :  { %v32126_v3 = vadd.f32 %v10232_v48, %v32056_v24  ;;  %v32129_v4 = vadd.f32 %v10234_v46, %v32059_v29 }
0x39c0   :  { %27054 = vmatmul.mubr.msk.f32.vlgmr.msra.gmra.mrb[136].mxu0 %vm131_vm1, %v32126_v3  ;;  %27061 = vmatmul.mubr.msk.f32.vlgmr.msra.gmra.mrb[136].mxu1 %vm131_vm1, %v32129_v4 }
0x39c1   :  { %29611 = vmatpush3.bf16.msra.mxu0 %v30822_v7  ;;  %29617 = vmatpush3.bf16.msra.mxu1 %v30822_v7 }
0x39c2   :  { %29612 = vmatprep.subr.bf16.mxu0 %v30699_v0  ;;  %29618 = vmatprep.subr.bf16.mxu1 %v30699_v0 }
0x39c3   :  { %27071 = vmatprep.mubr.msk.f32.mxu0 %vm30700_vm0, %v30701_v1  ;;  %27082 = vmatprep.mubr.msk.f32.mxu1 %vm30700_vm0, %v30701_v1 }
0x39c5   :  { %29614 = vmatpush3.bf16.msra.mxu0 %v30846_v12  ;;  %29620 = vmatpush3.bf16.msra.mxu1 %v30846_v12 }
0x39c6   :  { %29621 = vmatprep.subr.bf16.mxu0 %v30699_v0  ;;  %29627 = vmatprep.subr.bf16.mxu1 %v30699_v0 }
0x3a93   :  { %v10305_v5 = vpop.f32.mrb[136].mxu0  ;;  %v10379_v8 = vpop.f32.mrb[136].mxu1 }
0x3a94   :  { %v10306_v9 = vadd.f32 %v31920_v2, %v10305_v5  ;;  %v10380_v10 = vadd.f32 %v31920_v2, %v10379_v8  ;;  %v27055_v11 = vpop.f32.mrb[137].mxu0  ;;  %v27062_v14 = vpop.f32.mrb[137].mxu1 }
0x3a96   :  { %v10309_v15 = vmax.f32 %v10306_v9, 0.0  ;;  %v10383_v17 = vmax.f32 %v10380_v10, 0.0 }
0x3a98   :  { %27072 = vmatmul.mubr.msk.f32.vlgmr.msra.gmra.mrb[138].mxu0 %vm282_vm2, %v10309_v15  ;;  %27083 = vmatmul.mubr.msk.f32.vlgmr.msra.gmra.mrb[138].mxu1 %vm282_vm2, %v10383_v17 }
0x3a99   :  { %29623 = vmatpush3.bf16.msra.mxu0 %v30870_v22  ;;  %29629 = vmatpush3.bf16.msra.mxu1 %v30870_v22 }
0x3a9a   :  { %29624 = vmatprep.subr.bf16.mxu0 %v30699_v0  ;;  %29630 = vmatprep.subr.bf16.mxu1 %v30699_v0 }
0x3a9b   :  { %27093 = vmatprep.mubr.msk.f32.mxu0 %vm30700_vm0, %v30701_v1  ;;  %27104 = vmatprep.mubr.msk.f32.mxu1 %vm30700_vm0, %v30701_v1 }
0x3a9d   :  { %29626 = vmatpush3.bf16.msra.mxu0 %v30880_v27  ;;  %29632 = vmatpush3.bf16.msra.mxu1 %v30880_v27 }
0x3a9e   :  { %29633 = vmatprep.subr.bf16.mxu0 %v30699_v0  ;;  %29639 = vmatprep.subr.bf16.mxu1 %v30699_v0 }
0x3b6b   :  { %v10453_v18 = vpop.f32.mrb[138].mxu0  ;;  %v10527_v19 = vpop.f32.mrb[138].mxu1 }
0x3b6c   :  { %v10454_v20 = vadd.f32 %v31941_v56, %v10453_v18  ;;  %v10528_v21 = vadd.f32 %v31941_v56, %v10527_v19  ;;  %v27073_v23 = vpop.f32.mrb[139].mxu0  ;;  %v27084_v24 = vpop.f32.mrb[139].mxu1 }
0x3b6e   :  { %v10457_v29 = vmax.f32 %v10454_v20, 0.0  ;;  %v10531_v30 = vmax.f32 %v10528_v21, 0.0 }
0x3b70   :  { %27094 = vmatmul.mubr.msk.f32.vlgmr.msra.gmra.mrb[140].mxu0 %vm282_vm2, %v10457_v29  ;;  %27105 = vmatmul.mubr.msk.f32.vlgmr.msra.gmra.mrb[140].mxu1 %vm282_vm2, %v10531_v30 }
0x3b71   :  { %29635 = vmatpush3.bf16.msra.mxu0 %v30907_v37  ;;  %29641 = vmatpush3.bf16.msra.mxu1 %v30907_v37 }
0x3b72   :  { %29636 = vmatprep.subr.bf16.mxu0 %v30699_v0  ;;  %29642 = vmatprep.subr.bf16.mxu1 %v30699_v0 }
0x3b73   :  { %27115 = vmatprep.mubr.msk.f32.mxu0 %vm30700_vm0, %v30701_v1  ;;  %27126 = vmatprep.mubr.msk.f32.mxu1 %vm30700_vm0, %v30701_v1 }
0x3b75   :  { %29638 = vmatpush3.bf16.msra.mxu0 %v30917_v42  ;;  %29644 = vmatpush3.bf16.msra.mxu1 %v30917_v42 }
0x3b76   :  { %29645 = vmatprep.subr.bf16.mxu0 %v30699_v0  ;;  %29648 = vmatprep.subr.bf16.mxu1 %v30699_v0 }
0x3c43   :  { %v10601_v31 = vpop.f32.mrb[140].mxu0  ;;  %v10675_v32 = vpop.f32.mrb[140].mxu1 }
0x3c44   :  { %v10602_v33 = vadd.f32 %v31962_v25, %v10601_v31  ;;  %v10676_v34 = vadd.f32 %v31962_v25, %v10675_v32  ;;  %v27095_v16 = vpop.f32.mrb[141].mxu0  ;;  %v27106_v35 = vpop.f32.mrb[141].mxu1 }
0x3c46   :  { %v10605_v39 = vmax.f32 %v10602_v33, 0.0  ;;  %v10679_v40 = vmax.f32 %v10676_v34, 0.0 }
0x3c48   :  { %27116 = vmatmul.mubr.msk.f32.vlgmr.msra.gmra.mrb[142].mxu0 %vm282_vm2, %v10605_v39  ;;  %27127 = vmatmul.mubr.msk.f32.vlgmr.msra.gmra.mrb[142].mxu1 %vm282_vm2, %v10679_v40 }
0x3c49   :  { %29647 = vmatpush3.bf16.msra.mxu0 %v30820_v6  ;;  %29650 = vmatpush3.bf16.msra.mxu1 %v30820_v6 }
0x3c4a   :  { %27133 = vmatprep.mubr.msk.f32.mxu0 %vm30700_vm0, %v30701_v1  ;;  %27140 = vmatprep.mubr.msk.f32.mxu1 %vm30700_vm0, %v30701_v1 }
0x3c4b   :  { %29651 = vmatprep.subr.bf16.mxu0 %v30699_v0  ;;  %29657 = vmatprep.subr.bf16.mxu1 %v30699_v0 }
0x3d1b   :  { %v10749_v41 = vpop.f32.mrb[142].mxu0  ;;  %v10822_v43 = vpop.f32.mrb[142].mxu1 }
0x3d1c   :  { %v10750_v44 = vadd.f32 %v31979_v36, %v10749_v41  ;;  %v10823_v26 = vadd.f32 %v31979_v36, %v10822_v43  ;;  %v27117_v45 = vpop.f32.mrb[143].mxu0  ;;  %v27128_v13 = vpop.f32.mrb[143].mxu1 }
0x3d1e   :  { %v10826_v47 = vmul.f32 %v10750_v44, %v30954_v55  ;;  %v10828_v49 = vmul.f32 %v10823_v26, %v30963_v63 }
0x3d20   :  { %v32196_v50 = vadd.f32 %v10826_v47, %v32126_v3  ;;  %v32199_v51 = vadd.f32 %v10828_v49, %v32129_v4 }
0x3d22   :  { %27134 = vmatmul.mubr.msk.f32.vlgmr.msra.gmra.mrb[144].mxu0 %vm131_vm1, %v32196_v50  ;;  %27141 = vmatmul.mubr.msk.f32.vlgmr.msra.gmra.mrb[144].mxu1 %vm131_vm1, %v32199_v51 }
0x3d23   :  { %29653 = vmatpush3.bf16.msra.mxu0 %v30822_v7  ;;  %29659 = vmatpush3.bf16.msra.mxu1 %v30822_v7 }
0x3d24   :  { %29654 = vmatprep.subr.bf16.mxu0 %v30699_v0  ;;  %29660 = vmatprep.subr.bf16.mxu1 %v30699_v0 }
0x3d25   :  { %27151 = vmatprep.mubr.msk.f32.mxu0 %vm30700_vm0, %v30701_v1  ;;  %27162 = vmatprep.mubr.msk.f32.mxu1 %vm30700_vm0, %v30701_v1 }
0x3d27   :  { %29656 = vmatpush3.bf16.msra.mxu0 %v30846_v12  ;;  %29662 = vmatpush3.bf16.msra.mxu1 %v30846_v12 }
0x3d28   :  { %29663 = vmatprep.subr.bf16.mxu0 %v30699_v0  ;;  %29669 = vmatprep.subr.bf16.mxu1 %v30699_v0 }
0x3df5   :  { %v10899_v52 = vpop.f32.mrb[144].mxu0  ;;  %v10973_v38 = vpop.f32.mrb[144].mxu1 }
0x3df6   :  { %v10900_v53 = vadd.f32 %v31920_v2, %v10899_v52  ;;  %v10974_v28 = vadd.f32 %v31920_v2, %v10973_v38  ;;  %v27135_v54 = vpop.f32.mrb[145].mxu0  ;;  %v27142_v57 = vpop.f32.mrb[145].mxu1 }
0x3df8   :  { %v10903_v58 = vmax.f32 %v10900_v53, 0.0  ;;  %v10977_v59 = vmax.f32 %v10974_v28, 0.0 }
0x3dfa   :  { %27152 = vmatmul.mubr.msk.f32.vlgmr.msra.gmra.mrb[146].mxu0 %vm282_vm2, %v10903_v58  ;;  %27163 = vmatmul.mubr.msk.f32.vlgmr.msra.gmra.mrb[146].mxu1 %vm282_vm2, %v10977_v59 }
0x3dfb   :  { %29665 = vmatpush3.bf16.msra.mxu0 %v30870_v22  ;;  %29671 = vmatpush3.bf16.msra.mxu1 %v30870_v22 }
0x3dfc   :  { %29666 = vmatprep.subr.bf16.mxu0 %v30699_v0  ;;  %29672 = vmatprep.subr.bf16.mxu1 %v30699_v0 }
0x3dfd   :  { %27173 = vmatprep.mubr.msk.f32.mxu0 %vm30700_vm0, %v30701_v1  ;;  %27184 = vmatprep.mubr.msk.f32.mxu1 %vm30700_vm0, %v30701_v1 }
0x3dff   :  { %29668 = vmatpush3.bf16.msra.mxu0 %v30880_v27  ;;  %29674 = vmatpush3.bf16.msra.mxu1 %v30880_v27 }
0x3e00   :  { %29675 = vmatprep.subr.bf16.mxu0 %v30699_v0  ;;  %29681 = vmatprep.subr.bf16.mxu1 %v30699_v0 }
0x3ecd   :  { %v11047_v60 = vpop.f32.mrb[146].mxu0  ;;  %v11121_v61 = vpop.f32.mrb[146].mxu1 }
0x3ece   :  { %v11048_v62 = vadd.f32 %v31941_v56, %v11047_v60  ;;  %v11122_v48 = vadd.f32 %v31941_v56, %v11121_v61  ;;  %v27153_v46 = vpop.f32.mrb[147].mxu0  ;;  %v27164_v3 = vpop.f32.mrb[147].mxu1 }
0x3ed0   :  { %v11051_v4 = vmax.f32 %v11048_v62, 0.0  ;;  %v11125_v5 = vmax.f32 %v11122_v48, 0.0 }
0x3ed2   :  { %27174 = vmatmul.mubr.msk.f32.vlgmr.msra.gmra.mrb[148].mxu0 %vm282_vm2, %v11051_v4  ;;  %27185 = vmatmul.mubr.msk.f32.vlgmr.msra.gmra.mrb[148].mxu1 %vm282_vm2, %v11125_v5 }
0x3ed3   :  { %29677 = vmatpush3.bf16.msra.mxu0 %v30907_v37  ;;  %29683 = vmatpush3.bf16.msra.mxu1 %v30907_v37 }
0x3ed4   :  { %29678 = vmatprep.subr.bf16.mxu0 %v30699_v0  ;;  %29684 = vmatprep.subr.bf16.mxu1 %v30699_v0 }
0x3ed5   :  { %27195 = vmatprep.mubr.msk.f32.mxu0 %vm30700_vm0, %v30701_v1  ;;  %27206 = vmatprep.mubr.msk.f32.mxu1 %vm30700_vm0, %v30701_v1 }
0x3ed7   :  { %29680 = vmatpush3.bf16.msra.mxu0 %v30917_v42  ;;  %29686 = vmatpush3.bf16.msra.mxu1 %v30917_v42 }
0x3ed8   :  { %29687 = vmatprep.subr.bf16.mxu0 %v30699_v0  ;;  %29690 = vmatprep.subr.bf16.mxu1 %v30699_v0 }
0x3fa5   :  { %v11195_v8 = vpop.f32.mrb[148].mxu0  ;;  %v11269_v9 = vpop.f32.mrb[148].mxu1 }
0x3fa6   :  { %v11196_v10 = vadd.f32 %v31962_v25, %v11195_v8  ;;  %v11270_v11 = vadd.f32 %v31962_v25, %v11269_v9  ;;  %v27175_v14 = vpop.f32.mrb[149].mxu0  ;;  %v27186_v15 = vpop.f32.mrb[149].mxu1 }
0x3fa8   :  { %v11199_v17 = vmax.f32 %v11196_v10, 0.0  ;;  %v11273_v18 = vmax.f32 %v11270_v11, 0.0 }
0x3faa   :  { %27196 = vmatmul.mubr.msk.f32.vlgmr.msra.gmra.mrb[150].mxu0 %vm282_vm2, %v11199_v17  ;;  %27207 = vmatmul.mubr.msk.f32.vlgmr.msra.gmra.mrb[150].mxu1 %vm282_vm2, %v11273_v18 }
0x3fab   :  { %29689 = vmatpush3.bf16.msra.mxu0 %v30820_v6  ;;  %29692 = vmatpush3.bf16.msra.mxu1 %v30820_v6 }
0x3fac   :  { %27213 = vmatprep.mubr.msk.f32.mxu0 %vm30700_vm0, %v30701_v1  ;;  %27220 = vmatprep.mubr.msk.f32.mxu1 %vm30700_vm0, %v30701_v1 }
0x3fad   :  { %29693 = vmatprep.subr.bf16.mxu0 %v30699_v0  ;;  %29699 = vmatprep.subr.bf16.mxu1 %v30699_v0 }
0x407d   :  { %v11343_v19 = vpop.f32.mrb[150].mxu0  ;;  %v11416_v20 = vpop.f32.mrb[150].mxu1 }
0x407e   :  { %v11344_v21 = vadd.f32 %v31979_v36, %v11343_v19  ;;  %v11417_v23 = vadd.f32 %v31979_v36, %v11416_v20  ;;  %v27197_v24 = vpop.f32.mrb[151].mxu0  ;;  %v27208_v29 = vpop.f32.mrb[151].mxu1 }
0x4080   :  { %v11420_v30 = vmul.f32 %v11344_v21, %v30954_v55  ;;  %v11422_v31 = vmul.f32 %v11417_v23, %v30963_v63 }
0x4082   :  { %v32266_v32 = vadd.f32 %v11420_v30, %v32196_v50  ;;  %v32269_v33 = vadd.f32 %v11422_v31, %v32199_v51 }
0x4084   :  { %27214 = vmatmul.mubr.msk.f32.vlgmr.msra.gmra.mrb[152].mxu0 %vm131_vm1, %v32266_v32  ;;  %27221 = vmatmul.mubr.msk.f32.vlgmr.msra.gmra.mrb[152].mxu1 %vm131_vm1, %v32269_v33 }
0x4085   :  { %29695 = vmatpush3.bf16.msra.mxu0 %v30822_v7  ;;  %29701 = vmatpush3.bf16.msra.mxu1 %v30822_v7 }
0x4086   :  { %29696 = vmatprep.subr.bf16.mxu0 %v30699_v0  ;;  %29702 = vmatprep.subr.bf16.mxu1 %v30699_v0 }
0x4087   :  { %27231 = vmatprep.mubr.msk.f32.mxu0 %vm30700_vm0, %v30701_v1  ;;  %27242 = vmatprep.mubr.msk.f32.mxu1 %vm30700_vm0, %v30701_v1 }
0x4089   :  { %29698 = vmatpush3.bf16.msra.mxu0 %v30846_v12  ;;  %29704 = vmatpush3.bf16.msra.mxu1 %v30846_v12 }
0x408a   :  { %29705 = vmatprep.subr.bf16.mxu0 %v30699_v0  ;;  %29711 = vmatprep.subr.bf16.mxu1 %v30699_v0 }
0x4157   :  { %v11493_v34 = vpop.f32.mrb[152].mxu0  ;;  %v11567_v16 = vpop.f32.mrb[152].mxu1 }
0x4158   :  { %v11494_v35 = vadd.f32 %v31920_v2, %v11493_v34  ;;  %v11568_v39 = vadd.f32 %v31920_v2, %v11567_v16  ;;  %v27215_v40 = vpop.f32.mrb[153].mxu0  ;;  %v27222_v41 = vpop.f32.mrb[153].mxu1 }
0x415a   :  { %v11497_v43 = vmax.f32 %v11494_v35, 0.0  ;;  %v11571_v44 = vmax.f32 %v11568_v39, 0.0 }
0x415c   :  { %27232 = vmatmul.mubr.msk.f32.vlgmr.msra.gmra.mrb[154].mxu0 %vm282_vm2, %v11497_v43  ;;  %27243 = vmatmul.mubr.msk.f32.vlgmr.msra.gmra.mrb[154].mxu1 %vm282_vm2, %v11571_v44 }
0x415d   :  { %29707 = vmatpush3.bf16.msra.mxu0 %v30870_v22  ;;  %29713 = vmatpush3.bf16.msra.mxu1 %v30870_v22 }
0x415e   :  { %29708 = vmatprep.subr.bf16.mxu0 %v30699_v0  ;;  %29714 = vmatprep.subr.bf16.mxu1 %v30699_v0 }
0x415f   :  { %27253 = vmatprep.mubr.msk.f32.mxu0 %vm30700_vm0, %v30701_v1  ;;  %27264 = vmatprep.mubr.msk.f32.mxu1 %vm30700_vm0, %v30701_v1 }
0x4161   :  { %29710 = vmatpush3.bf16.msra.mxu0 %v30880_v27  ;;  %29716 = vmatpush3.bf16.msra.mxu1 %v30880_v27 }
0x4162   :  { %29717 = vmatprep.subr.bf16.mxu0 %v30699_v0  ;;  %29723 = vmatprep.subr.bf16.mxu1 %v30699_v0 }
0x422f   :  { %v11641_v26 = vpop.f32.mrb[154].mxu0  ;;  %v11715_v45 = vpop.f32.mrb[154].mxu1 }
0x4230   :  { %v11642_v13 = vadd.f32 %v31941_v56, %v11641_v26  ;;  %v11716_v47 = vadd.f32 %v31941_v56, %v11715_v45  ;;  %v27233_v49 = vpop.f32.mrb[155].mxu0  ;;  %v27244_v50 = vpop.f32.mrb[155].mxu1 }
0x4232   :  { %v11645_v51 = vmax.f32 %v11642_v13, 0.0  ;;  %v11719_v52 = vmax.f32 %v11716_v47, 0.0 }
0x4234   :  { %27254 = vmatmul.mubr.msk.f32.vlgmr.msra.gmra.mrb[156].mxu0 %vm282_vm2, %v11645_v51  ;;  %27265 = vmatmul.mubr.msk.f32.vlgmr.msra.gmra.mrb[156].mxu1 %vm282_vm2, %v11719_v52 }
0x4235   :  { %29719 = vmatpush3.bf16.msra.mxu0 %v30907_v37  ;;  %29725 = vmatpush3.bf16.msra.mxu1 %v30907_v37 }
0x4236   :  { %29720 = vmatprep.subr.bf16.mxu0 %v30699_v0  ;;  %29726 = vmatprep.subr.bf16.mxu1 %v30699_v0 }
0x4237   :  { %27275 = vmatprep.mubr.msk.f32.mxu0 %vm30700_vm0, %v30701_v1  ;;  %27286 = vmatprep.mubr.msk.f32.mxu1 %vm30700_vm0, %v30701_v1 }
0x4239   :  { %29722 = vmatpush3.bf16.msra.mxu0 %v30917_v42  ;;  %29728 = vmatpush3.bf16.msra.mxu1 %v30917_v42 }
0x423a   :  { %29729 = vmatprep.subr.bf16.mxu0 %v30699_v0  ;;  %29732 = vmatprep.subr.bf16.mxu1 %v30699_v0 }
0x4307   :  { %v11789_v38 = vpop.f32.mrb[156].mxu0  ;;  %v11863_v53 = vpop.f32.mrb[156].mxu1 }
0x4308   :  { %v11790_v28 = vadd.f32 %v31962_v25, %v11789_v38  ;;  %v11864_v54 = vadd.f32 %v31962_v25, %v11863_v53  ;;  %v27255_v57 = vpop.f32.mrb[157].mxu0  ;;  %v27266_v58 = vpop.f32.mrb[157].mxu1  ;;  %v32431_v53 = vld [vmem:[#allocation7] ss:$0 sm:$0xff] }
0x430a   :  { %v11793_v59 = vmax.f32 %v11790_v28, 0.0  ;;  %v11867_v60 = vmax.f32 %v11864_v54, 0.0 }
0x430c   :  { %27276 = vmatmul.mubr.msk.f32.vlgmr.msra.gmra.mrb[158].mxu0 %vm282_vm2, %v11793_v59  ;;  %27287 = vmatmul.mubr.msk.f32.vlgmr.msra.gmra.mrb[158].mxu1 %vm282_vm2, %v11867_v60 }
0x430d   :  { %29731 = vmatpush3.bf16.msra.mxu0 %v30820_v6  ;;  %29734 = vmatpush3.bf16.msra.mxu1 %v30820_v6 }
0x430e   :  { %27293 = vmatprep.mubr.msk.f32.mxu0 %vm30700_vm0, %v30701_v1  ;;  %27300 = vmatprep.mubr.msk.f32.mxu1 %vm30700_vm0, %v30701_v1 }
0x430f   :  { %29735 = vmatprep.subr.bf16.mxu0 %v30699_v0  ;;  %29741 = vmatprep.subr.bf16.mxu1 %v30699_v0 }
0x43df   :  { %v11937_v61 = vpop.f32.mrb[158].mxu0  ;;  %v12010_v62 = vpop.f32.mrb[158].mxu1 }
0x43e0   :  { %v11938_v48 = vadd.f32 %v31979_v36, %v11937_v61  ;;  %v12011_v46 = vadd.f32 %v31979_v36, %v12010_v62  ;;  %v27277_v3 = vpop.f32.mrb[159].mxu0  ;;  %v27288_v4 = vpop.f32.mrb[159].mxu1 }
0x43e2   :  { %v12014_v5 = vmul.f32 %v11938_v48, %v30954_v55  ;;  %v12016_v8 = vmul.f32 %v12011_v46, %v30963_v63  ;;  %v32452_v48 = vld [vmem:[%s33808_s5] ss:$0 sm:$0xff] }
0x43e4   :  { %v32336_v9 = vadd.f32 %v12014_v5, %v32266_v32  ;;  %v32339_v10 = vadd.f32 %v12016_v8, %v32269_v33 }
0x43e6   :  { %12019 = vst.msk [vmem:[#allocation8 + $0x20] sm:$0xff] %vm131_vm1, %v32336_v9  ;;  %12020 = vst.msk [vmem:[#allocation8 + $0x28] sm:$0xff] %vm131_vm1, %v32339_v10  ;;  %27294 = vmatmul.mubr.msk.f32.vlgmr.msra.gmra.mrb[160].mxu0 %vm131_vm1, %v32336_v9  ;;  %27301 = vmatmul.mubr.msk.f32.vlgmr.msra.gmra.mrb[160].mxu1 %vm131_vm1, %v32339_v10 }
0x43e7   :  { %29737 = vmatpush3.bf16.msra.mxu0 %v30822_v7  ;;  %29743 = vmatpush3.bf16.msra.mxu1 %v30822_v7 }
0x43e8   :  { %29738 = vmatprep.subr.bf16.mxu0 %v30699_v0  ;;  %29744 = vmatprep.subr.bf16.mxu1 %v30699_v0 }
0x43e9   :  { %27311 = vmatprep.mubr.msk.f32.mxu0 %vm30700_vm0, %v30701_v1  ;;  %27322 = vmatprep.mubr.msk.f32.mxu1 %vm30700_vm0, %v30701_v1 }
0x43eb   :  { %29740 = vmatpush3.bf16.msra.mxu0 %v30846_v12  ;;  %29746 = vmatpush3.bf16.msra.mxu1 %v30846_v12 }
0x43ec   :  { %29747 = vmatprep.subr.bf16.mxu0 %v30699_v0  ;;  %29753 = vmatprep.subr.bf16.mxu1 %v30699_v0 }
0x44b9   :  { %v12090_v11 = vpop.f32.mrb[160].mxu0  ;;  %v12164_v14 = vpop.f32.mrb[160].mxu1 }
0x44ba   :  { %v12091_v15 = vadd.f32 %v31920_v2, %v12090_v11  ;;  %v12165_v17 = vadd.f32 %v31920_v2, %v12164_v14  ;;  %v27295_v18 = vpop.f32.mrb[161].mxu0  ;;  %v27302_v19 = vpop.f32.mrb[161].mxu1  ;;  %v32473_v14 = vld [vmem:[%s33810_s7] ss:$0 sm:$0xff] }
0x44bc   :  { %v12094_v20 = vmax.f32 %v12091_v15, 0.0  ;;  %v12168_v21 = vmax.f32 %v12165_v17, 0.0 }
0x44be   :  { %27312 = vmatmul.mubr.msk.f32.vlgmr.msra.gmra.mrb[162].mxu0 %vm282_vm2, %v12094_v20  ;;  %27323 = vmatmul.mubr.msk.f32.vlgmr.msra.gmra.mrb[162].mxu1 %vm282_vm2, %v12168_v21 }
0x44bf   :  { %29749 = vmatpush3.bf16.msra.mxu0 %v30870_v22  ;;  %29755 = vmatpush3.bf16.msra.mxu1 %v30870_v22 }
0x44c0   :  { %29750 = vmatprep.subr.bf16.mxu0 %v30699_v0  ;;  %29756 = vmatprep.subr.bf16.mxu1 %v30699_v0 }
0x44c1   :  { %27333 = vmatprep.mubr.msk.f32.mxu0 %vm30700_vm0, %v30701_v1  ;;  %27344 = vmatprep.mubr.msk.f32.mxu1 %vm30700_vm0, %v30701_v1 }
0x44c3   :  { %29752 = vmatpush3.bf16.msra.mxu0 %v30880_v27  ;;  %29758 = vmatpush3.bf16.msra.mxu1 %v30880_v27 }
0x44c4   :  { %29759 = vmatprep.subr.bf16.mxu0 %v30699_v0  ;;  %29765 = vmatprep.subr.bf16.mxu1 %v30699_v0 }
0x4591   :  { %v12238_v2 = vpop.f32.mrb[162].mxu0  ;;  %v12312_v23 = vpop.f32.mrb[162].mxu1 }
0x4592   :  { %v12239_v24 = vadd.f32 %v31941_v56, %v12238_v2  ;;  %v12313_v29 = vadd.f32 %v31941_v56, %v12312_v23  ;;  %v27313_v30 = vpop.f32.mrb[163].mxu0  ;;  %v27324_v31 = vpop.f32.mrb[163].mxu1 }
0x4594   :  { %v12242_v32 = vmax.f32 %v12239_v24, 0.0  ;;  %v12316_v33 = vmax.f32 %v12313_v29, 0.0  ;;  %v32490_v24 = vld [vmem:[%s33812_s9] ss:$0 sm:$0xff] }
0x4596   :  { %27334 = vmatmul.mubr.msk.f32.vlgmr.msra.gmra.mrb[164].mxu0 %vm282_vm2, %v12242_v32  ;;  %27345 = vmatmul.mubr.msk.f32.vlgmr.msra.gmra.mrb[164].mxu1 %vm282_vm2, %v12316_v33 }
0x4597   :  { %29761 = vmatpush3.bf16.msra.mxu0 %v30907_v37  ;;  %29767 = vmatpush3.bf16.msra.mxu1 %v30907_v37 }
0x4598   :  { %29762 = vmatprep.subr.bf16.mxu0 %v30699_v0  ;;  %29768 = vmatprep.subr.bf16.mxu1 %v30699_v0 }
0x4599   :  { %27355 = vmatprep.mubr.msk.f32.mxu0 %vm30700_vm0, %v30701_v1  ;;  %27366 = vmatprep.mubr.msk.f32.mxu1 %vm30700_vm0, %v30701_v1 }
0x459b   :  { %29764 = vmatpush3.bf16.msra.mxu0 %v30917_v42  ;;  %29770 = vmatpush3.bf16.msra.mxu1 %v30917_v42 }
0x459c   :  { %29771 = vmatprep.subr.bf16.mxu0 %v30699_v0  ;;  %29774 = vmatprep.subr.bf16.mxu1 %v30699_v0 }
0x4669   :  { %v12386_v56 = vpop.f32.mrb[164].mxu0  ;;  %v12460_v34 = vpop.f32.mrb[164].mxu1 }
0x466a   :  { %v12387_v16 = vadd.f32 %v31962_v25, %v12386_v56  ;;  %v12461_v35 = vadd.f32 %v31962_v25, %v12460_v34  ;;  %v27335_v39 = vpop.f32.mrb[165].mxu0  ;;  %v27346_v40 = vpop.f32.mrb[165].mxu1 }
0x466c   :  { %v12390_v41 = vmax.f32 %v12387_v16, 0.0  ;;  %v12464_v43 = vmax.f32 %v12461_v35, 0.0 }
0x466e   :  { %27356 = vmatmul.mubr.msk.f32.vlgmr.msra.gmra.mrb[166].mxu0 %vm282_vm2, %v12390_v41  ;;  %27367 = vmatmul.mubr.msk.f32.vlgmr.msra.gmra.mrb[166].mxu1 %vm282_vm2, %v12464_v43 }
0x466f   :  { %29773 = vmatpush3.bf16.msra.mxu0 %v30820_v6  ;;  %29776 = vmatpush3.bf16.msra.mxu1 %v30820_v6 }
0x4670   :  { %27373 = vmatprep.mubr.msk.f32.mxu0 %vm30700_vm0, %v30701_v1  ;;  %27380 = vmatprep.mubr.msk.f32.mxu1 %vm30700_vm0, %v30701_v1 }
0x4671   :  { %29777 = vmatprep.subr.bf16.mxu0 %v30699_v0  ;;  %29783 = vmatprep.subr.bf16.mxu1 %v30699_v0 }
0x4741   :  { %v12534_v25 = vpop.f32.mrb[166].mxu0  ;;  %v12607_v44 = vpop.f32.mrb[166].mxu1 }
0x4742   :  { %v12535_v26 = vadd.f32 %v31979_v36, %v12534_v25  ;;  %v12608_v45 = vadd.f32 %v31979_v36, %v12607_v44  ;;  %v27357_v13 = vpop.f32.mrb[167].mxu0  ;;  %v27368_v47 = vpop.f32.mrb[167].mxu1 }
0x4744   :  { %v12611_v49 = vmul.f32 %v12535_v26, %v30954_v55  ;;  %v12613_v50 = vmul.f32 %v12608_v45, %v30963_v63 }
0x4746   :  { %v32410_v51 = vadd.f32 %v12611_v49, %v32336_v9  ;;  %v32413_v52 = vadd.f32 %v12613_v50, %v32339_v10 }
0x4748   :  { %27374 = vmatmul.mubr.msk.f32.vlgmr.msra.gmra.mrb[168].mxu0 %vm131_vm1, %v32410_v51  ;;  %27381 = vmatmul.mubr.msk.f32.vlgmr.msra.gmra.mrb[168].mxu1 %vm131_vm1, %v32413_v52 }
0x4749   :  { %29779 = vmatpush3.bf16.msra.mxu0 %v30822_v7  ;;  %29785 = vmatpush3.bf16.msra.mxu1 %v30822_v7 }
0x474a   :  { %29780 = vmatprep.subr.bf16.mxu0 %v30699_v0  ;;  %29786 = vmatprep.subr.bf16.mxu1 %v30699_v0 }
0x474b   :  { %27391 = vmatprep.mubr.msk.f32.mxu0 %vm30700_vm0, %v30701_v1  ;;  %27402 = vmatprep.mubr.msk.f32.mxu1 %vm30700_vm0, %v30701_v1 }
0x474d   :  { %29782 = vmatpush3.bf16.msra.mxu0 %v30846_v12  ;;  %29788 = vmatpush3.bf16.msra.mxu1 %v30846_v12 }
0x474e   :  { %29789 = vmatprep.subr.bf16.mxu0 %v30699_v0  ;;  %29795 = vmatprep.subr.bf16.mxu1 %v30699_v0 }
0x481b   :  { %v12684_v36 = vpop.f32.mrb[168].mxu0  ;;  %v12758_v38 = vpop.f32.mrb[168].mxu1 }
0x481c   :  { %v12685_v28 = vadd.f32 %v32431_v53, %v12684_v36  ;;  %v12759_v54 = vadd.f32 %v32431_v53, %v12758_v38  ;;  %v27375_v57 = vpop.f32.mrb[169].mxu0  ;;  %v27382_v58 = vpop.f32.mrb[169].mxu1 }
0x481e   :  { %v12688_v59 = vmax.f32 %v12685_v28, 0.0  ;;  %v12762_v60 = vmax.f32 %v12759_v54, 0.0 }
0x4820   :  { %27392 = vmatmul.mubr.msk.f32.vlgmr.msra.gmra.mrb[170].mxu0 %vm282_vm2, %v12688_v59  ;;  %27403 = vmatmul.mubr.msk.f32.vlgmr.msra.gmra.mrb[170].mxu1 %vm282_vm2, %v12762_v60 }
0x4821   :  { %29791 = vmatpush3.bf16.msra.mxu0 %v30870_v22  ;;  %29797 = vmatpush3.bf16.msra.mxu1 %v30870_v22 }
0x4822   :  { %29792 = vmatprep.subr.bf16.mxu0 %v30699_v0  ;;  %29798 = vmatprep.subr.bf16.mxu1 %v30699_v0 }
0x4823   :  { %27413 = vmatprep.mubr.msk.f32.mxu0 %vm30700_vm0, %v30701_v1  ;;  %27424 = vmatprep.mubr.msk.f32.mxu1 %vm30700_vm0, %v30701_v1 }
0x4825   :  { %29794 = vmatpush3.bf16.msra.mxu0 %v30880_v27  ;;  %29800 = vmatpush3.bf16.msra.mxu1 %v30880_v27 }
0x4826   :  { %29801 = vmatprep.subr.bf16.mxu0 %v30699_v0  ;;  %29807 = vmatprep.subr.bf16.mxu1 %v30699_v0 }
0x48f3   :  { %v12832_v61 = vpop.f32.mrb[170].mxu0  ;;  %v12906_v62 = vpop.f32.mrb[170].mxu1 }
0x48f4   :  { %v12833_v46 = vadd.f32 %v32452_v48, %v12832_v61  ;;  %v12907_v3 = vadd.f32 %v32452_v48, %v12906_v62  ;;  %v27393_v4 = vpop.f32.mrb[171].mxu0  ;;  %v27404_v5 = vpop.f32.mrb[171].mxu1 }
0x48f6   :  { %v12836_v8 = vmax.f32 %v12833_v46, 0.0  ;;  %v12910_v9 = vmax.f32 %v12907_v3, 0.0 }
0x48f8   :  { %27414 = vmatmul.mubr.msk.f32.vlgmr.msra.gmra.mrb[172].mxu0 %vm282_vm2, %v12836_v8  ;;  %27425 = vmatmul.mubr.msk.f32.vlgmr.msra.gmra.mrb[172].mxu1 %vm282_vm2, %v12910_v9 }
0x48f9   :  { %29803 = vmatpush3.bf16.msra.mxu0 %v30907_v37  ;;  %29809 = vmatpush3.bf16.msra.mxu1 %v30907_v37 }
0x48fa   :  { %29804 = vmatprep.subr.bf16.mxu0 %v30699_v0  ;;  %29810 = vmatprep.subr.bf16.mxu1 %v30699_v0 }
0x48fb   :  { %27435 = vmatprep.mubr.msk.f32.mxu0 %vm30700_vm0, %v30701_v1  ;;  %27446 = vmatprep.mubr.msk.f32.mxu1 %vm30700_vm0, %v30701_v1 }
0x48fd   :  { %29806 = vmatpush3.bf16.msra.mxu0 %v30917_v42  ;;  %29812 = vmatpush3.bf16.msra.mxu1 %v30917_v42 }
0x48fe   :  { %29813 = vmatprep.subr.bf16.mxu0 %v30699_v0  ;;  %29816 = vmatprep.subr.bf16.mxu1 %v30699_v0 }
0x49cb   :  { %v12980_v10 = vpop.f32.mrb[172].mxu0  ;;  %v13054_v11 = vpop.f32.mrb[172].mxu1 }
0x49cc   :  { %v12981_v15 = vadd.f32 %v32473_v14, %v12980_v10  ;;  %v13055_v17 = vadd.f32 %v32473_v14, %v13054_v11  ;;  %v27415_v18 = vpop.f32.mrb[173].mxu0  ;;  %v27426_v19 = vpop.f32.mrb[173].mxu1 }
0x49ce   :  { %v12984_v20 = vmax.f32 %v12981_v15, 0.0  ;;  %v13058_v21 = vmax.f32 %v13055_v17, 0.0 }
0x49d0   :  { %27436 = vmatmul.mubr.msk.f32.vlgmr.msra.gmra.mrb[174].mxu0 %vm282_vm2, %v12984_v20  ;;  %27447 = vmatmul.mubr.msk.f32.vlgmr.msra.gmra.mrb[174].mxu1 %vm282_vm2, %v13058_v21 }
0x49d1   :  { %29815 = vmatpush3.bf16.msra.mxu0 %v30820_v6  ;;  %29818 = vmatpush3.bf16.msra.mxu1 %v30820_v6 }
0x49d2   :  { %27453 = vmatprep.mubr.msk.f32.mxu0 %vm30700_vm0, %v30701_v1  ;;  %27460 = vmatprep.mubr.msk.f32.mxu1 %vm30700_vm0, %v30701_v1 }
0x49d3   :  { %29819 = vmatprep.subr.bf16.mxu0 %v30699_v0  ;;  %29825 = vmatprep.subr.bf16.mxu1 %v30699_v0 }
0x4aa3   :  { %v13128_v2 = vpop.f32.mrb[174].mxu0  ;;  %v13201_v23 = vpop.f32.mrb[174].mxu1 }
0x4aa4   :  { %v13129_v29 = vadd.f32 %v32490_v24, %v13128_v2  ;;  %v13202_v30 = vadd.f32 %v32490_v24, %v13201_v23  ;;  %v27437_v31 = vpop.f32.mrb[175].mxu0  ;;  %v27448_v32 = vpop.f32.mrb[175].mxu1 }
0x4aa6   :  { %v13205_v33 = vmul.f32 %v13129_v29, %v30954_v55  ;;  %v13207_v56 = vmul.f32 %v13202_v30, %v30963_v63 }
0x4aa8   :  { %v32497_v34 = vadd.f32 %v13205_v33, %v32410_v51  ;;  %v32500_v16 = vadd.f32 %v13207_v56, %v32413_v52 }
0x4aaa   :  { %27454 = vmatmul.mubr.msk.f32.vlgmr.msra.gmra.mrb[176].mxu0 %vm131_vm1, %v32497_v34  ;;  %27461 = vmatmul.mubr.msk.f32.vlgmr.msra.gmra.mrb[176].mxu1 %vm131_vm1, %v32500_v16 }
0x4aab   :  { %29821 = vmatpush3.bf16.msra.mxu0 %v30822_v7  ;;  %29827 = vmatpush3.bf16.msra.mxu1 %v30822_v7 }
0x4aac   :  { %29822 = vmatprep.subr.bf16.mxu0 %v30699_v0  ;;  %29828 = vmatprep.subr.bf16.mxu1 %v30699_v0 }
0x4aad   :  { %27471 = vmatprep.mubr.msk.f32.mxu0 %vm30700_vm0, %v30701_v1  ;;  %27482 = vmatprep.mubr.msk.f32.mxu1 %vm30700_vm0, %v30701_v1 }
0x4aaf   :  { %29824 = vmatpush3.bf16.msra.mxu0 %v30846_v12  ;;  %29830 = vmatpush3.bf16.msra.mxu1 %v30846_v12 }
0x4ab0   :  { %29831 = vmatprep.subr.bf16.mxu0 %v30699_v0  ;;  %29837 = vmatprep.subr.bf16.mxu1 %v30699_v0 }
0x4b7d   :  { %v13278_v35 = vpop.f32.mrb[176].mxu0  ;;  %v13352_v39 = vpop.f32.mrb[176].mxu1 }
0x4b7e   :  { %v13279_v40 = vadd.f32 %v32431_v53, %v13278_v35  ;;  %v13353_v41 = vadd.f32 %v32431_v53, %v13352_v39  ;;  %v27455_v43 = vpop.f32.mrb[177].mxu0  ;;  %v27462_v25 = vpop.f32.mrb[177].mxu1 }
0x4b80   :  { %v13282_v44 = vmax.f32 %v13279_v40, 0.0  ;;  %v13356_v26 = vmax.f32 %v13353_v41, 0.0 }
0x4b82   :  { %27472 = vmatmul.mubr.msk.f32.vlgmr.msra.gmra.mrb[178].mxu0 %vm282_vm2, %v13282_v44  ;;  %27483 = vmatmul.mubr.msk.f32.vlgmr.msra.gmra.mrb[178].mxu1 %vm282_vm2, %v13356_v26 }
0x4b83   :  { %29833 = vmatpush3.bf16.msra.mxu0 %v30870_v22  ;;  %29839 = vmatpush3.bf16.msra.mxu1 %v30870_v22 }
0x4b84   :  { %29834 = vmatprep.subr.bf16.mxu0 %v30699_v0  ;;  %29840 = vmatprep.subr.bf16.mxu1 %v30699_v0 }
0x4b85   :  { %27493 = vmatprep.mubr.msk.f32.mxu0 %vm30700_vm0, %v30701_v1  ;;  %27504 = vmatprep.mubr.msk.f32.mxu1 %vm30700_vm0, %v30701_v1 }
0x4b87   :  { %29836 = vmatpush3.bf16.msra.mxu0 %v30880_v27  ;;  %29842 = vmatpush3.bf16.msra.mxu1 %v30880_v27 }
0x4b88   :  { %29843 = vmatprep.subr.bf16.mxu0 %v30699_v0  ;;  %29849 = vmatprep.subr.bf16.mxu1 %v30699_v0 }
0x4c55   :  { %v13426_v45 = vpop.f32.mrb[178].mxu0  ;;  %v13500_v13 = vpop.f32.mrb[178].mxu1 }
0x4c56   :  { %v13427_v47 = vadd.f32 %v32452_v48, %v13426_v45  ;;  %v13501_v49 = vadd.f32 %v32452_v48, %v13500_v13  ;;  %v27473_v50 = vpop.f32.mrb[179].mxu0  ;;  %v27484_v51 = vpop.f32.mrb[179].mxu1 }
0x4c58   :  { %v13430_v52 = vmax.f32 %v13427_v47, 0.0  ;;  %v13504_v36 = vmax.f32 %v13501_v49, 0.0 }
0x4c5a   :  { %27494 = vmatmul.mubr.msk.f32.vlgmr.msra.gmra.mrb[180].mxu0 %vm282_vm2, %v13430_v52  ;;  %27505 = vmatmul.mubr.msk.f32.vlgmr.msra.gmra.mrb[180].mxu1 %vm282_vm2, %v13504_v36 }
0x4c5b   :  { %29845 = vmatpush3.bf16.msra.mxu0 %v30907_v37  ;;  %29851 = vmatpush3.bf16.msra.mxu1 %v30907_v37 }
0x4c5c   :  { %29846 = vmatprep.subr.bf16.mxu0 %v30699_v0  ;;  %29852 = vmatprep.subr.bf16.mxu1 %v30699_v0 }
0x4c5d   :  { %27515 = vmatprep.mubr.msk.f32.mxu0 %vm30700_vm0, %v30701_v1  ;;  %27526 = vmatprep.mubr.msk.f32.mxu1 %vm30700_vm0, %v30701_v1 }
0x4c5f   :  { %29848 = vmatpush3.bf16.msra.mxu0 %v30917_v42  ;;  %29854 = vmatpush3.bf16.msra.mxu1 %v30917_v42 }
0x4c60   :  { %29855 = vmatprep.subr.bf16.mxu0 %v30699_v0  ;;  %29858 = vmatprep.subr.bf16.mxu1 %v30699_v0 }
0x4d2d   :  { %v13574_v38 = vpop.f32.mrb[180].mxu0  ;;  %v13648_v28 = vpop.f32.mrb[180].mxu1 }
0x4d2e   :  { %v13575_v54 = vadd.f32 %v32473_v14, %v13574_v38  ;;  %v13649_v57 = vadd.f32 %v32473_v14, %v13648_v28  ;;  %v27495_v58 = vpop.f32.mrb[181].mxu0  ;;  %v27506_v59 = vpop.f32.mrb[181].mxu1 }
0x4d30   :  { %v13578_v60 = vmax.f32 %v13575_v54, 0.0  ;;  %v13652_v61 = vmax.f32 %v13649_v57, 0.0 }
0x4d32   :  { %27516 = vmatmul.mubr.msk.f32.vlgmr.msra.gmra.mrb[182].mxu0 %vm282_vm2, %v13578_v60  ;;  %27527 = vmatmul.mubr.msk.f32.vlgmr.msra.gmra.mrb[182].mxu1 %vm282_vm2, %v13652_v61 }
0x4d33   :  { %29857 = vmatpush3.bf16.msra.mxu0 %v30820_v6  ;;  %29860 = vmatpush3.bf16.msra.mxu1 %v30820_v6 }
0x4d34   :  { %27533 = vmatprep.mubr.msk.f32.mxu0 %vm30700_vm0, %v30701_v1  ;;  %27540 = vmatprep.mubr.msk.f32.mxu1 %vm30700_vm0, %v30701_v1 }
0x4d35   :  { %29861 = vmatprep.subr.bf16.mxu0 %v30699_v0  ;;  %29867 = vmatprep.subr.bf16.mxu1 %v30699_v0 }
0x4e05   :  { %v13722_v62 = vpop.f32.mrb[182].mxu0  ;;  %v13795_v46 = vpop.f32.mrb[182].mxu1 }
0x4e06   :  { %v13723_v3 = vadd.f32 %v32490_v24, %v13722_v62  ;;  %v13796_v4 = vadd.f32 %v32490_v24, %v13795_v46  ;;  %v27517_v5 = vpop.f32.mrb[183].mxu0  ;;  %v27528_v8 = vpop.f32.mrb[183].mxu1 }
0x4e08   :  { %v13799_v9 = vmul.f32 %v13723_v3, %v30954_v55  ;;  %v13801_v10 = vmul.f32 %v13796_v4, %v30963_v63 }
0x4e0a   :  { %v32567_v11 = vadd.f32 %v13799_v9, %v32497_v34  ;;  %v32570_v15 = vadd.f32 %v13801_v10, %v32500_v16 }
0x4e0c   :  { %27534 = vmatmul.mubr.msk.f32.vlgmr.msra.gmra.mrb[184].mxu0 %vm131_vm1, %v32567_v11  ;;  %27541 = vmatmul.mubr.msk.f32.vlgmr.msra.gmra.mrb[184].mxu1 %vm131_vm1, %v32570_v15 }
0x4e0d   :  { %29863 = vmatpush3.bf16.msra.mxu0 %v30822_v7  ;;  %29869 = vmatpush3.bf16.msra.mxu1 %v30822_v7 }
0x4e0e   :  { %29864 = vmatprep.subr.bf16.mxu0 %v30699_v0  ;;  %29870 = vmatprep.subr.bf16.mxu1 %v30699_v0 }
0x4e0f   :  { %27551 = vmatprep.mubr.msk.f32.mxu0 %vm30700_vm0, %v30701_v1  ;;  %27562 = vmatprep.mubr.msk.f32.mxu1 %vm30700_vm0, %v30701_v1 }
0x4e11   :  { %29866 = vmatpush3.bf16.msra.mxu0 %v30846_v12  ;;  %29872 = vmatpush3.bf16.msra.mxu1 %v30846_v12 }
0x4e12   :  { %29873 = vmatprep.subr.bf16.mxu0 %v30699_v0  ;;  %29879 = vmatprep.subr.bf16.mxu1 %v30699_v0 }
0x4edf   :  { %v13872_v17 = vpop.f32.mrb[184].mxu0  ;;  %v13946_v18 = vpop.f32.mrb[184].mxu1 }
0x4ee0   :  { %v13873_v19 = vadd.f32 %v32431_v53, %v13872_v17  ;;  %v13947_v20 = vadd.f32 %v32431_v53, %v13946_v18  ;;  %v27535_v21 = vpop.f32.mrb[185].mxu0  ;;  %v27542_v2 = vpop.f32.mrb[185].mxu1 }
0x4ee2   :  { %v13876_v23 = vmax.f32 %v13873_v19, 0.0  ;;  %v13950_v29 = vmax.f32 %v13947_v20, 0.0 }
0x4ee4   :  { %27552 = vmatmul.mubr.msk.f32.vlgmr.msra.gmra.mrb[186].mxu0 %vm282_vm2, %v13876_v23  ;;  %27563 = vmatmul.mubr.msk.f32.vlgmr.msra.gmra.mrb[186].mxu1 %vm282_vm2, %v13950_v29 }
0x4ee5   :  { %29875 = vmatpush3.bf16.msra.mxu0 %v30870_v22  ;;  %29881 = vmatpush3.bf16.msra.mxu1 %v30870_v22 }
0x4ee6   :  { %29876 = vmatprep.subr.bf16.mxu0 %v30699_v0  ;;  %29882 = vmatprep.subr.bf16.mxu1 %v30699_v0 }
0x4ee7   :  { %27573 = vmatprep.mubr.msk.f32.mxu0 %vm30700_vm0, %v30701_v1  ;;  %27584 = vmatprep.mubr.msk.f32.mxu1 %vm30700_vm0, %v30701_v1 }
0x4ee9   :  { %29878 = vmatpush3.bf16.msra.mxu0 %v30880_v27  ;;  %29884 = vmatpush3.bf16.msra.mxu1 %v30880_v27 }
0x4eea   :  { %29885 = vmatprep.subr.bf16.mxu0 %v30699_v0  ;;  %29891 = vmatprep.subr.bf16.mxu1 %v30699_v0 }
0x4fb7   :  { %v14020_v30 = vpop.f32.mrb[186].mxu0  ;;  %v14094_v31 = vpop.f32.mrb[186].mxu1 }
0x4fb8   :  { %v14021_v32 = vadd.f32 %v32452_v48, %v14020_v30  ;;  %v14095_v33 = vadd.f32 %v32452_v48, %v14094_v31  ;;  %v27553_v56 = vpop.f32.mrb[187].mxu0  ;;  %v27564_v34 = vpop.f32.mrb[187].mxu1 }
0x4fba   :  { %v14024_v16 = vmax.f32 %v14021_v32, 0.0  ;;  %v14098_v35 = vmax.f32 %v14095_v33, 0.0 }
0x4fbc   :  { %27574 = vmatmul.mubr.msk.f32.vlgmr.msra.gmra.mrb[188].mxu0 %vm282_vm2, %v14024_v16  ;;  %27585 = vmatmul.mubr.msk.f32.vlgmr.msra.gmra.mrb[188].mxu1 %vm282_vm2, %v14098_v35 }
0x4fbd   :  { %29887 = vmatpush3.bf16.msra.mxu0 %v30907_v37  ;;  %29893 = vmatpush3.bf16.msra.mxu1 %v30907_v37 }
0x4fbe   :  { %29888 = vmatprep.subr.bf16.mxu0 %v30699_v0  ;;  %29894 = vmatprep.subr.bf16.mxu1 %v30699_v0 }
0x4fbf   :  { %27595 = vmatprep.mubr.msk.f32.mxu0 %vm30700_vm0, %v30701_v1  ;;  %27606 = vmatprep.mubr.msk.f32.mxu1 %vm30700_vm0, %v30701_v1 }
0x4fc1   :  { %29890 = vmatpush3.bf16.msra.mxu0 %v30917_v42  ;;  %29896 = vmatpush3.bf16.msra.mxu1 %v30917_v42 }
0x4fc2   :  { %29897 = vmatprep.subr.bf16.mxu0 %v30699_v0  ;;  %29900 = vmatprep.subr.bf16.mxu1 %v30699_v0 }
0x508f   :  { %v14168_v39 = vpop.f32.mrb[188].mxu0  ;;  %v14242_v40 = vpop.f32.mrb[188].mxu1 }
0x5090   :  { %v14169_v41 = vadd.f32 %v32473_v14, %v14168_v39  ;;  %v14243_v43 = vadd.f32 %v32473_v14, %v14242_v40  ;;  %v27575_v25 = vpop.f32.mrb[189].mxu0  ;;  %v27586_v44 = vpop.f32.mrb[189].mxu1 }
0x5092   :  { %v14172_v26 = vmax.f32 %v14169_v41, 0.0  ;;  %v14246_v45 = vmax.f32 %v14243_v43, 0.0 }
0x5094   :  { %27596 = vmatmul.mubr.msk.f32.vlgmr.msra.gmra.mrb[190].mxu0 %vm282_vm2, %v14172_v26  ;;  %27607 = vmatmul.mubr.msk.f32.vlgmr.msra.gmra.mrb[190].mxu1 %vm282_vm2, %v14246_v45 }
0x5095   :  { %29899 = vmatpush3.bf16.msra.mxu0 %v30820_v6  ;;  %29902 = vmatpush3.bf16.msra.mxu1 %v30820_v6 }
0x5096   :  { %27613 = vmatprep.mubr.msk.f32.mxu0 %vm30700_vm0, %v30701_v1  ;;  %27620 = vmatprep.mubr.msk.f32.mxu1 %vm30700_vm0, %v30701_v1 }
0x5097   :  { %29903 = vmatprep.subr.bf16.mxu0 %v30699_v0  ;;  %29909 = vmatprep.subr.bf16.mxu1 %v30699_v0 }
0x5167   :  { %v14316_v13 = vpop.f32.mrb[190].mxu0  ;;  %v14389_v47 = vpop.f32.mrb[190].mxu1 }
0x5168   :  { %v14317_v49 = vadd.f32 %v32490_v24, %v14316_v13  ;;  %v14390_v50 = vadd.f32 %v32490_v24, %v14389_v47  ;;  %v27597_v51 = vpop.f32.mrb[191].mxu0  ;;  %v27608_v52 = vpop.f32.mrb[191].mxu1 }
0x516a   :  { %v14393_v36 = vmul.f32 %v14317_v49, %v30954_v55  ;;  %v14395_v38 = vmul.f32 %v14390_v50, %v30963_v63 }
0x516c   :  { %v32637_v28 = vadd.f32 %v14393_v36, %v32567_v11  ;;  %v32640_v54 = vadd.f32 %v14395_v38, %v32570_v15 }
0x516e   :  { %27614 = vmatmul.mubr.msk.f32.vlgmr.msra.gmra.mrb[192].mxu0 %vm131_vm1, %v32637_v28  ;;  %27621 = vmatmul.mubr.msk.f32.vlgmr.msra.gmra.mrb[192].mxu1 %vm131_vm1, %v32640_v54 }
0x516f   :  { %29905 = vmatpush3.bf16.msra.mxu0 %v30822_v7  ;;  %29911 = vmatpush3.bf16.msra.mxu1 %v30822_v7 }
0x5170   :  { %29906 = vmatprep.subr.bf16.mxu0 %v30699_v0  ;;  %29912 = vmatprep.subr.bf16.mxu1 %v30699_v0 }
0x5171   :  { %27631 = vmatprep.mubr.msk.f32.mxu0 %vm30700_vm0, %v30701_v1  ;;  %27642 = vmatprep.mubr.msk.f32.mxu1 %vm30700_vm0, %v30701_v1 }
0x5173   :  { %29908 = vmatpush3.bf16.msra.mxu0 %v30846_v12  ;;  %29914 = vmatpush3.bf16.msra.mxu1 %v30846_v12 }
0x5174   :  { %29915 = vmatprep.subr.bf16.mxu0 %v30699_v0  ;;  %29921 = vmatprep.subr.bf16.mxu1 %v30699_v0 }
0x5241   :  { %v14466_v57 = vpop.f32.mrb[192].mxu0  ;;  %v14540_v58 = vpop.f32.mrb[192].mxu1 }
0x5242   :  { %v14467_v59 = vadd.f32 %v32431_v53, %v14466_v57  ;;  %v14541_v60 = vadd.f32 %v32431_v53, %v14540_v58  ;;  %v27615_v61 = vpop.f32.mrb[193].mxu0  ;;  %v27622_v62 = vpop.f32.mrb[193].mxu1 }
0x5244   :  { %v14470_v46 = vmax.f32 %v14467_v59, 0.0  ;;  %v14544_v3 = vmax.f32 %v14541_v60, 0.0 }
0x5246   :  { %27632 = vmatmul.mubr.msk.f32.vlgmr.msra.gmra.mrb[194].mxu0 %vm282_vm2, %v14470_v46  ;;  %27643 = vmatmul.mubr.msk.f32.vlgmr.msra.gmra.mrb[194].mxu1 %vm282_vm2, %v14544_v3 }
0x5247   :  { %29917 = vmatpush3.bf16.msra.mxu0 %v30870_v22  ;;  %29923 = vmatpush3.bf16.msra.mxu1 %v30870_v22 }
0x5248   :  { %29918 = vmatprep.subr.bf16.mxu0 %v30699_v0  ;;  %29924 = vmatprep.subr.bf16.mxu1 %v30699_v0 }
0x5249   :  { %27653 = vmatprep.mubr.msk.f32.mxu0 %vm30700_vm0, %v30701_v1  ;;  %27664 = vmatprep.mubr.msk.f32.mxu1 %vm30700_vm0, %v30701_v1 }
0x524b   :  { %29920 = vmatpush3.bf16.msra.mxu0 %v30880_v27  ;;  %29926 = vmatpush3.bf16.msra.mxu1 %v30880_v27 }
0x524c   :  { %29927 = vmatprep.subr.bf16.mxu0 %v30699_v0  ;;  %29933 = vmatprep.subr.bf16.mxu1 %v30699_v0 }
0x5319   :  { %v14614_v4 = vpop.f32.mrb[194].mxu0  ;;  %v14688_v5 = vpop.f32.mrb[194].mxu1 }
0x531a   :  { %v14615_v8 = vadd.f32 %v32452_v48, %v14614_v4  ;;  %v14689_v9 = vadd.f32 %v32452_v48, %v14688_v5  ;;  %v27633_v10 = vpop.f32.mrb[195].mxu0  ;;  %v27644_v11 = vpop.f32.mrb[195].mxu1 }
0x531c   :  { %v14618_v15 = vmax.f32 %v14615_v8, 0.0  ;;  %v14692_v17 = vmax.f32 %v14689_v9, 0.0 }
0x531e   :  { %27654 = vmatmul.mubr.msk.f32.vlgmr.msra.gmra.mrb[196].mxu0 %vm282_vm2, %v14618_v15  ;;  %27665 = vmatmul.mubr.msk.f32.vlgmr.msra.gmra.mrb[196].mxu1 %vm282_vm2, %v14692_v17 }
0x531f   :  { %29929 = vmatpush3.bf16.msra.mxu0 %v30907_v37  ;;  %29935 = vmatpush3.bf16.msra.mxu1 %v30907_v37 }
0x5320   :  { %29930 = vmatprep.subr.bf16.mxu0 %v30699_v0  ;;  %29936 = vmatprep.subr.bf16.mxu1 %v30699_v0 }
0x5321   :  { %27675 = vmatprep.mubr.msk.f32.mxu0 %vm30700_vm0, %v30701_v1  ;;  %27686 = vmatprep.mubr.msk.f32.mxu1 %vm30700_vm0, %v30701_v1 }
0x5323   :  { %29932 = vmatpush3.bf16.msra.mxu0 %v30917_v42  ;;  %29938 = vmatpush3.bf16.msra.mxu1 %v30917_v42 }
0x5324   :  { %29939 = vmatprep.subr.bf16.mxu0 %v30699_v0  ;;  %29942 = vmatprep.subr.bf16.mxu1 %v30699_v0 }
0x53f1   :  { %v14762_v18 = vpop.f32.mrb[196].mxu0  ;;  %v14836_v19 = vpop.f32.mrb[196].mxu1 }
0x53f2   :  { %v14763_v20 = vadd.f32 %v32473_v14, %v14762_v18  ;;  %v14837_v21 = vadd.f32 %v32473_v14, %v14836_v19  ;;  %v27655_v2 = vpop.f32.mrb[197].mxu0  ;;  %v27666_v23 = vpop.f32.mrb[197].mxu1 }
0x53f4   :  { %v14766_v29 = vmax.f32 %v14763_v20, 0.0  ;;  %v14840_v30 = vmax.f32 %v14837_v21, 0.0 }
0x53f6   :  { %27676 = vmatmul.mubr.msk.f32.vlgmr.msra.gmra.mrb[198].mxu0 %vm282_vm2, %v14766_v29  ;;  %27687 = vmatmul.mubr.msk.f32.vlgmr.msra.gmra.mrb[198].mxu1 %vm282_vm2, %v14840_v30 }
0x53f7   :  { %29941 = vmatpush3.bf16.msra.mxu0 %v30820_v6  ;;  %29944 = vmatpush3.bf16.msra.mxu1 %v30820_v6 }
0x53f8   :  { %27693 = vmatprep.mubr.msk.f32.mxu0 %vm30700_vm0, %v30701_v1  ;;  %27700 = vmatprep.mubr.msk.f32.mxu1 %vm30700_vm0, %v30701_v1 }
0x53f9   :  { %29945 = vmatprep.subr.bf16.mxu0 %v30699_v0  ;;  %29951 = vmatprep.subr.bf16.mxu1 %v30699_v0 }
0x54c9   :  { %v14910_v31 = vpop.f32.mrb[198].mxu0  ;;  %v14983_v32 = vpop.f32.mrb[198].mxu1 }
0x54ca   :  { %v14911_v33 = vadd.f32 %v32490_v24, %v14910_v31  ;;  %v14984_v56 = vadd.f32 %v32490_v24, %v14983_v32  ;;  %v27677_v34 = vpop.f32.mrb[199].mxu0  ;;  %v27688_v16 = vpop.f32.mrb[199].mxu1 }
0x54cc   :  { %v14987_v35 = vmul.f32 %v14911_v33, %v30954_v55  ;;  %v14989_v39 = vmul.f32 %v14984_v56, %v30963_v63 }
0x54ce   :  { %v32707_v40 = vadd.f32 %v14987_v35, %v32637_v28  ;;  %v32710_v41 = vadd.f32 %v14989_v39, %v32640_v54 }
0x54d0   :  { %27694 = vmatmul.mubr.msk.f32.vlgmr.msra.gmra.mrb[200].mxu0 %vm131_vm1, %v32707_v40  ;;  %27701 = vmatmul.mubr.msk.f32.vlgmr.msra.gmra.mrb[200].mxu1 %vm131_vm1, %v32710_v41 }
0x54d1   :  { %29947 = vmatpush3.bf16.msra.mxu0 %v30822_v7  ;;  %29953 = vmatpush3.bf16.msra.mxu1 %v30822_v7 }
0x54d2   :  { %29948 = vmatprep.subr.bf16.mxu0 %v30699_v0  ;;  %29954 = vmatprep.subr.bf16.mxu1 %v30699_v0 }
0x54d3   :  { %27711 = vmatprep.mubr.msk.f32.mxu0 %vm30700_vm0, %v30701_v1  ;;  %27722 = vmatprep.mubr.msk.f32.mxu1 %vm30700_vm0, %v30701_v1 }
0x54d5   :  { %29950 = vmatpush3.bf16.msra.mxu0 %v30846_v12  ;;  %29956 = vmatpush3.bf16.msra.mxu1 %v30846_v12 }
0x54d6   :  { %29957 = vmatprep.subr.bf16.mxu0 %v30699_v0  ;;  %29963 = vmatprep.subr.bf16.mxu1 %v30699_v0 }
0x55a3   :  { %v15060_v43 = vpop.f32.mrb[200].mxu0  ;;  %v15134_v25 = vpop.f32.mrb[200].mxu1 }
0x55a4   :  { %v15061_v44 = vadd.f32 %v32431_v53, %v15060_v43  ;;  %v15135_v26 = vadd.f32 %v32431_v53, %v15134_v25  ;;  %v27695_v45 = vpop.f32.mrb[201].mxu0  ;;  %v27702_v13 = vpop.f32.mrb[201].mxu1 }
0x55a6   :  { %v15064_v47 = vmax.f32 %v15061_v44, 0.0  ;;  %v15138_v49 = vmax.f32 %v15135_v26, 0.0 }
0x55a8   :  { %27712 = vmatmul.mubr.msk.f32.vlgmr.msra.gmra.mrb[202].mxu0 %vm282_vm2, %v15064_v47  ;;  %27723 = vmatmul.mubr.msk.f32.vlgmr.msra.gmra.mrb[202].mxu1 %vm282_vm2, %v15138_v49 }
0x55a9   :  { %29959 = vmatpush3.bf16.msra.mxu0 %v30870_v22  ;;  %29965 = vmatpush3.bf16.msra.mxu1 %v30870_v22 }
0x55aa   :  { %29960 = vmatprep.subr.bf16.mxu0 %v30699_v0  ;;  %29966 = vmatprep.subr.bf16.mxu1 %v30699_v0 }
0x55ab   :  { %27733 = vmatprep.mubr.msk.f32.mxu0 %vm30700_vm0, %v30701_v1  ;;  %27744 = vmatprep.mubr.msk.f32.mxu1 %vm30700_vm0, %v30701_v1 }
0x55ad   :  { %29962 = vmatpush3.bf16.msra.mxu0 %v30880_v27  ;;  %29968 = vmatpush3.bf16.msra.mxu1 %v30880_v27 }
0x55ae   :  { %29969 = vmatprep.subr.bf16.mxu0 %v30699_v0  ;;  %29975 = vmatprep.subr.bf16.mxu1 %v30699_v0 }
0x567b   :  { %v15208_v50 = vpop.f32.mrb[202].mxu0  ;;  %v15282_v51 = vpop.f32.mrb[202].mxu1 }
0x567c   :  { %v15209_v52 = vadd.f32 %v32452_v48, %v15208_v50  ;;  %v15283_v36 = vadd.f32 %v32452_v48, %v15282_v51  ;;  %v27713_v38 = vpop.f32.mrb[203].mxu0  ;;  %v27724_v28 = vpop.f32.mrb[203].mxu1 }
0x567e   :  { %v15212_v54 = vmax.f32 %v15209_v52, 0.0  ;;  %v15286_v57 = vmax.f32 %v15283_v36, 0.0 }
0x5680   :  { %27734 = vmatmul.mubr.msk.f32.vlgmr.msra.gmra.mrb[204].mxu0 %vm282_vm2, %v15212_v54  ;;  %27745 = vmatmul.mubr.msk.f32.vlgmr.msra.gmra.mrb[204].mxu1 %vm282_vm2, %v15286_v57 }
0x5681   :  { %29971 = vmatpush3.bf16.msra.mxu0 %v30907_v37  ;;  %29977 = vmatpush3.bf16.msra.mxu1 %v30907_v37 }
0x5682   :  { %29972 = vmatprep.subr.bf16.mxu0 %v30699_v0  ;;  %29978 = vmatprep.subr.bf16.mxu1 %v30699_v0 }
0x5683   :  { %27755 = vmatprep.mubr.msk.f32.mxu0 %vm30700_vm0, %v30701_v1  ;;  %27766 = vmatprep.mubr.msk.f32.mxu1 %vm30700_vm0, %v30701_v1 }
0x5685   :  { %29974 = vmatpush3.bf16.msra.mxu0 %v30917_v42  ;;  %29980 = vmatpush3.bf16.msra.mxu1 %v30917_v42 }
0x5686   :  { %29981 = vmatprep.subr.bf16.mxu0 %v30699_v0  ;;  %29984 = vmatprep.subr.bf16.mxu1 %v30699_v0 }
0x5753   :  { %v15356_v58 = vpop.f32.mrb[204].mxu0  ;;  %v15430_v59 = vpop.f32.mrb[204].mxu1 }
0x5754   :  { %v15357_v60 = vadd.f32 %v32473_v14, %v15356_v58  ;;  %v15431_v61 = vadd.f32 %v32473_v14, %v15430_v59  ;;  %v27735_v62 = vpop.f32.mrb[205].mxu0  ;;  %v27746_v46 = vpop.f32.mrb[205].mxu1 }
0x5756   :  { %v15360_v3 = vmax.f32 %v15357_v60, 0.0  ;;  %v15434_v4 = vmax.f32 %v15431_v61, 0.0 }
0x5758   :  { %27756 = vmatmul.mubr.msk.f32.vlgmr.msra.gmra.mrb[206].mxu0 %vm282_vm2, %v15360_v3  ;;  %27767 = vmatmul.mubr.msk.f32.vlgmr.msra.gmra.mrb[206].mxu1 %vm282_vm2, %v15434_v4 }
0x5759   :  { %29983 = vmatpush3.bf16.msra.mxu0 %v30820_v6  ;;  %29986 = vmatpush3.bf16.msra.mxu1 %v30820_v6 }
0x575a   :  { %27773 = vmatprep.mubr.msk.f32.mxu0 %vm30700_vm0, %v30701_v1  ;;  %27780 = vmatprep.mubr.msk.f32.mxu1 %vm30700_vm0, %v30701_v1 }
0x575b   :  { %29987 = vmatprep.subr.bf16.mxu0 %v30699_v0  ;;  %29993 = vmatprep.subr.bf16.mxu1 %v30699_v0 }
0x582b   :  { %v15504_v5 = vpop.f32.mrb[206].mxu0  ;;  %v15577_v8 = vpop.f32.mrb[206].mxu1 }
0x582c   :  { %v15505_v9 = vadd.f32 %v32490_v24, %v15504_v5  ;;  %v15578_v10 = vadd.f32 %v32490_v24, %v15577_v8  ;;  %v27757_v11 = vpop.f32.mrb[207].mxu0  ;;  %v27768_v15 = vpop.f32.mrb[207].mxu1 }
0x582e   :  { %v15581_v17 = vmul.f32 %v15505_v9, %v30954_v55  ;;  %v15583_v18 = vmul.f32 %v15578_v10, %v30963_v63 }
0x5830   :  { %v32777_v19 = vadd.f32 %v15581_v17, %v32707_v40  ;;  %v32780_v20 = vadd.f32 %v15583_v18, %v32710_v41 }
0x5832   :  { %27774 = vmatmul.mubr.msk.f32.vlgmr.msra.gmra.mrb[208].mxu0 %vm131_vm1, %v32777_v19  ;;  %27781 = vmatmul.mubr.msk.f32.vlgmr.msra.gmra.mrb[208].mxu1 %vm131_vm1, %v32780_v20 }
0x5833   :  { %29989 = vmatpush3.bf16.msra.mxu0 %v30822_v7  ;;  %29995 = vmatpush3.bf16.msra.mxu1 %v30822_v7 }
0x5834   :  { %29990 = vmatprep.subr.bf16.mxu0 %v30699_v0  ;;  %29996 = vmatprep.subr.bf16.mxu1 %v30699_v0 }
0x5835   :  { %27791 = vmatprep.mubr.msk.f32.mxu0 %vm30700_vm0, %v30701_v1  ;;  %27802 = vmatprep.mubr.msk.f32.mxu1 %vm30700_vm0, %v30701_v1 }
0x5837   :  { %29992 = vmatpush3.bf16.msra.mxu0 %v30846_v12  ;;  %29998 = vmatpush3.bf16.msra.mxu1 %v30846_v12 }
0x5838   :  { %29999 = vmatprep.subr.bf16.mxu0 %v30699_v0  ;;  %30005 = vmatprep.subr.bf16.mxu1 %v30699_v0 }
0x5905   :  { %v15654_v21 = vpop.f32.mrb[208].mxu0  ;;  %v15728_v2 = vpop.f32.mrb[208].mxu1 }
0x5906   :  { %v15655_v23 = vadd.f32 %v32431_v53, %v15654_v21  ;;  %v15729_v29 = vadd.f32 %v32431_v53, %v15728_v2  ;;  %v27775_v30 = vpop.f32.mrb[209].mxu0  ;;  %v27782_v31 = vpop.f32.mrb[209].mxu1 }
0x5908   :  { %v15658_v32 = vmax.f32 %v15655_v23, 0.0  ;;  %v15732_v33 = vmax.f32 %v15729_v29, 0.0 }
0x590a   :  { %27792 = vmatmul.mubr.msk.f32.vlgmr.msra.gmra.mrb[210].mxu0 %vm282_vm2, %v15658_v32  ;;  %27803 = vmatmul.mubr.msk.f32.vlgmr.msra.gmra.mrb[210].mxu1 %vm282_vm2, %v15732_v33 }
0x590b   :  { %30001 = vmatpush3.bf16.msra.mxu0 %v30870_v22  ;;  %30007 = vmatpush3.bf16.msra.mxu1 %v30870_v22 }
0x590c   :  { %30002 = vmatprep.subr.bf16.mxu0 %v30699_v0  ;;  %30008 = vmatprep.subr.bf16.mxu1 %v30699_v0 }
0x590d   :  { %27813 = vmatprep.mubr.msk.f32.mxu0 %vm30700_vm0, %v30701_v1  ;;  %27824 = vmatprep.mubr.msk.f32.mxu1 %vm30700_vm0, %v30701_v1 }
0x590f   :  { %30004 = vmatpush3.bf16.msra.mxu0 %v30880_v27  ;;  %30010 = vmatpush3.bf16.msra.mxu1 %v30880_v27 }
0x5910   :  { %30011 = vmatprep.subr.bf16.mxu0 %v30699_v0  ;;  %30017 = vmatprep.subr.bf16.mxu1 %v30699_v0 }
0x59dd   :  { %v15802_v56 = vpop.f32.mrb[210].mxu0  ;;  %v15876_v34 = vpop.f32.mrb[210].mxu1 }
0x59de   :  { %v15803_v16 = vadd.f32 %v32452_v48, %v15802_v56  ;;  %v15877_v35 = vadd.f32 %v32452_v48, %v15876_v34  ;;  %v27793_v39 = vpop.f32.mrb[211].mxu0  ;;  %v27804_v40 = vpop.f32.mrb[211].mxu1 }
0x59e0   :  { %v15806_v41 = vmax.f32 %v15803_v16, 0.0  ;;  %v15880_v43 = vmax.f32 %v15877_v35, 0.0 }
0x59e2   :  { %27814 = vmatmul.mubr.msk.f32.vlgmr.msra.gmra.mrb[212].mxu0 %vm282_vm2, %v15806_v41  ;;  %27825 = vmatmul.mubr.msk.f32.vlgmr.msra.gmra.mrb[212].mxu1 %vm282_vm2, %v15880_v43 }
0x59e3   :  { %30013 = vmatpush3.bf16.msra.mxu0 %v30907_v37  ;;  %30019 = vmatpush3.bf16.msra.mxu1 %v30907_v37 }
0x59e4   :  { %30014 = vmatprep.subr.bf16.mxu0 %v30699_v0  ;;  %30020 = vmatprep.subr.bf16.mxu1 %v30699_v0 }
0x59e5   :  { %27835 = vmatprep.mubr.msk.f32.mxu0 %vm30700_vm0, %v30701_v1  ;;  %27846 = vmatprep.mubr.msk.f32.mxu1 %vm30700_vm0, %v30701_v1 }
0x59e7   :  { %30016 = vmatpush3.bf16.msra.mxu0 %v30917_v42  ;;  %30022 = vmatpush3.bf16.msra.mxu1 %v30917_v42 }
0x59e8   :  { %30023 = vmatprep.subr.bf16.mxu0 %v30699_v0  ;;  %30026 = vmatprep.subr.bf16.mxu1 %v30699_v0 }
0x5ab5   :  { %v15950_v25 = vpop.f32.mrb[212].mxu0  ;;  %v16024_v44 = vpop.f32.mrb[212].mxu1 }
0x5ab6   :  { %v15951_v26 = vadd.f32 %v32473_v14, %v15950_v25  ;;  %v16025_v45 = vadd.f32 %v32473_v14, %v16024_v44  ;;  %v27815_v13 = vpop.f32.mrb[213].mxu0  ;;  %v27826_v47 = vpop.f32.mrb[213].mxu1  ;;  %v32938_v44 = vld [vmem:[#allocation7] ss:$0 sm:$0xff] }
0x5ab8   :  { %v15954_v49 = vmax.f32 %v15951_v26, 0.0  ;;  %v16028_v50 = vmax.f32 %v16025_v45, 0.0 }
0x5aba   :  { %27836 = vmatmul.mubr.msk.f32.vlgmr.msra.gmra.mrb[214].mxu0 %vm282_vm2, %v15954_v49  ;;  %27847 = vmatmul.mubr.msk.f32.vlgmr.msra.gmra.mrb[214].mxu1 %vm282_vm2, %v16028_v50 }
0x5abb   :  { %30025 = vmatpush3.bf16.msra.mxu0 %v30820_v6  ;;  %30028 = vmatpush3.bf16.msra.mxu1 %v30820_v6 }
0x5abc   :  { %27853 = vmatprep.mubr.msk.f32.mxu0 %vm30700_vm0, %v30701_v1  ;;  %27860 = vmatprep.mubr.msk.f32.mxu1 %vm30700_vm0, %v30701_v1 }
0x5abd   :  { %30029 = vmatprep.subr.bf16.mxu0 %v30699_v0  ;;  %30035 = vmatprep.subr.bf16.mxu1 %v30699_v0 }
0x5b8d   :  { %v16098_v51 = vpop.f32.mrb[214].mxu0  ;;  %v16171_v52 = vpop.f32.mrb[214].mxu1 }
0x5b8e   :  { %v16099_v36 = vadd.f32 %v32490_v24, %v16098_v51  ;;  %v16172_v38 = vadd.f32 %v32490_v24, %v16171_v52  ;;  %v27837_v28 = vpop.f32.mrb[215].mxu0  ;;  %v27848_v54 = vpop.f32.mrb[215].mxu1 }
0x5b90   :  { %v16175_v57 = vmul.f32 %v16099_v36, %v30954_v55  ;;  %v16177_v58 = vmul.f32 %v16172_v38, %v30963_v63  ;;  %v32959_v36 = vld [vmem:[%s33808_s5] ss:$0 sm:$0xff] }
0x5b92   :  { %v32847_v59 = vadd.f32 %v16175_v57, %v32777_v19  ;;  %v32850_v60 = vadd.f32 %v16177_v58, %v32780_v20 }
0x5b94   :  { %27854 = vmatmul.mubr.msk.f32.vlgmr.msra.gmra.mrb[216].mxu0 %vm131_vm1, %v32847_v59  ;;  %27861 = vmatmul.mubr.msk.f32.vlgmr.msra.gmra.mrb[216].mxu1 %vm131_vm1, %v32850_v60 }
0x5b95   :  { %30031 = vmatpush3.bf16.msra.mxu0 %v30822_v7  ;;  %30037 = vmatpush3.bf16.msra.mxu1 %v30822_v7 }
0x5b96   :  { %30032 = vmatprep.subr.bf16.mxu0 %v30699_v0  ;;  %30038 = vmatprep.subr.bf16.mxu1 %v30699_v0 }
0x5b97   :  { %27871 = vmatprep.mubr.msk.f32.mxu0 %vm30700_vm0, %v30701_v1  ;;  %27882 = vmatprep.mubr.msk.f32.mxu1 %vm30700_vm0, %v30701_v1 }
0x5b99   :  { %30034 = vmatpush3.bf16.msra.mxu0 %v30846_v12  ;;  %30040 = vmatpush3.bf16.msra.mxu1 %v30846_v12 }
0x5b9a   :  { %30041 = vmatprep.subr.bf16.mxu0 %v30699_v0  ;;  %30047 = vmatprep.subr.bf16.mxu1 %v30699_v0 }
0x5c67   :  { %v16248_v61 = vpop.f32.mrb[216].mxu0  ;;  %v16322_v62 = vpop.f32.mrb[216].mxu1 }
0x5c68   :  { %v16249_v46 = vadd.f32 %v32431_v53, %v16248_v61  ;;  %v16323_v3 = vadd.f32 %v32431_v53, %v16322_v62  ;;  %v27855_v4 = vpop.f32.mrb[217].mxu0  ;;  %v27862_v5 = vpop.f32.mrb[217].mxu1  ;;  %v32980_v62 = vld [vmem:[%s33810_s7] ss:$0 sm:$0xff] }
0x5c6a   :  { %v16252_v8 = vmax.f32 %v16249_v46, 0.0  ;;  %v16326_v9 = vmax.f32 %v16323_v3, 0.0 }
0x5c6c   :  { %27872 = vmatmul.mubr.msk.f32.vlgmr.msra.gmra.mrb[218].mxu0 %vm282_vm2, %v16252_v8  ;;  %27883 = vmatmul.mubr.msk.f32.vlgmr.msra.gmra.mrb[218].mxu1 %vm282_vm2, %v16326_v9 }
0x5c6d   :  { %30043 = vmatpush3.bf16.msra.mxu0 %v30870_v22  ;;  %30049 = vmatpush3.bf16.msra.mxu1 %v30870_v22 }
0x5c6e   :  { %30044 = vmatprep.subr.bf16.mxu0 %v30699_v0  ;;  %30050 = vmatprep.subr.bf16.mxu1 %v30699_v0 }
0x5c6f   :  { %27893 = vmatprep.mubr.msk.f32.mxu0 %vm30700_vm0, %v30701_v1  ;;  %27904 = vmatprep.mubr.msk.f32.mxu1 %vm30700_vm0, %v30701_v1 }
0x5c71   :  { %30046 = vmatpush3.bf16.msra.mxu0 %v30880_v27  ;;  %30052 = vmatpush3.bf16.msra.mxu1 %v30880_v27 }
0x5c72   :  { %30053 = vmatprep.subr.bf16.mxu0 %v30699_v0  ;;  %30059 = vmatprep.subr.bf16.mxu1 %v30699_v0 }
0x5d3f   :  { %v16396_v53 = vpop.f32.mrb[218].mxu0  ;;  %v16470_v10 = vpop.f32.mrb[218].mxu1 }
0x5d40   :  { %v16397_v11 = vadd.f32 %v32452_v48, %v16396_v53  ;;  %v16471_v15 = vadd.f32 %v32452_v48, %v16470_v10  ;;  %v27873_v17 = vpop.f32.mrb[219].mxu0  ;;  %v27884_v18 = vpop.f32.mrb[219].mxu1 }
0x5d42   :  { %v16400_v19 = vmax.f32 %v16397_v11, 0.0  ;;  %v16474_v20 = vmax.f32 %v16471_v15, 0.0  ;;  %v32997_v11 = vld [vmem:[%s33812_s9] ss:$0 sm:$0xff] }
0x5d44   :  { %27894 = vmatmul.mubr.msk.f32.vlgmr.msra.gmra.mrb[220].mxu0 %vm282_vm2, %v16400_v19  ;;  %27905 = vmatmul.mubr.msk.f32.vlgmr.msra.gmra.mrb[220].mxu1 %vm282_vm2, %v16474_v20 }
0x5d45   :  { %30055 = vmatpush3.bf16.msra.mxu0 %v30907_v37  ;;  %30061 = vmatpush3.bf16.msra.mxu1 %v30907_v37 }
0x5d46   :  { %30056 = vmatprep.subr.bf16.mxu0 %v30699_v0  ;;  %30062 = vmatprep.subr.bf16.mxu1 %v30699_v0 }
0x5d47   :  { %27915 = vmatprep.mubr.msk.f32.mxu0 %vm30700_vm0, %v30701_v1  ;;  %27926 = vmatprep.mubr.msk.f32.mxu1 %vm30700_vm0, %v30701_v1 }
0x5d49   :  { %30058 = vmatpush3.bf16.msra.mxu0 %v30917_v42  ;;  %30064 = vmatpush3.bf16.msra.mxu1 %v30917_v42 }
0x5d4a   :  { %30065 = vmatprep.subr.bf16.mxu0 %v30699_v0  ;;  %30068 = vmatprep.subr.bf16.mxu1 %v30699_v0 }
0x5e17   :  { %v16544_v48 = vpop.f32.mrb[220].mxu0  ;;  %v16618_v21 = vpop.f32.mrb[220].mxu1 }
0x5e18   :  { %v16545_v2 = vadd.f32 %v32473_v14, %v16544_v48  ;;  %v16619_v23 = vadd.f32 %v32473_v14, %v16618_v21  ;;  %v27895_v29 = vpop.f32.mrb[221].mxu0  ;;  %v27906_v30 = vpop.f32.mrb[221].mxu1 }
0x5e1a   :  { %v16548_v31 = vmax.f32 %v16545_v2, 0.0  ;;  %v16622_v32 = vmax.f32 %v16619_v23, 0.0 }
0x5e1c   :  { %27916 = vmatmul.mubr.msk.f32.vlgmr.msra.gmra.mrb[222].mxu0 %vm282_vm2, %v16548_v31  ;;  %27927 = vmatmul.mubr.msk.f32.vlgmr.msra.gmra.mrb[222].mxu1 %vm282_vm2, %v16622_v32 }
0x5e1d   :  { %30067 = vmatpush3.bf16.msra.mxu0 %v30820_v6  ;;  %30070 = vmatpush3.bf16.msra.mxu1 %v30820_v6 }
0x5e1e   :  { %27933 = vmatprep.mubr.msk.f32.mxu0 %vm30700_vm0, %v30701_v1  ;;  %27940 = vmatprep.mubr.msk.f32.mxu1 %vm30700_vm0, %v30701_v1 }
0x5e1f   :  { %30071 = vmatprep.subr.bf16.mxu0 %v30699_v0  ;;  %30077 = vmatprep.subr.bf16.mxu1 %v30699_v0 }
0x5eef   :  { %v16692_v14 = vpop.f32.mrb[222].mxu0  ;;  %v16765_v33 = vpop.f32.mrb[222].mxu1 }
0x5ef0   :  { %v16693_v56 = vadd.f32 %v32490_v24, %v16692_v14  ;;  %v16766_v34 = vadd.f32 %v32490_v24, %v16765_v33  ;;  %v27917_v16 = vpop.f32.mrb[223].mxu0  ;;  %v27928_v35 = vpop.f32.mrb[223].mxu1 }
0x5ef2   :  { %v16769_v39 = vmul.f32 %v16693_v56, %v30954_v55  ;;  %v16771_v40 = vmul.f32 %v16766_v34, %v30963_v63 }
0x5ef4   :  { %v32917_v41 = vadd.f32 %v16769_v39, %v32847_v59  ;;  %v32920_v43 = vadd.f32 %v16771_v40, %v32850_v60 }
0x5ef6   :  { %27934 = vmatmul.mubr.msk.f32.vlgmr.msra.gmra.mrb[224].mxu0 %vm131_vm1, %v32917_v41  ;;  %27941 = vmatmul.mubr.msk.f32.vlgmr.msra.gmra.mrb[224].mxu1 %vm131_vm1, %v32920_v43 }
0x5ef7   :  { %30073 = vmatpush3.bf16.msra.mxu0 %v30822_v7  ;;  %30079 = vmatpush3.bf16.msra.mxu1 %v30822_v7 }
0x5ef8   :  { %30074 = vmatprep.subr.bf16.mxu0 %v30699_v0  ;;  %30080 = vmatprep.subr.bf16.mxu1 %v30699_v0 }
0x5ef9   :  { %27951 = vmatprep.mubr.msk.f32.mxu0 %vm30700_vm0, %v30701_v1  ;;  %27962 = vmatprep.mubr.msk.f32.mxu1 %vm30700_vm0, %v30701_v1 }
0x5efb   :  { %30076 = vmatpush3.bf16.msra.mxu0 %v30846_v12  ;;  %30082 = vmatpush3.bf16.msra.mxu1 %v30846_v12 }
0x5efc   :  { %30083 = vmatprep.subr.bf16.mxu0 %v30699_v0  ;;  %30089 = vmatprep.subr.bf16.mxu1 %v30699_v0 }
0x5fc9   :  { %v16842_v24 = vpop.f32.mrb[224].mxu0  ;;  %v16916_v25 = vpop.f32.mrb[224].mxu1 }
0x5fca   :  { %v16843_v26 = vadd.f32 %v32938_v44, %v16842_v24  ;;  %v16917_v45 = vadd.f32 %v32938_v44, %v16916_v25  ;;  %v27935_v13 = vpop.f32.mrb[225].mxu0  ;;  %v27942_v47 = vpop.f32.mrb[225].mxu1 }
0x5fcc   :  { %v16846_v49 = vmax.f32 %v16843_v26, 0.0  ;;  %v16920_v50 = vmax.f32 %v16917_v45, 0.0 }
0x5fce   :  { %27952 = vmatmul.mubr.msk.f32.vlgmr.msra.gmra.mrb[226].mxu0 %vm282_vm2, %v16846_v49  ;;  %27963 = vmatmul.mubr.msk.f32.vlgmr.msra.gmra.mrb[226].mxu1 %vm282_vm2, %v16920_v50 }
0x5fcf   :  { %30085 = vmatpush3.bf16.msra.mxu0 %v30870_v22  ;;  %30091 = vmatpush3.bf16.msra.mxu1 %v30870_v22 }
0x5fd0   :  { %30086 = vmatprep.subr.bf16.mxu0 %v30699_v0  ;;  %30092 = vmatprep.subr.bf16.mxu1 %v30699_v0 }
0x5fd1   :  { %27973 = vmatprep.mubr.msk.f32.mxu0 %vm30700_vm0, %v30701_v1  ;;  %27984 = vmatprep.mubr.msk.f32.mxu1 %vm30700_vm0, %v30701_v1 }
0x5fd3   :  { %30088 = vmatpush3.bf16.msra.mxu0 %v30880_v27  ;;  %30094 = vmatpush3.bf16.msra.mxu1 %v30880_v27 }
0x5fd4   :  { %30095 = vmatprep.subr.bf16.mxu0 %v30699_v0  ;;  %30101 = vmatprep.subr.bf16.mxu1 %v30699_v0 }
0x60a1   :  { %v16990_v51 = vpop.f32.mrb[226].mxu0  ;;  %v17064_v52 = vpop.f32.mrb[226].mxu1 }
0x60a2   :  { %v16991_v38 = vadd.f32 %v32959_v36, %v16990_v51  ;;  %v17065_v28 = vadd.f32 %v32959_v36, %v17064_v52  ;;  %v27953_v54 = vpop.f32.mrb[227].mxu0  ;;  %v27964_v57 = vpop.f32.mrb[227].mxu1 }
0x60a4   :  { %v16994_v58 = vmax.f32 %v16991_v38, 0.0  ;;  %v17068_v59 = vmax.f32 %v17065_v28, 0.0 }
0x60a6   :  { %27974 = vmatmul.mubr.msk.f32.vlgmr.msra.gmra.mrb[228].mxu0 %vm282_vm2, %v16994_v58  ;;  %27985 = vmatmul.mubr.msk.f32.vlgmr.msra.gmra.mrb[228].mxu1 %vm282_vm2, %v17068_v59 }
0x60a7   :  { %30097 = vmatpush3.bf16.msra.mxu0 %v30907_v37  ;;  %30103 = vmatpush3.bf16.msra.mxu1 %v30907_v37 }
0x60a8   :  { %30098 = vmatprep.subr.bf16.mxu0 %v30699_v0  ;;  %30104 = vmatprep.subr.bf16.mxu1 %v30699_v0 }
0x60a9   :  { %27995 = vmatprep.mubr.msk.f32.mxu0 %vm30700_vm0, %v30701_v1  ;;  %28006 = vmatprep.mubr.msk.f32.mxu1 %vm30700_vm0, %v30701_v1 }
0x60ab   :  { %30100 = vmatpush3.bf16.msra.mxu0 %v30917_v42  ;;  %30106 = vmatpush3.bf16.msra.mxu1 %v30917_v42 }
0x60ac   :  { %30107 = vmatprep.subr.bf16.mxu0 %v30699_v0  ;;  %30110 = vmatprep.subr.bf16.mxu1 %v30699_v0 }
0x6179   :  { %v17138_v60 = vpop.f32.mrb[228].mxu0  ;;  %v17212_v61 = vpop.f32.mrb[228].mxu1 }
0x617a   :  { %v17139_v46 = vadd.f32 %v32980_v62, %v17138_v60  ;;  %v17213_v3 = vadd.f32 %v32980_v62, %v17212_v61  ;;  %v27975_v4 = vpop.f32.mrb[229].mxu0  ;;  %v27986_v5 = vpop.f32.mrb[229].mxu1 }
0x617c   :  { %v17142_v8 = vmax.f32 %v17139_v46, 0.0  ;;  %v17216_v9 = vmax.f32 %v17213_v3, 0.0 }
0x617e   :  { %27996 = vmatmul.mubr.msk.f32.vlgmr.msra.gmra.mrb[230].mxu0 %vm282_vm2, %v17142_v8  ;;  %28007 = vmatmul.mubr.msk.f32.vlgmr.msra.gmra.mrb[230].mxu1 %vm282_vm2, %v17216_v9 }
0x617f   :  { %30109 = vmatpush3.bf16.msra.mxu0 %v30820_v6  ;;  %30112 = vmatpush3.bf16.msra.mxu1 %v30820_v6 }
0x6180   :  { %28013 = vmatprep.mubr.msk.f32.mxu0 %vm30700_vm0, %v30701_v1  ;;  %28020 = vmatprep.mubr.msk.f32.mxu1 %vm30700_vm0, %v30701_v1 }
0x6181   :  { %30113 = vmatprep.subr.bf16.mxu0 %v30699_v0  ;;  %30119 = vmatprep.subr.bf16.mxu1 %v30699_v0 }
0x6251   :  { %v17286_v53 = vpop.f32.mrb[230].mxu0  ;;  %v17359_v10 = vpop.f32.mrb[230].mxu1 }
0x6252   :  { %v17287_v15 = vadd.f32 %v32997_v11, %v17286_v53  ;;  %v17360_v17 = vadd.f32 %v32997_v11, %v17359_v10  ;;  %v27997_v18 = vpop.f32.mrb[231].mxu0  ;;  %v28008_v19 = vpop.f32.mrb[231].mxu1 }
0x6254   :  { %v17363_v20 = vmul.f32 %v17287_v15, %v30954_v55  ;;  %v17365_v48 = vmul.f32 %v17360_v17, %v30963_v63 }
0x6256   :  { %v33004_v21 = vadd.f32 %v17363_v20, %v32917_v41  ;;  %v33007_v2 = vadd.f32 %v17365_v48, %v32920_v43 }
0x6258   :  { %28014 = vmatmul.mubr.msk.f32.vlgmr.msra.gmra.mrb[232].mxu0 %vm131_vm1, %v33004_v21  ;;  %28021 = vmatmul.mubr.msk.f32.vlgmr.msra.gmra.mrb[232].mxu1 %vm131_vm1, %v33007_v2 }
0x6259   :  { %30115 = vmatpush3.bf16.msra.mxu0 %v30822_v7  ;;  %30121 = vmatpush3.bf16.msra.mxu1 %v30822_v7 }
0x625a   :  { %30116 = vmatprep.subr.bf16.mxu0 %v30699_v0  ;;  %30122 = vmatprep.subr.bf16.mxu1 %v30699_v0 }
0x625b   :  { %28031 = vmatprep.mubr.msk.f32.mxu0 %vm30700_vm0, %v30701_v1  ;;  %28042 = vmatprep.mubr.msk.f32.mxu1 %vm30700_vm0, %v30701_v1 }
0x625d   :  { %30118 = vmatpush3.bf16.msra.mxu0 %v30846_v12  ;;  %30124 = vmatpush3.bf16.msra.mxu1 %v30846_v12 }
0x625e   :  { %30125 = vmatprep.subr.bf16.mxu0 %v30699_v0  ;;  %30131 = vmatprep.subr.bf16.mxu1 %v30699_v0 }
0x632b   :  { %v17436_v23 = vpop.f32.mrb[232].mxu0  ;;  %v17510_v29 = vpop.f32.mrb[232].mxu1 }
0x632c   :  { %v17437_v30 = vadd.f32 %v32938_v44, %v17436_v23  ;;  %v17511_v31 = vadd.f32 %v32938_v44, %v17510_v29  ;;  %v28015_v32 = vpop.f32.mrb[233].mxu0  ;;  %v28022_v14 = vpop.f32.mrb[233].mxu1 }
0x632e   :  { %v17440_v33 = vmax.f32 %v17437_v30, 0.0  ;;  %v17514_v56 = vmax.f32 %v17511_v31, 0.0 }
0x6330   :  { %28032 = vmatmul.mubr.msk.f32.vlgmr.msra.gmra.mrb[234].mxu0 %vm282_vm2, %v17440_v33  ;;  %28043 = vmatmul.mubr.msk.f32.vlgmr.msra.gmra.mrb[234].mxu1 %vm282_vm2, %v17514_v56 }
0x6331   :  { %30127 = vmatpush3.bf16.msra.mxu0 %v30870_v22  ;;  %30133 = vmatpush3.bf16.msra.mxu1 %v30870_v22 }
0x6332   :  { %30128 = vmatprep.subr.bf16.mxu0 %v30699_v0  ;;  %30134 = vmatprep.subr.bf16.mxu1 %v30699_v0 }
0x6333   :  { %28053 = vmatprep.mubr.msk.f32.mxu0 %vm30700_vm0, %v30701_v1  ;;  %28064 = vmatprep.mubr.msk.f32.mxu1 %vm30700_vm0, %v30701_v1 }
0x6335   :  { %30130 = vmatpush3.bf16.msra.mxu0 %v30880_v27  ;;  %30136 = vmatpush3.bf16.msra.mxu1 %v30880_v27 }
0x6336   :  { %30137 = vmatprep.subr.bf16.mxu0 %v30699_v0  ;;  %30143 = vmatprep.subr.bf16.mxu1 %v30699_v0 }
0x6403   :  { %v17584_v34 = vpop.f32.mrb[234].mxu0  ;;  %v17658_v16 = vpop.f32.mrb[234].mxu1 }
0x6404   :  { %v17585_v35 = vadd.f32 %v32959_v36, %v17584_v34  ;;  %v17659_v39 = vadd.f32 %v32959_v36, %v17658_v16  ;;  %v28033_v40 = vpop.f32.mrb[235].mxu0  ;;  %v28044_v41 = vpop.f32.mrb[235].mxu1 }
0x6406   :  { %v17588_v43 = vmax.f32 %v17585_v35, 0.0  ;;  %v17662_v24 = vmax.f32 %v17659_v39, 0.0 }
0x6408   :  { %28054 = vmatmul.mubr.msk.f32.vlgmr.msra.gmra.mrb[236].mxu0 %vm282_vm2, %v17588_v43  ;;  %28065 = vmatmul.mubr.msk.f32.vlgmr.msra.gmra.mrb[236].mxu1 %vm282_vm2, %v17662_v24 }
0x6409   :  { %30139 = vmatpush3.bf16.msra.mxu0 %v30907_v37  ;;  %30145 = vmatpush3.bf16.msra.mxu1 %v30907_v37 }
0x640a   :  { %30140 = vmatprep.subr.bf16.mxu0 %v30699_v0  ;;  %30146 = vmatprep.subr.bf16.mxu1 %v30699_v0 }
0x640b   :  { %28075 = vmatprep.mubr.msk.f32.mxu0 %vm30700_vm0, %v30701_v1  ;;  %28086 = vmatprep.mubr.msk.f32.mxu1 %vm30700_vm0, %v30701_v1 }
0x640d   :  { %30142 = vmatpush3.bf16.msra.mxu0 %v30917_v42  ;;  %30148 = vmatpush3.bf16.msra.mxu1 %v30917_v42 }
0x640e   :  { %30149 = vmatprep.subr.bf16.mxu0 %v30699_v0  ;;  %30152 = vmatprep.subr.bf16.mxu1 %v30699_v0 }
0x64db   :  { %v17732_v25 = vpop.f32.mrb[236].mxu0  ;;  %v17806_v26 = vpop.f32.mrb[236].mxu1 }
0x64dc   :  { %v17733_v45 = vadd.f32 %v32980_v62, %v17732_v25  ;;  %v17807_v13 = vadd.f32 %v32980_v62, %v17806_v26  ;;  %v28055_v47 = vpop.f32.mrb[237].mxu0  ;;  %v28066_v49 = vpop.f32.mrb[237].mxu1 }
0x64de   :  { %v17736_v50 = vmax.f32 %v17733_v45, 0.0  ;;  %v17810_v51 = vmax.f32 %v17807_v13, 0.0 }
0x64e0   :  { %28076 = vmatmul.mubr.msk.f32.vlgmr.msra.gmra.mrb[238].mxu0 %vm282_vm2, %v17736_v50  ;;  %28087 = vmatmul.mubr.msk.f32.vlgmr.msra.gmra.mrb[238].mxu1 %vm282_vm2, %v17810_v51 }
0x64e1   :  { %30151 = vmatpush3.bf16.msra.mxu0 %v30820_v6  ;;  %30154 = vmatpush3.bf16.msra.mxu1 %v30820_v6 }
0x64e2   :  { %28093 = vmatprep.mubr.msk.f32.mxu0 %vm30700_vm0, %v30701_v1  ;;  %28100 = vmatprep.mubr.msk.f32.mxu1 %vm30700_vm0, %v30701_v1 }
0x64e3   :  { %30155 = vmatprep.subr.bf16.mxu0 %v30699_v0  ;;  %30161 = vmatprep.subr.bf16.mxu1 %v30699_v0 }
0x65b3   :  { %v17880_v52 = vpop.f32.mrb[238].mxu0  ;;  %v17953_v38 = vpop.f32.mrb[238].mxu1 }
0x65b4   :  { %v17881_v28 = vadd.f32 %v32997_v11, %v17880_v52  ;;  %v17954_v54 = vadd.f32 %v32997_v11, %v17953_v38  ;;  %v28077_v57 = vpop.f32.mrb[239].mxu0  ;;  %v28088_v58 = vpop.f32.mrb[239].mxu1 }
0x65b6   :  { %v17957_v59 = vmul.f32 %v17881_v28, %v30954_v55  ;;  %v17959_v60 = vmul.f32 %v17954_v54, %v30963_v63 }
0x65b8   :  { %v33074_v61 = vadd.f32 %v17957_v59, %v33004_v21  ;;  %v33077_v46 = vadd.f32 %v17959_v60, %v33007_v2 }
0x65ba   :  { %17962 = vst.msk [vmem:[#allocation8 + $0x30] sm:$0xff] %vm131_vm1, %v33074_v61  ;;  %17963 = vst.msk [vmem:[#allocation8 + $0x38] sm:$0xff] %vm131_vm1, %v33077_v46  ;;  %28094 = vmatmul.mubr.msk.f32.vlgmr.msra.gmra.mrb[240].mxu0 %vm131_vm1, %v33074_v61  ;;  %28101 = vmatmul.mubr.msk.f32.vlgmr.msra.gmra.mrb[240].mxu1 %vm131_vm1, %v33077_v46 }
0x65bb   :  { %30157 = vmatpush3.bf16.msra.mxu0 %v30822_v7  ;;  %30163 = vmatpush3.bf16.msra.mxu1 %v30822_v7 }
0x65bc   :  { %30158 = vmatprep.subr.bf16.mxu0 %v30699_v0  ;;  %30164 = vmatprep.subr.bf16.mxu1 %v30699_v0 }
0x65bd   :  { %28111 = vmatprep.mubr.msk.f32.mxu0 %vm30700_vm0, %v30701_v1  ;;  %28122 = vmatprep.mubr.msk.f32.mxu1 %vm30700_vm0, %v30701_v1 }
0x65bf   :  { %30160 = vmatpush3.bf16.msra.mxu0 %v30846_v12  ;;  %30166 = vmatpush3.bf16.msra.mxu1 %v30846_v12 }
0x65c0   :  { %30167 = vmatprep.subr.bf16.mxu0 %v30699_v0  ;;  %30173 = vmatprep.subr.bf16.mxu1 %v30699_v0 }
0x668d   :  { %v18033_v3 = vpop.f32.mrb[240].mxu0  ;;  %v18107_v4 = vpop.f32.mrb[240].mxu1 }
0x668e   :  { %v18034_v5 = vadd.f32 %v32938_v44, %v18033_v3  ;;  %v18108_v8 = vadd.f32 %v32938_v44, %v18107_v4  ;;  %v28095_v9 = vpop.f32.mrb[241].mxu0  ;;  %v28102_v53 = vpop.f32.mrb[241].mxu1 }
0x6690   :  { %v18037_v10 = vmax.f32 %v18034_v5, 0.0  ;;  %v18111_v15 = vmax.f32 %v18108_v8, 0.0 }
0x6692   :  { %28112 = vmatmul.mubr.msk.f32.vlgmr.msra.gmra.mrb[242].mxu0 %vm282_vm2, %v18037_v10  ;;  %28123 = vmatmul.mubr.msk.f32.vlgmr.msra.gmra.mrb[242].mxu1 %vm282_vm2, %v18111_v15 }
0x6693   :  { %30169 = vmatpush3.bf16.msra.mxu0 %v30870_v22  ;;  %30175 = vmatpush3.bf16.msra.mxu1 %v30870_v22 }
0x6694   :  { %30170 = vmatprep.subr.bf16.mxu0 %v30699_v0  ;;  %30176 = vmatprep.subr.bf16.mxu1 %v30699_v0 }
0x6695   :  { %28133 = vmatprep.mubr.msk.f32.mxu0 %vm30700_vm0, %v30701_v1  ;;  %28144 = vmatprep.mubr.msk.f32.mxu1 %vm30700_vm0, %v30701_v1 }
0x6697   :  { %30172 = vmatpush3.bf16.msra.mxu0 %v30880_v27  ;;  %30178 = vmatpush3.bf16.msra.mxu1 %v30880_v27 }
0x6698   :  { %30179 = vmatprep.subr.bf16.mxu0 %v30699_v0  ;;  %30185 = vmatprep.subr.bf16.mxu1 %v30699_v0 }
0x6765   :  { %v18181_v17 = vpop.f32.mrb[242].mxu0  ;;  %v18255_v18 = vpop.f32.mrb[242].mxu1 }
0x6766   :  { %v18182_v19 = vadd.f32 %v32959_v36, %v18181_v17  ;;  %v18256_v20 = vadd.f32 %v32959_v36, %v18255_v18  ;;  %v28113_v48 = vpop.f32.mrb[243].mxu0  ;;  %v28124_v21 = vpop.f32.mrb[243].mxu1 }
0x6768   :  { %v18185_v2 = vmax.f32 %v18182_v19, 0.0  ;;  %v18259_v23 = vmax.f32 %v18256_v20, 0.0 }
0x676a   :  { %28134 = vmatmul.mubr.msk.f32.vlgmr.msra.gmra.mrb[244].mxu0 %vm282_vm2, %v18185_v2  ;;  %28145 = vmatmul.mubr.msk.f32.vlgmr.msra.gmra.mrb[244].mxu1 %vm282_vm2, %v18259_v23 }
0x676b   :  { %30181 = vmatpush3.bf16.msra.mxu0 %v30907_v37  ;;  %30187 = vmatpush3.bf16.msra.mxu1 %v30907_v37 }
0x676c   :  { %30182 = vmatprep.subr.bf16.mxu0 %v30699_v0  ;;  %30188 = vmatprep.subr.bf16.mxu1 %v30699_v0 }
0x676d   :  { %28155 = vmatprep.mubr.msk.f32.mxu0 %vm30700_vm0, %v30701_v1  ;;  %28166 = vmatprep.mubr.msk.f32.mxu1 %vm30700_vm0, %v30701_v1 }
0x676f   :  { %30184 = vmatpush3.bf16.msra.mxu0 %v30917_v42  ;;  %30190 = vmatpush3.bf16.msra.mxu1 %v30917_v42 }
0x6770   :  { %30191 = vmatprep.subr.bf16.mxu0 %v30699_v0  ;;  %30194 = vmatprep.subr.bf16.mxu1 %v30699_v0 }
0x683d   :  { %v18329_v29 = vpop.f32.mrb[244].mxu0  ;;  %v18403_v30 = vpop.f32.mrb[244].mxu1 }
0x683e   :  { %v18330_v31 = vadd.f32 %v32980_v62, %v18329_v29  ;;  %v18404_v32 = vadd.f32 %v32980_v62, %v18403_v30  ;;  %v28135_v14 = vpop.f32.mrb[245].mxu0  ;;  %v28146_v33 = vpop.f32.mrb[245].mxu1 }
0x6840   :  { %v18333_v56 = vmax.f32 %v18330_v31, 0.0  ;;  %v18407_v34 = vmax.f32 %v18404_v32, 0.0 }
0x6842   :  { %28156 = vmatmul.mubr.msk.f32.vlgmr.msra.gmra.mrb[246].mxu0 %vm282_vm2, %v18333_v56  ;;  %28167 = vmatmul.mubr.msk.f32.vlgmr.msra.gmra.mrb[246].mxu1 %vm282_vm2, %v18407_v34 }
0x6843   :  { %30193 = vmatpush3.bf16.msra.mxu0 %v30820_v6  ;;  %30196 = vmatpush3.bf16.msra.mxu1 %v30820_v6 }
0x6844   :  { %28173 = vmatprep.mubr.msk.f32.mxu0 %vm30700_vm0, %v30701_v1  ;;  %28180 = vmatprep.mubr.msk.f32.mxu1 %vm30700_vm0, %v30701_v1 }
0x6845   :  { %30197 = vmatprep.subr.bf16.mxu0 %v30699_v0  ;;  %30203 = vmatprep.subr.bf16.mxu1 %v30699_v0 }
0x6915   :  { %v18477_v16 = vpop.f32.mrb[246].mxu0  ;;  %v18550_v35 = vpop.f32.mrb[246].mxu1 }
0x6916   :  { %v18478_v39 = vadd.f32 %v32997_v11, %v18477_v16  ;;  %v18551_v40 = vadd.f32 %v32997_v11, %v18550_v35  ;;  %v28157_v41 = vpop.f32.mrb[247].mxu0  ;;  %v28168_v43 = vpop.f32.mrb[247].mxu1 }
0x6918   :  { %v18554_v24 = vmul.f32 %v18478_v39, %v30954_v55  ;;  %v18556_v25 = vmul.f32 %v18551_v40, %v30963_v63 }
0x691a   :  { %v33148_v26 = vadd.f32 %v18554_v24, %v33074_v61  ;;  %v33151_v45 = vadd.f32 %v18556_v25, %v33077_v46 }
0x691c   :  { %28174 = vmatmul.mubr.msk.f32.vlgmr.msra.gmra.mrb[248].mxu0 %vm131_vm1, %v33148_v26  ;;  %28181 = vmatmul.mubr.msk.f32.vlgmr.msra.gmra.mrb[248].mxu1 %vm131_vm1, %v33151_v45 }
0x691d   :  { %30199 = vmatpush3.bf16.msra.mxu0 %v30822_v7  ;;  %30205 = vmatpush3.bf16.msra.mxu1 %v30822_v7 }
0x691e   :  { %30200 = vmatprep.subr.bf16.mxu0 %v30699_v0  ;;  %30206 = vmatprep.subr.bf16.mxu1 %v30699_v0 }
0x691f   :  { %28191 = vmatprep.mubr.msk.f32.mxu0 %vm30700_vm0, %v30701_v1  ;;  %28202 = vmatprep.mubr.msk.f32.mxu1 %vm30700_vm0, %v30701_v1 }
0x6921   :  { %30202 = vmatpush3.bf16.msra.mxu0 %v30846_v12  ;;  %30208 = vmatpush3.bf16.msra.mxu1 %v30846_v12 }
0x6922   :  { %30209 = vmatprep.subr.bf16.mxu0 %v30699_v0  ;;  %30215 = vmatprep.subr.bf16.mxu1 %v30699_v0 }
0x69ef   :  { %v18627_v13 = vpop.f32.mrb[248].mxu0  ;;  %v18701_v47 = vpop.f32.mrb[248].mxu1 }
0x69f0   :  { %v18628_v49 = vadd.f32 %v32938_v44, %v18627_v13  ;;  %v18702_v50 = vadd.f32 %v32938_v44, %v18701_v47  ;;  %v28175_v51 = vpop.f32.mrb[249].mxu0  ;;  %v28182_v52 = vpop.f32.mrb[249].mxu1 }
0x69f2   :  { %v18631_v38 = vmax.f32 %v18628_v49, 0.0  ;;  %v18705_v28 = vmax.f32 %v18702_v50, 0.0 }
0x69f4   :  { %28192 = vmatmul.mubr.msk.f32.vlgmr.msra.gmra.mrb[250].mxu0 %vm282_vm2, %v18631_v38  ;;  %28203 = vmatmul.mubr.msk.f32.vlgmr.msra.gmra.mrb[250].mxu1 %vm282_vm2, %v18705_v28 }
0x69f5   :  { %30211 = vmatpush3.bf16.msra.mxu0 %v30870_v22  ;;  %30217 = vmatpush3.bf16.msra.mxu1 %v30870_v22 }
0x69f6   :  { %30212 = vmatprep.subr.bf16.mxu0 %v30699_v0  ;;  %30218 = vmatprep.subr.bf16.mxu1 %v30699_v0 }
0x69f7   :  { %28213 = vmatprep.mubr.msk.f32.mxu0 %vm30700_vm0, %v30701_v1  ;;  %28224 = vmatprep.mubr.msk.f32.mxu1 %vm30700_vm0, %v30701_v1 }
0x69f9   :  { %30214 = vmatpush3.bf16.msra.mxu0 %v30880_v27  ;;  %30220 = vmatpush3.bf16.msra.mxu1 %v30880_v27 }
0x69fa   :  { %30221 = vmatprep.subr.bf16.mxu0 %v30699_v0  ;;  %30227 = vmatprep.subr.bf16.mxu1 %v30699_v0 }
0x6ac7   :  { %v18775_v54 = vpop.f32.mrb[250].mxu0  ;;  %v18849_v57 = vpop.f32.mrb[250].mxu1 }
0x6ac8   :  { %v18776_v58 = vadd.f32 %v32959_v36, %v18775_v54  ;;  %v18850_v59 = vadd.f32 %v32959_v36, %v18849_v57  ;;  %v28193_v60 = vpop.f32.mrb[251].mxu0  ;;  %v28204_v61 = vpop.f32.mrb[251].mxu1 }
0x6aca   :  { %v18779_v46 = vmax.f32 %v18776_v58, 0.0  ;;  %v18853_v3 = vmax.f32 %v18850_v59, 0.0 }
0x6acc   :  { %28214 = vmatmul.mubr.msk.f32.vlgmr.msra.gmra.mrb[252].mxu0 %vm282_vm2, %v18779_v46  ;;  %28225 = vmatmul.mubr.msk.f32.vlgmr.msra.gmra.mrb[252].mxu1 %vm282_vm2, %v18853_v3 }
0x6acd   :  { %30223 = vmatpush3.bf16.msra.mxu0 %v30907_v37  ;;  %30229 = vmatpush3.bf16.msra.mxu1 %v30907_v37 }
0x6ace   :  { %30224 = vmatprep.subr.bf16.mxu0 %v30699_v0  ;;  %30230 = vmatprep.subr.bf16.mxu1 %v30699_v0 }
0x6acf   :  { %28235 = vmatprep.mubr.msk.f32.mxu0 %vm30700_vm0, %v30701_v1  ;;  %28246 = vmatprep.mubr.msk.f32.mxu1 %vm30700_vm0, %v30701_v1 }
0x6ad1   :  { %30226 = vmatpush3.bf16.msra.mxu0 %v30917_v42  ;;  %30232 = vmatpush3.bf16.msra.mxu1 %v30917_v42 }
0x6ad2   :  { %30233 = vmatprep.subr.bf16.mxu0 %v30699_v0  ;;  %30236 = vmatprep.subr.bf16.mxu1 %v30699_v0 }
0x6b9f   :  { %v18923_v4 = vpop.f32.mrb[252].mxu0  ;;  %v18997_v5 = vpop.f32.mrb[252].mxu1 }
0x6ba0   :  { %v18924_v8 = vadd.f32 %v32980_v62, %v18923_v4  ;;  %v18998_v9 = vadd.f32 %v32980_v62, %v18997_v5  ;;  %v28215_v53 = vpop.f32.mrb[253].mxu0  ;;  %v28226_v10 = vpop.f32.mrb[253].mxu1 }
0x6ba2   :  { %v18927_v15 = vmax.f32 %v18924_v8, 0.0  ;;  %v19001_v17 = vmax.f32 %v18998_v9, 0.0 }
0x6ba4   :  { %28236 = vmatmul.mubr.msk.f32.vlgmr.msra.gmra.mrb[254].mxu0 %vm282_vm2, %v18927_v15  ;;  %28247 = vmatmul.mubr.msk.f32.vlgmr.msra.gmra.mrb[254].mxu1 %vm282_vm2, %v19001_v17 }
0x6ba5   :  { %30235 = vmatpush3.bf16.msra.mxu0 %v30820_v6  ;;  %30238 = vmatpush3.bf16.msra.mxu1 %v30820_v6 }
0x6ba6   :  { %28253 = vmatprep.mubr.msk.f32.mxu0 %vm30700_vm0, %v30701_v1  ;;  %28260 = vmatprep.mubr.msk.f32.mxu1 %vm30700_vm0, %v30701_v1 }
0x6ba7   :  { %30239 = vmatprep.subr.bf16.mxu0 %v30699_v0  ;;  %30245 = vmatprep.subr.bf16.mxu1 %v30699_v0 }
0x6c77   :  { %v19071_v18 = vpop.f32.mrb[254].mxu0  ;;  %v19144_v19 = vpop.f32.mrb[254].mxu1 }
0x6c78   :  { %v19072_v20 = vadd.f32 %v32997_v11, %v19071_v18  ;;  %v19145_v48 = vadd.f32 %v32997_v11, %v19144_v19  ;;  %v28237_v21 = vpop.f32.mrb[255].mxu0  ;;  %v28248_v2 = vpop.f32.mrb[255].mxu1 }
0x6c7a   :  { %v19148_v23 = vmul.f32 %v19072_v20, %v30954_v55  ;;  %v19150_v29 = vmul.f32 %v19145_v48, %v30963_v63 }
0x6c7c   :  { %v33218_v30 = vadd.f32 %v19148_v23, %v33148_v26  ;;  %v33221_v31 = vadd.f32 %v19150_v29, %v33151_v45 }
0x6c7e   :  { %28254 = vmatmul.mubr.msk.f32.vlgmr.msra.gmra.mrb[0].mxu0 %vm131_vm1, %v33218_v30  ;;  %28261 = vmatmul.mubr.msk.f32.vlgmr.msra.gmra.mrb[0].mxu1 %vm131_vm1, %v33221_v31 }
0x6c7f   :  { %30241 = vmatpush3.bf16.msra.mxu0 %v30822_v7  ;;  %30247 = vmatpush3.bf16.msra.mxu1 %v30822_v7 }
0x6c80   :  { %30242 = vmatprep.subr.bf16.mxu0 %v30699_v0  ;;  %30248 = vmatprep.subr.bf16.mxu1 %v30699_v0 }
0x6c81   :  { %28271 = vmatprep.mubr.msk.f32.mxu0 %vm30700_vm0, %v30701_v1  ;;  %28282 = vmatprep.mubr.msk.f32.mxu1 %vm30700_vm0, %v30701_v1 }
0x6c83   :  { %30244 = vmatpush3.bf16.msra.mxu0 %v30846_v12  ;;  %30250 = vmatpush3.bf16.msra.mxu1 %v30846_v12 }
0x6c84   :  { %30251 = vmatprep.subr.bf16.mxu0 %v30699_v0  ;;  %30257 = vmatprep.subr.bf16.mxu1 %v30699_v0 }
0x6d51   :  { %v19221_v32 = vpop.f32.mrb[0].mxu0  ;;  %v19295_v14 = vpop.f32.mrb[0].mxu1 }
0x6d52   :  { %v19222_v33 = vadd.f32 %v32938_v44, %v19221_v32  ;;  %v19296_v56 = vadd.f32 %v32938_v44, %v19295_v14  ;;  %v28255_v34 = vpop.f32.mrb[1].mxu0  ;;  %v28262_v16 = vpop.f32.mrb[1].mxu1 }
0x6d54   :  { %v19225_v35 = vmax.f32 %v19222_v33, 0.0  ;;  %v19299_v39 = vmax.f32 %v19296_v56, 0.0 }
0x6d56   :  { %28272 = vmatmul.mubr.msk.f32.vlgmr.msra.gmra.mrb[2].mxu0 %vm282_vm2, %v19225_v35  ;;  %28283 = vmatmul.mubr.msk.f32.vlgmr.msra.gmra.mrb[2].mxu1 %vm282_vm2, %v19299_v39 }
0x6d57   :  { %30253 = vmatpush3.bf16.msra.mxu0 %v30870_v22  ;;  %30259 = vmatpush3.bf16.msra.mxu1 %v30870_v22 }
0x6d58   :  { %30254 = vmatprep.subr.bf16.mxu0 %v30699_v0  ;;  %30260 = vmatprep.subr.bf16.mxu1 %v30699_v0 }
0x6d59   :  { %28293 = vmatprep.mubr.msk.f32.mxu0 %vm30700_vm0, %v30701_v1  ;;  %28304 = vmatprep.mubr.msk.f32.mxu1 %vm30700_vm0, %v30701_v1 }
0x6d5b   :  { %30256 = vmatpush3.bf16.msra.mxu0 %v30880_v27  ;;  %30262 = vmatpush3.bf16.msra.mxu1 %v30880_v27 }
0x6d5c   :  { %30263 = vmatprep.subr.bf16.mxu0 %v30699_v0  ;;  %30269 = vmatprep.subr.bf16.mxu1 %v30699_v0 }
0x6e29   :  { %v19369_v40 = vpop.f32.mrb[2].mxu0  ;;  %v19443_v41 = vpop.f32.mrb[2].mxu1 }
0x6e2a   :  { %v19370_v43 = vadd.f32 %v32959_v36, %v19369_v40  ;;  %v19444_v24 = vadd.f32 %v32959_v36, %v19443_v41  ;;  %v28273_v25 = vpop.f32.mrb[3].mxu0  ;;  %v28284_v26 = vpop.f32.mrb[3].mxu1 }
0x6e2c   :  { %v19373_v45 = vmax.f32 %v19370_v43, 0.0  ;;  %v19447_v13 = vmax.f32 %v19444_v24, 0.0 }
0x6e2e   :  { %28294 = vmatmul.mubr.msk.f32.vlgmr.msra.gmra.mrb[4].mxu0 %vm282_vm2, %v19373_v45  ;;  %28305 = vmatmul.mubr.msk.f32.vlgmr.msra.gmra.mrb[4].mxu1 %vm282_vm2, %v19447_v13 }
0x6e2f   :  { %30265 = vmatpush3.bf16.msra.mxu0 %v30907_v37  ;;  %30271 = vmatpush3.bf16.msra.mxu1 %v30907_v37 }
0x6e30   :  { %30266 = vmatprep.subr.bf16.mxu0 %v30699_v0  ;;  %30272 = vmatprep.subr.bf16.mxu1 %v30699_v0 }
0x6e31   :  { %28315 = vmatprep.mubr.msk.f32.mxu0 %vm30700_vm0, %v30701_v1  ;;  %28326 = vmatprep.mubr.msk.f32.mxu1 %vm30700_vm0, %v30701_v1 }
0x6e33   :  { %30268 = vmatpush3.bf16.msra.mxu0 %v30917_v42  ;;  %30274 = vmatpush3.bf16.msra.mxu1 %v30917_v42 }
0x6e34   :  { %30275 = vmatprep.subr.bf16.mxu0 %v30699_v0  ;;  %30278 = vmatprep.subr.bf16.mxu1 %v30699_v0 }
0x6f01   :  { %v19517_v47 = vpop.f32.mrb[4].mxu0  ;;  %v19591_v49 = vpop.f32.mrb[4].mxu1 }
0x6f02   :  { %v19518_v50 = vadd.f32 %v32980_v62, %v19517_v47  ;;  %v19592_v51 = vadd.f32 %v32980_v62, %v19591_v49  ;;  %v28295_v52 = vpop.f32.mrb[5].mxu0  ;;  %v28306_v38 = vpop.f32.mrb[5].mxu1 }
0x6f04   :  { %v19521_v28 = vmax.f32 %v19518_v50, 0.0  ;;  %v19595_v54 = vmax.f32 %v19592_v51, 0.0 }
0x6f06   :  { %28316 = vmatmul.mubr.msk.f32.vlgmr.msra.gmra.mrb[6].mxu0 %vm282_vm2, %v19521_v28  ;;  %28327 = vmatmul.mubr.msk.f32.vlgmr.msra.gmra.mrb[6].mxu1 %vm282_vm2, %v19595_v54 }
0x6f07   :  { %30277 = vmatpush3.bf16.msra.mxu0 %v30820_v6  ;;  %30280 = vmatpush3.bf16.msra.mxu1 %v30820_v6 }
0x6f08   :  { %28333 = vmatprep.mubr.msk.f32.mxu0 %vm30700_vm0, %v30701_v1  ;;  %28340 = vmatprep.mubr.msk.f32.mxu1 %vm30700_vm0, %v30701_v1 }
0x6f09   :  { %30281 = vmatprep.subr.bf16.mxu0 %v30699_v0  ;;  %30287 = vmatprep.subr.bf16.mxu1 %v30699_v0 }
0x6fd9   :  { %v19665_v57 = vpop.f32.mrb[6].mxu0  ;;  %v19738_v58 = vpop.f32.mrb[6].mxu1 }
0x6fda   :  { %v19666_v59 = vadd.f32 %v32997_v11, %v19665_v57  ;;  %v19739_v60 = vadd.f32 %v32997_v11, %v19738_v58  ;;  %v28317_v61 = vpop.f32.mrb[7].mxu0  ;;  %v28328_v46 = vpop.f32.mrb[7].mxu1 }
0x6fdc   :  { %v19742_v3 = vmul.f32 %v19666_v59, %v30954_v55  ;;  %v19744_v4 = vmul.f32 %v19739_v60, %v30963_v63 }
0x6fde   :  { %v33288_v5 = vadd.f32 %v19742_v3, %v33218_v30  ;;  %v33291_v8 = vadd.f32 %v19744_v4, %v33221_v31 }
0x6fe0   :  { %28334 = vmatmul.mubr.msk.f32.vlgmr.msra.gmra.mrb[8].mxu0 %vm131_vm1, %v33288_v5  ;;  %28341 = vmatmul.mubr.msk.f32.vlgmr.msra.gmra.mrb[8].mxu1 %vm131_vm1, %v33291_v8 }
0x6fe1   :  { %30283 = vmatpush3.bf16.msra.mxu0 %v30822_v7  ;;  %30289 = vmatpush3.bf16.msra.mxu1 %v30822_v7 }
0x6fe2   :  { %30284 = vmatprep.subr.bf16.mxu0 %v30699_v0  ;;  %30290 = vmatprep.subr.bf16.mxu1 %v30699_v0 }
0x6fe3   :  { %28351 = vmatprep.mubr.msk.f32.mxu0 %vm30700_vm0, %v30701_v1  ;;  %28362 = vmatprep.mubr.msk.f32.mxu1 %vm30700_vm0, %v30701_v1 }
0x6fe5   :  { %30286 = vmatpush3.bf16.msra.mxu0 %v30846_v12  ;;  %30292 = vmatpush3.bf16.msra.mxu1 %v30846_v12 }
0x6fe6   :  { %30293 = vmatprep.subr.bf16.mxu0 %v30699_v0  ;;  %30299 = vmatprep.subr.bf16.mxu1 %v30699_v0 }
0x70b3   :  { %v19815_v9 = vpop.f32.mrb[8].mxu0  ;;  %v19889_v53 = vpop.f32.mrb[8].mxu1 }
0x70b4   :  { %v19816_v10 = vadd.f32 %v32938_v44, %v19815_v9  ;;  %v19890_v15 = vadd.f32 %v32938_v44, %v19889_v53  ;;  %v28335_v17 = vpop.f32.mrb[9].mxu0  ;;  %v28342_v18 = vpop.f32.mrb[9].mxu1 }
0x70b6   :  { %v19819_v19 = vmax.f32 %v19816_v10, 0.0  ;;  %v19893_v20 = vmax.f32 %v19890_v15, 0.0 }
0x70b8   :  { %28352 = vmatmul.mubr.msk.f32.vlgmr.msra.gmra.mrb[10].mxu0 %vm282_vm2, %v19819_v19  ;;  %28363 = vmatmul.mubr.msk.f32.vlgmr.msra.gmra.mrb[10].mxu1 %vm282_vm2, %v19893_v20 }
0x70b9   :  { %30295 = vmatpush3.bf16.msra.mxu0 %v30870_v22  ;;  %30301 = vmatpush3.bf16.msra.mxu1 %v30870_v22 }
0x70ba   :  { %30296 = vmatprep.subr.bf16.mxu0 %v30699_v0  ;;  %30302 = vmatprep.subr.bf16.mxu1 %v30699_v0 }
0x70bb   :  { %28373 = vmatprep.mubr.msk.f32.mxu0 %vm30700_vm0, %v30701_v1  ;;  %28384 = vmatprep.mubr.msk.f32.mxu1 %vm30700_vm0, %v30701_v1 }
0x70bd   :  { %30298 = vmatpush3.bf16.msra.mxu0 %v30880_v27  ;;  %30304 = vmatpush3.bf16.msra.mxu1 %v30880_v27 }
0x70be   :  { %30305 = vmatprep.subr.bf16.mxu0 %v30699_v0  ;;  %30311 = vmatprep.subr.bf16.mxu1 %v30699_v0 }
0x718b   :  { %v19963_v48 = vpop.f32.mrb[10].mxu0  ;;  %v20037_v21 = vpop.f32.mrb[10].mxu1 }
0x718c   :  { %v19964_v2 = vadd.f32 %v32959_v36, %v19963_v48  ;;  %v20038_v23 = vadd.f32 %v32959_v36, %v20037_v21  ;;  %v28353_v29 = vpop.f32.mrb[11].mxu0  ;;  %v28364_v30 = vpop.f32.mrb[11].mxu1 }
0x718e   :  { %v19967_v31 = vmax.f32 %v19964_v2, 0.0  ;;  %v20041_v32 = vmax.f32 %v20038_v23, 0.0 }
0x7190   :  { %28374 = vmatmul.mubr.msk.f32.vlgmr.msra.gmra.mrb[12].mxu0 %vm282_vm2, %v19967_v31  ;;  %28385 = vmatmul.mubr.msk.f32.vlgmr.msra.gmra.mrb[12].mxu1 %vm282_vm2, %v20041_v32 }
0x7191   :  { %30307 = vmatpush3.bf16.msra.mxu0 %v30907_v37  ;;  %30313 = vmatpush3.bf16.msra.mxu1 %v30907_v37 }
0x7192   :  { %30308 = vmatprep.subr.bf16.mxu0 %v30699_v0  ;;  %30314 = vmatprep.subr.bf16.mxu1 %v30699_v0 }
0x7193   :  { %28395 = vmatprep.mubr.msk.f32.mxu0 %vm30700_vm0, %v30701_v1  ;;  %28406 = vmatprep.mubr.msk.f32.mxu1 %vm30700_vm0, %v30701_v1 }
0x7195   :  { %30310 = vmatpush3.bf16.msra.mxu0 %v30917_v42  ;;  %30316 = vmatpush3.bf16.msra.mxu1 %v30917_v42 }
0x7196   :  { %30317 = vmatprep.subr.bf16.mxu0 %v30699_v0  ;;  %30320 = vmatprep.subr.bf16.mxu1 %v30699_v0 }
0x7263   :  { %v20111_v14 = vpop.f32.mrb[12].mxu0  ;;  %v20185_v33 = vpop.f32.mrb[12].mxu1 }
0x7264   :  { %v20112_v56 = vadd.f32 %v32980_v62, %v20111_v14  ;;  %v20186_v34 = vadd.f32 %v32980_v62, %v20185_v33  ;;  %v28375_v16 = vpop.f32.mrb[13].mxu0  ;;  %v28386_v35 = vpop.f32.mrb[13].mxu1  ;;  %v33449_v33 = vld [vmem:[#allocation7] ss:$0 sm:$0xff] }
0x7266   :  { %v20115_v39 = vmax.f32 %v20112_v56, 0.0  ;;  %v20189_v40 = vmax.f32 %v20186_v34, 0.0 }
0x7268   :  { %28396 = vmatmul.mubr.msk.f32.vlgmr.msra.gmra.mrb[14].mxu0 %vm282_vm2, %v20115_v39  ;;  %28407 = vmatmul.mubr.msk.f32.vlgmr.msra.gmra.mrb[14].mxu1 %vm282_vm2, %v20189_v40 }
0x7269   :  { %30319 = vmatpush3.bf16.msra.mxu0 %v30820_v6  ;;  %30322 = vmatpush3.bf16.msra.mxu1 %v30820_v6 }
0x726a   :  { %28413 = vmatprep.mubr.msk.f32.mxu0 %vm30700_vm0, %v30701_v1  ;;  %28420 = vmatprep.mubr.msk.f32.mxu1 %vm30700_vm0, %v30701_v1 }
0x726b   :  { %30323 = vmatprep.subr.bf16.mxu0 %v30699_v0  ;;  %30329 = vmatprep.subr.bf16.mxu1 %v30699_v0 }
0x733b   :  { %v20259_v41 = vpop.f32.mrb[14].mxu0  ;;  %v20332_v43 = vpop.f32.mrb[14].mxu1 }
0x733c   :  { %v20260_v24 = vadd.f32 %v32997_v11, %v20259_v41  ;;  %v20333_v25 = vadd.f32 %v32997_v11, %v20332_v43  ;;  %v28397_v26 = vpop.f32.mrb[15].mxu0  ;;  %v28408_v45 = vpop.f32.mrb[15].mxu1 }
0x733e   :  { %v20336_v13 = vmul.f32 %v20260_v24, %v30954_v55  ;;  %v20338_v47 = vmul.f32 %v20333_v25, %v30963_v63  ;;  %v33470_v24 = vld [vmem:[%s33808_s5] ss:$0 sm:$0xff] }
0x7340   :  { %v33358_v49 = vadd.f32 %v20336_v13, %v33288_v5  ;;  %v33361_v50 = vadd.f32 %v20338_v47, %v33291_v8 }
0x7342   :  { %28414 = vmatmul.mubr.msk.f32.vlgmr.msra.gmra.mrb[16].mxu0 %vm131_vm1, %v33358_v49  ;;  %28421 = vmatmul.mubr.msk.f32.vlgmr.msra.gmra.mrb[16].mxu1 %vm131_vm1, %v33361_v50 }
0x7343   :  { %30325 = vmatpush3.bf16.msra.mxu0 %v30822_v7  ;;  %30331 = vmatpush3.bf16.msra.mxu1 %v30822_v7 }
0x7344   :  { %30326 = vmatprep.subr.bf16.mxu0 %v30699_v0  ;;  %30332 = vmatprep.subr.bf16.mxu1 %v30699_v0 }
0x7345   :  { %28431 = vmatprep.mubr.msk.f32.mxu0 %vm30700_vm0, %v30701_v1  ;;  %28442 = vmatprep.mubr.msk.f32.mxu1 %vm30700_vm0, %v30701_v1 }
0x7347   :  { %30328 = vmatpush3.bf16.msra.mxu0 %v30846_v12  ;;  %30334 = vmatpush3.bf16.msra.mxu1 %v30846_v12 }
0x7348   :  { %30335 = vmatprep.subr.bf16.mxu0 %v30699_v0  ;;  %30341 = vmatprep.subr.bf16.mxu1 %v30699_v0 }
0x7415   :  { %v20409_v51 = vpop.f32.mrb[16].mxu0  ;;  %v20483_v52 = vpop.f32.mrb[16].mxu1 }
0x7416   :  { %v20410_v38 = vadd.f32 %v32938_v44, %v20409_v51  ;;  %v20484_v28 = vadd.f32 %v32938_v44, %v20483_v52  ;;  %v28415_v54 = vpop.f32.mrb[17].mxu0  ;;  %v28422_v57 = vpop.f32.mrb[17].mxu1  ;;  %v33491_v52 = vld [vmem:[%s33810_s7] ss:$0 sm:$0xff] }
0x7418   :  { %v20413_v58 = vmax.f32 %v20410_v38, 0.0  ;;  %v20487_v59 = vmax.f32 %v20484_v28, 0.0 }
0x741a   :  { %28432 = vmatmul.mubr.msk.f32.vlgmr.msra.gmra.mrb[18].mxu0 %vm282_vm2, %v20413_v58  ;;  %28443 = vmatmul.mubr.msk.f32.vlgmr.msra.gmra.mrb[18].mxu1 %vm282_vm2, %v20487_v59 }
0x741b   :  { %30337 = vmatpush3.bf16.msra.mxu0 %v30870_v22  ;;  %30343 = vmatpush3.bf16.msra.mxu1 %v30870_v22 }
0x741c   :  { %30338 = vmatprep.subr.bf16.mxu0 %v30699_v0  ;;  %30344 = vmatprep.subr.bf16.mxu1 %v30699_v0 }
0x741d   :  { %28453 = vmatprep.mubr.msk.f32.mxu0 %vm30700_vm0, %v30701_v1  ;;  %28464 = vmatprep.mubr.msk.f32.mxu1 %vm30700_vm0, %v30701_v1 }
0x741f   :  { %30340 = vmatpush3.bf16.msra.mxu0 %v30880_v27  ;;  %30346 = vmatpush3.bf16.msra.mxu1 %v30880_v27 }
0x7420   :  { %30347 = vmatprep.subr.bf16.mxu0 %v30699_v0  ;;  %30353 = vmatprep.subr.bf16.mxu1 %v30699_v0 }
0x74ed   :  { %v20557_v44 = vpop.f32.mrb[18].mxu0  ;;  %v20631_v60 = vpop.f32.mrb[18].mxu1 }
0x74ee   :  { %v20558_v61 = vadd.f32 %v32959_v36, %v20557_v44  ;;  %v20632_v46 = vadd.f32 %v32959_v36, %v20631_v60  ;;  %v28433_v3 = vpop.f32.mrb[19].mxu0  ;;  %v28444_v4 = vpop.f32.mrb[19].mxu1 }
0x74f0   :  { %v20561_v5 = vmax.f32 %v20558_v61, 0.0  ;;  %v20635_v8 = vmax.f32 %v20632_v46, 0.0  ;;  %v33508_v61 = vld [vmem:[%s33812_s9] ss:$0 sm:$0xff]  ;;  %s30703_s9 = smov [#allocation8]  }
0x74f1   :  { %s23912_s22 = sshll.u32 %s30703_s9, 4  ;;  %s23913_s22 = int_to_ptr.vmem [resolvable:$true] %s23912_s22 }
0x74f2   :  { %28454 = vmatmul.mubr.msk.f32.vlgmr.msra.gmra.mrb[20].mxu0 %vm282_vm2, %v20561_v5  ;;  %28465 = vmatmul.mubr.msk.f32.vlgmr.msra.gmra.mrb[20].mxu1 %vm282_vm2, %v20635_v8  ;;  %s30666_s23 = scalar_lea.vmem %s23913_s22, 1280  ;;  %p30671_p11 = scmp.lt.s32.totalorder %s23913_s22, %s23913_s22 }
0x74f3   :  { %30349 = vmatpush3.bf16.msra.mxu0 %v30907_v37  ;;  %30355 = vmatpush3.bf16.msra.mxu1 %v30907_v37  ;;  %p30667_p10 = scmp.ne.s32.totalorder %s23913_s22, %s30666_s23  ;;  %p30672_p12 = scmp.lt.s32.totalorder %s30666_s23, %s30666_s23 }
0x74f4   :  { %30350 = vmatprep.subr.bf16.mxu0 %v30699_v0  ;;  %30356 = vmatprep.subr.bf16.mxu1 %v30699_v0 }
0x74f5   :  { %28475 = vmatprep.mubr.msk.f32.mxu0 %vm30700_vm0, %v30701_v1  ;;  %28486 = vmatprep.mubr.msk.f32.mxu1 %vm30700_vm0, %v30701_v1  ;;  %p30673_p13 = por %p30672_p12, %p30671_p11 }
0x74f7   :  { %30352 = vmatpush3.bf16.msra.mxu0 %v30917_v42  ;;  %30358 = vmatpush3.bf16.msra.mxu1 %v30917_v42  ;;  %p30674_p0 = pnand %p30673_p13, %p30667_p10 }
0x74f8   :  { %30359 = vmatprep.subr.bf16.mxu0 %v30699_v0  ;;  %30362 = vmatprep.subr.bf16.mxu1 %v30699_v0 }
0x75c5   :  { %v20705_v36 = vpop.f32.mrb[20].mxu0  ;;  %v20779_v9 = vpop.f32.mrb[20].mxu1 }
0x75c6   :  { %v20706_v53 = vadd.f32 %v32980_v62, %v20705_v36  ;;  %v20780_v10 = vadd.f32 %v32980_v62, %v20779_v9  ;;  %v28455_v15 = vpop.f32.mrb[21].mxu0  ;;  %v28466_v17 = vpop.f32.mrb[21].mxu1 }
0x75c8   :  { %v20709_v18 = vmax.f32 %v20706_v53, 0.0  ;;  %v20783_v19 = vmax.f32 %v20780_v10, 0.0 }
0x75ca   :  { %28476 = vmatmul.mubr.msk.f32.vlgmr.msra.gmra.mrb[22].mxu0 %vm282_vm2, %v20709_v18  ;;  %28487 = vmatmul.mubr.msk.f32.vlgmr.msra.gmra.mrb[22].mxu1 %vm282_vm2, %v20783_v19 }
0x75cb   :  { %30361 = vmatpush3.bf16.msra.mxu0 %v30820_v6  ;;  %30364 = vmatpush3.bf16.msra.mxu1 %v30820_v6 }
0x75cc   :  { %28493 = vmatprep.mubr.msk.f32.mxu0 %vm30700_vm0, %v30701_v1  ;;  %28500 = vmatprep.mubr.msk.f32.mxu1 %vm30700_vm0, %v30701_v1 }
0x75cd   :  { %30365 = vmatprep.subr.bf16.mxu0 %v30699_v0  ;;  %30371 = vmatprep.subr.bf16.mxu1 %v30699_v0 }
0x769d   :  { %v20853_v62 = vpop.f32.mrb[22].mxu0  ;;  %v20926_v20 = vpop.f32.mrb[22].mxu1 }
0x769e   :  { %v20854_v48 = vadd.f32 %v32997_v11, %v20853_v62  ;;  %v20927_v21 = vadd.f32 %v32997_v11, %v20926_v20  ;;  %v28477_v2 = vpop.f32.mrb[23].mxu0  ;;  %v28488_v23 = vpop.f32.mrb[23].mxu1 }
0x76a0   :  { %v20930_v29 = vmul.f32 %v20854_v48, %v30954_v55  ;;  %v20932_v30 = vmul.f32 %v20927_v21, %v30963_v63 }
0x76a2   :  { %v33428_v31 = vadd.f32 %v20930_v29, %v33358_v49  ;;  %v33431_v32 = vadd.f32 %v20932_v30, %v33361_v50 }
0x76a4   :  { %28494 = vmatmul.mubr.msk.f32.vlgmr.msra.gmra.mrb[24].mxu0 %vm131_vm1, %v33428_v31  ;;  %28501 = vmatmul.mubr.msk.f32.vlgmr.msra.gmra.mrb[24].mxu1 %vm131_vm1, %v33431_v32 }
0x76a5   :  { %30367 = vmatpush3.bf16.msra.mxu0 %v30822_v7  ;;  %30373 = vmatpush3.bf16.msra.mxu1 %v30822_v7 }
0x76a6   :  { %30368 = vmatprep.subr.bf16.mxu0 %v30699_v0  ;;  %30374 = vmatprep.subr.bf16.mxu1 %v30699_v0 }
0x76a7   :  { %28511 = vmatprep.mubr.msk.f32.mxu0 %vm30700_vm0, %v30701_v1  ;;  %28522 = vmatprep.mubr.msk.f32.mxu1 %vm30700_vm0, %v30701_v1 }
0x76a9   :  { %30370 = vmatpush3.bf16.msra.mxu0 %v30846_v12  ;;  %30376 = vmatpush3.bf16.msra.mxu1 %v30846_v12 }
0x76aa   :  { %30377 = vmatprep.subr.bf16.mxu0 %v30699_v0  ;;  %30383 = vmatprep.subr.bf16.mxu1 %v30699_v0 }
0x7777   :  { %v21003_v11 = vpop.f32.mrb[24].mxu0  ;;  %v21077_v14 = vpop.f32.mrb[24].mxu1 }
0x7778   :  { %v21004_v56 = vadd.f32 %v33449_v33, %v21003_v11  ;;  %v21078_v34 = vadd.f32 %v33449_v33, %v21077_v14  ;;  %v28495_v16 = vpop.f32.mrb[25].mxu0  ;;  %v28502_v35 = vpop.f32.mrb[25].mxu1 }
0x777a   :  { %v21007_v39 = vmax.f32 %v21004_v56, 0.0  ;;  %v21081_v40 = vmax.f32 %v21078_v34, 0.0 }
0x777c   :  { %28512 = vmatmul.mubr.msk.f32.vlgmr.msra.gmra.mrb[26].mxu0 %vm282_vm2, %v21007_v39  ;;  %28523 = vmatmul.mubr.msk.f32.vlgmr.msra.gmra.mrb[26].mxu1 %vm282_vm2, %v21081_v40 }
0x777d   :  { %30379 = vmatpush3.bf16.msra.mxu0 %v30870_v22  ;;  %30385 = vmatpush3.bf16.msra.mxu1 %v30870_v22 }
0x777e   :  { %30380 = vmatprep.subr.bf16.mxu0 %v30699_v0  ;;  %30386 = vmatprep.subr.bf16.mxu1 %v30699_v0 }
0x777f   :  { %28533 = vmatprep.mubr.msk.f32.mxu0 %vm30700_vm0, %v30701_v1  ;;  %28544 = vmatprep.mubr.msk.f32.mxu1 %vm30700_vm0, %v30701_v1 }
0x7781   :  { %30382 = vmatpush3.bf16.msra.mxu0 %v30880_v27  ;;  %30388 = vmatpush3.bf16.msra.mxu1 %v30880_v27 }
0x7782   :  { %30389 = vmatprep.subr.bf16.mxu0 %v30699_v0  ;;  %30395 = vmatprep.subr.bf16.mxu1 %v30699_v0 }
0x784f   :  { %v21151_v41 = vpop.f32.mrb[26].mxu0  ;;  %v21225_v43 = vpop.f32.mrb[26].mxu1 }
0x7850   :  { %v21152_v25 = vadd.f32 %v33470_v24, %v21151_v41  ;;  %v21226_v26 = vadd.f32 %v33470_v24, %v21225_v43  ;;  %v28513_v45 = vpop.f32.mrb[27].mxu0  ;;  %v28524_v13 = vpop.f32.mrb[27].mxu1 }
0x7852   :  { %v21155_v47 = vmax.f32 %v21152_v25, 0.0  ;;  %v21229_v49 = vmax.f32 %v21226_v26, 0.0 }
0x7854   :  { %28534 = vmatmul.mubr.msk.f32.vlgmr.msra.gmra.mrb[28].mxu0 %vm282_vm2, %v21155_v47  ;;  %28545 = vmatmul.mubr.msk.f32.vlgmr.msra.gmra.mrb[28].mxu1 %vm282_vm2, %v21229_v49 }
0x7855   :  { %30391 = vmatpush3.bf16.msra.mxu0 %v30907_v37  ;;  %30397 = vmatpush3.bf16.msra.mxu1 %v30907_v37 }
0x7856   :  { %30392 = vmatprep.subr.bf16.mxu0 %v30699_v0  ;;  %30398 = vmatprep.subr.bf16.mxu1 %v30699_v0 }
0x7857   :  { %28555 = vmatprep.mubr.msk.f32.mxu0 %vm30700_vm0, %v30701_v1  ;;  %28566 = vmatprep.mubr.msk.f32.mxu1 %vm30700_vm0, %v30701_v1 }
0x7859   :  { %30394 = vmatpush3.bf16.msra.mxu0 %v30917_v42  ;;  %30400 = vmatpush3.bf16.msra.mxu1 %v30917_v42 }
0x785a   :  { %30401 = vmatprep.subr.bf16.mxu0 %v30699_v0  ;;  %30404 = vmatprep.subr.bf16.mxu1 %v30699_v0 }
0x7927   :  { %v21299_v50 = vpop.f32.mrb[28].mxu0  ;;  %v21373_v51 = vpop.f32.mrb[28].mxu1 }
0x7928   :  { %v21300_v38 = vadd.f32 %v33491_v52, %v21299_v50  ;;  %v21374_v28 = vadd.f32 %v33491_v52, %v21373_v51  ;;  %v28535_v54 = vpop.f32.mrb[29].mxu0  ;;  %v28546_v57 = vpop.f32.mrb[29].mxu1 }
0x792a   :  { %v21303_v58 = vmax.f32 %v21300_v38, 0.0  ;;  %v21377_v59 = vmax.f32 %v21374_v28, 0.0 }
0x792c   :  { %28556 = vmatmul.mubr.msk.f32.vlgmr.msra.gmra.mrb[30].mxu0 %vm282_vm2, %v21303_v58  ;;  %28567 = vmatmul.mubr.msk.f32.vlgmr.msra.gmra.mrb[30].mxu1 %vm282_vm2, %v21377_v59 }
0x792d   :  { %30403 = vmatpush3.bf16.msra.mxu0 %v30820_v6  ;;  %30406 = vmatpush3.bf16.msra.mxu1 %v30820_v6 }
0x792e   :  { %28573 = vmatprep.mubr.msk.f32.mxu0 %vm30700_vm0, %v30701_v1  ;;  %28580 = vmatprep.mubr.msk.f32.mxu1 %vm30700_vm0, %v30701_v1 }
0x792f   :  { %30407 = vmatprep.subr.bf16.mxu0 %v30699_v0  ;;  %30413 = vmatprep.subr.bf16.mxu1 %v30699_v0 }
0x79ff   :  { %v21447_v44 = vpop.f32.mrb[30].mxu0  ;;  %v21520_v60 = vpop.f32.mrb[30].mxu1 }
0x7a00   :  { %v21448_v46 = vadd.f32 %v33508_v61, %v21447_v44  ;;  %v21521_v3 = vadd.f32 %v33508_v61, %v21520_v60  ;;  %v28557_v4 = vpop.f32.mrb[31].mxu0  ;;  %v28568_v5 = vpop.f32.mrb[31].mxu1 }
0x7a02   :  { %v21524_v8 = vmul.f32 %v21448_v46, %v30954_v55  ;;  %v21526_v36 = vmul.f32 %v21521_v3, %v30963_v63 }
0x7a04   :  { %v33515_v9 = vadd.f32 %v21524_v8, %v33428_v31  ;;  %v33518_v53 = vadd.f32 %v21526_v36, %v33431_v32 }
0x7a06   :  { %28574 = vmatmul.mubr.msk.f32.vlgmr.msra.gmra.mrb[32].mxu0 %vm131_vm1, %v33515_v9  ;;  %28581 = vmatmul.mubr.msk.f32.vlgmr.msra.gmra.mrb[32].mxu1 %vm131_vm1, %v33518_v53 }
0x7a07   :  { %30409 = vmatpush3.bf16.msra.mxu0 %v30822_v7  ;;  %30415 = vmatpush3.bf16.msra.mxu1 %v30822_v7 }
0x7a08   :  { %30410 = vmatprep.subr.bf16.mxu0 %v30699_v0  ;;  %30416 = vmatprep.subr.bf16.mxu1 %v30699_v0 }
0x7a09   :  { %28591 = vmatprep.mubr.msk.f32.mxu0 %vm30700_vm0, %v30701_v1  ;;  %28602 = vmatprep.mubr.msk.f32.mxu1 %vm30700_vm0, %v30701_v1 }
0x7a0b   :  { %30412 = vmatpush3.bf16.msra.mxu0 %v30846_v12  ;;  %30418 = vmatpush3.bf16.msra.mxu1 %v30846_v12 }
0x7a0c   :  { %30419 = vmatprep.subr.bf16.mxu0 %v30699_v0  ;;  %30425 = vmatprep.subr.bf16.mxu1 %v30699_v0 }
0x7ad9   :  { %v21597_v10 = vpop.f32.mrb[32].mxu0  ;;  %v21671_v15 = vpop.f32.mrb[32].mxu1 }
0x7ada   :  { %v21598_v17 = vadd.f32 %v33449_v33, %v21597_v10  ;;  %v21672_v18 = vadd.f32 %v33449_v33, %v21671_v15  ;;  %v28575_v19 = vpop.f32.mrb[33].mxu0  ;;  %v28582_v62 = vpop.f32.mrb[33].mxu1 }
0x7adc   :  { %v21601_v20 = vmax.f32 %v21598_v17, 0.0  ;;  %v21675_v48 = vmax.f32 %v21672_v18, 0.0 }
0x7ade   :  { %28592 = vmatmul.mubr.msk.f32.vlgmr.msra.gmra.mrb[34].mxu0 %vm282_vm2, %v21601_v20  ;;  %28603 = vmatmul.mubr.msk.f32.vlgmr.msra.gmra.mrb[34].mxu1 %vm282_vm2, %v21675_v48 }
0x7adf   :  { %30421 = vmatpush3.bf16.msra.mxu0 %v30870_v22  ;;  %30427 = vmatpush3.bf16.msra.mxu1 %v30870_v22 }
0x7ae0   :  { %30422 = vmatprep.subr.bf16.mxu0 %v30699_v0  ;;  %30428 = vmatprep.subr.bf16.mxu1 %v30699_v0 }
0x7ae1   :  { %28613 = vmatprep.mubr.msk.f32.mxu0 %vm30700_vm0, %v30701_v1  ;;  %28624 = vmatprep.mubr.msk.f32.mxu1 %vm30700_vm0, %v30701_v1 }
0x7ae3   :  { %30424 = vmatpush3.bf16.msra.mxu0 %v30880_v27  ;;  %30430 = vmatpush3.bf16.msra.mxu1 %v30880_v27 }
0x7ae4   :  { %30431 = vmatprep.subr.bf16.mxu0 %v30699_v0  ;;  %30437 = vmatprep.subr.bf16.mxu1 %v30699_v0 }
0x7bb1   :  { %v21745_v21 = vpop.f32.mrb[34].mxu0  ;;  %v21819_v2 = vpop.f32.mrb[34].mxu1 }
0x7bb2   :  { %v21746_v23 = vadd.f32 %v33470_v24, %v21745_v21  ;;  %v21820_v29 = vadd.f32 %v33470_v24, %v21819_v2  ;;  %v28593_v30 = vpop.f32.mrb[35].mxu0  ;;  %v28604_v31 = vpop.f32.mrb[35].mxu1 }
0x7bb4   :  { %v21749_v32 = vmax.f32 %v21746_v23, 0.0  ;;  %v21823_v11 = vmax.f32 %v21820_v29, 0.0 }
0x7bb6   :  { %28614 = vmatmul.mubr.msk.f32.vlgmr.msra.gmra.mrb[36].mxu0 %vm282_vm2, %v21749_v32  ;;  %28625 = vmatmul.mubr.msk.f32.vlgmr.msra.gmra.mrb[36].mxu1 %vm282_vm2, %v21823_v11 }
0x7bb7   :  { %30433 = vmatpush3.bf16.msra.mxu0 %v30907_v37  ;;  %30439 = vmatpush3.bf16.msra.mxu1 %v30907_v37 }
0x7bb8   :  { %30434 = vmatprep.subr.bf16.mxu0 %v30699_v0  ;;  %30440 = vmatprep.subr.bf16.mxu1 %v30699_v0 }
0x7bb9   :  { %28635 = vmatprep.mubr.msk.f32.mxu0 %vm30700_vm0, %v30701_v1  ;;  %28646 = vmatprep.mubr.msk.f32.mxu1 %vm30700_vm0, %v30701_v1 }
0x7bbb   :  { %30436 = vmatpush3.bf16.msra.mxu0 %v30917_v42  ;;  %30442 = vmatpush3.bf16.msra.mxu1 %v30917_v42 }
0x7bbc   :  { %30443 = vmatprep.subr.bf16.mxu0 %v30699_v0  ;;  %30446 = vmatprep.subr.bf16.mxu1 %v30699_v0 }
0x7c89   :  { %v21893_v14 = vpop.f32.mrb[36].mxu0  ;;  %v21967_v56 = vpop.f32.mrb[36].mxu1 }
0x7c8a   :  { %v21894_v34 = vadd.f32 %v33491_v52, %v21893_v14  ;;  %v21968_v16 = vadd.f32 %v33491_v52, %v21967_v56  ;;  %v28615_v35 = vpop.f32.mrb[37].mxu0  ;;  %v28626_v39 = vpop.f32.mrb[37].mxu1 }
0x7c8c   :  { %v21897_v40 = vmax.f32 %v21894_v34, 0.0  ;;  %v21971_v41 = vmax.f32 %v21968_v16, 0.0 }
0x7c8e   :  { %28636 = vmatmul.mubr.msk.f32.vlgmr.msra.gmra.mrb[38].mxu0 %vm282_vm2, %v21897_v40  ;;  %28647 = vmatmul.mubr.msk.f32.vlgmr.msra.gmra.mrb[38].mxu1 %vm282_vm2, %v21971_v41 }
0x7c8f   :  { %30445 = vmatpush3.bf16.msra.mxu0 %v30820_v6  ;;  %30448 = vmatpush3.bf16.msra.mxu1 %v30820_v6 }
0x7c90   :  { %28653 = vmatprep.mubr.msk.f32.mxu0 %vm30700_vm0, %v30701_v1  ;;  %28660 = vmatprep.mubr.msk.f32.mxu1 %vm30700_vm0, %v30701_v1 }
0x7c91   :  { %30449 = vmatprep.subr.bf16.mxu0 %v30699_v0  ;;  %30455 = vmatprep.subr.bf16.mxu1 %v30699_v0 }
0x7d61   :  { %v22041_v43 = vpop.f32.mrb[38].mxu0  ;;  %v22114_v25 = vpop.f32.mrb[38].mxu1 }
0x7d62   :  { %v22042_v26 = vadd.f32 %v33508_v61, %v22041_v43  ;;  %v22115_v45 = vadd.f32 %v33508_v61, %v22114_v25  ;;  %v28637_v13 = vpop.f32.mrb[39].mxu0  ;;  %v28648_v47 = vpop.f32.mrb[39].mxu1 }
0x7d64   :  { %v22118_v49 = vmul.f32 %v22042_v26, %v30954_v55  ;;  %v22120_v50 = vmul.f32 %v22115_v45, %v30963_v63 }
0x7d66   :  { %v33585_v51 = vadd.f32 %v22118_v49, %v33515_v9  ;;  %v33588_v38 = vadd.f32 %v22120_v50, %v33518_v53 }
0x7d68   :  { %28654 = vmatmul.mubr.msk.f32.vlgmr.msra.gmra.mrb[40].mxu0 %vm131_vm1, %v33585_v51  ;;  %28661 = vmatmul.mubr.msk.f32.vlgmr.msra.gmra.mrb[40].mxu1 %vm131_vm1, %v33588_v38 }
0x7d69   :  { %30451 = vmatpush3.bf16.msra.mxu0 %v30822_v7  ;;  %30457 = vmatpush3.bf16.msra.mxu1 %v30822_v7 }
0x7d6a   :  { %30452 = vmatprep.subr.bf16.mxu0 %v30699_v0  ;;  %30458 = vmatprep.subr.bf16.mxu1 %v30699_v0 }
0x7d6b   :  { %28671 = vmatprep.mubr.msk.f32.mxu0 %vm30700_vm0, %v30701_v1  ;;  %28682 = vmatprep.mubr.msk.f32.mxu1 %vm30700_vm0, %v30701_v1 }
0x7d6d   :  { %30454 = vmatpush3.bf16.msra.mxu0 %v30846_v12  ;;  %30460 = vmatpush3.bf16.msra.mxu1 %v30846_v12 }
0x7d6e   :  { %30461 = vmatprep.subr.bf16.mxu0 %v30699_v0  ;;  %30467 = vmatprep.subr.bf16.mxu1 %v30699_v0 }
0x7e3b   :  { %v22191_v28 = vpop.f32.mrb[40].mxu0  ;;  %v22265_v54 = vpop.f32.mrb[40].mxu1 }
0x7e3c   :  { %v22192_v57 = vadd.f32 %v33449_v33, %v22191_v28  ;;  %v22266_v58 = vadd.f32 %v33449_v33, %v22265_v54  ;;  %v28655_v59 = vpop.f32.mrb[41].mxu0  ;;  %v28662_v44 = vpop.f32.mrb[41].mxu1 }
0x7e3e   :  { %v22195_v60 = vmax.f32 %v22192_v57, 0.0  ;;  %v22269_v46 = vmax.f32 %v22266_v58, 0.0 }
0x7e40   :  { %28672 = vmatmul.mubr.msk.f32.vlgmr.msra.gmra.mrb[42].mxu0 %vm282_vm2, %v22195_v60  ;;  %28683 = vmatmul.mubr.msk.f32.vlgmr.msra.gmra.mrb[42].mxu1 %vm282_vm2, %v22269_v46 }
0x7e41   :  { %30463 = vmatpush3.bf16.msra.mxu0 %v30870_v22  ;;  %30469 = vmatpush3.bf16.msra.mxu1 %v30870_v22 }
0x7e42   :  { %30464 = vmatprep.subr.bf16.mxu0 %v30699_v0  ;;  %30470 = vmatprep.subr.bf16.mxu1 %v30699_v0 }
0x7e43   :  { %28693 = vmatprep.mubr.msk.f32.mxu0 %vm30700_vm0, %v30701_v1  ;;  %28704 = vmatprep.mubr.msk.f32.mxu1 %vm30700_vm0, %v30701_v1 }
0x7e45   :  { %30466 = vmatpush3.bf16.msra.mxu0 %v30880_v27  ;;  %30472 = vmatpush3.bf16.msra.mxu1 %v30880_v27 }
0x7e46   :  { %30473 = vmatprep.subr.bf16.mxu0 %v30699_v0  ;;  %30479 = vmatprep.subr.bf16.mxu1 %v30699_v0 }
0x7f13   :  { %v22339_v3 = vpop.f32.mrb[42].mxu0  ;;  %v22413_v4 = vpop.f32.mrb[42].mxu1 }
0x7f14   :  { %v22340_v5 = vadd.f32 %v33470_v24, %v22339_v3  ;;  %v22414_v8 = vadd.f32 %v33470_v24, %v22413_v4  ;;  %v28673_v36 = vpop.f32.mrb[43].mxu0  ;;  %v28684_v9 = vpop.f32.mrb[43].mxu1 }
0x7f16   :  { %v22343_v53 = vmax.f32 %v22340_v5, 0.0  ;;  %v22417_v10 = vmax.f32 %v22414_v8, 0.0 }
0x7f18   :  { %28694 = vmatmul.mubr.msk.f32.vlgmr.msra.gmra.mrb[44].mxu0 %vm282_vm2, %v22343_v53  ;;  %28705 = vmatmul.mubr.msk.f32.vlgmr.msra.gmra.mrb[44].mxu1 %vm282_vm2, %v22417_v10 }
0x7f19   :  { %30475 = vmatpush3.bf16.msra.mxu0 %v30907_v37  ;;  %30481 = vmatpush3.bf16.msra.mxu1 %v30907_v37 }
0x7f1a   :  { %30476 = vmatprep.subr.bf16.mxu0 %v30699_v0  ;;  %30482 = vmatprep.subr.bf16.mxu1 %v30699_v0 }
0x7f1b   :  { %28715 = vmatprep.mubr.msk.f32.mxu0 %vm30700_vm0, %v30701_v1  ;;  %28726 = vmatprep.mubr.msk.f32.mxu1 %vm30700_vm0, %v30701_v1 }
0x7f1d   :  { %30478 = vmatpush3.bf16.msra.mxu0 %v30917_v42  ;;  %30484 = vmatpush3.bf16.msra.mxu1 %v30917_v42 }
0x7f1e   :  { %30485 = vmatprep.subr.bf16.mxu0 %v30699_v0  ;;  %30488 = vmatprep.subr.bf16.mxu1 %v30699_v0 }
0x7feb   :  { %v22487_v15 = vpop.f32.mrb[44].mxu0  ;;  %v22561_v17 = vpop.f32.mrb[44].mxu1 }
0x7fec   :  { %v22488_v18 = vadd.f32 %v33491_v52, %v22487_v15  ;;  %v22562_v19 = vadd.f32 %v33491_v52, %v22561_v17  ;;  %v28695_v62 = vpop.f32.mrb[45].mxu0  ;;  %v28706_v20 = vpop.f32.mrb[45].mxu1 }
0x7fee   :  { %v22491_v48 = vmax.f32 %v22488_v18, 0.0  ;;  %v22565_v21 = vmax.f32 %v22562_v19, 0.0 }
0x7ff0   :  { %28716 = vmatmul.mubr.msk.f32.vlgmr.msra.gmra.mrb[46].mxu0 %vm282_vm2, %v22491_v48  ;;  %28727 = vmatmul.mubr.msk.f32.vlgmr.msra.gmra.mrb[46].mxu1 %vm282_vm2, %v22565_v21 }
0x7ff1   :  { %30487 = vmatpush3.bf16.msra.mxu0 %v30820_v6  ;;  %30490 = vmatpush3.bf16.msra.mxu1 %v30820_v6 }
0x7ff2   :  { %28733 = vmatprep.mubr.msk.f32.mxu0 %vm30700_vm0, %v30701_v1  ;;  %28740 = vmatprep.mubr.msk.f32.mxu1 %vm30700_vm0, %v30701_v1 }
0x7ff3   :  { %30491 = vmatprep.subr.bf16.mxu0 %v30699_v0  ;;  %30497 = vmatprep.subr.bf16.mxu1 %v30699_v0 }
0x80c3   :  { %v22635_v2 = vpop.f32.mrb[46].mxu0  ;;  %v22708_v23 = vpop.f32.mrb[46].mxu1 }
0x80c4   :  { %v22636_v29 = vadd.f32 %v33508_v61, %v22635_v2  ;;  %v22709_v30 = vadd.f32 %v33508_v61, %v22708_v23  ;;  %v28717_v31 = vpop.f32.mrb[47].mxu0  ;;  %v28728_v32 = vpop.f32.mrb[47].mxu1 }
0x80c6   :  { %v22712_v11 = vmul.f32 %v22636_v29, %v30954_v55  ;;  %v22714_v14 = vmul.f32 %v22709_v30, %v30963_v63 }
0x80c8   :  { %v33655_v56 = vadd.f32 %v22712_v11, %v33585_v51  ;;  %v33658_v34 = vadd.f32 %v22714_v14, %v33588_v38 }
0x80ca   :  { %28734 = vmatmul.mubr.msk.f32.vlgmr.msra.gmra.mrb[48].mxu0 %vm131_vm1, %v33655_v56  ;;  %28741 = vmatmul.mubr.msk.f32.vlgmr.msra.gmra.mrb[48].mxu1 %vm131_vm1, %v33658_v34 }
0x80cb   :  { %30493 = vmatpush3.bf16.msra.mxu0 %v30822_v7  ;;  %30499 = vmatpush3.bf16.msra.mxu1 %v30822_v7 }
0x80cc   :  { %30494 = vmatprep.subr.bf16.mxu0 %v30699_v0  ;;  %30500 = vmatprep.subr.bf16.mxu1 %v30699_v0 }
0x80cd   :  { %28751 = vmatprep.mubr.msk.f32.mxu0 %vm30700_vm0, %v30701_v1  ;;  %28762 = vmatprep.mubr.msk.f32.mxu1 %vm30700_vm0, %v30701_v1 }
0x80cf   :  { %30496 = vmatpush3.bf16.msra.mxu0 %v30846_v12  ;;  %30502 = vmatpush3.bf16.msra.mxu1 %v30846_v12 }
0x80d0   :  { %30503 = vmatprep.subr.bf16.mxu0 %v30699_v0  ;;  %30509 = vmatprep.subr.bf16.mxu1 %v30699_v0 }
0x819d   :  { %v22785_v16 = vpop.f32.mrb[48].mxu0  ;;  %v22859_v35 = vpop.f32.mrb[48].mxu1 }
0x819e   :  { %v22786_v39 = vadd.f32 %v33449_v33, %v22785_v16  ;;  %v22860_v40 = vadd.f32 %v33449_v33, %v22859_v35  ;;  %v28735_v41 = vpop.f32.mrb[49].mxu0  ;;  %v28742_v43 = vpop.f32.mrb[49].mxu1 }
0x81a0   :  { %v22789_v25 = vmax.f32 %v22786_v39, 0.0  ;;  %v22863_v26 = vmax.f32 %v22860_v40, 0.0 }
0x81a2   :  { %28752 = vmatmul.mubr.msk.f32.vlgmr.msra.gmra.mrb[50].mxu0 %vm282_vm2, %v22789_v25  ;;  %28763 = vmatmul.mubr.msk.f32.vlgmr.msra.gmra.mrb[50].mxu1 %vm282_vm2, %v22863_v26 }
0x81a3   :  { %30505 = vmatpush3.bf16.msra.mxu0 %v30870_v22  ;;  %30511 = vmatpush3.bf16.msra.mxu1 %v30870_v22 }
0x81a4   :  { %30506 = vmatprep.subr.bf16.mxu0 %v30699_v0  ;;  %30512 = vmatprep.subr.bf16.mxu1 %v30699_v0 }
0x81a5   :  { %28773 = vmatprep.mubr.msk.f32.mxu0 %vm30700_vm0, %v30701_v1  ;;  %28784 = vmatprep.mubr.msk.f32.mxu1 %vm30700_vm0, %v30701_v1 }
0x81a7   :  { %30508 = vmatpush3.bf16.msra.mxu0 %v30880_v27  ;;  %30514 = vmatpush3.bf16.msra.mxu1 %v30880_v27 }
0x81a8   :  { %30515 = vmatprep.subr.bf16.mxu0 %v30699_v0  ;;  %30521 = vmatprep.subr.bf16.mxu1 %v30699_v0 }
0x8275   :  { %v22933_v45 = vpop.f32.mrb[50].mxu0  ;;  %v23007_v13 = vpop.f32.mrb[50].mxu1 }
0x8276   :  { %v22934_v47 = vadd.f32 %v33470_v24, %v22933_v45  ;;  %v23008_v49 = vadd.f32 %v33470_v24, %v23007_v13  ;;  %v28753_v50 = vpop.f32.mrb[51].mxu0  ;;  %v28764_v51 = vpop.f32.mrb[51].mxu1 }
0x8278   :  { %v22937_v38 = vmax.f32 %v22934_v47, 0.0  ;;  %v23011_v28 = vmax.f32 %v23008_v49, 0.0 }
0x827a   :  { %28774 = vmatmul.mubr.msk.f32.vlgmr.msra.gmra.mrb[52].mxu0 %vm282_vm2, %v22937_v38  ;;  %28785 = vmatmul.mubr.msk.f32.vlgmr.msra.gmra.mrb[52].mxu1 %vm282_vm2, %v23011_v28 }
0x827b   :  { %30517 = vmatpush3.bf16.msra.mxu0 %v30907_v37  ;;  %30523 = vmatpush3.bf16.msra.mxu1 %v30907_v37 }
0x827c   :  { %30518 = vmatprep.subr.bf16.mxu0 %v30699_v0  ;;  %30524 = vmatprep.subr.bf16.mxu1 %v30699_v0 }
0x827d   :  { %28795 = vmatprep.mubr.msk.f32.mxu0 %vm30700_vm0, %v30701_v1  ;;  %28806 = vmatprep.mubr.msk.f32.mxu1 %vm30700_vm0, %v30701_v1 }
0x827f   :  { %30520 = vmatpush3.bf16.msra.mxu0 %v30917_v42  ;;  %30526 = vmatpush3.bf16.msra.mxu1 %v30917_v42 }
0x8280   :  { %30527 = vmatprep.subr.bf16.mxu0 %v30699_v0  ;;  %30530 = vmatprep.subr.bf16.mxu1 %v30699_v0 }
0x834d   :  { %v23081_v54 = vpop.f32.mrb[52].mxu0  ;;  %v23155_v57 = vpop.f32.mrb[52].mxu1 }
0x834e   :  { %v23082_v58 = vadd.f32 %v33491_v52, %v23081_v54  ;;  %v23156_v59 = vadd.f32 %v33491_v52, %v23155_v57  ;;  %v28775_v44 = vpop.f32.mrb[53].mxu0  ;;  %v28786_v60 = vpop.f32.mrb[53].mxu1 }
0x8350   :  { %v23085_v46 = vmax.f32 %v23082_v58, 0.0  ;;  %v23159_v3 = vmax.f32 %v23156_v59, 0.0 }
0x8352   :  { %28796 = vmatmul.mubr.msk.f32.vlgmr.msra.gmra.mrb[54].mxu0 %vm282_vm2, %v23085_v46  ;;  %28807 = vmatmul.mubr.msk.f32.vlgmr.msra.gmra.mrb[54].mxu1 %vm282_vm2, %v23159_v3 }
0x8353   :  { %30529 = vmatpush3.bf16.msra.mxu0 %v30820_v6  ;;  %30532 = vmatpush3.bf16.msra.mxu1 %v30820_v6 }
0x8354   :  { %28813 = vmatprep.mubr.msk.f32.mxu0 %vm30700_vm0, %v30701_v1  ;;  %28820 = vmatprep.mubr.msk.f32.mxu1 %vm30700_vm0, %v30701_v1 }
0x8355   :  { %30533 = vmatprep.subr.bf16.mxu0 %v30699_v0  ;;  %30539 = vmatprep.subr.bf16.mxu1 %v30699_v0 }
0x8425   :  { %v23229_v4 = vpop.f32.mrb[54].mxu0  ;;  %v23302_v5 = vpop.f32.mrb[54].mxu1 }
0x8426   :  { %v23230_v8 = vadd.f32 %v33508_v61, %v23229_v4  ;;  %v23303_v36 = vadd.f32 %v33508_v61, %v23302_v5  ;;  %v28797_v9 = vpop.f32.mrb[55].mxu0  ;;  %v28808_v53 = vpop.f32.mrb[55].mxu1 }
0x8428   :  { %v23306_v6 = vmul.f32 %v23230_v8, %v30954_v55  ;;  %v23308_v10 = vmul.f32 %v23303_v36, %v30963_v63 }
0x842a   :  { %v33725_v15 = vadd.f32 %v23306_v6, %v33655_v56  ;;  %v33728_v17 = vadd.f32 %v23308_v10, %v33658_v34 }
0x842c   :  { %28814 = vmatmul.mubr.msk.f32.vlgmr.msra.gmra.mrb[56].mxu0 %vm131_vm1, %v33725_v15  ;;  %28821 = vmatmul.mubr.msk.f32.vlgmr.msra.gmra.mrb[56].mxu1 %vm131_vm1, %v33728_v17 }
0x842d   :  { %30535 = vmatpush3.bf16.msra.mxu0 %v30822_v7  ;;  %30541 = vmatpush3.bf16.msra.mxu1 %v30822_v7 }
0x842e   :  { %30536 = vmatprep.subr.bf16.mxu0 %v30699_v0  ;;  %30542 = vmatprep.subr.bf16.mxu1 %v30699_v0 }
0x842f   :  { %28831 = vmatprep.mubr.msk.f32.mxu0 %vm30700_vm0, %v30701_v1  ;;  %28842 = vmatprep.mubr.msk.f32.mxu1 %vm30700_vm0, %v30701_v1 }
0x8431   :  { %30538 = vmatpush3.bf16.msra.mxu0 %v30846_v12  ;;  %30544 = vmatpush3.bf16.msra.mxu1 %v30846_v12 }
0x8432   :  { %30545 = vmatprep.subr.bf16.mxu0 %v30699_v0  ;;  %30551 = vmatprep.subr.bf16.mxu1 %v30699_v0 }
0x84ff   :  { %v23379_v18 = vpop.f32.mrb[56].mxu0  ;;  %v23453_v7 = vpop.f32.mrb[56].mxu1 }
0x8500   :  { %v23380_v19 = vadd.f32 %v33449_v33, %v23379_v18  ;;  %v23454_v62 = vadd.f32 %v33449_v33, %v23453_v7  ;;  %v28815_v20 = vpop.f32.mrb[57].mxu0  ;;  %v28822_v48 = vpop.f32.mrb[57].mxu1 }
0x8502   :  { %v23383_v21 = vmax.f32 %v23380_v19, 0.0  ;;  %v23457_v2 = vmax.f32 %v23454_v62, 0.0 }
0x8504   :  { %28832 = vmatmul.mubr.msk.f32.vlgmr.msra.gmra.mrb[58].mxu0 %vm282_vm2, %v23383_v21  ;;  %28843 = vmatmul.mubr.msk.f32.vlgmr.msra.gmra.mrb[58].mxu1 %vm282_vm2, %v23457_v2 }
0x8505   :  { %30547 = vmatpush3.bf16.msra.mxu0 %v30870_v22  ;;  %30553 = vmatpush3.bf16.msra.mxu1 %v30870_v22 }
0x8506   :  { %30548 = vmatprep.subr.bf16.mxu0 %v30699_v0  ;;  %30554 = vmatprep.subr.bf16.mxu1 %v30699_v0 }
0x8507   :  { %28853 = vmatprep.mubr.msk.f32.mxu0 %vm30700_vm0, %v30701_v1  ;;  %28864 = vmatprep.mubr.msk.f32.mxu1 %vm30700_vm0, %v30701_v1 }
0x8509   :  { %30550 = vmatpush3.bf16.msra.mxu0 %v30880_v27  ;;  %30556 = vmatpush3.bf16.msra.mxu1 %v30880_v27 }
0x850a   :  { %30557 = vmatprep.subr.bf16.mxu0 %v30699_v0  ;;  %30563 = vmatprep.subr.bf16.mxu1 %v30699_v0 }
0x85d7   :  { %v23527_v12 = vpop.f32.mrb[58].mxu0  ;;  %v23601_v22 = vpop.f32.mrb[58].mxu1 }
0x85d8   :  { %v23528_v33 = vadd.f32 %v33470_v24, %v23527_v12  ;;  %v23602_v23 = vadd.f32 %v33470_v24, %v23601_v22  ;;  %v28833_v29 = vpop.f32.mrb[59].mxu0  ;;  %v28844_v30 = vpop.f32.mrb[59].mxu1 }
0x85da   :  { %v23531_v31 = vmax.f32 %v23528_v33, 0.0  ;;  %v23605_v32 = vmax.f32 %v23602_v23, 0.0 }
0x85dc   :  { %28854 = vmatmul.mubr.msk.f32.vlgmr.msra.gmra.mrb[60].mxu0 %vm282_vm2, %v23531_v31  ;;  %28865 = vmatmul.mubr.msk.f32.vlgmr.msra.gmra.mrb[60].mxu1 %vm282_vm2, %v23605_v32 }
0x85dd   :  { %30559 = vmatpush3.bf16.msra.mxu0 %v30907_v37  ;;  %30565 = vmatpush3.bf16.msra.mxu1 %v30907_v37 }
0x85de   :  { %30560 = vmatprep.subr.bf16.mxu0 %v30699_v0  ;;  %30566 = vmatprep.subr.bf16.mxu1 %v30699_v0 }
0x85df   :  { %28875 = vmatprep.mubr.msk.f32.mxu0 %vm30700_vm0, %v30701_v1  ;;  %28886 = vmatprep.mubr.msk.f32.mxu1 %vm30700_vm0, %v30701_v1 }
0x85e1   :  { %30562 = vmatpush3.bf16.msra.mxu0 %v30917_v42  ;;  %30568 = vmatpush3.bf16.msra.mxu1 %v30917_v42 }
0x86af   :  { %v23675_v27 = vpop.f32.mrb[60].mxu0  ;;  %v23749_v24 = vpop.f32.mrb[60].mxu1 }
0x86b0   :  { %v23676_v11 = vadd.f32 %v33491_v52, %v23675_v27  ;;  %v23750_v37 = vadd.f32 %v33491_v52, %v23749_v24  ;;  %v28855_v14 = vpop.f32.mrb[61].mxu0  ;;  %v28866_v56 = vpop.f32.mrb[61].mxu1 }
0x86b2   :  { %v23679_v34 = vmax.f32 %v23676_v11, 0.0  ;;  %v23753_v0 = vmax.f32 %v23750_v37, 0.0 }
0x86b4   :  { %28876 = vmatmul.mubr.msk.f32.vlgmr.msra.gmra.mrb[62].mxu0 %vm282_vm2, %v23679_v34  ;;  %28887 = vmatmul.mubr.msk.f32.vlgmr.msra.gmra.mrb[62].mxu1 %vm282_vm2, %v23753_v0 }
0x8787   :  { %v23823_v16 = vpop.f32.mrb[62].mxu0  ;;  %v23896_v1 = vpop.f32.mrb[62].mxu1 }
0x8788   :  { %v23824_v35 = vadd.f32 %v33508_v61, %v23823_v16  ;;  %v23897_v42 = vadd.f32 %v33508_v61, %v23896_v1  ;;  %v28877_v39 = vpop.f32.mrb[63].mxu0  ;;  %v28888_v40 = vpop.f32.mrb[63].mxu1 }
0x878a   :  { %v23900_v52 = vmul.f32 %v23824_v35, %v30954_v55  ;;  %v23902_v41 = vmul.f32 %v23897_v42, %v30963_v63 }
0x878c   :  { %v23901_v43 = vadd.f32 %v23900_v52, %v33725_v15  ;;  %v23903_v25 = vadd.f32 %v23902_v41, %v33728_v17 }
0x878e   :  { %23905 = vst.msk [vmem:[#allocation8 + $0x40] sm:$0xff] %vm131_vm1, %v23901_v43  ;;  %23906 = vst.msk [vmem:[#allocation8 + $0x48] sm:$0xff] %vm131_vm1, %v23903_v25 }
0x878f   :  { %30677 = shalt.err (!%p30674_p0)
}
0x8790   :  { %s30678_s6 = scalar_lea.hbm %s33813_s10, 1280 }
0x8791   :  { %p30679_p1 = scmp.ne.s32.totalorder %s33813_s10, %s30678_s6  ;;  %p30682_p2 = scmp.lt.u32.totalorder %s30678_s6, %s33813_s10 }
0x8793   :  { %p30684_p3 = pnand %p30682_p2, %p30679_p1 }
0x8795   :  { %30687 = shalt.err (!%p30684_p3)
}
0x8796   :  { %23918 = dma.vmem_to_hbm [thread:$0]  %s23913_s22, 1280, %s33813_s10, [#allocation4], %s30696_s25, %s30696_s25, %s30697_s26  }
0x8797   :  { %30692 = dma.done.wait [#allocation4], 1280  }
0x8798   :  { %30693 = vsyncadd [#allocation4], 4294966016 }
0x8799   :  { %23922 = vsyncpa [#allocation3], 1 }
0x879a   :  { %23923 = vsyncpa [#allocation6], 1 }
0x879b   :  { %23924 = vsyncpa [#allocation4], 1 }

</bundles_post_ra>
